<compile_context>
chip_gen: v5e
topology: v5e:2x2
jax: 0.10.0
libtpu: 0.0.40
codegen_flags: <defaults>
</compile_context>

<pallas_src>
import jax
import jax.numpy as jnp
from jax import lax
from jax.experimental import pallas as pl
from jax.experimental.pallas import tpu as pltpu


def _round_up(v, m):
    return ((v + m - 1) // m) * m


def _zero_halo(pad_ref, h, w):
    """Zero only the 1-element halo frame around the (h, w) interior.

    Rows 0 and h+1 (full width) and columns 0 and w+1 (full height) are the
    only halo cells the 'same' conv ever reads; trailing alignment-pad columns
    may stay garbage because they only feed conv columns that are never read.
    The interior is fully overwritten every grid step.
    """
    n, hp2, wp2, c = pad_ref.shape
    zrow = jnp.zeros((n, 1, wp2, c), pad_ref.dtype)
    zcol = jnp.zeros((n, hp2, 1, c), pad_ref.dtype)
    pad_ref[:, pl.ds(0, 1), :, :] = zrow
    pad_ref[:, pl.ds(h + 1, 1), :, :] = zrow
    pad_ref[:, :, pl.ds(0, 1), :] = zcol
    pad_ref[:, :, pl.ds(w + 1, 1), :] = zcol


def _conv3x3_pool_relu(pad_ref, w_ref, b_ref, rp_ref, h, w):
    """conv3x3 'same' (im2col -> one MXU matmul) -> maxpool 2x2/2 -> ReLU.

    pad_ref : (TN, h+2, wpad+2, cin)  bf16; data at [:, 1:h+1, 1:w+1, :], halo 0
    w_ref   : (9*cin, cout)           bf16 taps, (dy, dx, cin)-major rows
    b_ref   : (1, cout)               f32
    rp_ref  : (TN, h//2, wpad, cout)  f32 scratch holding the row-pooled conv
    returns : (TN, h//2, w//2, cout)  f32, pooled + ReLU'd
    """
    n = pad_ref.shape[0]
    cin = pad_ref.shape[-1]
    wpad = pad_ref.shape[2] - 2            # multiple of 8 by construction
    cout = w_ref.shape[-1]
    m = n * h * wpad
    ho, wo = h // 2, w // 2

    # im2col: 9 shifted windows concatenated along the contraction (lane) dim.
    taps = []
    for dy in range(3):
        for dx in range(3):
            taps.append(
                pad_ref[:, pl.ds(dy, h), pl.ds(dx, wpad), :].reshape(m, cin))
    patches = jnp.concatenate(taps, axis=-1)                    # (m, 9*cin) bf16

    # One matmul per layer (K = 9*cin), f32 accumulation, bias added once.
    conv = jnp.dot(patches, w_ref[...], preferred_element_type=jnp.float32)
    conv = (conv + b_ref[...]).reshape(n, ho, 2, wpad, cout)

    # Row pool on the value via the major-dim split above (pure VALU, no
    # sublane-strided access); column pool with one strided ref read of the
    # half-size row-pooled scratch; ReLU last.
    rp_ref[...] = jnp.maximum(conv[:, :, 0, :, :], conv[:, :, 1, :, :])
    pooled = jnp.maximum(rp_ref[:, :, pl.ds(0, wo, 2), :],
                         rp_ref[:, :, pl.ds(1, wo, 2), :])
    return jnp.maximum(pooled, 0.0)


def _cnn_fused_kernel(x_ref, w1_ref, b1_ref, w2_ref, b2_ref, w3_ref, b3_ref,
                      o_ref, pad1, pad2, pad3, rp1, rp2, rp3):
    _, h1, wd1, _ = x_ref.shape
    h2, wd2 = h1 // 2, wd1 // 2
    h3, wd3 = h2 // 2, wd2 // 2

    # ---- block 1: conv1 -> maxpool -> relu ----
    _zero_halo(pad1, h1, wd1)
    pad1[:, pl.ds(1, h1), pl.ds(1, wd1), :] = x_ref[...]
    y1 = _conv3x3_pool_relu(pad1, w1_ref, b1_ref, rp1, h1, wd1)

    # ---- block 2 ----
    _zero_halo(pad2, h2, wd2)
    pad2[:, pl.ds(1, h2), pl.ds(1, wd2), :] = y1.astype(pad2.dtype)
    y2 = _conv3x3_pool_relu(pad2, w2_ref, b2_ref, rp2, h2, wd2)

    # ---- block 3 (width padded to 8 in scratch; padded columns never read) ----
    _zero_halo(pad3, h3, wd3)
    pad3[:, pl.ds(1, h3), pl.ds(1, wd3), :] = y2.astype(pad3.dtype)
    o_ref[...] = _conv3x3_pool_relu(pad3, w3_ref, b3_ref, rp3, h3, wd3)


def _layer_geoms(h, w, c0, couts):
    geoms, cin, hh, ww = [], c0, h, w
    for cout in couts:
        geoms.append((hh, ww, cin, cout))
        cin, hh, ww = cout, hh // 2, ww // 2
    return geoms


def _pick_batch_tile(n, h, w, c0, couts, budget_bytes=40 * 1024 * 1024):
    """Largest divisor of n whose per-step VMEM footprint fits a conservative
    budget (safe for v7x's 64 MiB VMEM as well as v5e/v6e's 128 MiB)."""
    per_elem = 0
    for (hh, ww, cin, cout) in _layer_geoms(h, w, c0, couts):
        wpad = _round_up(ww, 8)
        per_elem += (hh + 2) * (wpad + 2) * cin * 2     # bf16 pad scratch
        per_elem += (hh // 2) * wpad * cout * 4         # f32 row-pool scratch
    per_elem += 2 * h * w * c0 * 2                      # double-buffered input block
    hh, ww, _, cl = _layer_geoms(h, w, c0, couts)[-1]
    per_elem += 2 * (hh // 2) * (ww // 2) * cl * 4      # double-buffered output block
    best = 1
    for d in range(1, n + 1):
        if n % d == 0 and d * per_elem <= budget_bytes:
            best = d
    return best


def cnn_forward(x_nchw, params_oihw, *, batch_tile=None):
    """CNN.forward: 3 x (conv3x3 'same' -> maxpool2x2 -> relu), one Pallas call.

    x_nchw      : (N, C, H, W) float
    params_oihw : [(w_oihw, b), ...] PyTorch layouts (Cout, Cin, 3, 3), (Cout,)
    returns     : (N, 4*nf, H//8, W//8) f32 (NCHW)
    """
    n, c0, h, w = x_nchw.shape
    assert h % 8 == 0 and w % 8 == 0, "H, W must be multiples of 8 (3x maxpool-by-2)"

    x = jnp.transpose(x_nchw, (0, 2, 3, 1)).astype(jnp.bfloat16)    # NCHW -> NHWC bf16

    ws, bs, couts = [], [], []
    for w_oihw, b in params_oihw:
        w_hwio = jnp.transpose(w_oihw, (2, 3, 1, 0)).astype(jnp.bfloat16)  # OIHW->HWIO
        kh, kw, cin, cout = w_hwio.shape
        assert (kh, kw) == (3, 3)
        ws.append(w_hwio.reshape(kh * kw * cin, cout))              # (9*Cin, Cout) bf16
        bs.append(b.astype(jnp.float32).reshape(1, cout))
        couts.append(cout)
    c1, c2, c3 = couts

    h1, wd1 = h, w
    h2, wd2 = h1 // 2, wd1 // 2
    h3, wd3 = h2 // 2, wd2 // 2
    ho, wo = h3 // 2, wd3 // 2
    w1p, w2p, w3p = (_round_up(v, 8) for v in (wd1, wd2, wd3))

    tn = batch_tile if batch_tile is not None else _pick_batch_tile(n, h, w, c0, couts)
    assert n % tn == 0, "batch_tile must divide the batch"

    out_nhwc = pl.pallas_call(
        _cnn_fused_kernel,
        out_shape=jax.ShapeDtypeStruct((n, ho, wo, c3), jnp.float32),
        grid=(n // tn,),
        in_specs=[
            pl.BlockSpec((tn, h1, wd1, c0), lambda i: (i, 0, 0, 0)),
            pl.BlockSpec((9 * c0, c1), lambda i: (0, 0)),
            pl.BlockSpec((1, c1), lambda i: (0, 0)),
            pl.BlockSpec((9 * c1, c2), lambda i: (0, 0)),
            pl.BlockSpec((1, c2), lambda i: (0, 0)),
            pl.BlockSpec((9 * c2, c3), lambda i: (0, 0)),
            pl.BlockSpec((1, c3), lambda i: (0, 0)),
        ],
        out_specs=pl.BlockSpec((tn, ho, wo, c3), lambda i: (i, 0, 0, 0)),
        scratch_shapes=[
            pltpu.VMEM((tn, h1 + 2, w1p + 2, c0), jnp.bfloat16),    # pad1
            pltpu.VMEM((tn, h2 + 2, w2p + 2, c1), jnp.bfloat16),    # pad2
            pltpu.VMEM((tn, h3 + 2, w3p + 2, c2), jnp.bfloat16),    # pad3
            pltpu.VMEM((tn, h1 // 2, w1p, c1), jnp.float32),        # rp1 (row-pooled)
            pltpu.VMEM((tn, h2 // 2, w2p, c2), jnp.float32),        # rp2
            pltpu.VMEM((tn, h3 // 2, w3p, c3), jnp.float32),        # rp3
        ],
        compiler_params=pltpu.CompilerParams(
            dimension_semantics=("parallel",),
            vmem_limit_bytes=48 * 1024 * 1024),
    )(x, ws[0], bs[0], ws[1], bs[1], ws[2], bs[2])

    return jnp.transpose(out_nhwc, (0, 3, 1, 2))                    # NHWC -> NCHW


def reference_forward(x_nchw, params_oihw):
    """Pure-JAX reference (XLA conv) mirroring the kernel's bf16-operand /
    f32-accumulate policy, for a tight-tolerance structural check."""
    x = jnp.transpose(x_nchw, (0, 2, 3, 1)).astype(jnp.float32)
    for w_oihw, b in params_oihw:
        w = jnp.transpose(w_oihw, (2, 3, 1, 0)).astype(jnp.float32)
        y = lax.conv_general_dilated(
            x.astype(jnp.bfloat16), w.astype(jnp.bfloat16),
            window_strides=(1, 1), padding="SAME",
            dimension_numbers=("NHWC", "HWIO", "NHWC"),
            preferred_element_type=jnp.float32) + b.reshape(1, 1, 1, -1)
        y = lax.reduce_window(y, -jnp.inf, lax.max,
                              (1, 2, 2, 1), (1, 2, 2, 1), "VALID")
        x = jnp.maximum(y, 0.0)
    return jnp.transpose(x, (0, 3, 1, 2))


if __name__ == "__main__":
    key = jax.random.PRNGKey(0)
    batch, channels, spatial, nf = 2, 4, 16, 8

    k_x, k1, kb1, k2, kb2, k3, kb3 = jax.random.split(key, 7)
    x = jax.random.normal(k_x, (batch, channels, spatial, spatial), jnp.float32)

    def init_conv(kw, kb, cin, cout):
        # PyTorch-style OIHW weights; converted to HWIO/(9*Cin,Cout) in wrappers.
        w = jax.random.normal(kw, (cout, cin, 3, 3), jnp.float32) * 0.1
        bb = jax.random.normal(kb, (cout,), jnp.float32) * 0.1
        return w, bb

    params = [
        init_conv(k1, kb1, channels, nf),        # conv1: C   -> nf
        init_conv(k2, kb2, nf, 2 * nf),          # conv2: nf  -> 2nf
        init_conv(k3, kb3, 2 * nf, 4 * nf),      # conv3: 2nf -> 4nf
    ]

    ref = reference_forward(x, params)

    # Batch-tiled path (grid=(2,)): exercises the pipelined grid + per-step halo.
    out_tiled = cnn_forward(x, params, batch_tile=1)
    jax.block_until_ready(out_tiled)
    assert out_tiled.shape == (batch, 4 * nf, spatial // 8, spatial // 8), out_tiled.shape

    # Auto-tiled path (whole toy batch fits one step).
    out_auto = cnn_forward(x, params)
    jax.block_until_ready(out_auto)

    for name, out in (("tiled", out_tiled), ("auto", out_auto)):
        if not jnp.allclose(out, ref, atol=5e-3, rtol=5e-3):
            max_err = jnp.max(jnp.abs(out - ref))
            raise AssertionError(
                f"{name}: Pallas kernel mismatches reference, max|err|={max_err}")

    print("KERNEL_OK")
</pallas_src>

<mosaic_0001>
module attributes {stable_mosaic.version = 11 : i64} {
  func.func @_cnn_fused_kernel(%arg0: i32, %arg1: memref<1x16x16x4xbf16, #tpu.memory_space<vmem>>, %arg2: memref<36x8xbf16, #tpu.memory_space<vmem>>, %arg3: memref<1x8xf32, #tpu.memory_space<vmem>>, %arg4: memref<72x16xbf16, #tpu.memory_space<vmem>>, %arg5: memref<1x16xf32, #tpu.memory_space<vmem>>, %arg6: memref<144x32xbf16, #tpu.memory_space<vmem>>, %arg7: memref<1x32xf32, #tpu.memory_space<vmem>>, %arg8: memref<1x2x2x32xf32, #tpu.memory_space<vmem>>, %arg9: memref<1x18x18x4xbf16, #tpu.memory_space<vmem>>, %arg10: memref<1x10x10x8xbf16, #tpu.memory_space<vmem>>, %arg11: memref<1x6x10x16xbf16, #tpu.memory_space<vmem>>, %arg12: memref<1x8x16x8xf32, #tpu.memory_space<vmem>>, %arg13: memref<1x4x8x16xf32, #tpu.memory_space<vmem>>, %arg14: memref<1x2x8x32xf32, #tpu.memory_space<vmem>>) attributes {dimension_semantics = [#tpu.dimension_semantics<parallel>], iteration_bounds = array<i64: 2>, scalar_prefetch = 0 : i64, scratch_operands = 6 : i64, tpu.core_type = #tpu.core_type<tc>, window_params = [{transform_indices = @transform_0, window_bounds = array<i64: 1, 16, 16, 4>}, {pipeline_mode = #tpu.pipeline_mode<synchronous>, transform_indices = @transform_1, window_bounds = array<i64: 36, 8>}, {pipeline_mode = #tpu.pipeline_mode<synchronous>, transform_indices = @transform_2, window_bounds = array<i64: 1, 8>}, {pipeline_mode = #tpu.pipeline_mode<synchronous>, transform_indices = @transform_3, window_bounds = array<i64: 72, 16>}, {pipeline_mode = #tpu.pipeline_mode<synchronous>, transform_indices = @transform_4, window_bounds = array<i64: 1, 16>}, {pipeline_mode = #tpu.pipeline_mode<synchronous>, transform_indices = @transform_5, window_bounds = array<i64: 144, 32>}, {pipeline_mode = #tpu.pipeline_mode<synchronous>, transform_indices = @transform_6, window_bounds = array<i64: 1, 32>}, {transform_indices = @transform_7, window_bounds = array<i64: 1, 2, 2, 32>}]} {
    %cst = arith.constant 0.000000e+00 : bf16
    %0 = vector.broadcast %cst : bf16 to vector<1x1x18x4xbf16>
    %cst_0 = arith.constant 0.000000e+00 : bf16
    %1 = vector.broadcast %cst_0 : bf16 to vector<1x18x1x4xbf16>
    %c0 = arith.constant 0 : index
    %c0_1 = arith.constant 0 : index
    %c0_2 = arith.constant 0 : index
    %c0_3 = arith.constant 0 : index
    %2 = vector.load %arg9[%c0, %c0_1, %c0_2, %c0_3] : memref<1x18x18x4xbf16, #tpu.memory_space<vmem>>, vector<1x1x18x4xbf16>
    tpu.vector_store %arg9[%c0, %c0_1, %c0_2, %c0_3], %0 {strides = array<i32>} : memref<1x18x18x4xbf16, #tpu.memory_space<vmem>>, vector<1x1x18x4xbf16>,
    %c0_4 = arith.constant 0 : index
    %c17 = arith.constant 17 : index
    %c0_5 = arith.constant 0 : index
    %c0_6 = arith.constant 0 : index
    %3 = vector.load %arg9[%c0_4, %c17, %c0_5, %c0_6] : memref<1x18x18x4xbf16, #tpu.memory_space<vmem>>, vector<1x1x18x4xbf16>
    tpu.vector_store %arg9[%c0_4, %c17, %c0_5, %c0_6], %0 {strides = array<i32>} : memref<1x18x18x4xbf16, #tpu.memory_space<vmem>>, vector<1x1x18x4xbf16>,
    %c0_7 = arith.constant 0 : index
    %c0_8 = arith.constant 0 : index
    %c0_9 = arith.constant 0 : index
    %c0_10 = arith.constant 0 : index
    %4 = vector.load %arg9[%c0_7, %c0_8, %c0_9, %c0_10] : memref<1x18x18x4xbf16, #tpu.memory_space<vmem>>, vector<1x18x1x4xbf16>
    tpu.vector_store %arg9[%c0_7, %c0_8, %c0_9, %c0_10], %1 {strides = array<i32>} : memref<1x18x18x4xbf16, #tpu.memory_space<vmem>>, vector<1x18x1x4xbf16>,
    %c0_11 = arith.constant 0 : index
    %c0_12 = arith.constant 0 : index
    %c17_13 = arith.constant 17 : index
    %c0_14 = arith.constant 0 : index
    %5 = vector.load %arg9[%c0_11, %c0_12, %c17_13, %c0_14] : memref<1x18x18x4xbf16, #tpu.memory_space<vmem>>, vector<1x18x1x4xbf16>
    tpu.vector_store %arg9[%c0_11, %c0_12, %c17_13, %c0_14], %1 {strides = array<i32>} : memref<1x18x18x4xbf16, #tpu.memory_space<vmem>>, vector<1x18x1x4xbf16>,
    %c0_15 = arith.constant 0 : index
    %c0_16 = arith.constant 0 : index
    %c0_17 = arith.constant 0 : index
    %c0_18 = arith.constant 0 : index
    %6 = vector.load %arg1[%c0_15, %c0_16, %c0_17, %c0_18] : memref<1x16x16x4xbf16, #tpu.memory_space<vmem>>, vector<1x16x16x4xbf16>
    %c0_19 = arith.constant 0 : index
    %c1 = arith.constant 1 : index
    %c1_20 = arith.constant 1 : index
    %c0_21 = arith.constant 0 : index
    %7 = vector.load %arg9[%c0_19, %c1, %c1_20, %c0_21] : memref<1x18x18x4xbf16, #tpu.memory_space<vmem>>, vector<1x16x16x4xbf16>
    tpu.vector_store %arg9[%c0_19, %c1, %c1_20, %c0_21], %6 {strides = array<i32>} : memref<1x18x18x4xbf16, #tpu.memory_space<vmem>>, vector<1x16x16x4xbf16>,
    %c0_22 = arith.constant 0 : index
    %c0_23 = arith.constant 0 : index
    %c0_24 = arith.constant 0 : index
    %c0_25 = arith.constant 0 : index
    %8 = vector.load %arg9[%c0_22, %c0_23, %c0_24, %c0_25] : memref<1x18x18x4xbf16, #tpu.memory_space<vmem>>, vector<1x16x16x4xbf16>
    %9 = vector.shape_cast %8 : vector<1x16x16x4xbf16> to vector<256x4xbf16>
    %c0_26 = arith.constant 0 : index
    %c0_27 = arith.constant 0 : index
    %c1_28 = arith.constant 1 : index
    %c0_29 = arith.constant 0 : index
    %10 = vector.load %arg9[%c0_26, %c0_27, %c1_28, %c0_29] : memref<1x18x18x4xbf16, #tpu.memory_space<vmem>>, vector<1x16x16x4xbf16>
    %11 = vector.shape_cast %10 : vector<1x16x16x4xbf16> to vector<256x4xbf16>
    %c0_30 = arith.constant 0 : index
    %c0_31 = arith.constant 0 : index
    %c2 = arith.constant 2 : index
    %c0_32 = arith.constant 0 : index
    %12 = vector.load %arg9[%c0_30, %c0_31, %c2, %c0_32] : memref<1x18x18x4xbf16, #tpu.memory_space<vmem>>, vector<1x16x16x4xbf16>
    %13 = vector.shape_cast %12 : vector<1x16x16x4xbf16> to vector<256x4xbf16>
    %c0_33 = arith.constant 0 : index
    %c1_34 = arith.constant 1 : index
    %c0_35 = arith.constant 0 : index
    %c0_36 = arith.constant 0 : index
    %14 = vector.load %arg9[%c0_33, %c1_34, %c0_35, %c0_36] : memref<1x18x18x4xbf16, #tpu.memory_space<vmem>>, vector<1x16x16x4xbf16>
    %15 = vector.shape_cast %14 : vector<1x16x16x4xbf16> to vector<256x4xbf16>
    %c0_37 = arith.constant 0 : index
    %c1_38 = arith.constant 1 : index
    %c1_39 = arith.constant 1 : index
    %c0_40 = arith.constant 0 : index
    %16 = vector.load %arg9[%c0_37, %c1_38, %c1_39, %c0_40] : memref<1x18x18x4xbf16, #tpu.memory_space<vmem>>, vector<1x16x16x4xbf16>
    %17 = vector.shape_cast %16 : vector<1x16x16x4xbf16> to vector<256x4xbf16>
    %c0_41 = arith.constant 0 : index
    %c1_42 = arith.constant 1 : index
    %c2_43 = arith.constant 2 : index
    %c0_44 = arith.constant 0 : index
    %18 = vector.load %arg9[%c0_41, %c1_42, %c2_43, %c0_44] : memref<1x18x18x4xbf16, #tpu.memory_space<vmem>>, vector<1x16x16x4xbf16>
    %19 = vector.shape_cast %18 : vector<1x16x16x4xbf16> to vector<256x4xbf16>
    %c0_45 = arith.constant 0 : index
    %c2_46 = arith.constant 2 : index
    %c0_47 = arith.constant 0 : index
    %c0_48 = arith.constant 0 : index
    %20 = vector.load %arg9[%c0_45, %c2_46, %c0_47, %c0_48] : memref<1x18x18x4xbf16, #tpu.memory_space<vmem>>, vector<1x16x16x4xbf16>
    %21 = vector.shape_cast %20 : vector<1x16x16x4xbf16> to vector<256x4xbf16>
    %c0_49 = arith.constant 0 : index
    %c2_50 = arith.constant 2 : index
    %c1_51 = arith.constant 1 : index
    %c0_52 = arith.constant 0 : index
    %22 = vector.load %arg9[%c0_49, %c2_50, %c1_51, %c0_52] : memref<1x18x18x4xbf16, #tpu.memory_space<vmem>>, vector<1x16x16x4xbf16>
    %23 = vector.shape_cast %22 : vector<1x16x16x4xbf16> to vector<256x4xbf16>
    %c0_53 = arith.constant 0 : index
    %c2_54 = arith.constant 2 : index
    %c2_55 = arith.constant 2 : index
    %c0_56 = arith.constant 0 : index
    %24 = vector.load %arg9[%c0_53, %c2_54, %c2_55, %c0_56] : memref<1x18x18x4xbf16, #tpu.memory_space<vmem>>, vector<1x16x16x4xbf16>
    %25 = vector.shape_cast %24 : vector<1x16x16x4xbf16> to vector<256x4xbf16>
    %26 = tpu.concatenate %9, %11, %13, %15, %17, %19, %21, %23, %25 in 1 : vector<256x4xbf16>, vector<256x4xbf16>, vector<256x4xbf16>, vector<256x4xbf16>, vector<256x4xbf16>, vector<256x4xbf16>, vector<256x4xbf16>, vector<256x4xbf16>, vector<256x4xbf16> -> vector<256x36xbf16>
    %c0_57 = arith.constant 0 : index
    %c0_58 = arith.constant 0 : index
    %27 = vector.load %arg2[%c0_57, %c0_58] : memref<36x8xbf16, #tpu.memory_space<vmem>>, vector<36x8xbf16>
    %cst_59 = arith.constant dense<0.000000e+00> : vector<256x8xf32>
    %28 = tpu.matmul %26, %27, %cst_59 {dimension_numbers = #tpu.dot_dimension_numbers<[1], [0], [0], [1], [0, 0, 1, 1], [], []>} : vector<256x36xbf16>, vector<36x8xbf16>, vector<256x8xf32> -> vector<256x8xf32>
    %c0_60 = arith.constant 0 : index
    %c0_61 = arith.constant 0 : index
    %29 = vector.load %arg3[%c0_60, %c0_61] : memref<1x8xf32, #tpu.memory_space<vmem>>, vector<1x8xf32>
    %30 = vector.broadcast %29 : vector<1x8xf32> to vector<256x8xf32>
    %31 = arith.addf %28, %30 : vector<256x8xf32>
    %32 = vector.shape_cast %31 : vector<256x8xf32> to vector<1x8x2x16x8xf32>
    %33 = vector.extract_strided_slice %32 {offsets = [0, 0, 0, 0, 0], sizes = [1, 8, 1, 16, 8], strides = [1, 1, 1, 1, 1]} : vector<1x8x2x16x8xf32> to vector<1x8x1x16x8xf32>
    %34 = vector.shape_cast %33 : vector<1x8x1x16x8xf32> to vector<1x8x16x8xf32>
    %35 = vector.extract_strided_slice %32 {offsets = [0, 0, 1, 0, 0], sizes = [1, 8, 1, 16, 8], strides = [1, 1, 1, 1, 1]} : vector<1x8x2x16x8xf32> to vector<1x8x1x16x8xf32>
    %36 = vector.shape_cast %35 : vector<1x8x1x16x8xf32> to vector<1x8x16x8xf32>
    %37 = arith.maximumf %34, %36 : vector<1x8x16x8xf32>
    %c0_62 = arith.constant 0 : index
    %c0_63 = arith.constant 0 : index
    %c0_64 = arith.constant 0 : index
    %c0_65 = arith.constant 0 : index
    %38 = vector.load %arg12[%c0_62, %c0_63, %c0_64, %c0_65] : memref<1x8x16x8xf32, #tpu.memory_space<vmem>>, vector<1x8x16x8xf32>
    tpu.vector_store %arg12[%c0_62, %c0_63, %c0_64, %c0_65], %37 {strides = array<i32>} : memref<1x8x16x8xf32, #tpu.memory_space<vmem>>, vector<1x8x16x8xf32>,
    %c0_66 = arith.constant 0 : index
    %c0_67 = arith.constant 0 : index
    %c0_68 = arith.constant 0 : index
    %c0_69 = arith.constant 0 : index
    %39 = tpu.strided_load %arg12[%c0_66, %c0_67, %c0_68, %c0_69] {strides = array<i32: 1, 1, 2, 1>} : memref<1x8x16x8xf32, #tpu.memory_space<vmem>>, vector<1x8x8x8xf32>
    %c0_70 = arith.constant 0 : index
    %c0_71 = arith.constant 0 : index
    %c1_72 = arith.constant 1 : index
    %c0_73 = arith.constant 0 : index
    %40 = tpu.strided_load %arg12[%c0_70, %c0_71, %c1_72, %c0_73] {strides = array<i32: 1, 1, 2, 1>} : memref<1x8x16x8xf32, #tpu.memory_space<vmem>>, vector<1x8x8x8xf32>
    %41 = arith.maximumf %39, %40 : vector<1x8x8x8xf32>
    %cst_74 = arith.constant 0.000000e+00 : f32
    %42 = vector.broadcast %cst_74 : f32 to vector<1x8x8x8xf32>
    %43 = arith.maximumf %41, %42 : vector<1x8x8x8xf32>
    %cst_75 = arith.constant 0.000000e+00 : bf16
    %44 = vector.broadcast %cst_75 : bf16 to vector<1x1x10x8xbf16>
    %cst_76 = arith.constant 0.000000e+00 : bf16
    %45 = vector.broadcast %cst_76 : bf16 to vector<1x10x1x8xbf16>
    %c0_77 = arith.constant 0 : index
    %c0_78 = arith.constant 0 : index
    %c0_79 = arith.constant 0 : index
    %c0_80 = arith.constant 0 : index
    %46 = vector.load %arg10[%c0_77, %c0_78, %c0_79, %c0_80] : memref<1x10x10x8xbf16, #tpu.memory_space<vmem>>, vector<1x1x10x8xbf16>
    tpu.vector_store %arg10[%c0_77, %c0_78, %c0_79, %c0_80], %44 {strides = array<i32>} : memref<1x10x10x8xbf16, #tpu.memory_space<vmem>>, vector<1x1x10x8xbf16>,
    %c0_81 = arith.constant 0 : index
    %c9 = arith.constant 9 : index
    %c0_82 = arith.constant 0 : index
    %c0_83 = arith.constant 0 : index
    %47 = vector.load %arg10[%c0_81, %c9, %c0_82, %c0_83] : memref<1x10x10x8xbf16, #tpu.memory_space<vmem>>, vector<1x1x10x8xbf16>
    tpu.vector_store %arg10[%c0_81, %c9, %c0_82, %c0_83], %44 {strides = array<i32>} : memref<1x10x10x8xbf16, #tpu.memory_space<vmem>>, vector<1x1x10x8xbf16>,
    %c0_84 = arith.constant 0 : index
    %c0_85 = arith.constant 0 : index
    %c0_86 = arith.constant 0 : index
    %c0_87 = arith.constant 0 : index
    %48 = vector.load %arg10[%c0_84, %c0_85, %c0_86, %c0_87] : memref<1x10x10x8xbf16, #tpu.memory_space<vmem>>, vector<1x10x1x8xbf16>
    tpu.vector_store %arg10[%c0_84, %c0_85, %c0_86, %c0_87], %45 {strides = array<i32>} : memref<1x10x10x8xbf16, #tpu.memory_space<vmem>>, vector<1x10x1x8xbf16>,
    %c0_88 = arith.constant 0 : index
    %c0_89 = arith.constant 0 : index
    %c9_90 = arith.constant 9 : index
    %c0_91 = arith.constant 0 : index
    %49 = vector.load %arg10[%c0_88, %c0_89, %c9_90, %c0_91] : memref<1x10x10x8xbf16, #tpu.memory_space<vmem>>, vector<1x10x1x8xbf16>
    tpu.vector_store %arg10[%c0_88, %c0_89, %c9_90, %c0_91], %45 {strides = array<i32>} : memref<1x10x10x8xbf16, #tpu.memory_space<vmem>>, vector<1x10x1x8xbf16>,
    %50 = arith.truncf %43 : vector<1x8x8x8xf32> to vector<1x8x8x8xbf16>
    %c0_92 = arith.constant 0 : index
    %c1_93 = arith.constant 1 : index
    %c1_94 = arith.constant 1 : index
    %c0_95 = arith.constant 0 : index
    %51 = vector.load %arg10[%c0_92, %c1_93, %c1_94, %c0_95] : memref<1x10x10x8xbf16, #tpu.memory_space<vmem>>, vector<1x8x8x8xbf16>
    tpu.vector_store %arg10[%c0_92, %c1_93, %c1_94, %c0_95], %50 {strides = array<i32>} : memref<1x10x10x8xbf16, #tpu.memory_space<vmem>>, vector<1x8x8x8xbf16>,
    %c0_96 = arith.constant 0 : index
    %c0_97 = arith.constant 0 : index
    %c0_98 = arith.constant 0 : index
    %c0_99 = arith.constant 0 : index
    %52 = vector.load %arg10[%c0_96, %c0_97, %c0_98, %c0_99] : memref<1x10x10x8xbf16, #tpu.memory_space<vmem>>, vector<1x8x8x8xbf16>
    %53 = vector.shape_cast %52 : vector<1x8x8x8xbf16> to vector<64x8xbf16>
    %c0_100 = arith.constant 0 : index
    %c0_101 = arith.constant 0 : index
    %c1_102 = arith.constant 1 : index
    %c0_103 = arith.constant 0 : index
    %54 = vector.load %arg10[%c0_100, %c0_101, %c1_102, %c0_103] : memref<1x10x10x8xbf16, #tpu.memory_space<vmem>>, vector<1x8x8x8xbf16>
    %55 = vector.shape_cast %54 : vector<1x8x8x8xbf16> to vector<64x8xbf16>
    %c0_104 = arith.constant 0 : index
    %c0_105 = arith.constant 0 : index
    %c2_106 = arith.constant 2 : index
    %c0_107 = arith.constant 0 : index
    %56 = vector.load %arg10[%c0_104, %c0_105, %c2_106, %c0_107] : memref<1x10x10x8xbf16, #tpu.memory_space<vmem>>, vector<1x8x8x8xbf16>
    %57 = vector.shape_cast %56 : vector<1x8x8x8xbf16> to vector<64x8xbf16>
    %c0_108 = arith.constant 0 : index
    %c1_109 = arith.constant 1 : index
    %c0_110 = arith.constant 0 : index
    %c0_111 = arith.constant 0 : index
    %58 = vector.load %arg10[%c0_108, %c1_109, %c0_110, %c0_111] : memref<1x10x10x8xbf16, #tpu.memory_space<vmem>>, vector<1x8x8x8xbf16>
    %59 = vector.shape_cast %58 : vector<1x8x8x8xbf16> to vector<64x8xbf16>
    %c0_112 = arith.constant 0 : index
    %c1_113 = arith.constant 1 : index
    %c1_114 = arith.constant 1 : index
    %c0_115 = arith.constant 0 : index
    %60 = vector.load %arg10[%c0_112, %c1_113, %c1_114, %c0_115] : memref<1x10x10x8xbf16, #tpu.memory_space<vmem>>, vector<1x8x8x8xbf16>
    %61 = vector.shape_cast %60 : vector<1x8x8x8xbf16> to vector<64x8xbf16>
    %c0_116 = arith.constant 0 : index
    %c1_117 = arith.constant 1 : index
    %c2_118 = arith.constant 2 : index
    %c0_119 = arith.constant 0 : index
    %62 = vector.load %arg10[%c0_116, %c1_117, %c2_118, %c0_119] : memref<1x10x10x8xbf16, #tpu.memory_space<vmem>>, vector<1x8x8x8xbf16>
    %63 = vector.shape_cast %62 : vector<1x8x8x8xbf16> to vector<64x8xbf16>
    %c0_120 = arith.constant 0 : index
    %c2_121 = arith.constant 2 : index
    %c0_122 = arith.constant 0 : index
    %c0_123 = arith.constant 0 : index
    %64 = vector.load %arg10[%c0_120, %c2_121, %c0_122, %c0_123] : memref<1x10x10x8xbf16, #tpu.memory_space<vmem>>, vector<1x8x8x8xbf16>
    %65 = vector.shape_cast %64 : vector<1x8x8x8xbf16> to vector<64x8xbf16>
    %c0_124 = arith.constant 0 : index
    %c2_125 = arith.constant 2 : index
    %c1_126 = arith.constant 1 : index
    %c0_127 = arith.constant 0 : index
    %66 = vector.load %arg10[%c0_124, %c2_125, %c1_126, %c0_127] : memref<1x10x10x8xbf16, #tpu.memory_space<vmem>>, vector<1x8x8x8xbf16>
    %67 = vector.shape_cast %66 : vector<1x8x8x8xbf16> to vector<64x8xbf16>
    %c0_128 = arith.constant 0 : index
    %c2_129 = arith.constant 2 : index
    %c2_130 = arith.constant 2 : index
    %c0_131 = arith.constant 0 : index
    %68 = vector.load %arg10[%c0_128, %c2_129, %c2_130, %c0_131] : memref<1x10x10x8xbf16, #tpu.memory_space<vmem>>, vector<1x8x8x8xbf16>
    %69 = vector.shape_cast %68 : vector<1x8x8x8xbf16> to vector<64x8xbf16>
    %70 = tpu.concatenate %53, %55, %57, %59, %61, %63, %65, %67, %69 in 1 : vector<64x8xbf16>, vector<64x8xbf16>, vector<64x8xbf16>, vector<64x8xbf16>, vector<64x8xbf16>, vector<64x8xbf16>, vector<64x8xbf16>, vector<64x8xbf16>, vector<64x8xbf16> -> vector<64x72xbf16>
    %c0_132 = arith.constant 0 : index
    %c0_133 = arith.constant 0 : index
    %71 = vector.load %arg4[%c0_132, %c0_133] : memref<72x16xbf16, #tpu.memory_space<vmem>>, vector<72x16xbf16>
    %cst_134 = arith.constant dense<0.000000e+00> : vector<64x16xf32>
    %72 = tpu.matmul %70, %71, %cst_134 {dimension_numbers = #tpu.dot_dimension_numbers<[1], [0], [0], [1], [0, 0, 1, 1], [], []>} : vector<64x72xbf16>, vector<72x16xbf16>, vector<64x16xf32> -> vector<64x16xf32>
    %c0_135 = arith.constant 0 : index
    %c0_136 = arith.constant 0 : index
    %73 = vector.load %arg5[%c0_135, %c0_136] : memref<1x16xf32, #tpu.memory_space<vmem>>, vector<1x16xf32>
    %74 = vector.broadcast %73 : vector<1x16xf32> to vector<64x16xf32>
    %75 = arith.addf %72, %74 : vector<64x16xf32>
    %76 = vector.shape_cast %75 : vector<64x16xf32> to vector<1x4x2x8x16xf32>
    %77 = vector.extract_strided_slice %76 {offsets = [0, 0, 0, 0, 0], sizes = [1, 4, 1, 8, 16], strides = [1, 1, 1, 1, 1]} : vector<1x4x2x8x16xf32> to vector<1x4x1x8x16xf32>
    %78 = vector.shape_cast %77 : vector<1x4x1x8x16xf32> to vector<1x4x8x16xf32>
    %79 = vector.extract_strided_slice %76 {offsets = [0, 0, 1, 0, 0], sizes = [1, 4, 1, 8, 16], strides = [1, 1, 1, 1, 1]} : vector<1x4x2x8x16xf32> to vector<1x4x1x8x16xf32>
    %80 = vector.shape_cast %79 : vector<1x4x1x8x16xf32> to vector<1x4x8x16xf32>
    %81 = arith.maximumf %78, %80 : vector<1x4x8x16xf32>
    %c0_137 = arith.constant 0 : index
    %c0_138 = arith.constant 0 : index
    %c0_139 = arith.constant 0 : index
    %c0_140 = arith.constant 0 : index
    %82 = vector.load %arg13[%c0_137, %c0_138, %c0_139, %c0_140] : memref<1x4x8x16xf32, #tpu.memory_space<vmem>>, vector<1x4x8x16xf32>
    tpu.vector_store %arg13[%c0_137, %c0_138, %c0_139, %c0_140], %81 {strides = array<i32>} : memref<1x4x8x16xf32, #tpu.memory_space<vmem>>, vector<1x4x8x16xf32>,
    %c0_141 = arith.constant 0 : index
    %c0_142 = arith.constant 0 : index
    %c0_143 = arith.constant 0 : index
    %c0_144 = arith.constant 0 : index
    %83 = tpu.strided_load %arg13[%c0_141, %c0_142, %c0_143, %c0_144] {strides = array<i32: 1, 1, 2, 1>} : memref<1x4x8x16xf32, #tpu.memory_space<vmem>>, vector<1x4x4x16xf32>
    %c0_145 = arith.constant 0 : index
    %c0_146 = arith.constant 0 : index
    %c1_147 = arith.constant 1 : index
    %c0_148 = arith.constant 0 : index
    %84 = tpu.strided_load %arg13[%c0_145, %c0_146, %c1_147, %c0_148] {strides = array<i32: 1, 1, 2, 1>} : memref<1x4x8x16xf32, #tpu.memory_space<vmem>>, vector<1x4x4x16xf32>
    %85 = arith.maximumf %83, %84 : vector<1x4x4x16xf32>
    %cst_149 = arith.constant 0.000000e+00 : f32
    %86 = vector.broadcast %cst_149 : f32 to vector<1x4x4x16xf32>
    %87 = arith.maximumf %85, %86 : vector<1x4x4x16xf32>
    %cst_150 = arith.constant 0.000000e+00 : bf16
    %88 = vector.broadcast %cst_150 : bf16 to vector<1x1x10x16xbf16>
    %cst_151 = arith.constant 0.000000e+00 : bf16
    %89 = vector.broadcast %cst_151 : bf16 to vector<1x6x1x16xbf16>
    %c0_152 = arith.constant 0 : index
    %c0_153 = arith.constant 0 : index
    %c0_154 = arith.constant 0 : index
    %c0_155 = arith.constant 0 : index
    %90 = vector.load %arg11[%c0_152, %c0_153, %c0_154, %c0_155] : memref<1x6x10x16xbf16, #tpu.memory_space<vmem>>, vector<1x1x10x16xbf16>
    tpu.vector_store %arg11[%c0_152, %c0_153, %c0_154, %c0_155], %88 {strides = array<i32>} : memref<1x6x10x16xbf16, #tpu.memory_space<vmem>>, vector<1x1x10x16xbf16>,
    %c0_156 = arith.constant 0 : index
    %c5 = arith.constant 5 : index
    %c0_157 = arith.constant 0 : index
    %c0_158 = arith.constant 0 : index
    %91 = vector.load %arg11[%c0_156, %c5, %c0_157, %c0_158] : memref<1x6x10x16xbf16, #tpu.memory_space<vmem>>, vector<1x1x10x16xbf16>
    tpu.vector_store %arg11[%c0_156, %c5, %c0_157, %c0_158], %88 {strides = array<i32>} : memref<1x6x10x16xbf16, #tpu.memory_space<vmem>>, vector<1x1x10x16xbf16>,
    %c0_159 = arith.constant 0 : index
    %c0_160 = arith.constant 0 : index
    %c0_161 = arith.constant 0 : index
    %c0_162 = arith.constant 0 : index
    %92 = vector.load %arg11[%c0_159, %c0_160, %c0_161, %c0_162] : memref<1x6x10x16xbf16, #tpu.memory_space<vmem>>, vector<1x6x1x16xbf16>
    tpu.vector_store %arg11[%c0_159, %c0_160, %c0_161, %c0_162], %89 {strides = array<i32>} : memref<1x6x10x16xbf16, #tpu.memory_space<vmem>>, vector<1x6x1x16xbf16>,
    %c0_163 = arith.constant 0 : index
    %c0_164 = arith.constant 0 : index
    %c5_165 = arith.constant 5 : index
    %c0_166 = arith.constant 0 : index
    %93 = vector.load %arg11[%c0_163, %c0_164, %c5_165, %c0_166] : memref<1x6x10x16xbf16, #tpu.memory_space<vmem>>, vector<1x6x1x16xbf16>
    tpu.vector_store %arg11[%c0_163, %c0_164, %c5_165, %c0_166], %89 {strides = array<i32>} : memref<1x6x10x16xbf16, #tpu.memory_space<vmem>>, vector<1x6x1x16xbf16>,
    %94 = arith.truncf %87 : vector<1x4x4x16xf32> to vector<1x4x4x16xbf16>
    %c0_167 = arith.constant 0 : index
    %c1_168 = arith.constant 1 : index
    %c1_169 = arith.constant 1 : index
    %c0_170 = arith.constant 0 : index
    %95 = vector.load %arg11[%c0_167, %c1_168, %c1_169, %c0_170] : memref<1x6x10x16xbf16, #tpu.memory_space<vmem>>, vector<1x4x4x16xbf16>
    tpu.vector_store %arg11[%c0_167, %c1_168, %c1_169, %c0_170], %94 {strides = array<i32>} : memref<1x6x10x16xbf16, #tpu.memory_space<vmem>>, vector<1x4x4x16xbf16>,
    %c0_171 = arith.constant 0 : index
    %c0_172 = arith.constant 0 : index
    %c0_173 = arith.constant 0 : index
    %c0_174 = arith.constant 0 : index
    %96 = vector.load %arg11[%c0_171, %c0_172, %c0_173, %c0_174] : memref<1x6x10x16xbf16, #tpu.memory_space<vmem>>, vector<1x4x8x16xbf16>
    %97 = vector.shape_cast %96 : vector<1x4x8x16xbf16> to vector<32x16xbf16>
    %c0_175 = arith.constant 0 : index
    %c0_176 = arith.constant 0 : index
    %c1_177 = arith.constant 1 : index
    %c0_178 = arith.constant 0 : index
    %98 = vector.load %arg11[%c0_175, %c0_176, %c1_177, %c0_178] : memref<1x6x10x16xbf16, #tpu.memory_space<vmem>>, vector<1x4x8x16xbf16>
    %99 = vector.shape_cast %98 : vector<1x4x8x16xbf16> to vector<32x16xbf16>
    %c0_179 = arith.constant 0 : index
    %c0_180 = arith.constant 0 : index
    %c2_181 = arith.constant 2 : index
    %c0_182 = arith.constant 0 : index
    %100 = vector.load %arg11[%c0_179, %c0_180, %c2_181, %c0_182] : memref<1x6x10x16xbf16, #tpu.memory_space<vmem>>, vector<1x4x8x16xbf16>
    %101 = vector.shape_cast %100 : vector<1x4x8x16xbf16> to vector<32x16xbf16>
    %c0_183 = arith.constant 0 : index
    %c1_184 = arith.constant 1 : index
    %c0_185 = arith.constant 0 : index
    %c0_186 = arith.constant 0 : index
    %102 = vector.load %arg11[%c0_183, %c1_184, %c0_185, %c0_186] : memref<1x6x10x16xbf16, #tpu.memory_space<vmem>>, vector<1x4x8x16xbf16>
    %103 = vector.shape_cast %102 : vector<1x4x8x16xbf16> to vector<32x16xbf16>
    %c0_187 = arith.constant 0 : index
    %c1_188 = arith.constant 1 : index
    %c1_189 = arith.constant 1 : index
    %c0_190 = arith.constant 0 : index
    %104 = vector.load %arg11[%c0_187, %c1_188, %c1_189, %c0_190] : memref<1x6x10x16xbf16, #tpu.memory_space<vmem>>, vector<1x4x8x16xbf16>
    %105 = vector.shape_cast %104 : vector<1x4x8x16xbf16> to vector<32x16xbf16>
    %c0_191 = arith.constant 0 : index
    %c1_192 = arith.constant 1 : index
    %c2_193 = arith.constant 2 : index
    %c0_194 = arith.constant 0 : index
    %106 = vector.load %arg11[%c0_191, %c1_192, %c2_193, %c0_194] : memref<1x6x10x16xbf16, #tpu.memory_space<vmem>>, vector<1x4x8x16xbf16>
    %107 = vector.shape_cast %106 : vector<1x4x8x16xbf16> to vector<32x16xbf16>
    %c0_195 = arith.constant 0 : index
    %c2_196 = arith.constant 2 : index
    %c0_197 = arith.constant 0 : index
    %c0_198 = arith.constant 0 : index
    %108 = vector.load %arg11[%c0_195, %c2_196, %c0_197, %c0_198] : memref<1x6x10x16xbf16, #tpu.memory_space<vmem>>, vector<1x4x8x16xbf16>
    %109 = vector.shape_cast %108 : vector<1x4x8x16xbf16> to vector<32x16xbf16>
    %c0_199 = arith.constant 0 : index
    %c2_200 = arith.constant 2 : index
    %c1_201 = arith.constant 1 : index
    %c0_202 = arith.constant 0 : index
    %110 = vector.load %arg11[%c0_199, %c2_200, %c1_201, %c0_202] : memref<1x6x10x16xbf16, #tpu.memory_space<vmem>>, vector<1x4x8x16xbf16>
    %111 = vector.shape_cast %110 : vector<1x4x8x16xbf16> to vector<32x16xbf16>
    %c0_203 = arith.constant 0 : index
    %c2_204 = arith.constant 2 : index
    %c2_205 = arith.constant 2 : index
    %c0_206 = arith.constant 0 : index
    %112 = vector.load %arg11[%c0_203, %c2_204, %c2_205, %c0_206] : memref<1x6x10x16xbf16, #tpu.memory_space<vmem>>, vector<1x4x8x16xbf16>
    %113 = vector.shape_cast %112 : vector<1x4x8x16xbf16> to vector<32x16xbf16>
    %114 = tpu.concatenate %97, %99, %101, %103, %105, %107, %109, %111, %113 in 1 : vector<32x16xbf16>, vector<32x16xbf16>, vector<32x16xbf16>, vector<32x16xbf16>, vector<32x16xbf16>, vector<32x16xbf16>, vector<32x16xbf16>, vector<32x16xbf16>, vector<32x16xbf16> -> vector<32x144xbf16>
    %c0_207 = arith.constant 0 : index
    %c0_208 = arith.constant 0 : index
    %115 = vector.load %arg6[%c0_207, %c0_208] : memref<144x32xbf16, #tpu.memory_space<vmem>>, vector<144x32xbf16>
    %cst_209 = arith.constant dense<0.000000e+00> : vector<32x32xf32>
    %116 = tpu.matmul %114, %115, %cst_209 {dimension_numbers = #tpu.dot_dimension_numbers<[1], [0], [0], [1], [0, 0, 1, 1], [], []>} : vector<32x144xbf16>, vector<144x32xbf16>, vector<32x32xf32> -> vector<32x32xf32>
    %c0_210 = arith.constant 0 : index
    %c0_211 = arith.constant 0 : index
    %117 = vector.load %arg7[%c0_210, %c0_211] : memref<1x32xf32, #tpu.memory_space<vmem>>, vector<1x32xf32>
    %118 = vector.broadcast %117 : vector<1x32xf32> to vector<32x32xf32>
    %119 = arith.addf %116, %118 : vector<32x32xf32>
    %120 = vector.shape_cast %119 : vector<32x32xf32> to vector<1x2x2x8x32xf32>
    %121 = vector.extract_strided_slice %120 {offsets = [0, 0, 0, 0, 0], sizes = [1, 2, 1, 8, 32], strides = [1, 1, 1, 1, 1]} : vector<1x2x2x8x32xf32> to vector<1x2x1x8x32xf32>
    %122 = vector.shape_cast %121 : vector<1x2x1x8x32xf32> to vector<1x2x8x32xf32>
    %123 = vector.extract_strided_slice %120 {offsets = [0, 0, 1, 0, 0], sizes = [1, 2, 1, 8, 32], strides = [1, 1, 1, 1, 1]} : vector<1x2x2x8x32xf32> to vector<1x2x1x8x32xf32>
    %124 = vector.shape_cast %123 : vector<1x2x1x8x32xf32> to vector<1x2x8x32xf32>
    %125 = arith.maximumf %122, %124 : vector<1x2x8x32xf32>
    %c0_212 = arith.constant 0 : index
    %c0_213 = arith.constant 0 : index
    %c0_214 = arith.constant 0 : index
    %c0_215 = arith.constant 0 : index
    %126 = vector.load %arg14[%c0_212, %c0_213, %c0_214, %c0_215] : memref<1x2x8x32xf32, #tpu.memory_space<vmem>>, vector<1x2x8x32xf32>
    tpu.vector_store %arg14[%c0_212, %c0_213, %c0_214, %c0_215], %125 {strides = array<i32>} : memref<1x2x8x32xf32, #tpu.memory_space<vmem>>, vector<1x2x8x32xf32>,
    %c0_216 = arith.constant 0 : index
    %c0_217 = arith.constant 0 : index
    %c0_218 = arith.constant 0 : index
    %c0_219 = arith.constant 0 : index
    %127 = tpu.strided_load %arg14[%c0_216, %c0_217, %c0_218, %c0_219] {strides = array<i32: 1, 1, 2, 1>} : memref<1x2x8x32xf32, #tpu.memory_space<vmem>>, vector<1x2x2x32xf32>
    %c0_220 = arith.constant 0 : index
    %c0_221 = arith.constant 0 : index
    %c1_222 = arith.constant 1 : index
    %c0_223 = arith.constant 0 : index
    %128 = tpu.strided_load %arg14[%c0_220, %c0_221, %c1_222, %c0_223] {strides = array<i32: 1, 1, 2, 1>} : memref<1x2x8x32xf32, #tpu.memory_space<vmem>>, vector<1x2x2x32xf32>
    %129 = arith.maximumf %127, %128 : vector<1x2x2x32xf32>
    %cst_224 = arith.constant 0.000000e+00 : f32
    %130 = vector.broadcast %cst_224 : f32 to vector<1x2x2x32xf32>
    %131 = arith.maximumf %129, %130 : vector<1x2x2x32xf32>
    %c0_225 = arith.constant 0 : index
    %c0_226 = arith.constant 0 : index
    %c0_227 = arith.constant 0 : index
    %c0_228 = arith.constant 0 : index
    %132 = vector.load %arg8[%c0_225, %c0_226, %c0_227, %c0_228] : memref<1x2x2x32xf32, #tpu.memory_space<vmem>>, vector<1x2x2x32xf32>
    tpu.vector_store %arg8[%c0_225, %c0_226, %c0_227, %c0_228], %131 {strides = array<i32>} : memref<1x2x2x32xf32, #tpu.memory_space<vmem>>, vector<1x2x2x32xf32>,
    return
  }
  func.func @transform_0(%arg0: i32) -> (i32, i32, i32, i32) {
    %c0_i32 = arith.constant 0 : i32
    %c0_i32_0 = arith.constant 0 : i32
    %c0_i32_1 = arith.constant 0 : i32
    %c0_i32_2 = arith.constant 0 : i32
    return %arg0, %c0_i32, %c0_i32_0, %c0_i32_1 : i32, i32, i32, i32
  }
  func.func @transform_1(%arg0: i32) -> (i32, i32) {
    %c0_i32 = arith.constant 0 : i32
    %c0_i32_0 = arith.constant 0 : i32
    %c0_i32_1 = arith.constant 0 : i32
    return %c0_i32, %c0_i32_0 : i32, i32
  }
  func.func @transform_2(%arg0: i32) -> (i32, i32) {
    %c0_i32 = arith.constant 0 : i32
    %c0_i32_0 = arith.constant 0 : i32
    %c0_i32_1 = arith.constant 0 : i32
    return %c0_i32, %c0_i32_0 : i32, i32
  }
  func.func @transform_3(%arg0: i32) -> (i32, i32) {
    %c0_i32 = arith.constant 0 : i32
    %c0_i32_0 = arith.constant 0 : i32
    %c0_i32_1 = arith.constant 0 : i32
    return %c0_i32, %c0_i32_0 : i32, i32
  }
  func.func @transform_4(%arg0: i32) -> (i32, i32) {
    %c0_i32 = arith.constant 0 : i32
    %c0_i32_0 = arith.constant 0 : i32
    %c0_i32_1 = arith.constant 0 : i32
    return %c0_i32, %c0_i32_0 : i32, i32
  }
  func.func @transform_5(%arg0: i32) -> (i32, i32) {
    %c0_i32 = arith.constant 0 : i32
    %c0_i32_0 = arith.constant 0 : i32
    %c0_i32_1 = arith.constant 0 : i32
    return %c0_i32, %c0_i32_0 : i32, i32
  }
  func.func @transform_6(%arg0: i32) -> (i32, i32) {
    %c0_i32 = arith.constant 0 : i32
    %c0_i32_0 = arith.constant 0 : i32
    %c0_i32_1 = arith.constant 0 : i32
    return %c0_i32, %c0_i32_0 : i32, i32
  }
  func.func @transform_7(%arg0: i32) -> (i32, i32, i32, i32) {
    %c0_i32 = arith.constant 0 : i32
    %c0_i32_0 = arith.constant 0 : i32
    %c0_i32_1 = arith.constant 0 : i32
    %c0_i32_2 = arith.constant 0 : i32
    return %arg0, %c0_i32, %c0_i32_0, %c0_i32_1 : i32, i32, i32, i32
  }
}

</mosaic_0001>

<bundles_post_ra>
// kernel: tpu_custom_call.1
= control target key start
LH: loop header
LB: loop body
LE: loop exit
PB: predicated region body
PF: predicated region fallthrough
CT: control target
= control target key end

     0   :  { %12 = vsyncpa [#allocation9], 0  ;;  %s8798_s0 = inlined_call_operand.vmem [shape: bf16[2,16,16,4], index: 0, kind: input, shape index: {}]   ;;  %s8799_s1 = inlined_call_operand.vmem [shape: bf16[36,8], index: 1, kind: input, shape index: {}]   ;;  %s8800_s2 = inlined_call_operand.vmem [shape: f32[1,8], index: 2, kind: input, shape index: {}]   ;;  %s8801_s3 = inlined_call_operand.vmem [shape: bf16[72,16], index: 3, kind: input, shape index: {}]   ;;  %s8802_s4 = inlined_call_operand.vmem [shape: f32[1,16], index: 4, kind: input, shape index: {}]   ;;  %s8803_s5 = inlined_call_operand.vmem [shape: bf16[144,32], index: 5, kind: input, shape index: {}]   ;;  %s8804_s6 = inlined_call_operand.vmem [shape: f32[1,32], index: 6, kind: input, shape index: {}]   ;;  %s8805_s7 = inlined_call_operand.hbm [shape: f32[2,2,2,32], index: 7, kind: output, shape index: {}]  }
   0x1   :  { %14 = vsyncpa [#allocation9 + $0x1], 0  ;;  %s6522_s24 = smov 0   ;;  %s6524_s25 = smov 0  }
   0x2   :  { %s6526_s26 = smov 0   ;;  %s6528_s27 = smov 0  }
   0x3 LB: > { %s6543_s28 = sadd.s32 4294967295, %s6463_s27   ;;  %s5810_s29 = sadd.s32 4294967294, %s6463_s27   ;;  %s6463_s27 = sphi %s6528_s27, %s8875_s27   ;;  %s6459_s26 = sphi %s6526_s26, %s8874_s26   ;;  %s6455_s25 = sphi %s6524_s25, %s8873_s25   ;;  %s6451_s24 = sphi %s6522_s24, %s8872_s24  }
   0x4   : > { %s6547_s30 = sadd.s32 1, %s6463_s27   ;;  %s179_s8 = sadd.s32 1, %s6459_s26 }
   0x5   : > { %s176_s9 = ssub.s32 %s6463_s27, %s6547_s30  ;;  %p189_p0 = scmp.ne.s32.totalorder %s6459_s26, %s6455_s25 }
   0x6   : > { %p177_p1 = scmp.eq.s32.totalorder %s176_s9, 0  ;;  %p190_p2 = scmp.eq.s32.totalorder %s6543_s28, 1 }
   0x7   : > { %p195_p3 = scmp.ne.s32.totalorder %s6455_s25, %s6451_s24  ;;  %p196_p4 = scmp.eq.s32.totalorder %s5810_s29, 1 }
   0x8   : > { %s6558_s10 = scalar_select %p177_p1, %s6459_s26, %s179_s8  }
   0x9   : > { %p6560_p5 = por %p190_p2, %p189_p0  ;;  %p6564_p6 = por %p196_p4, %p195_p3 }
   0xa   : > { %p5813_p7 = scmp.ge.s32.totalorder %s6463_s27, 1  ;;  %p240_p8 = scmp.lt.s32.totalorder %s6463_s27, 3 }
   0xc   : > { %p241_p9 = pnand %p5813_p7, %p240_p8 }
   0xd   : > { %p272_p10 = scmp.lt.s32.totalorder (!%p241_p9), %s6543_s28, 1  ;;  %s6466_s18 = smov (!%p241_p9), 12  }
   0xe   : > { %244 = sbr.rel (%p241_p9) target bundleno = 1381 (0x565), region = 48  ;;  %s6467_s19 = smov (!%p241_p9), 24  }
   0xf   : > { %s6468_s20 = smov (!%p241_p9), 8   ;;  %s6469_s21 = smov (!%p241_p9), 4  }
  0x10   : > { %s6470_s22 = smov (!%p241_p9), 20   ;;  %s6471_s23 = smov (!%p241_p9), 32  }
  0x11   : > { %s6472_s29 = smov (!%p241_p9), 16   ;;  %s6473_s8 = smov (!%p241_p9), 28  }
  0x12   : > { %s6477_s15 = smov (!%p241_p9), 64   ;;  %s6334_s9 = sshll.u32 (!%p241_p9), %s6543_s28, 2 }
  0x13   : > { %vm281_vm0 = vcmask 24576   ;;  %vm8806_vm1 = vsmask.f32 256  ;;  %vm278_vm2 = vcmask 27648   ;;  %v293_v1 = vld [vmem:[#allocation2 + $0xc] sm:$0x1] }
  0x14   : > { %vm6573_vm3 = vmand %vm281_vm0, %vm8806_vm1  ;;  %s273_s13 = scalar_select %p272_p10, %s6543_s28, 1  ;;  %v296_v3 = vld [vmem:[#allocation2 + $0x18] sm:$0x1]  ;;  %vm8807_vm4 = vsmask.f32 7938  ;;  %v6465_v4 = vmov 0  }
  0x15   : > { %v294_v2 = vsel %vm6573_vm3, 0, %v293_v1  ;;  %279 = vst.msk [vmem:[#allocation2] sm:$0xf] %vm278_vm2, %v6465_v4  ;;  %vm432_vm5 = vsmask.f32 4368  ;;  %v297_v5 = vsel %vm6573_vm3, 0, %v296_v3  ;;  %vm6612_vm7 = vmand %vm278_vm2, %vm8807_vm4 }
  0x16   : > { %295 = vst [vmem:[#allocation2 + $0xc] sm:$0x1] %v294_v2  ;;  %s6252_s14 = sshll.u32 %s273_s13, 7  ;;  %vm6602_vm6 = vmor %vm8806_vm1, %vm432_vm5  ;;  %vm1368_vm9 = vcmask 1042432   ;;  %vm917_vm10 = vsmask.f32 3328 }
  0x17   : > { %s6585_s17 = scalar_lea.vmem %s8798_s0, %s6252_s14  ;;  %280 = vst.msk [vmem:[#allocation2 + $0x4] sm:$0xf] %vm278_vm2, %v6465_v4  ;;  %vm6618_vm8 = vmand %vm281_vm0, %vm8807_vm4  ;;  %v299_v41 = vld [vmem:[#allocation2 + $0x24] sm:$0x1]  ;;  %vm1369_vm11 = vcmask 1046532   ;;  %vm8808_vm15 = vcmask 31744  }
  0x18   : > { %v400_v6 = vld [vmem:[%s6585_s17] sm:$0xf]  ;;  %v401_v7 = vld [vmem:[%s6585_s17 + $0x4] sm:$0xf]  ;;  %282 = vst.msk [vmem:[#allocation2 + $0x8] sm:$0x1] %vm281_vm0, %v6465_v4  ;;  %vm6644_vm12 = vmor %vm1368_vm9, %vm1369_vm11 }
  0x19   : > { %v435_v8 = vshrl.u32 %v400_v6, 16  ;;  %v438_v9 = vshll.u32 %v400_v6, 16  ;;  %v443_v10 = vshrl.u32 %v401_v7, 16  ;;  %v446_v11 = vshll.u32 %v401_v7, 16  ;;  %284 = vst.msk [vmem:[#allocation2 + $0xcc] sm:$0xf] %vm278_vm2, %v6465_v4 }
  0x1a   : > { %285 = vst.msk [vmem:[#allocation2 + $0xd0] sm:$0xf] %vm278_vm2, %v6465_v4  ;;  %v402_v12 = vld [vmem:[%s6585_s17 + $0x8] sm:$0xf]  ;;  %v403_v13 = vld [vmem:[%s6585_s17 + $0xc] sm:$0xf] }
  0x1b   : > { %v437_v15 = vrot.slane %v435_v8, 7  ;;  %v6606_v16 = vrot.slane %v443_v10, 7  ;;  %286 = vst.msk [vmem:[#allocation2 + $0xd4] sm:$0x1] %vm281_vm0, %v6465_v4  ;;  %v452_v17 = vshrl.u32 %v402_v12, 16  ;;  %v455_v18 = vshll.u32 %v402_v12, 16 }
  0x1c   : > { %298 = vst [vmem:[#allocation2 + $0x18] sm:$0x1] %v297_v5  ;;  %v460_v21 = vshrl.u32 %v403_v13, 16  ;;  %v463_v22 = vshll.u32 %v403_v13, 16  ;;  %v1304_v27 = vld [vmem:[#allocation2] sm:$0xe] }
  0x1d   : > { %v757_v20 = vld [vmem:[#allocation2 + $0xc] sm:$0xf]  ;;  %v440_v24 = vor.u32 %v438_v9, %v437_v15  ;;  %v441_v25 = vrot.slane %v437_v15, 4  ;;  %v448_v26 = vor.u32 %v446_v11, %v6606_v16  ;;  %v290_v28 = vld [vmem:[#allocation2] sm:$0x1]  ;;  %v454_v30 = vrot.slane %v452_v17, 7 }
  0x1e   : > { %v870_v29 = vld [vmem:[#allocation2 + $0x4] sm:$0xf]  ;;  %v6623_v31 = vrot.slane %v460_v21, 7  ;;  %v291_v32 = vsel %vm6573_vm3, 0, %v290_v28  ;;  %v5817_v42 = vrot.slane %v1304_v27, 9  ;;  %v300_v47 = vsel %vm6573_vm3, 0, %v299_v41 }
  0x1f   : > { %v449_v33 = vsel %vm6602_vm6, %v441_v25, %v448_v26  ;;  %v758_v34 = vsel %vm6612_vm7, %v440_v24, %v757_v20  ;;  %v346_v35 = vld [vmem:[#allocation2 + $0x8] sm:$0x1]  ;;  %v934_v36 = vshrl.u32 %v870_v29, 16  ;;  %292 = vst [vmem:[#allocation2] sm:$0x1] %v291_v32  ;;  %v457_v38 = vor.u32 %v455_v18, %v454_v30  ;;  %s6478_s13 = smov 80  }
  0x20   : > { %759 = vst [vmem:[#allocation2 + $0xc] sm:$0xf] %v758_v34  ;;  %v347_v37 = vsel %vm6618_vm8, 0, %v346_v35  ;;  %v458_v39 = vrot.slane %v454_v30, 4  ;;  %v465_v40 = vor.u32 %v463_v22, %v6623_v31  ;;  %v1373_v43 = vrot.slane %v870_v29, 5  ;;  %s6479_s14 = smov 96  }
  0x21   : > { %760 = vst.msk [vmem:[#allocation2 + $0x10] sm:$0xf] %vm278_vm2, %v449_v33  ;;  %v930_v44 = vshll.u32 %v870_v29, 16  ;;  %v936_v46 = vrot.slane %v934_v36, 4  ;;  %v404_v48 = vld [vmem:[%s6585_s17 + $0x10] sm:$0xf] }
  0x22   : > { %348 = vst [vmem:[#allocation2 + $0x8] sm:$0x1] %v347_v37  ;;  %v466_v45 = vsel %vm6602_vm6, %v458_v39, %v465_v40  ;;  %v469_v51 = vshrl.u32 %v404_v48, 16  ;;  %v405_v54 = vld [vmem:[%s6585_s17 + $0x14] sm:$0xf]  ;;  %v472_v55 = vshll.u32 %v404_v48, 16  ;;  %v1374_v63 = vsel %vm6644_vm12, %v5817_v42, %v1373_v43 }
  0x23   : > { %v764_v49 = vld [vmem:[#allocation2 + $0x18] sm:$0xf]  ;;  %767 = vst.msk [vmem:[#allocation2 + $0x1c] sm:$0xf] %vm278_vm2, %v466_v45  ;;  %v6641_v50 = vrot.slane %v930_v44, 5  ;;  %v477_v57 = vshrl.u32 %v405_v54, 16  ;;  %v2844_v24 = vunpack.c.l.b16 %v1374_v63 }
  0x24   : > { %v765_v53 = vsel %vm6612_vm7, %v457_v38, %v764_v49  ;;  %301 = vst [vmem:[#allocation2 + $0x24] sm:$0x1] %v300_v47  ;;  %vm918_vm13 = vsmask.f32 7440  ;;  %v471_v56 = vrot.slane %v469_v51, 7  ;;  %v450_v58 = vrot.slane %v6606_v16, 4 }
  0x25   : > { %766 = vst [vmem:[#allocation2 + $0x18] sm:$0xf] %v765_v53  ;;  %v937_v60 = vor.u32 %v936_v46, %v6641_v50  ;;  %v480_v61 = vshll.u32 %v405_v54, 16  ;;  %v349_v62 = vld [vmem:[#allocation2 + $0x14] sm:$0x1]  ;;  %v1375_v1 = vrot.slane %v1373_v43, 4  ;;  %vm6667_vm14 = vmor %vm917_vm10, %vm918_vm13 }
  0x26   : > { %v869_v59 = vld [vmem:[#allocation2] sm:$0xf]  ;;  %v474_v7 = vor.u32 %v472_v55, %v471_v56  ;;  %v475_v8 = vrot.slane %v471_v56, 4  ;;  %v6655_v9 = vrot.slane %v477_v57, 7  ;;  %v350_v10 = vsel %vm6618_vm8, 0, %v349_v62 }
  0x27   : > { %v921_v2 = vshrl.u32 %v869_v59, 16  ;;  %v924_v3 = vshll.u32 %v869_v59, 16  ;;  %v1305_v5 = vld [vmem:[#allocation2 + $0xc] sm:$0xe]  ;;  %351 = vst [vmem:[#allocation2 + $0x14] sm:$0x1] %v350_v10 }
  0x28   : > { %v6269_v6 = vld [vmem:[#allocation2 + $0xc] sm:$0xff]  ;;  %v938_v20 = vrot.slane %v937_v60, 4  ;;  %v482_v21 = vor.u32 %v480_v61, %v6655_v9  ;;  %v5818_v28 = vrot.slane %v1305_v5, 9  ;;  %v352_v37 = vld [vmem:[#allocation2 + $0x20] sm:$0x1]  ;;  %v467_v55 = vrot.slane %v6623_v31, 4 }
  0x29   : > { %v6659_v11 = vld [vmem:[#allocation2 + $0x10] sm:$0xf]  ;;  %v901_v12 = vld [vmem:[#allocation2 + $0x8] sm:$0x1]  ;;  %v923_v13 = vrot.slane %v921_v2, 4  ;;  %v926_v15 = vrot.slane %v924_v3, 5  ;;  %2988 = vrot.lane.b32.xlu1 %v6269_v6, %s6466_s18 }
  0x2a   : > { %v940_v17 = vshll.u32 %v901_v12, 16  ;;  %v1376_v18 = vrot.slane %v901_v12, 5  ;;  %v6663_v22 = vld [vmem:[#allocation2 + $0x10] sm:$0xf]  ;;  %v1380_v29 = vrot.slane %v6659_v11, 5  ;;  %v483_v35 = vsel %vm6602_vm6, %v475_v8, %v482_v21  ;;  %v6329_v25 = vld [vmem:[%s8803_s5 + $0x20] sm:$0xff] }
  0x2b   : > { %v927_v26 = vor.u32 %v926_v15, %v923_v13  ;;  %v771_v27 = vld [vmem:[#allocation2 + $0x24] sm:$0xf]  ;;  %v1915_v30 = vld [vmem:[#allocation2 + $0xc] sm:$0xe]  ;;  %v6678_v38 = vld [vmem:[#allocation2 + $0x1c] sm:$0xf] }
  0x2c   : > { %v1377_v32 = vsel %vm6644_vm12, %v1375_v1, %v1376_v18  ;;  %v942_v33 = vrot.slane %v940_v17, 5  ;;  %v6285_v34 = vld [vmem:[#allocation2 + $0x18] sm:$0xff]  ;;  %v772_v36 = vsel %vm6612_vm7, %v474_v7, %v771_v27  ;;  %774 = vst.msk [vmem:[#allocation2 + $0x28] sm:$0xf] %vm278_vm2, %v483_v35  ;;  %v5833_v44 = vrot.slane %v1915_v30, 9 }
  0x2d   : > { %v2845_v39 = vunpack.c.l.b16 %v1377_v32  ;;  %v6270_v40 = vld [vmem:[#allocation2 + $0x18] sm:$0xff]  ;;  %v928_v41 = vrot.slane %v927_v26, 4  ;;  %773 = vst [vmem:[#allocation2 + $0x24] sm:$0xf] %v772_v36  ;;  %3244 = vrot.lane.b32.xlu2 %v6285_v34, %s6467_s19  ;;  %v1981_v45 = vrot.slane %v6663_v22, 5  ;;  %v353_v51 = vsel %vm6618_vm8, 0, %v352_v37 }
  0x2e   : > { %v2524_v42 = vld [vmem:[#allocation2 + $0x18] sm:$0xe]  ;;  %v943_v43 = vsel %vm6667_vm14, %v938_v20, %v942_v33  ;;  %v6685_v46 = vld [vmem:[#allocation2 + $0x1c] sm:$0xf]  ;;  %v871_v54 = vld [vmem:[#allocation2 + $0xc] sm:$0xf]  ;;  %v6695_v59 = vsel %vm6644_vm12, %v5818_v28, %v1380_v29 }
  0x2f   : > { %v2876_v47 = vpack.c.b16 %v2845_v39, %v2844_v24  ;;  %v933_v48 = vsel %vm6667_vm14, %v928_v41, %v6641_v50  ;;  %v2765_v49 = vunpack.c.l.b16 %v943_v43  ;;  %v1916_v53 = vld [vmem:[#allocation2 + $0x18] sm:$0xe]  ;;  %v761_v57 = vld [vmem:[#allocation2 + $0x14] sm:$0x1]  ;;  %354 = vst [vmem:[#allocation2 + $0x20] sm:$0x1] %v353_v51  ;;  %v6706_v63 = vsel %vm6644_vm12, %v5833_v44, %v1981_v45 }
  0x30   : > { %v2764_v56 = vunpack.c.l.b16 %v933_v48  ;;  %v5849_v60 = vrot.slane %v2524_v42, 9  ;;  %v762_v50 = vsel %vm6573_vm3, %v450_v58, %v761_v57  ;;  %v1382_v61 = vrot.slane %v1380_v29, 4  ;;  %v1483_v7 = vld [vmem:[#allocation2 + $0xc] sm:$0xf]  ;;  %v2092_v15 = vld [vmem:[#allocation2 + $0x18] sm:$0xf] }
  0x31   : > { %2892 = vrot.lane.b32.xlu0 %v2876_v47, %s6468_s20  ;;  %v2590_v62 = vrot.slane %v6678_v38, 5  ;;  %v5834_v31 = vrot.slane %v1916_v53, 9  ;;  %2990 = vrot.lane.b32.xlu1 %v6270_v40, %s6466_s18  ;;  %763 = vst [vmem:[#allocation2 + $0x14] sm:$0x1] %v762_v50  ;;  %v1988_v1 = vrot.slane %v6685_v46, 5  ;;  %v945_v2 = vshrl.u32 %v871_v54, 16 }
  0x32   : > { %v948_v3 = vshll.u32 %v871_v54, 16  ;;  %v2796_v5 = vpack.c.b16 %v2765_v49, %v2764_v56  ;;  %v1983_v16 = vrot.slane %v1981_v45, 4  ;;  %v954_v6 = vshll.u32 %v6659_v11, 16 }
  0x33   : > { %v958_v58 = vshrl.u32 %v6659_v11, 16  ;;  %v6713_v8 = vsel %vm6644_vm12, %v5849_v60, %v2590_v62  ;;  %v6715_v10 = vrot.slane %v2590_v62, 4  ;;  %v6719_v12 = vsel %vm6644_vm12, %v5834_v31, %v1988_v1 }
  0x34   : > { %v947_v13 = vrot.slane %v945_v2, 4  ;;  %v6721_v17 = vrot.slane %v1988_v1, 4  ;;  %v950_v18 = vrot.slane %v948_v3, 5  ;;  %v956_v20 = vrot.slane %v954_v6, 5  ;;  %v6286_v24 = vld [vmem:[#allocation2 + $0x24] sm:$0xff] }
  0x35   : > { %v960_v21 = vrot.slane %v958_v58, 4  ;;  %v1532_v11 = vshrl.u32 %v1483_v7, 16  ;;  %v1535_v26 = vshll.u32 %v1483_v7, 16  ;;  %v1541_v27 = vshll.u32 %v6663_v22, 16 }
  0x36   : > { %v1545_v28 = vshrl.u32 %v6663_v22, 16  ;;  %v768_v29 = vld [vmem:[#allocation2 + $0x20] sm:$0x1]  ;;  %v951_v30 = vor.u32 %v950_v18, %v947_v13  ;;  %v2141_v33 = vshrl.u32 %v2092_v15, 16  ;;  %v2144_v34 = vshll.u32 %v2092_v15, 16 }
  0x37   : > { %v961_v32 = vor.u32 %v960_v21, %v956_v20  ;;  %v769_v35 = vsel %vm6573_vm3, %v467_v55, %v768_v29  ;;  %v1534_v36 = vrot.slane %v1532_v11, 4  ;;  %v1537_v37 = vrot.slane %v1535_v26, 5 }
  0x38   : > { %v1543_v39 = vrot.slane %v1541_v27, 5  ;;  %v902_v40 = vld [vmem:[#allocation2 + $0x14] sm:$0x1]  ;;  %v2846_v41 = vunpack.c.l.b16 %v6695_v59  ;;  %v3100_v22 = vunpack.c.l.b16 %v6706_v63  ;;  %770 = vst [vmem:[#allocation2 + $0x20] sm:$0x1] %v769_v35  ;;  %v3356_v43 = vunpack.c.l.b16 %v6713_v8 }
  0x39   : > { %2812 = vrot.lane.b32.xlu0 %v2796_v5, %s6469_s21  ;;  %v1515_v42 = vld [vmem:[#allocation2 + $0x14] sm:$0x1]  ;;  %v3102_v44 = vunpack.c.l.b16 %v6719_v12  ;;  %3246 = vrot.lane.b32.xlu1 %v6286_v24, %s6467_s19  ;;  %v1383_v45 = vrot.slane %v902_v40, 5  ;;  %v952_v48 = vrot.slane %v951_v30, 4  ;;  %v962_v49 = vrot.slane %v961_v32, 4 }
  0x3a   : > { %v1984_v47 = vrot.slane %v1515_v42, 5  ;;  %v964_v51 = vshll.u32 %v902_v40, 16  ;;  %v1538_v53 = vor.u32 %v1537_v37, %v1534_v36  ;;  %v1547_v54 = vrot.slane %v1545_v28, 4  ;;  %v1485_v30 = vld [vmem:[#allocation2 + $0x18] sm:$0xf] }
  0x3b   : > { %v1551_v55 = vshll.u32 %v1515_v42, 16  ;;  %v1384_v56 = vsel %vm6644_vm12, %v1382_v61, %v1383_v45  ;;  %v957_v59 = vsel %vm6667_vm14, %v952_v48, %v956_v20  ;;  %v2143_v60 = vrot.slane %v2141_v33, 4  ;;  %v873_v45 = vld [vmem:[#allocation2 + $0x18] sm:$0xf] }
  0x3c   : > { %v1985_v57 = vsel %vm6644_vm12, %v1983_v16, %v1984_v47  ;;  %v2847_v50 = vunpack.c.l.b16 %v1384_v56  ;;  %v966_v31 = vrot.slane %v964_v51, 5  ;;  %v2766_v63 = vunpack.c.l.b16 %v957_v59  ;;  %v6760_v51 = vld [vmem:[#allocation2 + $0x1c] sm:$0xf] }
  0x3d   : > { %v3101_v62 = vunpack.c.l.b16 %v1985_v57  ;;  %v1539_v1 = vrot.slane %v1538_v53, 4  ;;  %v1548_v2 = vor.u32 %v1547_v54, %v1543_v39  ;;  %v1553_v3 = vrot.slane %v1551_v55, 5 }
  0x3e   : > { %v2146_v5 = vrot.slane %v2144_v34, 5  ;;  %v2877_v6 = vpack.c.b16 %v2847_v50, %v2846_v41  ;;  %v967_v61 = vsel %vm6667_vm14, %v962_v49, %v966_v31  ;;  %v2150_v7 = vshll.u32 %v6678_v38, 16  ;;  %v355_v50 = vld [vmem:[#allocation2 + $0x2c] sm:$0x1] }
  0x3f   : > { %v3132_v58 = vpack.c.b16 %v3101_v62, %v3100_v22  ;;  %v2124_v16 = vld [vmem:[#allocation2 + $0x20] sm:$0x1]  ;;  %v2767_v12 = vunpack.c.l.b16 %v967_v61  ;;  %v1544_v13 = vsel %vm6667_vm14, %v1539_v1, %v1543_v39  ;;  %v1549_v15 = vrot.slane %v1548_v2, 4 }
  0x40   : > { %v1516_v8 = vld [vmem:[#allocation2 + $0x20] sm:$0x1]  ;;  %v2147_v18 = vor.u32 %v2146_v5, %v2143_v60  ;;  %v2593_v20 = vrot.slane %v2124_v16, 5  ;;  %v6746_v24 = vunpack.c.l.b16 %v1544_v13  ;;  %v2152_v11 = vrot.slane %v2150_v7, 5  ;;  %v2094_v13 = vld [vmem:[#allocation2 + $0x24] sm:$0xf] }
  0x41   : > { %2894 = vrot.lane.b32.xlu0 %v2877_v6, %s6468_s20  ;;  %3148 = vrot.lane.b32.xlu2 %v3132_v58, %s6470_s22  ;;  %v1991_v21 = vrot.slane %v1516_v8, 5  ;;  %v2797_v26 = vpack.c.b16 %v2767_v12, %v2766_v63  ;;  %v1554_v27 = vsel %vm6667_vm14, %v1549_v15, %v1553_v3  ;;  %v2154_v29 = vshrl.u32 %v6678_v38, 16  ;;  %v6767_v31 = vld [vmem:[#allocation2 + $0x20] sm:$0x1] }
  0x42   : > { %v2148_v28 = vrot.slane %v2147_v18, 4  ;;  %v2594_v32 = vsel %vm6644_vm12, %v6715_v10, %v2593_v20  ;;  %v3021_v34 = vunpack.c.l.b16 %v1554_v27  ;;  %v2160_v35 = vshll.u32 %v2124_v16, 16 }
  0x43   : > { %v1992_v33 = vsel %vm6644_vm12, %v6721_v17, %v1991_v21  ;;  %v3357_v36 = vunpack.c.l.b16 %v2594_v32  ;;  %v2156_v40 = vrot.slane %v2154_v29, 4  ;;  %v1556_v22 = vshrl.u32 %v1485_v30, 16  ;;  %v2525_v21 = vld [vmem:[#allocation2 + $0x24] sm:$0xe] }
  0x44   : > { %v3103_v37 = vunpack.c.l.b16 %v1992_v33  ;;  %v2153_v39 = vsel %vm6667_vm14, %v2148_v28, %v2152_v11  ;;  %v3052_v41 = vpack.c.b16 %v3021_v34, %v6746_v24  ;;  %v2162_v38 = vrot.slane %v2160_v35, 5 }
  0x45   : > { %v3276_v42 = vunpack.c.l.b16 %v2153_v39  ;;  %v3388_v47 = vpack.c.b16 %v3357_v36, %v3356_v43  ;;  %v2157_v48 = vor.u32 %v2156_v40, %v2152_v11  ;;  %v1559_v49 = vshll.u32 %v1485_v30, 16  ;;  %v2095_v30 = vld [vmem:[#allocation2 + $0x28] sm:$0xf] }
  0x46   : > { %v3133_v10 = vpack.c.b16 %v3103_v37, %v3102_v44  ;;  %v1558_v17 = vrot.slane %v1556_v22, 4  ;;  %v1565_v53 = vshll.u32 %v6685_v46, 16  ;;  %v1569_v54 = vshrl.u32 %v6685_v46, 16  ;;  %v1487_v37 = vld [vmem:[#allocation2 + $0x24] sm:$0xf] }
  0x47   : > { %v1575_v55 = vshll.u32 %v1516_v8, 16  ;;  %3404 = vrot.lane.b32.xlu1 %v3388_v47, %s6471_s23  ;;  %v2158_v56 = vrot.slane %v2157_v48, 4  ;;  %v1561_v57 = vrot.slane %v1559_v49, 5  ;;  %v969_v59 = vshrl.u32 %v873_v45, 16  ;;  %v6784_v39 = vld [vmem:[#allocation2 + $0x28] sm:$0xf] }
  0x48   : > { %v972_v60 = vshll.u32 %v873_v45, 16  ;;  %v1567_v43 = vrot.slane %v1565_v53, 5  ;;  %v1571_v44 = vrot.slane %v1569_v54, 4  ;;  %v978_v46 = vshll.u32 %v6760_v51, 16  ;;  %v1306_v53 = vld [vmem:[#allocation2 + $0x18] sm:$0xe] }
  0x49   : > { %3150 = vrot.lane.b32.xlu0 %v3133_v10, %s6470_s22  ;;  %2814 = vrot.lane.b32.xlu2 %v2797_v26, %s6469_s21  ;;  %v1577_v62 = vrot.slane %v1575_v55, 5  ;;  %v2163_v63 = vsel %vm6667_vm14, %v2158_v56, %v2162_v38  ;;  %v1562_v1 = vor.u32 %v1561_v57, %v1558_v17  ;;  %v971_v2 = vrot.slane %v969_v59, 4 }
  0x4a   : > { %v974_v3 = vrot.slane %v972_v60, 5  ;;  %v3277_v5 = vunpack.c.l.b16 %v2163_v63  ;;  %v1572_v6 = vor.u32 %v1571_v44, %v1567_v43  ;;  %v980_v58 = vrot.slane %v978_v46, 5 }
  0x4b   : > { %v982_v61 = vshrl.u32 %v6760_v51, 16  ;;  %v1563_v7 = vrot.slane %v1562_v1, 4  ;;  %v988_v8 = vshll.u32 %v6767_v31, 16  ;;  %v356_v12 = vsel %vm6618_vm8, 0, %v355_v50 }
  0x4c   : > { %v975_v16 = vor.u32 %v974_v3, %v971_v2  ;;  %v3308_v15 = vpack.c.b16 %v3277_v5, %v3276_v42  ;;  %v1573_v18 = vrot.slane %v1572_v6, 4  ;;  %357 = vst [vmem:[#allocation2 + $0x2c] sm:$0x1] %v356_v12  ;;  %v2165_v32 = vshrl.u32 %v2094_v13, 16  ;;  %v358_v3 = vld [vmem:[#allocation2 + $0x38] sm:$0x1] }
  0x4d   : > { %v984_v20 = vrot.slane %v982_v61, 4  ;;  %v1568_v24 = vsel %vm6667_vm14, %v1563_v7, %v1567_v43  ;;  %v990_v26 = vrot.slane %v988_v8, 5  ;;  %v484_v33 = vrot.slane %v6655_v9, 4  ;;  %v406_v7 = vld [vmem:[%s6585_s17 + $0x18] sm:$0xf] }
  0x4e   : > { %v976_v11 = vrot.slane %v975_v16, 4  ;;  %v1578_v27 = vsel %vm6667_vm14, %v1573_v18, %v1577_v62  ;;  %v3022_v28 = vunpack.c.l.b16 %v1568_v24  ;;  %v5850_v36 = vrot.slane %v2525_v21, 9  ;;  %v302_v62 = vld [vmem:[#allocation2 + $0x30] sm:$0x1] }
  0x4f   : > { %v985_v29 = vor.u32 %v984_v20, %v980_v58  ;;  %3068 = vrot.lane.b32.xlu1 %v3052_v41, %s6472_s29  ;;  %v3023_v34 = vunpack.c.l.b16 %v1578_v27  ;;  %v2597_v42 = vrot.slane %v2095_v30, 5  ;;  %v2167_v22 = vrot.slane %v2165_v32, 4 }
  0x50   : > { %v981_v35 = vsel %vm6667_vm14, %v976_v11, %v980_v58  ;;  %v2168_v9 = vshll.u32 %v2094_v13, 16  ;;  %v2174_v47 = vshll.u32 %v2095_v30, 16  ;;  %v2178_v10 = vshrl.u32 %v2095_v30, 16  ;;  %v407_v11 = vld [vmem:[%s6585_s17 + $0x1c] sm:$0xf] }
  0x51   : > { %3324 = vrot.lane.b32.xlu0 %v3308_v15, %s6473_s8  ;;  %v986_v40 = vrot.slane %v985_v29, 4  ;;  %v2768_v38 = vunpack.c.l.b16 %v981_v35  ;;  %v3053_v45 = vpack.c.b16 %v3023_v34, %v3022_v28  ;;  %v1580_v48 = vshrl.u32 %v1487_v37, 16 }
  0x52   : > { %v1583_v49 = vshll.u32 %v1487_v37, 16  ;;  %v1589_v17 = vshll.u32 %v6784_v39, 16  ;;  %v2170_v56 = vrot.slane %v2168_v9, 5  ;;  %v2176_v57 = vrot.slane %v2174_v47, 5 }
  0x53   : > { %v991_v41 = vsel %vm6667_vm14, %v986_v40, %v990_v26  ;;  %3070 = vrot.lane.b32.xlu2 %v3053_v45, %s6472_s29  ;;  %v775_v55 = vld [vmem:[#allocation2 + $0x2c] sm:$0x1]  ;;  %v2180_v59 = vrot.slane %v2178_v10, 4  ;;  %v6795_v50 = vsel %vm6644_vm12, %v5850_v36, %v2597_v42  ;;  %v1582_v43 = vrot.slane %v1580_v48, 4  ;;  %v1917_v36 = vld [vmem:[#allocation2 + $0x24] sm:$0xe] }
  0x54   : > { %v2769_v54 = vunpack.c.l.b16 %v991_v41  ;;  %v776_v60 = vsel %vm6573_vm3, %v484_v33, %v775_v55  ;;  %v1585_v44 = vrot.slane %v1583_v49, 5  ;;  %v2171_v63 = vor.u32 %v2170_v56, %v2167_v22 }
  0x55   : > { %777 = vst [vmem:[#allocation2 + $0x2c] sm:$0x1] %v776_v60  ;;  %v1591_v1 = vrot.slane %v1589_v17, 5  ;;  %v1593_v2 = vshrl.u32 %v6784_v39, 16  ;;  %v5819_v6 = vrot.slane %v1306_v53, 9  ;;  %v1387_v58 = vrot.slane %v6760_v51, 5 }
  0x56   : > { %v2798_v46 = vpack.c.b16 %v2769_v54, %v2768_v38  ;;  %v1586_v5 = vor.u32 %v1585_v44, %v1582_v43  ;;  %v1390_v61 = vrot.slane %v6767_v31, 5  ;;  %v2172_v16 = vrot.slane %v2171_v63, 4 }
  0x57   : > { %v2181_v8 = vor.u32 %v2180_v59, %v2176_v57  ;;  %v1595_v12 = vrot.slane %v1593_v2, 4  ;;  %v303_v13 = vsel %vm6573_vm3, 0, %v302_v62  ;;  %v6806_v18 = vsel %vm6644_vm12, %v5819_v6, %v1387_v58 }
  0x58   : > { %2816 = vrot.lane.b32.xlu1 %v2798_v46, %s6469_s21  ;;  %v1587_v15 = vrot.slane %v1586_v5, 4  ;;  %v1389_v20 = vrot.slane %v1387_v58, 4  ;;  %304 = vst [vmem:[#allocation2 + $0x30] sm:$0x1] %v303_v13  ;;  %v359_v51 = vsel %vm6618_vm8, 0, %v358_v3  ;;  %v2599_v31 = vrot.slane %v2597_v42, 4 }
  0x59   : > { %v2177_v21 = vsel %vm6667_vm14, %v2172_v16, %v2176_v57  ;;  %v1596_v24 = vor.u32 %v1595_v12, %v1591_v1  ;;  %360 = vst [vmem:[#allocation2 + $0x38] sm:$0x1] %v359_v51  ;;  %v486_v26 = vshrl.u32 %v406_v7, 16  ;;  %v3358_v27 = vunpack.c.l.b16 %v6795_v50  ;;  %v1307_v46 = vld [vmem:[#allocation2 + $0x24] sm:$0xe] }
  0x5a   : > { %v1592_v28 = vsel %vm6667_vm14, %v1587_v15, %v1591_v1  ;;  %v6818_v29 = vsel %vm6644_vm12, %v1389_v20, %v1390_v61  ;;  %v489_v30 = vshll.u32 %v406_v7, 16  ;;  %v2182_v32 = vrot.slane %v2181_v8, 4  ;;  %v876_v7 = vld [vmem:[#allocation2 + $0x28] sm:$0xf]  ;;  %v875_v16 = vld [vmem:[#allocation2 + $0x24] sm:$0xf] }
  0x5b   : > { %v1597_v33 = vrot.slane %v1596_v24, 4  ;;  %v2848_v34 = vunpack.c.l.b16 %v6806_v18  ;;  %v488_v35 = vrot.slane %v486_v26, 7  ;;  %v3278_v40 = vunpack.c.l.b16 %v2177_v21 }
  0x5c   : > { %v2125_v37 = vld [vmem:[#allocation2 + $0x2c] sm:$0x1]  ;;  %v3024_v42 = vunpack.c.l.b16 %v1592_v28  ;;  %v494_v22 = vshrl.u32 %v407_v11, 16  ;;  %v497_v45 = vshll.u32 %v407_v11, 16  ;;  %v2849_v41 = vunpack.c.l.b16 %v6818_v29 }
  0x5d   : > { %v1517_v38 = vld [vmem:[#allocation2 + $0x2c] sm:$0x1]  ;;  %v2600_v9 = vrot.slane %v2125_v37, 5  ;;  %v2184_v47 = vshll.u32 %v2125_v37, 16  ;;  %v491_v48 = vor.u32 %v489_v30, %v488_v35  ;;  %v492_v49 = vrot.slane %v488_v35, 4  ;;  %v6271_v37 = vld [vmem:[#allocation2 + $0x24] sm:$0xff] }
  0x5e   : > { %v1599_v10 = vshll.u32 %v1517_v38, 16  ;;  %v496_v17 = vrot.slane %v494_v22, 7  ;;  %v5835_v53 = vrot.slane %v1917_v36, 9  ;;  %v1995_v59 = vrot.slane %v6784_v39, 5  ;;  %v904_v39 = vld [vmem:[#allocation2 + $0x2c] sm:$0x1] }
  0x5f   : > { %v2601_v54 = vsel %vm6644_vm12, %v2599_v31, %v2600_v9  ;;  %v2186_v55 = vrot.slane %v2184_v47, 5  ;;  %v778_v57 = vld [vmem:[#allocation2 + $0x30] sm:$0xf]  ;;  %v1998_v12 = vrot.slane %v1517_v38, 5  ;;  %v5820_v15 = vrot.slane %v1307_v46, 9 }
  0x60   : > { %v1601_v56 = vrot.slane %v1599_v10, 5  ;;  %v3359_v60 = vunpack.c.l.b16 %v2601_v54  ;;  %v499_v50 = vor.u32 %v497_v45, %v496_v17  ;;  %v501_v43 = vrot.slane %v496_v17, 4  ;;  %v782_v62 = vld [vmem:[#allocation2 + $0x38] sm:$0x1] }
  0x61   : > { %v779_v44 = vsel %vm6612_vm7, %v491_v48, %v778_v57  ;;  %v2187_v63 = vsel %vm6667_vm14, %v2182_v32, %v2186_v55  ;;  %v1996_v2 = vsel %vm6644_vm12, %v5835_v53, %v1995_v59  ;;  %v1997_v3 = vrot.slane %v1995_v59, 4 }
  0x62   : > { %v1602_v1 = vsel %vm6667_vm14, %v1597_v33, %v1601_v56  ;;  %780 = vst [vmem:[#allocation2 + $0x30] sm:$0xf] %v779_v44  ;;  %v3389_v5 = vpack.c.b16 %v3359_v60, %v3358_v27  ;;  %v3279_v6 = vunpack.c.l.b16 %v2187_v63  ;;  %v500_v61 = vsel %vm6602_vm6, %v492_v49, %v499_v50 }
  0x63   : > { %v3025_v58 = vunpack.c.l.b16 %v1602_v1  ;;  %781 = vst.msk [vmem:[#allocation2 + $0x34] sm:$0xf] %vm278_vm2, %v500_v61  ;;  %v783_v8 = vsel %vm6573_vm3, %v501_v43, %v782_v62  ;;  %v3104_v13 = vunpack.c.l.b16 %v1996_v2  ;;  %v1394_v31 = vrot.slane %v876_v7, 5 }
  0x64   : > { %3406 = vrot.lane.b32.xlu0 %v3389_v5, %s6471_s23  ;;  %v3309_v20 = vpack.c.b16 %v3279_v6, %v3278_v40  ;;  %784 = vst [vmem:[#allocation2 + $0x38] sm:$0x1] %v783_v8  ;;  %v1397_v21 = vrot.slane %v904_v39, 5  ;;  %v1999_v24 = vsel %vm6644_vm12, %v1997_v3, %v1998_v12  ;;  %v993_v11 = vshrl.u32 %v875_v16, 16 }
  0x65   : > { %v3054_v51 = vpack.c.b16 %v3025_v58, %v3024_v42  ;;  %v996_v26 = vshll.u32 %v875_v16, 16  ;;  %v1002_v27 = vshll.u32 %v876_v7, 16  ;;  %v3105_v28 = vunpack.c.l.b16 %v1999_v24 }
  0x66   : > { %3326 = vrot.lane.b32.xlu2 %v3309_v20, %s6473_s8  ;;  %v1395_v29 = vsel %vm6644_vm12, %v5820_v15, %v1394_v31  ;;  %v1396_v30 = vrot.slane %v1394_v31, 4  ;;  %v1006_v32 = vshrl.u32 %v876_v7, 16  ;;  %v995_v33 = vrot.slane %v993_v11, 4 }
  0x67   : > { %3072 = vrot.lane.b32.xlu1 %v3054_v51, %s6472_s29  ;;  %v998_v35 = vrot.slane %v996_v26, 5  ;;  %v1004_v36 = vrot.slane %v1002_v27, 5  ;;  %v2878_v40 = vpack.c.b16 %v2849_v41, %v2848_v34  ;;  %v1012_v45 = vshll.u32 %v904_v39, 16 }
  0x68   : > { %v1398_v42 = vsel %vm6644_vm12, %v1396_v30, %v1397_v21  ;;  %v1008_v22 = vrot.slane %v1006_v32, 4  ;;  %v2850_v10 = vunpack.c.l.b16 %v1395_v29  ;;  %v6849_v53 = vpack.c.b16 %v3105_v28, %v3104_v13 }
  0x69   : > { %v2096_v38 = vld [vmem:[#allocation2 + $0x30] sm:$0xf]  ;;  %v999_v48 = vor.u32 %v998_v35, %v995_v33  ;;  %v2851_v54 = vunpack.c.l.b16 %v1398_v42  ;;  %v1014_v56 = vrot.slane %v1012_v45, 5  ;;  %vm3485_vm0 = vcmask 64512  }
  0x6a   : > { %v2189_v9 = vshrl.u32 %v2096_v38, 16  ;;  %v2192_v47 = vshll.u32 %v2096_v38, 16  ;;  %v2526_v49 = vld [vmem:[#allocation2 + $0x30] sm:$0xe]  ;;  %v2097_v17 = vld [vmem:[#allocation2 + $0x34] sm:$0xf]  ;;  %v1009_v55 = vor.u32 %v1008_v22, %v1004_v36 }
  0x6b   : > { %v1918_v57 = vld [vmem:[#allocation2 + $0x30] sm:$0xe]  ;;  %v2126_v18 = vld [vmem:[#allocation2 + $0x38] sm:$0x1]  ;;  %v2198_v59 = vshll.u32 %v2097_v17, 16  ;;  %v2202_v60 = vshrl.u32 %v2097_v17, 16  ;;  %v6865_v26 = vpack.c.b16 %v2851_v54, %v2850_v10 }
  0x6c   : > { %v2191_v34 = vrot.slane %v2189_v9, 4  ;;  %v2194_v41 = vrot.slane %v2192_v47, 5  ;;  %2992 = vrot.lane.b32.xlu0 %v6271_v37, %s6466_s18  ;;  %v2208_v50 = vshll.u32 %v2126_v18, 16  ;;  %v1000_v43 = vrot.slane %v999_v48, 4  ;;  %v1518_v6 = vld [vmem:[#allocation2 + $0x38] sm:$0x1] }
  0x6d   : > { %v1010_v44 = vrot.slane %v1009_v55, 4  ;;  %v5851_v62 = vrot.slane %v2526_v49, 9  ;;  %v2200_v63 = vrot.slane %v2198_v59, 5  ;;  %v2204_v1 = vrot.slane %v2202_v60, 4  ;;  %v1490_v12 = vld [vmem:[#allocation2 + $0x34] sm:$0xf] }
  0x6e   : > { %v2195_v46 = vor.u32 %v2194_v41, %v2191_v34  ;;  %v2604_v2 = vrot.slane %v2097_v17, 5  ;;  %2896 = vrot.lane.b32.xlu2 %v2878_v40, %s6468_s20  ;;  %v1005_v3 = vsel %vm6667_vm14, %v1000_v43, %v1004_v36  ;;  %v2607_v5 = vrot.slane %v2126_v18, 5  ;;  %v6287_v13 = vld [vmem:[#allocation2 + $0x30] sm:$0xff]  ;;  %v305_v40 = vld [vmem:[#allocation2 + $0x3c] sm:$0x1] }
  0x6f   : > { %v1015_v39 = vsel %vm6667_vm14, %v1010_v44, %v1014_v56  ;;  %v5836_v58 = vrot.slane %v1918_v57, 9  ;;  %v2205_v7 = vor.u32 %v2204_v1, %v2200_v63  ;;  %v2210_v16 = vrot.slane %v2208_v50, 5  ;;  %v1489_v21 = vld [vmem:[#allocation2 + $0x30] sm:$0xf]  ;;  %v361_v38 = vld [vmem:[#allocation2 + $0x44] sm:$0x1] }
  0x70   : > { %v2196_v61 = vrot.slane %v2195_v46, 4  ;;  %v6857_v8 = vunpack.c.l.b16 %v1005_v3  ;;  %v6859_v15 = vunpack.c.l.b16 %v1015_v39  ;;  %v2605_v20 = vsel %vm6644_vm12, %v5851_v62, %v2604_v2  ;;  %v408_v47 = vld [vmem:[%s6585_s17 + $0x20] sm:$0xf]  ;;  %v409_v10 = vld [vmem:[%s6585_s17 + $0x24] sm:$0xf] }
  0x71   : > { %v2606_v51 = vrot.slane %v2604_v2, 4  ;;  %v2002_v31 = vrot.slane %v1490_v12, 5  ;;  %v2206_v11 = vrot.slane %v2205_v7, 4  ;;  %v2005_v27 = vrot.slane %v1518_v6, 5  ;;  %v311_v55 = vld [vmem:[#allocation2 + $0x54] sm:$0x1] }
  0x72   : > { %v2201_v24 = vsel %vm6667_vm14, %v2196_v61, %v2200_v63  ;;  %v3360_v35 = vunpack.c.l.b16 %v2605_v20  ;;  %v1604_v37 = vshrl.u32 %v1489_v21, 16  ;;  %v2799_v22 = vpack.c.b16 %v6859_v15, %v6857_v8  ;;  %v367_v56 = vld [vmem:[#allocation2 + $0x5c] sm:$0x1]  ;;  %v412_v59 = vld [vmem:[%s6585_s17 + $0x30] sm:$0xf] }
  0x73   : > { %v3280_v28 = vunpack.c.l.b16 %v2201_v24  ;;  %v2608_v29 = vsel %vm6644_vm12, %v2606_v51, %v2607_v5  ;;  %v6871_v30 = vsel %vm6644_vm12, %v5836_v58, %v2002_v31  ;;  %v2004_v32 = vrot.slane %v2002_v31, 4  ;;  %v413_v62 = vld [vmem:[%s6585_s17 + $0x34] sm:$0xf] }
  0x74   : > { %v2211_v33 = vsel %vm6667_vm14, %v2206_v11, %v2210_v16  ;;  %v3361_v36 = vunpack.c.l.b16 %v2608_v29  ;;  %3248 = vrot.lane.b32.xlu0 %v6287_v13, %s6467_s19  ;;  %v1607_v45 = vshll.u32 %v1489_v21, 16  ;;  %v1613_v9 = vshll.u32 %v1490_v12, 16  ;;  %v323_v21 = vld [vmem:[#allocation2 + $0x84] sm:$0x1]  ;;  %v6904_v29 = vld [vmem:[%s6585_s17 + $0x50] sm:$0xf] }
  0x75   : > { %v3281_v42 = vunpack.c.l.b16 %v2211_v33  ;;  %v6882_v48 = vsel %vm6644_vm12, %v2004_v32, %v2005_v27  ;;  %v3106_v49 = vunpack.c.l.b16 %v6871_v30  ;;  %v1606_v17 = vrot.slane %v1604_v37, 4  ;;  %v379_v37 = vld [vmem:[#allocation2 + $0x8c] sm:$0x1]  ;;  %v6948_v30 = vld [vmem:[%s6585_s17 + $0x3c] sm:$0xf] }
  0x76   : > { %v1617_v54 = vshrl.u32 %v1490_v12, 16  ;;  %3152 = vrot.lane.b32.xlu2 %v6849_v53, %s6470_s22  ;;  %v1609_v18 = vrot.slane %v1607_v45, 5  ;;  %v1615_v34 = vrot.slane %v1613_v9, 5  ;;  %v1623_v41 = vshll.u32 %v1518_v6, 16 }
  0x77   : > { %v3310_v57 = vpack.c.b16 %v3281_v42, %v3280_v28  ;;  %v3390_v60 = vpack.c.b16 %v3361_v36, %v3360_v35  ;;  %v306_v43 = vsel %vm6573_vm3, 0, %v305_v40  ;;  %v362_v44 = vsel %vm6618_vm8, 0, %v361_v38  ;;  %v421_v40 = vld [vmem:[%s6585_s17 + $0x54] sm:$0xf] }
  0x78   : > { %v1619_v50 = vrot.slane %v1617_v54, 4  ;;  %v1610_v46 = vor.u32 %v1609_v18, %v1606_v17  ;;  %v1625_v63 = vrot.slane %v1623_v41, 5  ;;  %307 = vst [vmem:[#allocation2 + $0x3c] sm:$0x1] %v306_v43  ;;  %v503_v1 = vshrl.u32 %v408_v47, 16  ;;  %v6272_v17 = vld [vmem:[#allocation2 + $0x30] sm:$0xff] }
  0x79   : > { %3328 = vrot.lane.b32.xlu1 %v3310_v57, %s6473_s8  ;;  %v506_v53 = vshll.u32 %v408_v47, 16  ;;  %363 = vst [vmem:[#allocation2 + $0x44] sm:$0x1] %v362_v44  ;;  %v511_v3 = vshrl.u32 %v409_v10, 16  ;;  %v514_v39 = vshll.u32 %v409_v10, 16  ;;  %v312_v5 = vsel %vm6573_vm3, 0, %v311_v55 }
  0x7a   : > { %v1620_v2 = vor.u32 %v1619_v50, %v1615_v34  ;;  %v1611_v6 = vrot.slane %v1610_v46, 4  ;;  %v505_v58 = vrot.slane %v503_v1, 7  ;;  %313 = vst [vmem:[#allocation2 + $0x54] sm:$0x1] %v312_v5  ;;  %v368_v61 = vsel %vm6618_vm8, 0, %v367_v56 }
  0x7b   : > { %v537_v7 = vshrl.u32 %v412_v59, 16  ;;  %v513_v8 = vrot.slane %v511_v3, 7  ;;  %369 = vst [vmem:[#allocation2 + $0x5c] sm:$0x1] %v368_v61  ;;  %v540_v12 = vshll.u32 %v412_v59, 16  ;;  %v545_v13 = vshrl.u32 %v413_v62, 16 }
  0x7c   : > { %v1621_v16 = vrot.slane %v1620_v2, 4  ;;  %2818 = vrot.lane.b32.xlu0 %v2799_v22, %s6469_s21  ;;  %v1616_v15 = vsel %vm6667_vm14, %v1611_v6, %v1615_v34  ;;  %v508_v20 = vor.u32 %v506_v53, %v505_v58  ;;  %v509_v51 = vrot.slane %v505_v58, 4  ;;  %v6913_v47 = vld [vmem:[#allocation2 + $0x90] sm:$0x1]  ;;  %v6916_v10 = vld [vmem:[%s6585_s17 + $0x58] sm:$0xf] }
  0x7d   : > { %v539_v31 = vrot.slane %v537_v7, 7  ;;  %v3026_v11 = vunpack.c.l.b16 %v1616_v15  ;;  %v516_v27 = vor.u32 %v514_v39, %v513_v8  ;;  %v518_v28 = vrot.slane %v513_v8, 4  ;;  %v6925_v18 = vld [vmem:[%s6585_s17 + $0x5c] sm:$0xf]  ;;  %v6931_v50 = vld [vmem:[#allocation2 + $0x60] sm:$0x1] }
  0x7e   : > { %v1626_v24 = vsel %vm6667_vm14, %v1621_v16, %v1625_v63  ;;  %3408 = vrot.lane.b32.xlu2 %v3390_v60, %s6471_s23  ;;  %v3107_v32 = vunpack.c.l.b16 %v6882_v48  ;;  %v547_v36 = vrot.slane %v545_v13, 7  ;;  %v548_v45 = vshll.u32 %v413_v62, 16  ;;  %v6934_v43 = vld [vmem:[%s6585_s17 + $0x38] sm:$0xf] }
  0x7f   : > { %v3027_v33 = vunpack.c.l.b16 %v1626_v24  ;;  %v542_v35 = vor.u32 %v540_v12, %v539_v31  ;;  %v517_v38 = vsel %vm6602_vm6, %v509_v51, %v516_v27  ;;  %v785_v42 = vld [vmem:[#allocation2 + $0x3c] sm:$0xf]  ;;  %v543_v22 = vrot.slane %v539_v31, 4 }
  0x80   : > { %v324_v9 = vsel %vm6573_vm3, 0, %v323_v21  ;;  %v786_v54 = vsel %vm6612_vm7, %v508_v20, %v785_v42  ;;  %788 = vst.msk [vmem:[#allocation2 + $0x40] sm:$0xf] %vm278_vm2, %v517_v38  ;;  %v789_v55 = vld [vmem:[#allocation2 + $0x44] sm:$0x1]  ;;  %v552_v56 = vrot.slane %v547_v36, 4  ;;  %v550_v41 = vor.u32 %v548_v45, %v547_v36 }
  0x81   : > { %2898 = vrot.lane.b32.xlu1 %v6865_v26, %s6468_s20  ;;  %v3055_v48 = vpack.c.b16 %v3027_v33, %v3026_v11  ;;  %v605_v57 = vshrl.u32 %v6904_v29, 16  ;;  %787 = vst [vmem:[#allocation2 + $0x3c] sm:$0xf] %v786_v54  ;;  %v790_v34 = vsel %vm6573_vm3, %v518_v28, %v789_v55  ;;  %v799_v26 = vld [vmem:[#allocation2 + $0x54] sm:$0xf]  ;;  %v380_v59 = vsel %vm6618_vm8, 0, %v379_v37 }
  0x82   : > { %v613_v60 = vshrl.u32 %v421_v40, 16  ;;  %v3135_v44 = vpack.c.b16 %v3107_v32, %v3106_v49  ;;  %791 = vst [vmem:[#allocation2 + $0x44] sm:$0x1] %v790_v34  ;;  %v800_v62 = vsel %vm6612_vm7, %v542_v35, %v799_v26  ;;  %v803_v46 = vld [vmem:[#allocation2 + $0x5c] sm:$0x1]  ;;  %v616_v1 = vshll.u32 %v421_v40, 16 }
  0x83   : > { %v607_v63 = vrot.slane %v605_v57, 7  ;;  %v551_v53 = vsel %vm6602_vm6, %v543_v22, %v550_v41  ;;  %801 = vst [vmem:[#allocation2 + $0x54] sm:$0xf] %v800_v62  ;;  %v804_v2 = vsel %vm6573_vm3, %v552_v56, %v803_v46  ;;  %v608_v3 = vshll.u32 %v6904_v29, 16 }
  0x84   : > { %v6945_v39 = vrot.slane %v613_v60, 7  ;;  %3074 = vrot.lane.b32.xlu0 %v3055_v48, %s6472_s29  ;;  %802 = vst.msk [vmem:[#allocation2 + $0x58] sm:$0xf] %vm278_vm2, %v551_v53  ;;  %v327_v5 = vsel %vm6573_vm3, 0, %v6913_v47  ;;  %v622_v6 = vshrl.u32 %v6916_v10, 16  ;;  %v625_v58 = vshll.u32 %v6916_v10, 16 }
  0x85   : > { %v611_v49 = vrot.slane %v607_v63, 4  ;;  %805 = vst [vmem:[#allocation2 + $0x5c] sm:$0x1] %v804_v2  ;;  %v630_v16 = vshrl.u32 %v6925_v18, 16  ;;  %v633_v8 = vshll.u32 %v6925_v18, 16  ;;  %v315_v13 = vsel %vm6573_vm3, 0, %v6931_v50 }
  0x86   : > { %v618_v61 = vor.u32 %v616_v1, %v6945_v39  ;;  %v620_v7 = vrot.slane %v6945_v39, 4  ;;  %2994 = vrot.lane.b32.xlu2 %v6272_v17, %s6466_s18  ;;  %325 = vst [vmem:[#allocation2 + $0x84] sm:$0x1] %v324_v9  ;;  %v6962_v12 = vrot.slane %v622_v6, 7  ;;  %v554_v15 = vshrl.u32 %v6934_v43, 16 }
  0x87   : > { %v557_v20 = vshll.u32 %v6934_v43, 16  ;;  %v2099_v51 = vld [vmem:[#allocation2 + $0x40] sm:$0xf]  ;;  %381 = vst [vmem:[#allocation2 + $0x8c] sm:$0x1] %v380_v59  ;;  %v6969_v31 = vrot.slane %v630_v16, 7  ;;  %v610_v29 = vor.u32 %v608_v3, %v607_v63 }
  0x88   : > { %v562_v21 = vshrl.u32 %v6948_v30, 16  ;;  %v2527_v24 = vld [vmem:[#allocation2 + $0x3c] sm:$0xe]  ;;  %v2611_v11 = vrot.slane %v2099_v51, 5  ;;  %v2222_v28 = vshll.u32 %v2099_v51, 16  ;;  %v619_v32 = vsel %vm6602_vm6, %v611_v49, %v618_v61 }
  0x89   : > { %3154 = vrot.lane.b32.xlu1 %v3135_v44, %s6470_s22  ;;  %v2098_v27 = vld [vmem:[#allocation2 + $0x3c] sm:$0xf]  ;;  %v2127_v33 = vld [vmem:[#allocation2 + $0x44] sm:$0x1]  ;;  %v5852_v35 = vrot.slane %v2527_v24, 9  ;;  %v2226_v40 = vshrl.u32 %v2099_v51, 16  ;;  %v635_v49 = vor.u32 %v633_v8, %v6969_v31 }
  0x8a   : > { %v2213_v36 = vshrl.u32 %v2098_v27, 16  ;;  %v2216_v37 = vshll.u32 %v2098_v27, 16  ;;  %v2613_v38 = vrot.slane %v2611_v11, 4  ;;  %v2614_v42 = vrot.slane %v2127_v33, 5  ;;  %v6288_v9 = vld [vmem:[#allocation2 + $0x3c] sm:$0xff] }
  0x8b   : > { %v2224_v22 = vrot.slane %v2222_v28, 5  ;;  %v2232_v45 = vshll.u32 %v2127_v33, 16  ;;  %v2612_v48 = vsel %vm6644_vm12, %v5852_v35, %v2611_v11  ;;  %v2228_v55 = vrot.slane %v2226_v40, 4  ;;  %v884_v56 = vld [vmem:[#allocation2 + $0x58] sm:$0xf] }
  0x8c   : > { %v2215_v17 = vrot.slane %v2213_v36, 4  ;;  %v2218_v54 = vrot.slane %v2216_v37, 5  ;;  %v2615_v57 = vsel %vm6644_vm12, %v2613_v38, %v2614_v42  ;;  %v3362_v18 = vunpack.c.l.b16 %v2612_v48  ;;  %v908_v41 = vld [vmem:[#allocation2 + $0x5c] sm:$0x1]  ;;  %v1311_v26 = vld [vmem:[#allocation2 + $0x54] sm:$0xe] }
  0x8d   : > { %v2234_v34 = vrot.slane %v2232_v45, 5  ;;  %v1422_v59 = vrot.slane %v884_v56, 5  ;;  %v3363_v60 = vunpack.c.l.b16 %v2615_v57  ;;  %v2229_v62 = vor.u32 %v2228_v55, %v2224_v22  ;;  %v827_v63 = vld [vmem:[#allocation2 + $0x84] sm:$0xf]  ;;  %830 = vst.msk [vmem:[#allocation2 + $0x88] sm:$0xf] %vm278_vm2, %v619_v32 }
  0x8e   : > { %v2219_v44 = vor.u32 %v2218_v54, %v2215_v17  ;;  %v5824_v46 = vrot.slane %v1311_v26, 9  ;;  %3250 = vrot.lane.b32.xlu2 %v6288_v9, %s6467_s19  ;;  %v1425_v53 = vrot.slane %v908_v41, 5  ;;  %v828_v2 = vsel %vm6612_vm7, %v610_v29, %v827_v63  ;;  %v831_v3 = vld [vmem:[#allocation2 + $0x8c] sm:$0x1]  ;;  %v883_v39 = vld [vmem:[#allocation2 + $0x54] sm:$0xf] }
  0x8f   : > { %v1424_v1 = vrot.slane %v1422_v59, 4  ;;  %v3391_v6 = vpack.c.b16 %v3363_v60, %v3362_v18  ;;  %v2230_v16 = vrot.slane %v2229_v62, 4  ;;  %829 = vst [vmem:[#allocation2 + $0x84] sm:$0xf] %v828_v2  ;;  %v832_v27 = vsel %vm6573_vm3, %v620_v7, %v831_v3 }
  0x90   : > { %v2220_v61 = vrot.slane %v2219_v44, 4  ;;  %v1423_v51 = vsel %vm6644_vm12, %v5824_v46, %v1422_v59  ;;  %v1089_v28 = vshrl.u32 %v883_v39, 16  ;;  %328 = vst [vmem:[#allocation2 + $0x90] sm:$0x1] %v327_v5  ;;  %v1092_v33 = vshll.u32 %v883_v39, 16 }
  0x91   : > { %v1426_v24 = vsel %vm6644_vm12, %v1424_v1, %v1425_v53  ;;  %v2858_v11 = vunpack.c.l.b16 %v1423_v51  ;;  %3410 = vrot.lane.b32.xlu1 %v3391_v6, %s6471_s23  ;;  %v2235_v29 = vsel %vm6667_vm14, %v2230_v16, %v2234_v34  ;;  %833 = vst [vmem:[#allocation2 + $0x8c] sm:$0x1] %v832_v27  ;;  %v1098_v37 = vshll.u32 %v884_v56, 16 }
  0x92   : > { %v2225_v8 = vsel %vm6667_vm14, %v2220_v61, %v2224_v22  ;;  %v2859_v32 = vunpack.c.l.b16 %v1426_v24  ;;  %v3283_v36 = vunpack.c.l.b16 %v2235_v29  ;;  %v1091_v7 = vrot.slane %v1089_v28, 4  ;;  %316 = vst [vmem:[#allocation2 + $0x60] sm:$0x1] %v315_v13  ;;  %v370_v28 = vld [vmem:[#allocation2 + $0x68] sm:$0x1] }
  0x93   : > { %v3282_v35 = vunpack.c.l.b16 %v2225_v8  ;;  %v1094_v47 = vrot.slane %v1092_v33, 5  ;;  %v1102_v5 = vshrl.u32 %v884_v56, 16  ;;  %v1108_v40 = vshll.u32 %v908_v41, 16  ;;  %v382_v8 = vld [vmem:[#allocation2 + $0x98] sm:$0x1] }
  0x94   : > { %v627_v38 = vor.u32 %v625_v58, %v6962_v12  ;;  %v2883_v22 = vpack.c.b16 %v2859_v32, %v2858_v11  ;;  %v7006_v45 = vld [vmem:[#allocation2 + $0x88] sm:$0xf]  ;;  %v1100_v9 = vrot.slane %v1098_v37, 5  ;;  %v628_v48 = vrot.slane %v6962_v12, 4 }
  0x95   : > { %v3311_v42 = vpack.c.b16 %v3283_v36, %v3282_v35  ;;  %v1194_v17 = vshll.u32 %v7006_v45, 16  ;;  %v1198_v54 = vshrl.u32 %v7006_v45, 16  ;;  %v1095_v50 = vor.u32 %v1094_v47, %v1091_v7  ;;  %v329_v47 = vld [vmem:[#allocation2 + $0x9c] sm:$0x1] }
  0x96   : > { %v1104_v13 = vrot.slane %v1102_v5, 4  ;;  %v891_v55 = vld [vmem:[#allocation2 + $0x84] sm:$0xf]  ;;  %v1110_v56 = vrot.slane %v1108_v40, 5  ;;  %v636_v10 = vsel %vm6602_vm6, %v628_v48, %v635_v49  ;;  %v556_v58 = vrot.slane %v554_v15, 7 }
  0x97   : > { %3330 = vrot.lane.b32.xlu0 %v3311_v42, %s6473_s8  ;;  %v7018_v57 = vrot.slane %v562_v21, 7  ;;  %v1185_v12 = vshrl.u32 %v891_v55, 16  ;;  %v1188_v18 = vshll.u32 %v891_v55, 16  ;;  %v1196_v34 = vrot.slane %v1194_v17, 5  ;;  %v834_v26 = vld [vmem:[#allocation2 + $0x90] sm:$0xf] }
  0x98   : > { %v1200_v41 = vrot.slane %v1198_v54, 4  ;;  %v912_v59 = vld [vmem:[#allocation2 + $0x8c] sm:$0x1]  ;;  %v1096_v60 = vrot.slane %v1095_v50, 4  ;;  %v1105_v44 = vor.u32 %v1104_v13, %v1100_v9  ;;  %v835_v62 = vsel %vm6612_vm7, %v627_v38, %v834_v26  ;;  %837 = vst.msk [vmem:[#allocation2 + $0x94] sm:$0xf] %vm278_vm2, %v636_v10 }
  0x99   : > { %v559_v15 = vor.u32 %v557_v20, %v556_v58  ;;  %2906 = vrot.lane.b32.xlu1 %v2883_v22, %s6468_s20  ;;  %v1187_v21 = vrot.slane %v1185_v12, 4  ;;  %v1190_v46 = vrot.slane %v1188_v18, 5  ;;  %v1204_v1 = vshll.u32 %v912_v59, 16  ;;  %836 = vst [vmem:[#allocation2 + $0x90] sm:$0xf] %v835_v62 }
  0x9a   : > { %v1201_v63 = vor.u32 %v1200_v41, %v1196_v34  ;;  %v1101_v53 = vsel %vm6667_vm14, %v1096_v60, %v1100_v9  ;;  %v1106_v2 = vrot.slane %v1105_v44, 4  ;;  %v560_v3 = vrot.slane %v556_v58, 4  ;;  %v806_v49 = vld [vmem:[#allocation2 + $0x60] sm:$0xf]  ;;  %v1315_v20 = vld [vmem:[#allocation2 + $0x84] sm:$0xe]  ;;  %v7065_v44 = vpop.permute.xlu2 %3244 }
  0x9b   : > { %v565_v39 = vshll.u32 %v6948_v30, 16  ;;  %v1191_v6 = vor.u32 %v1190_v46, %v1187_v21  ;;  %v1206_v16 = vrot.slane %v1204_v1, 5  ;;  %v2778_v43 = vunpack.c.l.b16 %v1101_v53  ;;  %v7050_v9 = vld [vmem:[%s6585_s17 + $0x60] sm:$0xf] }
  0x9c   : > { %v1202_v61 = vrot.slane %v1201_v63, 4  ;;  %v1111_v51 = vsel %vm6667_vm14, %v1106_v2, %v1110_v56  ;;  %v569_v11 = vrot.slane %v7018_v57, 4  ;;  %v807_v27 = vsel %vm6612_vm7, %v559_v15, %v806_v49 }
  0x9d   : > { %v567_v24 = vor.u32 %v565_v39, %v7018_v57  ;;  %v1192_v29 = vrot.slane %v1191_v6, 4  ;;  %v2779_v32 = vunpack.c.l.b16 %v1111_v51  ;;  %808 = vst [vmem:[#allocation2 + $0x60] sm:$0xf] %v807_v27  ;;  %v5828_v33 = vrot.slane %v1315_v20, 9 }
  0x9e   : > { %v1207_v30 = vsel %vm6667_vm14, %v1202_v61, %v1206_v16  ;;  %v1450_v7 = vrot.slane %v7006_v45, 5  ;;  %v1453_v37 = vrot.slane %v912_v59, 5  ;;  %v371_v38 = vsel %vm6618_vm8, 0, %v370_v28  ;;  %v425_v61 = vld [vmem:[%s6585_s17 + $0x64] sm:$0xf] }
  0x9f   : > { %v2787_v35 = vunpack.c.l.b16 %v1207_v30  ;;  %v568_v36 = vsel %vm6602_vm6, %v560_v3, %v567_v24  ;;  %v1197_v5 = vsel %vm6667_vm14, %v1192_v29, %v1196_v34  ;;  %v2803_v40 = vpack.c.b16 %v2779_v32, %v2778_v43  ;;  %v7047_v22 = vld [vmem:[#allocation2 + $0x94] sm:$0xf]  ;;  %372 = vst [vmem:[#allocation2 + $0x68] sm:$0x1] %v371_v38  ;;  %v317_v28 = vld [vmem:[#allocation2 + $0x6c] sm:$0x1] }
  0xa0   : > { %809 = vst.msk [vmem:[#allocation2 + $0x64] sm:$0xf] %vm278_vm2, %v568_v36  ;;  %v383_v42 = vsel %vm6618_vm8, 0, %v382_v8  ;;  %v2786_v48 = vunpack.c.l.b16 %v1197_v5  ;;  %v6280_v45 = vld [vmem:[#allocation2 + $0x90] sm:$0xff]  ;;  %v1451_v17 = vsel %vm6644_vm12, %v5828_v33, %v1450_v7  ;;  %v1452_v54 = vrot.slane %v1450_v7, 4 }
  0xa1   : > { %v1505_v50 = vld [vmem:[#allocation2 + $0x90] sm:$0xf]  ;;  %2826 = vrot.lane.b32.xlu2 %v2803_v40, %s6469_s21  ;;  %v2866_v13 = vunpack.c.l.b16 %v1451_v17  ;;  %384 = vst [vmem:[#allocation2 + $0x98] sm:$0x1] %v383_v42  ;;  %v1805_v10 = vshll.u32 %v7047_v22, 16  ;;  %3010 = vrot.lane.b32.xlu1 %v6280_v45, %s6466_s18  ;;  %v1809_v18 = vshrl.u32 %v7047_v22, 16 }
  0xa2   : > { %v1796_v55 = vshrl.u32 %v1505_v50, 16  ;;  %v1799_v56 = vshll.u32 %v1505_v50, 16  ;;  %v2807_v58 = vpack.c.b16 %v2787_v35, %v2786_v48  ;;  %v1454_v12 = vsel %vm6644_vm12, %v1452_v54, %v1453_v37  ;;  %v416_v7 = vld [vmem:[%s6585_s17 + $0x40] sm:$0xf]  ;;  %v417_v45 = vld [vmem:[%s6585_s17 + $0x44] sm:$0xf] }
  0xa3   : > { %v330_v34 = vsel %vm6573_vm3, 0, %v329_v47  ;;  %v2867_v41 = vunpack.c.l.b16 %v1454_v12  ;;  %v7062_v60 = vrot.slane %v1805_v10, 5  ;;  %v1811_v15 = vrot.slane %v1809_v18, 4  ;;  %v7082_v37 = vpop.permute.xlu0 %2892  ;;  %v1926_v12 = vld [vmem:[#allocation2 + $0x90] sm:$0xe] }
  0xa4   : > { %v1798_v26 = vrot.slane %v1796_v55, 4  ;;  %v1801_v59 = vrot.slane %v1799_v56, 5  ;;  %331 = vst [vmem:[#allocation2 + $0x9c] sm:$0x1] %v330_v34  ;;  %2834 = vrot.lane.b32.xlu0 %v2807_v58, %s6469_s21  ;;  %v1922_v62 = vld [vmem:[#allocation2 + $0x60] sm:$0xe]  ;;  %v7099_v34 = vpop.permute.xlu2 %3148 }
  0xa5   : > { %v1497_v21 = vld [vmem:[#allocation2 + $0x60] sm:$0xf]  ;;  %v639_v46 = vshrl.u32 %v7050_v9, 16  ;;  %v637_v63 = vrot.slane %v6969_v31, 4  ;;  %v2887_v1 = vpack.c.b16 %v2867_v41, %v2866_v13  ;;  %v5840_v39 = vrot.slane %v1922_v62, 9 }
  0xa6   : > { %v1802_v53 = vor.u32 %v1801_v59, %v1798_v26  ;;  %v1700_v2 = vshrl.u32 %v1497_v21, 16  ;;  %v1812_v49 = vor.u32 %v1811_v15, %v7062_v60  ;;  %v1703_v6 = vshll.u32 %v1497_v21, 16  ;;  %v810_v43 = vld [vmem:[#allocation2 + $0x68] sm:$0x1] }
  0xa7   : > { %v1498_v3 = vld [vmem:[#allocation2 + $0x64] sm:$0xf]  ;;  %v641_v16 = vrot.slane %v639_v46, 7  ;;  %v642_v27 = vshll.u32 %v7050_v9, 16  ;;  %v811_v31 = vsel %vm6573_vm3, %v569_v11, %v810_v43  ;;  %v647_v48 = vshrl.u32 %v425_v61, 16 }
  0xa8   : > { %v2030_v20 = vrot.slane %v1498_v3, 5  ;;  %v1702_v51 = vrot.slane %v1700_v2, 4  ;;  %v1709_v24 = vshll.u32 %v1498_v3, 16  ;;  %v6276_v8 = vld [vmem:[#allocation2 + $0x60] sm:$0xff]  ;;  %v838_v29 = vld [vmem:[#allocation2 + $0x98] sm:$0x1] }
  0xa9   : > { %v1705_v30 = vrot.slane %v1703_v6, 5  ;;  %v1713_v32 = vshrl.u32 %v1498_v3, 16  ;;  %2914 = vrot.lane.b32.xlu2 %v2887_v1, %s6468_s20  ;;  %812 = vst [vmem:[#allocation2 + $0x68] sm:$0x1] %v811_v31  ;;  %v839_v33 = vsel %vm6573_vm3, %v637_v63, %v838_v29  ;;  %v1803_v35 = vrot.slane %v1802_v53, 4  ;;  %v7105_v63 = vpop.permute.xlu1 %2988 }
  0xaa   : > { %v7079_v36 = vrot.slane %v1812_v49, 4  ;;  %v7086_v57 = vsel %vm6644_vm12, %v5840_v39, %v2030_v20  ;;  %v2032_v11 = vrot.slane %v2030_v20, 4  ;;  %840 = vst [vmem:[#allocation2 + $0x98] sm:$0x1] %v839_v33  ;;  %v1711_v5 = vrot.slane %v1709_v24, 5 }
  0xab   : > { %v1706_v47 = vor.u32 %v1705_v30, %v1702_v51  ;;  %v841_v40 = vld [vmem:[#allocation2 + $0x9c] sm:$0xf]  ;;  %v1715_v38 = vrot.slane %v1713_v32, 4  ;;  %v644_v42 = vor.u32 %v642_v27, %v641_v16  ;;  %v645_v9 = vrot.slane %v641_v16, 4  ;;  %v385_v29 = vld [vmem:[#allocation2 + $0xa4] sm:$0x1]  ;;  %v2813_v30 = vpop.permute.xlu0 %2812 }
  0xac   : > { %3002 = vrot.lane.b32.xlu0 %v6276_v8, %s6466_s18  ;;  %v650_v54 = vshll.u32 %v425_v61, 16  ;;  %v318_v50 = vsel %vm6573_vm3, 0, %v317_v28  ;;  %v571_v13 = vshrl.u32 %v416_v7, 16  ;;  %v7092_v56 = vrot.slane %v647_v48, 7 }
  0xad   : > { %v1707_v17 = vrot.slane %v1706_v47, 4  ;;  %v1716_v55 = vor.u32 %v1715_v38, %v1711_v5  ;;  %v842_v10 = vsel %vm6612_vm7, %v644_v42, %v841_v40  ;;  %319 = vst [vmem:[#allocation2 + $0x6c] sm:$0x1] %v318_v50  ;;  %v574_v58 = vshll.u32 %v416_v7, 16  ;;  %v6253_v42 = vld [vmem:[#allocation2] sm:$0xff] }
  0xae   : > { %v1808_v18 = vsel %vm6667_vm14, %v1803_v35, %v7062_v60  ;;  %843 = vst [vmem:[#allocation2 + $0x9c] sm:$0xf] %v842_v10  ;;  %v573_v41 = vrot.slane %v571_v13, 7  ;;  %v579_v26 = vshrl.u32 %v417_v45, 16  ;;  %v582_v59 = vshll.u32 %v417_v45, 16 }
  0xaf   : > { %v3114_v62 = vunpack.c.l.b16 %v7086_v57  ;;  %v1712_v15 = vsel %vm6667_vm14, %v1707_v17, %v1711_v5  ;;  %v1717_v21 = vrot.slane %v1716_v55, 4  ;;  %v652_v46 = vor.u32 %v650_v54, %v7092_v56  ;;  %v373_v57 = vld [vmem:[#allocation2 + $0x74] sm:$0x1]  ;;  %v6254_v17 = vld [vmem:[#allocation2 + $0xc] sm:$0xff] }
  0xb0   : > { %v1522_v1 = vld [vmem:[#allocation2 + $0x68] sm:$0x1]  ;;  %v576_v53 = vor.u32 %v574_v58, %v573_v41  ;;  %v577_v2 = vrot.slane %v573_v41, 4  ;;  %v7107_v60 = vrot.slane %v579_v26, 7  ;;  %v5844_v3 = vrot.slane %v1926_v12, 9  ;;  %v2815_v41 = vpop.permute.xlu2 %2814 }
  0xb1   : > { %v2033_v39 = vrot.slane %v1522_v1, 5  ;;  %v1526_v49 = vld [vmem:[#allocation2 + $0x98] sm:$0x1]  ;;  %v1719_v6 = vshll.u32 %v1522_v1, 16  ;;  %v653_v61 = vsel %vm6602_vm6, %v645_v9, %v652_v46  ;;  %v2058_v16 = vrot.slane %v7047_v22, 5  ;;  %v7141_v46 = vpop.permute.xlu1 %2990 }
  0xb2   : > { %v1815_v43 = vshll.u32 %v1526_v49, 16  ;;  %v3042_v20 = vunpack.c.l.b16 %v1808_v18  ;;  %844 = vst.msk [vmem:[#allocation2 + $0xa0] sm:$0xf] %vm278_vm2, %v653_v61  ;;  %v584_v51 = vor.u32 %v582_v59, %v7107_v60  ;;  %v2061_v24 = vrot.slane %v1526_v49, 5  ;;  %v877_v10 = vld [vmem:[#allocation2 + $0x30] sm:$0xf] }
  0xb3   : > { %v2034_v27 = vsel %vm6644_vm12, %v2032_v11, %v2033_v39  ;;  %v1721_v28 = vrot.slane %v1719_v6, 5  ;;  %v2059_v8 = vsel %vm6644_vm12, %v5844_v3, %v2058_v16  ;;  %v2060_v31 = vrot.slane %v2058_v16, 4  ;;  %v7132_v58 = vld [vmem:[#allocation2 + $0x34] sm:$0xf] }
  0xb4   : > { %v3115_v32 = vunpack.c.l.b16 %v2034_v27  ;;  %v1817_v33 = vrot.slane %v1815_v43, 5  ;;  %v3034_v22 = vunpack.c.l.b16 %v1712_v15  ;;  %v585_v35 = vsel %vm6602_vm6, %v577_v2, %v584_v51  ;;  %v813_v7 = vld [vmem:[#allocation2 + $0x6c] sm:$0xf] }
  0xb5   : > { %v1722_v47 = vsel %vm6667_vm14, %v1717_v21, %v1721_v28  ;;  %v814_v11 = vsel %vm6612_vm7, %v576_v53, %v813_v7  ;;  %816 = vst.msk [vmem:[#allocation2 + $0x70] sm:$0xf] %vm278_vm2, %v585_v35  ;;  %v2062_v5 = vsel %vm6644_vm12, %v2060_v31, %v2061_v24  ;;  %v3122_v40 = vunpack.c.l.b16 %v2059_v8  ;;  %v2114_v38 = vld [vmem:[#allocation2 + $0x9c] sm:$0xf]  ;;  %v7158_v31 = vld [vmem:[#allocation2 + $0x38] sm:$0x1] }
  0xb6   : > { %v3139_v9 = vpack.c.b16 %v3115_v32, %v3114_v62  ;;  %v1818_v48 = vsel %vm6667_vm14, %v7079_v36, %v1817_v33  ;;  %v3035_v45 = vunpack.c.l.b16 %v1722_v47  ;;  %815 = vst [vmem:[#allocation2 + $0x6c] sm:$0xf] %v814_v11  ;;  %v3123_v50 = vunpack.c.l.b16 %v2062_v5  ;;  %v2535_v7 = vld [vmem:[#allocation2 + $0x9c] sm:$0xe] }
  0xb7   : > { %v3043_v54 = vunpack.c.l.b16 %v1818_v48  ;;  %v386_v13 = vsel %vm6618_vm8, 0, %v385_v29  ;;  %v2405_v55 = vshrl.u32 %v2114_v38, 16  ;;  %v654_v18 = vrot.slane %v7092_v56, 4 }
  0xb8   : > { %3162 = vrot.lane.b32.xlu1 %v3139_v9, %s6470_s22  ;;  %v3059_v12 = vpack.c.b16 %v3035_v45, %v3034_v22  ;;  %387 = vst [vmem:[#allocation2 + $0xa4] sm:$0x1] %v386_v13  ;;  %v2408_v36 = vshll.u32 %v2114_v38, 16  ;;  %v374_v26 = vsel %vm6618_vm8, 0, %v373_v57  ;;  %v586_v62 = vrot.slane %v7107_v60, 4 }
  0xb9   : > { %v3063_v59 = vpack.c.b16 %v3043_v54, %v3042_v20  ;;  %v7139_v15 = vld [vmem:[#allocation2 + $0xa0] sm:$0xf]  ;;  %v2407_v21 = vrot.slane %v2405_v55, 4  ;;  %375 = vst [vmem:[#allocation2 + $0x74] sm:$0x1] %v374_v26  ;;  %v3439_v1 = vsel %vm8808_vm15, %v6253_v42, %v2813_v30  ;;  %v3143_v3 = vpack.c.b16 %v3123_v50, %v3122_v40  ;;  %v2895_v30 = vpop.permute.xlu0 %2894 }
  0xba   : > { %3082 = vrot.lane.b32.xlu2 %v3059_v12, %s6472_s29  ;;  %v2410_v56 = vrot.slane %v2408_v36, 5  ;;  %v2414_v53 = vshll.u32 %v7139_v15, 16  ;;  %v2418_v2 = vshrl.u32 %v7139_v15, 16  ;;  %v3442_v60 = vsel %vm8808_vm15, %v6254_v17, %v2815_v41  ;;  %v6296_v6 = vld [vmem:[#allocation2 + $0x9c] sm:$0xff]  ;;  %v7176_v41 = vpop.permute.xlu2 %3070 }
  0xbb   : > { %3090 = vrot.lane.b32.xlu0 %v3063_v59, %s6472_s29  ;;  %v1017_v39 = vshrl.u32 %v877_v10, 16  ;;  %v1020_v49 = vshll.u32 %v877_v10, 16  ;;  %v1026_v51 = vshll.u32 %v7132_v58, 16  ;;  %v7156_v8 = vsel %vm3485_vm0, %v3439_v1, %v7082_v37  ;;  %v7180_v1 = vpop.permute.xlu1 %3246 }
  0xbc   : > { %v2411_v61 = vor.u32 %v2410_v56, %v2407_v21  ;;  %v2416_v16 = vrot.slane %v2414_v53, 5  ;;  %v2420_v43 = vrot.slane %v2418_v2, 4  ;;  %v7149_v20 = vld [vmem:[#allocation2 + $0x70] sm:$0xf]  ;;  %v1030_v29 = vshrl.u32 %v7132_v58, 16 }
  0xbd   : > { %v2106_v24 = vld [vmem:[#allocation2 + $0x6c] sm:$0xf]  ;;  %v2318_v27 = vshll.u32 %v7149_v20, 16  ;;  %v2322_v28 = vshrl.u32 %v7149_v20, 16  ;;  %v1019_v35 = vrot.slane %v1017_v39, 4  ;;  %v1022_v38 = vrot.slane %v1020_v49, 5 }
  0xbe   : > { %v2412_v32 = vrot.slane %v2411_v61, 4  ;;  %v2309_v33 = vshrl.u32 %v2106_v24, 16  ;;  %v2312_v22 = vshll.u32 %v2106_v24, 16  ;;  %v6292_v57 = vld [vmem:[#allocation2 + $0x6c] sm:$0xff]  ;;  %v2421_v11 = vor.u32 %v2420_v43, %v2416_v16 }
  0xbf   : > { %v845_v47 = vld [vmem:[#allocation2 + $0xa4] sm:$0x1]  ;;  %v7161_v5 = vrot.slane %v2318_v27, 5  ;;  %v2324_v40 = vrot.slane %v2322_v28, 4  ;;  %v1028_v48 = vrot.slane %v1026_v51, 5  ;;  %v7167_v17 = vsel %vm3485_vm0, %v3442_v60, %v2895_v30 }
  0xc0   : > { %3266 = vrot.lane.b32.xlu1 %v6296_v6, %s6467_s19  ;;  %v846_v37 = vsel %vm6573_vm3, %v654_v18, %v845_v47  ;;  %v817_v42 = vld [vmem:[#allocation2 + $0x74] sm:$0x1]  ;;  %v2311_v9 = vrot.slane %v2309_v33, 4  ;;  %v2531_v45 = vld [vmem:[#allocation2 + $0x6c] sm:$0xe]  ;;  %v2417_v54 = vsel %vm6667_vm14, %v2412_v32, %v2416_v16  ;;  %v2314_v13 = vrot.slane %v2312_v22, 5 }
  0xc1   : > { %847 = vst [vmem:[#allocation2 + $0xa4] sm:$0x1] %v846_v37  ;;  %v818_v50 = vsel %vm6573_vm3, %v586_v62, %v817_v42  ;;  %v2325_v55 = vor.u32 %v2324_v40, %v7161_v5  ;;  %v1023_v10 = vor.u32 %v1022_v38, %v1019_v35  ;;  %v1032_v12 = vrot.slane %v1030_v29, 4  ;;  %v1308_v61 = vld [vmem:[#allocation2 + $0x30] sm:$0xe] }
  0xc2   : > { %3170 = vrot.lane.b32.xlu2 %v3143_v3, %s6470_s22  ;;  %819 = vst [vmem:[#allocation2 + $0x74] sm:$0x1] %v818_v50  ;;  %v1036_v18 = vshll.u32 %v7158_v31, 16  ;;  %v5860_v36 = vrot.slane %v2535_v7, 9  ;;  %v2422_v26 = vrot.slane %v2421_v11, 4  ;;  %v2315_v59 = vor.u32 %v2314_v13, %v2311_v9 }
  0xc3   : > { %3258 = vrot.lane.b32.xlu0 %v6292_v57, %s6467_s19  ;;  %v2667_v21 = vrot.slane %v7139_v15, 5  ;;  %v5856_v62 = vrot.slane %v2531_v45, 9  ;;  %v1024_v56 = vrot.slane %v1023_v10, 4  ;;  %v1033_v53 = vor.u32 %v1032_v12, %v1028_v48  ;;  %v1919_v28 = vld [vmem:[#allocation2 + $0x3c] sm:$0xe] }
  0xc4   : > { %v1038_v2 = vrot.slane %v1036_v18, 5  ;;  %v2639_v3 = vrot.slane %v7149_v20, 5  ;;  %v7183_v60 = vunpack.c.l.b16 %v2417_v54  ;;  %v2316_v39 = vrot.slane %v2315_v59, 4  ;;  %v1492_v10 = vld [vmem:[#allocation2 + $0x40] sm:$0xf] }
  0xc5   : > { %v2326_v49 = vrot.slane %v2325_v55, 4  ;;  %v7187_v6 = vsel %vm6644_vm12, %v5860_v36, %v2667_v21  ;;  %v1029_v15 = vsel %vm6667_vm14, %v1024_v56, %v1028_v48  ;;  %v1034_v16 = vrot.slane %v1033_v53, 4  ;;  %v1519_v36 = vld [vmem:[#allocation2 + $0x44] sm:$0x1] }
  0xc6   : > { %v2669_v43 = vrot.slane %v2667_v21, 4  ;;  %v7193_v51 = vsel %vm6644_vm12, %v5856_v62, %v2639_v3  ;;  %v2321_v20 = vsel %vm6667_vm14, %v2316_v39, %v7161_v5  ;;  %v2772_v24 = vunpack.c.l.b16 %v1029_v15  ;;  %v7218_v21 = vpop.permute.xlu1 %3404  ;;  %v3151_v62 = vpop.permute.xlu0 %3150 }
  0xc7   : > { %v3378_v27 = vunpack.c.l.b16 %v7187_v6  ;;  %vm3518_vm5 = vcmask 97280   ;;  %v1039_v30 = vsel %vm6667_vm14, %v1034_v16, %v1038_v2  ;;  %v2641_v32 = vrot.slane %v2639_v3, 4  ;;  %v1491_v3 = vld [vmem:[#allocation2 + $0x3c] sm:$0xf] }
  0xc8   : > { %v2135_v29 = vld [vmem:[#allocation2 + $0xa4] sm:$0x1]  ;;  %v3370_v33 = vunpack.c.l.b16 %v7193_v51  ;;  %v5821_v22 = vrot.slane %v1308_v61, 9  ;;  %v2773_v57 = vunpack.c.l.b16 %v1039_v30  ;;  %v1401_v11 = vrot.slane %v7132_v58, 5  ;;  %v7210_v58 = vpop.permute.xlu2 %3326 }
  0xc9   : > { %v2424_v35 = vshll.u32 %v2135_v29, 16  ;;  %v2131_v7 = vld [vmem:[#allocation2 + $0x74] sm:$0x1]  ;;  %v2670_v47 = vrot.slane %v2135_v29, 5  ;;  %v1404_v38 = vrot.slane %v7158_v31, 5  ;;  %v5837_v37 = vrot.slane %v1919_v28, 9 }
  0xca   : > { %v2328_v5 = vshll.u32 %v2131_v7, 16  ;;  %v2642_v40 = vrot.slane %v2131_v7, 5  ;;  %v2800_v9 = vpack.c.b16 %v2773_v57, %v2772_v24  ;;  %v1402_v45 = vsel %vm6644_vm12, %v5821_v22, %v1401_v11  ;;  %v3720_v57 = vld [vmem:[%s8799_s1 + $0x10] sm:$0x3] }
  0xcb   : > { %v2426_v42 = vrot.slane %v2424_v35, 5  ;;  %v2671_v48 = vsel %vm6644_vm12, %v2669_v43, %v2670_v47  ;;  %v3290_v50 = vunpack.c.l.b16 %v2321_v20  ;;  %v1403_v55 = vrot.slane %v1401_v11, 4 }
  0xcc   : > { %v2330_v54 = vrot.slane %v2328_v5, 5  ;;  %v2643_v13 = vsel %vm6644_vm12, %v2641_v32, %v2642_v40  ;;  %2820 = vrot.lane.b32.xlu2 %v2800_v9, %s6469_s21  ;;  %v3522_v12 = vsel %vm3518_vm5, %v7167_v17, %v7141_v46  ;;  %v2852_v18 = vunpack.c.l.b16 %v1402_v45  ;;  %v410_v45 = vld [vmem:[%s6585_s17 + $0x28] sm:$0xf] }
  0xcd   : > { %v2427_v31 = vsel %vm6667_vm14, %v2422_v26, %v2426_v42  ;;  %v2009_v59 = vrot.slane %v1492_v10, 5  ;;  %v3379_v2 = vunpack.c.l.b16 %v2671_v48  ;;  %v1405_v26 = vsel %vm6644_vm12, %v1403_v55, %v1404_v38  ;;  %v308_v38 = vld [vmem:[#allocation2 + $0x48] sm:$0x1] }
  0xce   : > { %v3299_v56 = vunpack.c.l.b16 %v2427_v31  ;;  %v2331_v53 = vsel %vm6667_vm14, %v2326_v49, %v2330_v54  ;;  %v3371_v61 = vunpack.c.l.b16 %v2643_v13  ;;  %v2853_v15 = vunpack.c.l.b16 %v1405_v26  ;;  %v3069_v31 = vpop.permute.xlu1 %3068 }
  0xcf   : > { %v3291_v39 = vunpack.c.l.b16 %v2331_v53  ;;  %v2010_v46 = vsel %vm6644_vm12, %v5837_v37, %v2009_v59  ;;  %v2011_v16 = vrot.slane %v2009_v59, 4  ;;  %v2012_v43 = vrot.slane %v1519_v36, 5  ;;  %v364_v37 = vld [vmem:[#allocation2 + $0x50] sm:$0x1]  ;;  %v6273_v59 = vld [vmem:[#allocation2 + $0x3c] sm:$0xff] }
  0xd0   : > { %v3319_v17 = vpack.c.b16 %v3299_v56, %v7183_v60  ;;  %v3108_v51 = vunpack.c.l.b16 %v2010_v46  ;;  %v2880_v24 = vpack.c.b16 %v2853_v15, %v2852_v18  ;;  %v1628_v28 = vshrl.u32 %v1491_v3, 16  ;;  %v3325_v18 = vpop.permute.xlu0 %3324 }
  0xd1   : > { %v3315_v20 = vpack.c.b16 %v3291_v39, %v3290_v50  ;;  %v1631_v49 = vshll.u32 %v1491_v3, 16  ;;  %v2013_v29 = vsel %vm6644_vm12, %v2011_v16, %v2012_v43  ;;  %v1637_v30 = vshll.u32 %v1492_v10, 16  ;;  %v411_v50 = vld [vmem:[%s6585_s17 + $0x2c] sm:$0xf]  ;;  %v1312_v39 = vld [vmem:[#allocation2 + $0x60] sm:$0xe] }
  0xd2   : > { %3346 = vrot.lane.b32.xlu1 %v3319_v17, %s6473_s8  ;;  %v1641_v32 = vshrl.u32 %v1492_v10, 16  ;;  %v1647_v22 = vshll.u32 %v1519_v36, 16  ;;  %v3109_v35 = vunpack.c.l.b16 %v2013_v29  ;;  %v1630_v60 = vrot.slane %v1628_v28, 4  ;;  %v7268_v28 = vld [vmem:[#allocation2 + $0x68] sm:$0x1] }
  0xd3   : > { %3338 = vrot.lane.b32.xlu0 %v3315_v20, %s6473_s8  ;;  %v1633_v7 = vrot.slane %v1631_v49, 5  ;;  %vm8810_vm9 = vcmask 130048   ;;  %v3399_v47 = vpack.c.b16 %v3379_v2, %v3378_v27  ;;  %v3395_v11 = vpack.c.b16 %v3371_v61, %v3370_v33  ;;  %v7242_v33 = vpop.permute.xlu2 %2896 }
  0xd4   : > { %v1639_v5 = vrot.slane %v1637_v30, 5  ;;  %v1643_v40 = vrot.slane %v1641_v32, 4  ;;  %2900 = vrot.lane.b32.xlu2 %v2880_v24, %s6468_s20  ;;  %v7237_v42 = vpack.c.b16 %v3109_v35, %v3108_v51  ;;  %v1649_v48 = vrot.slane %v1647_v22, 5  ;;  %v6302_v51 = vld [vmem:[%s8799_s1 + $0x8] sm:$0xff]  ;;  %v7266_v24 = vld [vmem:[#allocation2 + $0x64] sm:$0xf] }
  0xd5   : > { %v1634_v9 = vor.u32 %v1633_v7, %v1630_v60  ;;  %vm8809_vm10 = vcmask 162816   ;;  %vm3617_vm11 = vcmask 195584   ;;  %v3555_v6 = vsel %vm8810_vm9, %v3522_v12, %v7176_v41  ;;  %v893_v30 = vld [vmem:[#allocation2 + $0x90] sm:$0xf]  ;;  %v7275_v60 = vld [vmem:[#allocation2 + $0x94] sm:$0xf] }
  0xd6   : > { %v1644_v54 = vor.u32 %v1643_v40, %v1639_v5  ;;  %v3734_v27 = vunpack.c.l.b16 %v3720_v57  ;;  %vm3773_vm13 = vcmask 1041408   ;;  %v309_v55 = vsel %vm6573_vm3, 0, %v308_v38 }
  0xd7   : > { %v1635_v13 = vrot.slane %v1634_v9, 4  ;;  %v365_v10 = vsel %vm6618_vm8, 0, %v364_v37  ;;  %310 = vst [vmem:[#allocation2 + $0x48] sm:$0x1] %v309_v55  ;;  %v520_v53 = vshrl.u32 %v410_v45, 16  ;;  %v523_v41 = vshll.u32 %v410_v45, 16 }
  0xd8   : > { %v1645_v36 = vrot.slane %v1644_v54, 4  ;;  %v3737_v56 = vpack.c.b16 %v3734_v27, %v3734_v27  ;;  %v7252_v2 = vsel %vm8809_vm10, %v3555_v6, %v3151_v62  ;;  %366 = vst [vmem:[#allocation2 + $0x50] sm:$0x1] %v365_v10  ;;  %v528_v26 = vshrl.u32 %v411_v50, 16  ;;  %v7287_v37 = vld [vmem:[#allocation2 + $0x98] sm:$0x1] }
  0xd9   : > { %v1640_v12 = vsel %vm6667_vm14, %v1635_v13, %v1639_v5  ;;  %v531_v3 = vshll.u32 %v411_v50, 16  ;;  %v522_v46 = vrot.slane %v520_v53, 7  ;;  %v3520_v17 = vsel %vm3518_vm5, %v7156_v8, %v7105_v63 }
  0xda   : > { %3426 = vrot.lane.b32.xlu1 %v3399_v47, %s6471_s23  ;;  %v1650_v61 = vsel %vm6667_vm14, %v1645_v36, %v1649_v48  ;;  %v3775_v15 = vsel %vm3773_vm13, %v3737_v56, 0  ;;  %v3028_v62 = vunpack.c.l.b16 %v1640_v12  ;;  %v530_v43 = vrot.slane %v528_v26, 7  ;;  %v885_v47 = vld [vmem:[#allocation2 + $0x60] sm:$0xf]  ;;  %v7299_v36 = vpop.permute.xlu0 %3406 }
  0xdb   : > { %3418 = vrot.lane.b32.xlu0 %v3395_v11, %s6471_s23  ;;  %v3029_v16 = vunpack.c.l.b16 %v1650_v61  ;;  %3782 = vmatpush.bf16.msra.mxu0 %v3775_v15  ;;  %v3553_v20 = vsel %vm8810_vm9, %v3520_v17, %v3069_v31  ;;  %v525_v49 = vor.u32 %v523_v41, %v522_v46  ;;  %v526_v29 = vrot.slane %v522_v46, 4  ;;  %v7292_v54 = vpop.permute.xlu2 %3152  ;;  %v6255_v31 = vld [vmem:[#allocation2 + $0x18] sm:$0xff] }
  0xdc   : > { %v3586_v63 = vsel %vm8809_vm10, %v3553_v20, %v7099_v34  ;;  %v5825_v8 = vrot.slane %v1312_v39, 9  ;;  %6336 = vmatpush.bf16.msra.mxu3 %v3775_v15  ;;  %6335 = vmatpush.bf16.msra.mxu2 %v3775_v15  ;;  %v533_v32 = vor.u32 %v531_v3, %v530_v43  ;;  %v535_v22 = vrot.slane %v530_v43, 4 }
  0xdd   : > { %2996 = vrot.lane.b32.xlu2 %v6273_v59, %s6466_s18  ;;  %v3619_v35 = vsel %vm3617_vm11, %v3586_v63, %v7065_v44  ;;  %vm3650_vm13 = vcmask 228352   ;;  %v1429_v57 = vrot.slane %v7266_v24, 5  ;;  %v1432_v34 = vrot.slane %v7268_v28, 5  ;;  %v6301_v44 = vld [vmem:[%s8799_s1] sm:$0xff] }
  0xde   : > { %v3652_v7 = vsel %vm3650_vm13, %v3619_v35, %v3325_v18  ;;  %vm3683_vm1 = vcmask 261120   ;;  %v3056_v11 = vpack.c.b16 %v3029_v16, %v3028_v62  ;;  %v534_v5 = vsel %vm6602_vm6, %v526_v29, %v533_v32  ;;  %v792_v40 = vld [vmem:[#allocation2 + $0x48] sm:$0xf]  ;;  %v2817_v18 = vpop.permute.xlu1 %2816 }
  0xdf   : > { %3783 = vmatpush.bf16.msra.mxu0 %v6302_v51  ;;  %v3685_v38 = vsel %vm3683_vm1, %v3652_v7, %v7218_v21  ;;  %v1209_v9 = vshrl.u32 %v893_v30, 16  ;;  %v793_v48 = vsel %vm6612_vm7, %v525_v49, %v792_v40  ;;  %795 = vst.msk [vmem:[#allocation2 + $0x4c] sm:$0xf] %vm278_vm2, %v534_v5  ;;  %v796_v45 = vld [vmem:[#allocation2 + $0x50] sm:$0x1]  ;;  %v1430_v6 = vsel %vm6644_vm12, %v5825_v8, %v1429_v57 }
  0xe0   : > { %v1431_v27 = vrot.slane %v1429_v57, 4  ;;  %v1212_v50 = vshll.u32 %v893_v30, 16  ;;  %6338 = vmatpush.bf16.msra.mxu3 %v6302_v51  ;;  %6337 = vmatpush.bf16.msra.mxu2 %v6302_v51  ;;  %794 = vst [vmem:[#allocation2 + $0x48] sm:$0xf] %v793_v48  ;;  %v797_v21 = vsel %vm6573_vm3, %v535_v22, %v796_v45  ;;  %v2860_v13 = vunpack.c.l.b16 %v1430_v6 }
  0xe1   : > { %v1211_v55 = vrot.slane %v1209_v9, 4  ;;  %v1218_v10 = vshll.u32 %v7275_v60, 16  ;;  %798 = vst [vmem:[#allocation2 + $0x50] sm:$0x1] %v797_v21  ;;  %v1222_v53 = vshrl.u32 %v7275_v60, 16  ;;  %v1228_v41 = vshll.u32 %v7287_v37, 16 }
  0xe2   : > { %3156 = vrot.lane.b32.xlu1 %v7237_v42, %s6470_s22  ;;  %v1433_v59 = vsel %vm6644_vm12, %v1431_v27, %v1432_v34  ;;  %v1214_v56 = vrot.slane %v1212_v50, 5  ;;  %vm3740_vm4 = vcmask 293888   ;;  %v1113_v3 = vshrl.u32 %v885_v47, 16 }
  0xe3   : > { %3076 = vrot.lane.b32.xlu0 %v3056_v11, %s6472_s29  ;;  %3784 = vmatpush.bf16.msra.mxu0 %v6301_v44  ;;  %v2861_v12 = vunpack.c.l.b16 %v1433_v59  ;;  %v7308_v26 = vrot.slane %v1218_v10, 5  ;;  %v7313_v42 = vsel %vm3617_vm11, %v7252_v2, %v7180_v1  ;;  %v1224_v61 = vrot.slane %v1222_v53, 4  ;;  %v7325_v45 = vpop.permute.xlu2 %3408 }
  0xe4   : > { %v1215_v39 = vor.u32 %v1214_v56, %v1211_v55  ;;  %v1116_v15 = vshll.u32 %v885_v47, 16  ;;  %6340 = vmatpush.bf16.msra.mxu3 %v6301_v44  ;;  %6339 = vmatpush.bf16.msra.mxu2 %v6301_v44  ;;  %v3445_v46 = vsel %vm8808_vm15, %v6255_v31, %v2817_v18  ;;  %v1115_v17 = vrot.slane %v1113_v3, 4  ;;  %v1316_v18 = vld [vmem:[#allocation2 + $0x90] sm:$0xe] }
  0xe5   : > { %v1122_v62 = vshll.u32 %v7266_v24, 16  ;;  %v1126_v16 = vshrl.u32 %v7266_v24, 16  ;;  %v7318_v43 = vpack.c.b16 %v2861_v12, %v2860_v13  ;;  %v1230_v20 = vrot.slane %v1228_v41, 5 }
  0xe6   : > { %6065 = vmatmul.msk.bf16.vlgmr.msra.gmra.mxu0 %vm3740_vm4, %v3685_v38  ;;  %v1216_v51 = vrot.slane %v1215_v39, 4  ;;  %v1118_v1 = vrot.slane %v1116_v15, 5  ;;  %v2101_v2 = vld [vmem:[#allocation2 + $0x4c] sm:$0xf]  ;;  %v1225_v49 = vor.u32 %v1224_v61, %v7308_v26  ;;  %v1132_v8 = vshll.u32 %v7268_v28, 16  ;;  %v7329_v21 = vpop.permute.xlu1 %3072 }
  0xe7   : > { %v1124_v29 = vrot.slane %v1122_v62, 5  ;;  %v1128_v63 = vrot.slane %v1126_v16, 4  ;;  %v2528_v30 = vld [vmem:[#allocation2 + $0x48] sm:$0xe]  ;;  %v2618_v32 = vrot.slane %v2101_v2, 5  ;;  %v2246_v35 = vshll.u32 %v2101_v2, 16 }
  0xe8   : > { %v2100_v22 = vld [vmem:[#allocation2 + $0x48] sm:$0xf]  ;;  %v1119_v7 = vor.u32 %v1118_v1, %v1115_v17  ;;  %v3491_v24 = vsel %vm3485_vm0, %v3445_v46, %v7242_v33  ;;  %v2128_v57 = vld [vmem:[#allocation2 + $0x50] sm:$0x1]  ;;  %v5853_v34 = vrot.slane %v2528_v30, 9  ;;  %v2250_v5 = vshrl.u32 %v2101_v2, 16  ;;  %v2993_v33 = vpop.permute.xlu0 %2992 }
  0xe9   : > { %v2237_v47 = vshrl.u32 %v2100_v22, 16  ;;  %v2240_v11 = vshll.u32 %v2100_v22, 16  ;;  %v2620_v40 = vrot.slane %v2618_v32, 4  ;;  %v2621_v44 = vrot.slane %v2128_v57, 5  ;;  %v6289_v48 = vld [vmem:[#allocation2 + $0x48] sm:$0xff] }
  0xea   : > { %v2248_v38 = vrot.slane %v2246_v35, 5  ;;  %v2256_v9 = vshll.u32 %v2128_v57, 16  ;;  %v2619_v28 = vsel %vm6644_vm12, %v5853_v34, %v2618_v32  ;;  %v2252_v50 = vrot.slane %v2250_v5, 4  ;;  %3252 = vrot.lane.b32.xlu2 %v6289_v48, %s6467_s19  ;;  %v1923_v30 = vld [vmem:[#allocation2 + $0x6c] sm:$0xe] }
  0xeb   : > { %v2239_v6 = vrot.slane %v2237_v47, 4  ;;  %v2242_v27 = vrot.slane %v2240_v11, 5  ;;  %v2622_v13 = vsel %vm6644_vm12, %v2620_v40, %v2621_v44  ;;  %v3364_v55 = vunpack.c.l.b16 %v2619_v28  ;;  %v7356_v35 = vld [vmem:[#allocation2 + $0x74] sm:$0x1]  ;;  %v7361_v40 = vpop.permute.xlu2 %2994  ;;  %v7364_v48 = vld [vmem:[#allocation2 + $0xa0] sm:$0xf] }
  0xec   : > { %v1221_v10 = vsel %vm6667_vm14, %v1216_v51, %v7308_v26  ;;  %v1226_v31 = vrot.slane %v1225_v49, 4  ;;  %v3365_v59 = vunpack.c.l.b16 %v2622_v13  ;;  %v2253_v53 = vor.u32 %v2252_v50, %v2248_v38 }
  0xed   : > { %v2243_v56 = vor.u32 %v2242_v27, %v2239_v6  ;;  %v2258_v41 = vrot.slane %v2256_v9, 5  ;;  %v1120_v3 = vrot.slane %v1119_v7, 4  ;;  %v1129_v39 = vor.u32 %v1128_v63, %v1124_v29  ;;  %v1507_v9 = vld [vmem:[#allocation2 + $0x9c] sm:$0xf]  ;;  %v7372_v27 = vld [vmem:[#allocation2 + $0xa4] sm:$0x1] }
  0xee   : > { %v1231_v12 = vsel %vm6667_vm14, %v1226_v31, %v1230_v20  ;;  %v1134_v61 = vrot.slane %v1132_v8, 5  ;;  %v3392_v15 = vpack.c.b16 %v3365_v59, %v3364_v55  ;;  %v2254_v17 = vrot.slane %v2253_v53, 4  ;;  %v7351_v8 = vld [vmem:[#allocation2 + $0x70] sm:$0xf]  ;;  %v7374_v50 = vpop.permute.xlu1 %3328 }
  0xef   : > { %v2244_v46 = vrot.slane %v2243_v56, 4  ;;  %v5829_v62 = vrot.slane %v1316_v18, 9  ;;  %v7339_v16 = vunpack.c.l.b16 %v1221_v10  ;;  %v1125_v26 = vsel %vm6667_vm14, %v1120_v3, %v1124_v29  ;;  %v1499_v56 = vld [vmem:[#allocation2 + $0x6c] sm:$0xf] }
  0xf0   : > { %v1130_v51 = vrot.slane %v1129_v39, 4  ;;  %v1457_v1 = vrot.slane %v7275_v60, 5  ;;  %3412 = vrot.lane.b32.xlu1 %v3392_v15, %s6471_s23  ;;  %v2259_v2 = vsel %vm6667_vm14, %v2254_v17, %v2258_v41  ;;  %v7349_v49 = vunpack.c.l.b16 %v1231_v12 }
  0xf1   : > { %v2249_v20 = vsel %vm6667_vm14, %v2244_v46, %v2248_v38  ;;  %v2780_v63 = vunpack.c.l.b16 %v1125_v26  ;;  %v3285_v22 = vunpack.c.l.b16 %v2259_v2  ;;  %v3524_v60 = vsel %vm3518_vm5, %v3491_v24, %v2993_v33  ;;  %v7376_v33 = vpop.permute.xlu0 %3248  ;;  %v426_v2 = vld [vmem:[%s6585_s17 + $0x68] sm:$0xf] }
  0xf2   : > { %v3284_v32 = vunpack.c.l.b16 %v2249_v20  ;;  %v1135_v29 = vsel %vm6667_vm14, %v1130_v51, %v1134_v61  ;;  %v1458_v57 = vsel %vm6644_vm12, %v5829_v62, %v1457_v1  ;;  %v1459_v34 = vrot.slane %v1457_v1, 4 }
  0xf3   : > { %v2781_v7 = vunpack.c.l.b16 %v1135_v29  ;;  %v1460_v47 = vrot.slane %v7287_v37, 5  ;;  %v2868_v5 = vunpack.c.l.b16 %v1458_v57  ;;  %v5841_v44 = vrot.slane %v1923_v30, 9  ;;  %v427_v57 = vld [vmem:[%s6585_s17 + $0x6c] sm:$0xf] }
  0xf4   : > { %v3312_v11 = vpack.c.b16 %v3285_v22, %v3284_v32  ;;  %v2037_v38 = vrot.slane %v7351_v8, 5  ;;  %v2040_v6 = vrot.slane %v7356_v35, 5  ;;  %v3654_v37 = vsel %vm3650_vm13, %v7313_v42, %v7210_v58 }
  0xf5   : > { %v2804_v24 = vpack.c.b16 %v2781_v7, %v2780_v63  ;;  %v1461_v28 = vsel %vm6644_vm12, %v1459_v34, %v1460_v47  ;;  %v3687_v31 = vsel %vm3683_vm1, %v3654_v37, %v7299_v36  ;;  %v2808_v18 = vpack.c.b16 %v7349_v49, %v7339_v16  ;;  %v6281_v49 = vld [vmem:[#allocation2 + $0x9c] sm:$0xff] }
  0xf6   : > { %3332 = vrot.lane.b32.xlu0 %v3312_v11, %s6473_s8  ;;  %v2869_v13 = vunpack.c.l.b16 %v1461_v28  ;;  %v2038_v55 = vsel %vm6644_vm12, %v5841_v44, %v2037_v38  ;;  %v2039_v10 = vrot.slane %v2037_v38, 4  ;;  %6066 = vmatmul.msk.bf16.gmra.mxu0 %vm3740_vm4, %v3687_v31  ;;  %v1820_v58 = vshrl.u32 %v1507_v9, 16  ;;  %v7406_v11 = vpop.permute.xlu2 %3250 }
  0xf7   : > { %2828 = vrot.lane.b32.xlu2 %v2804_v24, %s6469_s21  ;;  %v1823_v42 = vshll.u32 %v1507_v9, 16  ;;  %v1829_v59 = vshll.u32 %v7364_v48, 16  ;;  %v3557_v53 = vsel %vm8810_vm9, %v3524_v60, %v7329_v21  ;;  %v1833_v36 = vshrl.u32 %v7364_v48, 16  ;;  %v332_v21 = vld [vmem:[#allocation2 + $0xa8] sm:$0x1]  ;;  %v7411_v24 = vpop.permute.xlu1 %2898 }
  0xf8   : > { %v2041_v41 = vsel %vm6644_vm12, %v2039_v10, %v2040_v6  ;;  %v1839_v12 = vshll.u32 %v7372_v27, 16  ;;  %2908 = vrot.lane.b32.xlu1 %v7318_v43, %s6468_s20  ;;  %v3116_v3 = vunpack.c.l.b16 %v2038_v55  ;;  %v1822_v39 = vrot.slane %v1820_v58, 4  ;;  %v320_v9 = vld [vmem:[#allocation2 + $0x78] sm:$0x1]  ;;  %v418_v10 = vld [vmem:[%s6585_s17 + $0x48] sm:$0xf] }
  0xf9   : > { %v1825_v61 = vrot.slane %v1823_v42, 5  ;;  %v1831_v15 = vrot.slane %v1829_v59, 5  ;;  %v2888_v46 = vpack.c.b16 %v2869_v13, %v2868_v5  ;;  %v3117_v17 = vunpack.c.l.b16 %v2041_v41  ;;  %v2819_v28 = vpop.permute.xlu0 %2818  ;;  %v419_v59 = vld [vmem:[%s6585_s17 + $0x4c] sm:$0xf] }
  0xfa   : > { %v1835_v62 = vrot.slane %v1833_v36, 4  ;;  %v1724_v16 = vshrl.u32 %v1499_v56, 16  ;;  %v1841_v51 = vrot.slane %v1839_v12, 5  ;;  %v3590_v1 = vsel %vm8809_vm10, %v3557_v53, %v7292_v54 }
  0xfb   : > { %v1826_v26 = vor.u32 %v1825_v61, %v1822_v39  ;;  %v1727_v20 = vshll.u32 %v1499_v56, 16  ;;  %v1733_v30 = vshll.u32 %v7351_v8, 16  ;;  %v1737_v32 = vshrl.u32 %v7351_v8, 16  ;;  %v6277_v56 = vld [vmem:[#allocation2 + $0x6c] sm:$0xff] }
  0xfc   : > { %v1836_v63 = vor.u32 %v1835_v62, %v1831_v15  ;;  %v1726_v43 = vrot.slane %v1724_v16, 4  ;;  %v1743_v60 = vshll.u32 %v7356_v35, 16  ;;  %v333_v7 = vsel %vm6573_vm3, 0, %v332_v21 }
  0xfd   : > { %v1827_v22 = vrot.slane %v1826_v26, 4  ;;  %v1729_v29 = vrot.slane %v1727_v20, 5  ;;  %v1735_v34 = vrot.slane %v1733_v30, 5  ;;  %v1739_v47 = vrot.slane %v1737_v32, 4  ;;  %334 = vst [vmem:[#allocation2 + $0xa8] sm:$0x1] %v333_v7 }
  0xfe   : > { %2836 = vrot.lane.b32.xlu0 %v2808_v18, %s6469_s21  ;;  %v1837_v54 = vrot.slane %v1836_v63, 4  ;;  %v656_v5 = vshrl.u32 %v426_v2, 16  ;;  %v3140_v8 = vpack.c.b16 %v3117_v17, %v3116_v3  ;;  %v659_v38 = vshll.u32 %v426_v2, 16  ;;  %v6256_v3 = vld [vmem:[#allocation2 + $0x24] sm:$0xff]  ;;  %v1927_v63 = vld [vmem:[#allocation2 + $0x9c] sm:$0xe] }
  0xff   : > { %2916 = vrot.lane.b32.xlu2 %v2888_v46, %s6468_s20  ;;  %v1832_v35 = vsel %vm6667_vm14, %v1827_v22, %v1831_v15  ;;  %v1730_v44 = vor.u32 %v1729_v29, %v1726_v43  ;;  %v1740_v37 = vor.u32 %v1739_v47, %v1735_v34  ;;  %v1745_v13 = vrot.slane %v1743_v60, 5  ;;  %v388_v29 = vld [vmem:[#allocation2 + $0xb0] sm:$0x1] }
 0x100   : > { %v1842_v6 = vsel %vm6667_vm14, %v1837_v54, %v1841_v51  ;;  %v658_v55 = vrot.slane %v656_v5, 7  ;;  %3012 = vrot.lane.b32.xlu1 %v6281_v49, %s6466_s18  ;;  %v7417_v31 = vunpack.c.l.b16 %v1832_v35  ;;  %v664_v58 = vshrl.u32 %v427_v57, 16  ;;  %v376_v54 = vld [vmem:[#allocation2 + $0x80] sm:$0x1] }
 0x101   : > { %v1731_v18 = vrot.slane %v1730_v44, 4  ;;  %v667_v42 = vshll.u32 %v427_v57, 16  ;;  %v7420_v53 = vunpack.c.l.b16 %v1842_v6  ;;  %v1741_v41 = vrot.slane %v1740_v37, 4  ;;  %v6260_v57 = vld [vmem:[#allocation2 + $0x54] sm:$0xff]  ;;  %v2827_v44 = vpop.permute.xlu2 %2826 }
 0x102   : > { %v661_v36 = vor.u32 %v659_v38, %v658_v55  ;;  %v321_v12 = vsel %vm6573_vm3, 0, %v320_v9  ;;  %v662_v61 = vrot.slane %v658_v55, 4  ;;  %v7426_v15 = vrot.slane %v664_v58, 7  ;;  %v879_v38 = vld [vmem:[#allocation2 + $0x3c] sm:$0xf]  ;;  %v3075_v55 = vpop.permute.xlu0 %3074 }
 0x103   : > { %v1736_v39 = vsel %vm6667_vm14, %v1731_v18, %v1735_v34  ;;  %322 = vst [vmem:[#allocation2 + $0x78] sm:$0x1] %v321_v12  ;;  %v588_v46 = vshrl.u32 %v418_v10, 16  ;;  %v1746_v17 = vsel %vm6667_vm14, %v1741_v41, %v1745_v13  ;;  %v591_v16 = vshll.u32 %v418_v10, 16  ;;  %v3155_v13 = vpop.permute.xlu1 %3154  ;;  %v7453_v10 = vld [vmem:[#allocation2 + $0x40] sm:$0xf] }
 0x104   : > { %v3036_v62 = vunpack.c.l.b16 %v1736_v39  ;;  %v596_v21 = vshrl.u32 %v419_v59, 16  ;;  %v3623_v26 = vsel %vm3617_vm11, %v3590_v1, %v7376_v33  ;;  %v3037_v51 = vunpack.c.l.b16 %v1746_v17  ;;  %v848_v2 = vld [vmem:[#allocation2 + $0xa8] sm:$0xf] }
 0x105   : > { %v669_v20 = vor.u32 %v667_v42, %v7426_v15  ;;  %v590_v49 = vrot.slane %v588_v46, 7  ;;  %v849_v43 = vsel %vm6612_vm7, %v661_v36, %v848_v2  ;;  %v599_v32 = vshll.u32 %v419_v59, 16 }
 0x106   : > { %3004 = vrot.lane.b32.xlu0 %v6277_v56, %s6466_s18  ;;  %v7436_v30 = vrot.slane %v596_v21, 7  ;;  %v3448_v22 = vsel %vm8808_vm15, %v6256_v3, %v2819_v28  ;;  %v3060_v60 = vpack.c.b16 %v3037_v51, %v3036_v62  ;;  %850 = vst [vmem:[#allocation2 + $0xa8] sm:$0xf] %v849_v43  ;;  %v3064_v34 = vpack.c.b16 %v7420_v53, %v7417_v31 }
 0x107   : > { %v670_v33 = vsel %vm6602_vm6, %v662_v61, %v669_v20  ;;  %v593_v1 = vor.u32 %v591_v16, %v590_v49  ;;  %v594_v7 = vrot.slane %v590_v49, 4  ;;  %v671_v47 = vrot.slane %v7426_v15, 4 }
 0x108   : > { %851 = vst.msk [vmem:[#allocation2 + $0xac] sm:$0xf] %vm278_vm2, %v670_v33  ;;  %v601_v5 = vor.u32 %v599_v32, %v7436_v30  ;;  %v5845_v35 = vrot.slane %v1927_v63, 9  ;;  %3164 = vrot.lane.b32.xlu1 %v3140_v8, %s6470_s22  ;;  %3084 = vrot.lane.b32.xlu2 %v3060_v60, %s6472_s29  ;;  %v603_v9 = vrot.slane %v7436_v30, 4  ;;  %v2065_v28 = vrot.slane %v7364_v48, 5 }
 0x109   : > { %v2068_v6 = vrot.slane %v7372_v27, 5  ;;  %v389_v37 = vsel %vm6618_vm8, 0, %v388_v29  ;;  %v3493_v8 = vsel %vm3485_vm0, %v3448_v22, %v7411_v24  ;;  %v3656_v48 = vsel %vm3650_vm13, %v3623_v26, %v7374_v50  ;;  %v7470_v24 = vld [vmem:[#allocation2 + $0x44] sm:$0x1] }
 0x10a   : > { %v602_v31 = vsel %vm6602_vm6, %v594_v7, %v601_v5  ;;  %v820_v18 = vld [vmem:[#allocation2 + $0x78] sm:$0xf]  ;;  %390 = vst [vmem:[#allocation2 + $0xb0] sm:$0x1] %v389_v37  ;;  %v377_v27 = vsel %vm6618_vm8, 0, %v376_v54  ;;  %v2066_v42 = vsel %vm6644_vm12, %v5845_v35, %v2065_v28  ;;  %v2067_v59 = vrot.slane %v2065_v28, 4  ;;  %v7493_v5 = vpop.permute.xlu2 %2914 }
 0x10b   : > { %v821_v58 = vsel %vm6612_vm7, %v593_v1, %v820_v18  ;;  %823 = vst.msk [vmem:[#allocation2 + $0x7c] sm:$0xf] %vm278_vm2, %v602_v31  ;;  %v3689_v56 = vsel %vm3683_vm1, %v3656_v48, %v7325_v45  ;;  %v3124_v53 = vunpack.c.l.b16 %v2066_v42  ;;  %v7473_v50 = vsel %vm8808_vm15, %v6260_v57, %v2827_v44  ;;  %v7496_v31 = vpop.permute.xlu1 %3410  ;;  %v3331_v18 = vpop.permute.xlu0 %3330 }
 0x10c   : > { %822 = vst [vmem:[#allocation2 + $0x78] sm:$0xf] %v821_v58  ;;  %6067 = vmatmul.msk.bf16.gmra.mxu0 %vm3740_vm4, %v3689_v56  ;;  %v1041_v41 = vshrl.u32 %v879_v38, 16  ;;  %v1044_v36 = vshll.u32 %v879_v38, 16  ;;  %v2069_v12 = vsel %vm6644_vm12, %v2067_v59, %v2068_v6  ;;  %v3526_v3 = vsel %vm3518_vm5, %v3493_v8, %v7361_v40 }
 0x10d   : > { %378 = vst [vmem:[#allocation2 + $0x80] sm:$0x1] %v377_v27  ;;  %v1050_v45 = vshll.u32 %v7453_v10, 16  ;;  %v1054_v39 = vshrl.u32 %v7453_v10, 16  ;;  %v3125_v61 = vunpack.c.l.b16 %v2069_v12  ;;  %v2116_v15 = vld [vmem:[#allocation2 + $0xa8] sm:$0xf]  ;;  %v3559_v20 = vsel %vm8810_vm9, %v3526_v3, %v3075_v55 }
 0x10e   : > { %3092 = vrot.lane.b32.xlu0 %v3064_v34, %s6472_s29  ;;  %v1043_v46 = vrot.slane %v1041_v41, 4  ;;  %v1046_v17 = vrot.slane %v1044_v36, 5  ;;  %v1060_v62 = vshll.u32 %v7470_v24, 16  ;;  %v2429_v26 = vshrl.u32 %v2116_v15, 16  ;;  %v2536_v35 = vld [vmem:[#allocation2 + $0xa8] sm:$0xe] }
 0x10f   : > { %v6297_v16 = vld [vmem:[#allocation2 + $0xa8] sm:$0xff]  ;;  %v2432_v51 = vshll.u32 %v2116_v15, 16  ;;  %v1052_v40 = vrot.slane %v1050_v45, 5  ;;  %v3144_v2 = vpack.c.b16 %v3125_v61, %v3124_v53  ;;  %v1056_v60 = vrot.slane %v1054_v39, 4 }
 0x110   : > { %v7484_v21 = vld [vmem:[#allocation2 + $0xac] sm:$0xf]  ;;  %v1047_v43 = vor.u32 %v1046_v17, %v1043_v46  ;;  %3268 = vrot.lane.b32.xlu1 %v6297_v16, %s6467_s19  ;;  %v2431_v22 = vrot.slane %v2429_v26, 4  ;;  %v1062_v33 = vrot.slane %v1060_v62, 5  ;;  %v3592_v37 = vsel %vm8809_vm10, %v3559_v20, %v3155_v13  ;;  %v1309_v62 = vld [vmem:[#allocation2 + $0x3c] sm:$0xe] }
 0x111   : > { %v2438_v49 = vshll.u32 %v7484_v21, 16  ;;  %v2442_v63 = vshrl.u32 %v7484_v21, 16  ;;  %v852_v32 = vld [vmem:[#allocation2 + $0xb0] sm:$0x1]  ;;  %v2434_v29 = vrot.slane %v2432_v51, 5  ;;  %3172 = vrot.lane.b32.xlu2 %v3144_v2, %s6470_s22  ;;  %v1057_v55 = vor.u32 %v1056_v60, %v1052_v40 }
 0x112   : > { %v853_v1 = vsel %vm6573_vm3, %v671_v47, %v852_v32  ;;  %v2109_v54 = vld [vmem:[#allocation2 + $0x7c] sm:$0xf]  ;;  %v1048_v34 = vrot.slane %v1047_v43, 4  ;;  %v3625_v3 = vsel %vm3617_vm11, %v3592_v37, %v7406_v11  ;;  %v5861_v39 = vrot.slane %v2536_v35, 9 }
 0x113   : > { %v2440_v7 = vrot.slane %v2438_v49, 5  ;;  %v2444_v57 = vrot.slane %v2442_v63, 4  ;;  %v6293_v44 = vld [vmem:[#allocation2 + $0x78] sm:$0xff]  ;;  %854 = vst [vmem:[#allocation2 + $0xb0] sm:$0x1] %v853_v1  ;;  %v2435_v38 = vor.u32 %v2434_v29, %v2431_v22  ;;  %v2342_v6 = vshll.u32 %v2109_v54, 16 }
 0x114   : > { %v2108_v28 = vld [vmem:[#allocation2 + $0x78] sm:$0xf]  ;;  %v824_v47 = vld [vmem:[#allocation2 + $0x80] sm:$0x1]  ;;  %v2346_v58 = vshrl.u32 %v2109_v54, 16  ;;  %v1053_v53 = vsel %vm6667_vm14, %v1048_v34, %v1052_v40  ;;  %v1058_v45 = vrot.slane %v1057_v55, 4 }
 0x115   : > { %v2445_v8 = vor.u32 %v2444_v57, %v2440_v7  ;;  %v2333_v48 = vshrl.u32 %v2108_v28, 16  ;;  %v2336_v27 = vshll.u32 %v2108_v28, 16  ;;  %v2436_v42 = vrot.slane %v2435_v38, 4  ;;  %v2532_v13 = vld [vmem:[#allocation2 + $0x78] sm:$0xe]  ;;  %v7525_v28 = vpop.permute.xlu1 %2906 }
 0x116   : > { %v825_v59 = vsel %vm6573_vm3, %v603_v9, %v824_v47  ;;  %v2344_v56 = vrot.slane %v2342_v6, 5  ;;  %3260 = vrot.lane.b32.xlu0 %v6293_v44, %s6467_s19  ;;  %v2348_v12 = vrot.slane %v2346_v58, 4  ;;  %v7510_v9 = vsel %vm3650_vm13, %v3625_v3, %v3331_v18  ;;  %v1920_v38 = vld [vmem:[#allocation2 + $0x48] sm:$0xe]  ;;  %v2835_v6 = vpop.permute.xlu0 %2834  ;;  %v1494_v47 = vld [vmem:[#allocation2 + $0x4c] sm:$0xf] }
 0x117   : > { %826 = vst [vmem:[#allocation2 + $0x80] sm:$0x1] %v825_v59  ;;  %v2335_v41 = vrot.slane %v2333_v48, 4  ;;  %v2338_v36 = vrot.slane %v2336_v27, 5  ;;  %v2441_v30 = vsel %vm6667_vm14, %v2436_v42, %v2440_v7  ;;  %v2774_v46 = vunpack.c.l.b16 %v1053_v53 }
 0x118   : > { %v2349_v15 = vor.u32 %v2348_v12, %v2344_v56  ;;  %v2674_v17 = vrot.slane %v7484_v21, 5  ;;  %v2446_v16 = vrot.slane %v2445_v8, 4  ;;  %v1063_v26 = vsel %vm6667_vm14, %v1058_v45, %v1062_v33  ;;  %v7519_v33 = vpop.permute.xlu2 %3082 }
 0x119   : > { %v2339_v61 = vor.u32 %v2338_v36, %v2335_v41  ;;  %v5857_v51 = vrot.slane %v2532_v13, 9  ;;  %v2646_v11 = vrot.slane %v2109_v54, 5  ;;  %v3300_v40 = vunpack.c.l.b16 %v2441_v30  ;;  %v1520_v13 = vld [vmem:[#allocation2 + $0x50] sm:$0x1]  ;;  %v1493_v30 = vld [vmem:[#allocation2 + $0x48] sm:$0xf] }
 0x11a   : > { %v2136_v20 = vld [vmem:[#allocation2 + $0xb0] sm:$0x1]  ;;  %v2775_v49 = vunpack.c.l.b16 %v1063_v26  ;;  %v2675_v63 = vsel %vm6644_vm12, %v5861_v39, %v2674_v17  ;;  %v2676_v32 = vrot.slane %v2674_v17, 4  ;;  %v5822_v29 = vrot.slane %v1309_v62, 9 }
 0x11b   : > { %v2340_v2 = vrot.slane %v2339_v61, 4  ;;  %v2448_v43 = vshll.u32 %v2136_v20, 16  ;;  %v2677_v22 = vrot.slane %v2136_v20, 5  ;;  %v2350_v60 = vrot.slane %v2349_v15, 4  ;;  %v6264_v20 = vld [vmem:[#allocation2 + $0x84] sm:$0xff] }
 0x11c   : > { %v2801_v1 = vpack.c.b16 %v2775_v49, %v2774_v46  ;;  %v2648_v7 = vrot.slane %v2646_v11, 4  ;;  %v3380_v35 = vunpack.c.l.b16 %v2675_v63  ;;  %v2647_v44 = vsel %vm6644_vm12, %v5857_v51, %v2646_v11 }
 0x11d   : > { %v2345_v21 = vsel %vm6667_vm14, %v2340_v2, %v2344_v56  ;;  %v2450_v57 = vrot.slane %v2448_v43, 5  ;;  %v2678_v34 = vsel %vm6644_vm12, %v2676_v32, %v2677_v22  ;;  %v1408_v8 = vrot.slane %v7453_v10, 5  ;;  %v2529_v43 = vld [vmem:[#allocation2 + $0x54] sm:$0xe] }
 0x11e   : > { %v2132_v54 = vld [vmem:[#allocation2 + $0x80] sm:$0x1]  ;;  %v3292_v55 = vunpack.c.l.b16 %v2345_v21  ;;  %2822 = vrot.lane.b32.xlu2 %v2801_v1, %s6469_s21  ;;  %v3381_v27 = vunpack.c.l.b16 %v2678_v34  ;;  %v1411_v58 = vrot.slane %v7470_v24, 5  ;;  %v2016_v42 = vrot.slane %v1494_v47, 5  ;;  %v2103_v1 = vld [vmem:[#allocation2 + $0x58] sm:$0xf] }
 0x11f   : > { %v2352_v37 = vshll.u32 %v2132_v54, 16  ;;  %v2649_v18 = vrot.slane %v2132_v54, 5  ;;  %v2451_v48 = vsel %vm6667_vm14, %v2446_v16, %v2450_v57  ;;  %v5838_v41 = vrot.slane %v1920_v38, 9  ;;  %v2102_v34 = vld [vmem:[#allocation2 + $0x54] sm:$0xf] }
 0x120   : > { %v3301_v59 = vunpack.c.l.b16 %v2451_v48  ;;  %v3372_v36 = vunpack.c.l.b16 %v2647_v44  ;;  %v1409_v10 = vsel %vm6644_vm12, %v5822_v29, %v1408_v8  ;;  %v1410_v3 = vrot.slane %v1408_v8, 4  ;;  %v7557_v44 = vpop.permute.xlu0 %3002 }
 0x121   : > { %v2354_v56 = vrot.slane %v2352_v37, 5  ;;  %v2650_v53 = vsel %vm6644_vm12, %v2648_v7, %v2649_v18  ;;  %v2854_v24 = vunpack.c.l.b16 %v1409_v10  ;;  %v2018_v61 = vrot.slane %v2016_v42, 4  ;;  %v2129_v7 = vld [vmem:[#allocation2 + $0x5c] sm:$0x1]  ;;  %v6274_v10 = vld [vmem:[#allocation2 + $0x48] sm:$0xff] }
 0x122   : > { %v3373_v12 = vunpack.c.l.b16 %v2650_v53  ;;  %v3320_v45 = vpack.c.b16 %v3301_v59, %v3300_v40  ;;  %v3400_v46 = vpack.c.b16 %v3381_v27, %v3380_v35  ;;  %v1412_v17 = vsel %vm6644_vm12, %v1410_v3, %v1411_v58  ;;  %v7555_v35 = vpop.permute.xlu1 %3010 }
 0x123   : > { %v2355_v39 = vsel %vm6667_vm14, %v2350_v60, %v2354_v56  ;;  %v2019_v62 = vrot.slane %v1520_v13, 5  ;;  %v2855_v16 = vunpack.c.l.b16 %v1412_v17  ;;  %v7543_v26 = vsel %vm6644_vm12, %v5838_v41, %v2016_v42  ;;  %v7551_v60 = vpop.permute.xlu2 %3170 }
 0x124   : > { %v3293_v15 = vunpack.c.l.b16 %v2355_v39  ;;  %3348 = vrot.lane.b32.xlu1 %v3320_v45, %s6473_s8  ;;  %v3691_v51 = vsel %vm3683_vm1, %v7510_v9, %v7496_v31  ;;  %v1652_v11 = vshrl.u32 %v1493_v30, 16  ;;  %v1655_v49 = vshll.u32 %v1493_v30, 16 }
 0x125   : > { %v2020_v2 = vsel %vm6644_vm12, %v2018_v61, %v2019_v62  ;;  %6068 = vmatmul.msk.bf16.gmra.mxu0 %vm3740_vm4, %v3691_v51  ;;  %v1661_v63 = vshll.u32 %v1494_v47, 16  ;;  %v3396_v32 = vpack.c.b16 %v3373_v12, %v3372_v36  ;;  %v2881_v22 = vpack.c.b16 %v2855_v16, %v2854_v24 }
 0x126   : > { %v3316_v40 = vpack.c.b16 %v3293_v15, %v3292_v55  ;;  %v1654_v29 = vrot.slane %v1652_v11, 4  ;;  %v1665_v21 = vshrl.u32 %v1494_v47, 16  ;;  %v3110_v31 = vunpack.c.l.b16 %v7543_v26 }
 0x127   : > { %v1657_v9 = vrot.slane %v1655_v49, 5  ;;  %v1663_v57 = vrot.slane %v1661_v63, 5  ;;  %v1671_v54 = vshll.u32 %v1520_v13, 16  ;;  %2902 = vrot.lane.b32.xlu2 %v2881_v22, %s6468_s20  ;;  %v3111_v38 = vunpack.c.l.b16 %v2020_v2 }
 0x128   : > { %3340 = vrot.lane.b32.xlu0 %v3316_v40, %s6473_s8  ;;  %v1667_v37 = vrot.slane %v1665_v21, 4  ;;  %v3472_v55 = vsel %vm8808_vm15, %v6264_v20, %v2835_v6  ;;  %v5854_v18 = vrot.slane %v2529_v43, 9  ;;  %v2625_v48 = vrot.slane %v2103_v1, 5  ;;  %v7573_v20 = vld [vmem:[#allocation2 + $0x74] sm:$0x1] }
 0x129   : > { %v1658_v8 = vor.u32 %v1657_v9, %v1654_v29  ;;  %v1673_v47 = vrot.slane %v1671_v54, 5  ;;  %v2628_v27 = vrot.slane %v2129_v7, 5  ;;  %v2261_v42 = vshrl.u32 %v2102_v34, 16  ;;  %v1313_v40 = vld [vmem:[#allocation2 + $0x6c] sm:$0xe] }
 0x12a   : > { %v1668_v58 = vor.u32 %v1667_v37, %v1663_v57  ;;  %v2264_v59 = vshll.u32 %v2102_v34, 16  ;;  %v2270_v56 = vshll.u32 %v2103_v1, 16  ;;  %v2626_v13 = vsel %vm6644_vm12, %v5854_v18, %v2625_v48  ;;  %v895_v29 = vld [vmem:[#allocation2 + $0x9c] sm:$0xf]  ;;  %v7581_v9 = vld [vmem:[#allocation2 + $0xa0] sm:$0xf] }
 0x12b   : > { %v1659_v53 = vrot.slane %v1658_v8, 4  ;;  %v2627_v41 = vrot.slane %v2625_v48, 4  ;;  %v2274_v36 = vshrl.u32 %v2103_v1, 16  ;;  %v3366_v6 = vunpack.c.l.b16 %v2626_v13  ;;  %v2821_v22 = vpop.permute.xlu2 %2820  ;;  %v6257_v37 = vld [vmem:[#allocation2 + $0x30] sm:$0xff] }
 0x12c   : > { %3428 = vrot.lane.b32.xlu1 %v3400_v46, %s6471_s23  ;;  %v1669_v12 = vrot.slane %v1668_v58, 4  ;;  %v2263_v3 = vrot.slane %v2261_v42, 4  ;;  %v2266_v30 = vrot.slane %v2264_v59, 5  ;;  %v2272_v24 = vrot.slane %v2270_v56, 5  ;;  %v7570_v46 = vld [vmem:[#allocation2 + $0x70] sm:$0xf] }
 0x12d   : > { %v1664_v45 = vsel %vm6667_vm14, %v1659_v53, %v1663_v57  ;;  %v2629_v39 = vsel %vm6644_vm12, %v2627_v41, %v2628_v27  ;;  %v2276_v61 = vrot.slane %v2274_v36, 4  ;;  %v2280_v11 = vshll.u32 %v2129_v7, 16  ;;  %v3163_v57 = vpop.permute.xlu1 %3162  ;;  %v6290_v48 = vld [vmem:[#allocation2 + $0x54] sm:$0xff]  ;;  %v887_v41 = vld [vmem:[#allocation2 + $0x6c] sm:$0xf] }
 0x12e   : > { %v1674_v15 = vsel %vm6667_vm14, %v1669_v12, %v1673_v47  ;;  %v3030_v17 = vunpack.c.l.b16 %v1664_v45  ;;  %v3367_v62 = vunpack.c.l.b16 %v2629_v39  ;;  %v2267_v16 = vor.u32 %v2266_v30, %v2263_v3 }
 0x12f   : > { %v3031_v26 = vunpack.c.l.b16 %v1674_v15  ;;  %v2277_v51 = vor.u32 %v2276_v61, %v2272_v24  ;;  %v3137_v2 = vpack.c.b16 %v3111_v38, %v3110_v31  ;;  %v3501_v49 = vsel %vm3485_vm0, %v7473_v50, %v7525_v28  ;;  %2998 = vrot.lane.b32.xlu2 %v6274_v10, %s6466_s18  ;;  %v3091_v31 = vpop.permute.xlu0 %3090 }
 0x130   : > { %3420 = vrot.lane.b32.xlu0 %v3396_v32, %s6471_s23  ;;  %v2268_v63 = vrot.slane %v2267_v16, 4  ;;  %v3509_v43 = vsel %vm3485_vm0, %v3472_v55, %v7493_v5  ;;  %v3393_v21 = vpack.c.b16 %v3367_v62, %v3366_v6  ;;  %v2282_v7 = vrot.slane %v2280_v11, 5  ;;  %v7589_v55 = vld [vmem:[#allocation2 + $0xa4] sm:$0x1] }
 0x131   : > { %v3057_v32 = vpack.c.b16 %v3031_v26, %v3030_v17  ;;  %v2278_v1 = vrot.slane %v2277_v51, 4  ;;  %v5826_v50 = vrot.slane %v1313_v40, 9  ;;  %v1436_v28 = vrot.slane %v7570_v46, 5 }
 0x132   : > { %v2273_v54 = vsel %vm6667_vm14, %v2268_v63, %v2272_v24  ;;  %v1439_v34 = vrot.slane %v7573_v20, 5  ;;  %v1233_v18 = vshrl.u32 %v895_v29, 16  ;;  %v1236_v8 = vshll.u32 %v895_v29, 16 }
 0x133   : > { %v2283_v5 = vsel %vm6667_vm14, %v2278_v1, %v2282_v7  ;;  %v3286_v38 = vunpack.c.l.b16 %v2273_v54  ;;  %v1437_v27 = vsel %vm6644_vm12, %v5826_v50, %v1436_v28  ;;  %v1438_v58 = vrot.slane %v1436_v28, 4 }
 0x134   : > { %3158 = vrot.lane.b32.xlu1 %v3137_v2, %s6470_s22  ;;  %v3287_v47 = vunpack.c.l.b16 %v2283_v5  ;;  %v1242_v42 = vshll.u32 %v7581_v9, 16  ;;  %v3534_v59 = vsel %vm3518_vm5, %v3501_v49, %v7557_v44  ;;  %v1235_v56 = vrot.slane %v1233_v18, 4  ;;  %v2901_v2 = vpop.permute.xlu2 %2900  ;;  %v1924_v5 = vld [vmem:[#allocation2 + $0x78] sm:$0xe] }
 0x135   : > { %v1238_v53 = vrot.slane %v1236_v8, 5  ;;  %v1246_v13 = vshrl.u32 %v7581_v9, 16  ;;  %v3542_v36 = vsel %vm3518_vm5, %v3509_v43, %v7555_v35  ;;  %v1440_v12 = vsel %vm6644_vm12, %v1438_v58, %v1439_v34  ;;  %v7623_v8 = vld [vmem:[#allocation2 + $0x80] sm:$0x1] }
 0x136   : > { %v1244_v10 = vrot.slane %v1242_v42, 5  ;;  %v1252_v6 = vshll.u32 %v7589_v55, 16  ;;  %v3451_v3 = vsel %vm8808_vm15, %v6257_v37, %v2821_v22  ;;  %v2862_v30 = vunpack.c.l.b16 %v1437_v27  ;;  %v3267_v22 = vpop.permute.xlu1 %3266 }
 0x137   : > { %v1239_v44 = vor.u32 %v1238_v53, %v1235_v56  ;;  %v1248_v45 = vrot.slane %v1246_v13, 4  ;;  %v3313_v39 = vpack.c.b16 %v3287_v47, %v3286_v38  ;;  %3254 = vrot.lane.b32.xlu2 %v6290_v48, %s6467_s19  ;;  %v2863_v24 = vunpack.c.l.b16 %v1440_v12  ;;  %v3259_v29 = vpop.permute.xlu0 %3258 }
 0x138   : > { %3078 = vrot.lane.b32.xlu0 %v3057_v32, %s6472_s29  ;;  %v3567_v35 = vsel %vm8810_vm9, %v3534_v59, %v7519_v33  ;;  %v1137_v61 = vshrl.u32 %v887_v41, 16  ;;  %v1254_v62 = vrot.slane %v1252_v6, 5  ;;  %v1140_v16 = vshll.u32 %v887_v41, 16  ;;  %v1317_v32 = vld [vmem:[#allocation2 + $0x9c] sm:$0xe] }
 0x139   : > { %v1240_v15 = vrot.slane %v1239_v44, 4  ;;  %v1249_v17 = vor.u32 %v1248_v45, %v1244_v10  ;;  %v1146_v51 = vshll.u32 %v7570_v46, 16  ;;  %v1150_v11 = vshrl.u32 %v7570_v46, 16 }
 0x13a   : > { %v1139_v26 = vrot.slane %v1137_v61, 4  ;;  %v1156_v40 = vshll.u32 %v7573_v20, 16  ;;  %v3600_v43 = vsel %vm8809_vm10, %v3567_v35, %v3163_v57  ;;  %v1142_v33 = vrot.slane %v1140_v16, 5  ;;  %v7621_v57 = vld [vmem:[#allocation2 + $0x7c] sm:$0xf] }
 0x13b   : > { %v1245_v49 = vsel %vm6667_vm14, %v1240_v15, %v1244_v10  ;;  %v1250_v63 = vrot.slane %v1249_v17, 4  ;;  %v2885_v1 = vpack.c.b16 %v2863_v24, %v2862_v30  ;;  %v3575_v7 = vsel %vm8810_vm9, %v3542_v36, %v3091_v31  ;;  %v1509_v36 = vld [vmem:[#allocation2 + $0xa8] sm:$0xf] }
 0x13c   : > { %3414 = vrot.lane.b32.xlu1 %v3393_v21, %s6471_s23  ;;  %v1148_v54 = vrot.slane %v1146_v51, 5  ;;  %v1152_v46 = vrot.slane %v1150_v11, 4  ;;  %v2790_v50 = vunpack.c.l.b16 %v1245_v49  ;;  %v1143_v28 = vor.u32 %v1142_v33, %v1139_v26  ;;  %v7652_v35 = vpop.permute.xlu2 %2996 }
 0x13d   : > { %v1255_v20 = vsel %vm6667_vm14, %v1250_v63, %v1254_v62  ;;  %v7619_v34 = vsel %vm3485_vm0, %v3451_v3, %v2901_v2  ;;  %v1158_v18 = vrot.slane %v1156_v40, 5  ;;  %v5830_v21 = vrot.slane %v1317_v32, 9  ;;  %v7643_v3 = vld [vmem:[#allocation2 + $0xb0] sm:$0x1]  ;;  %v1501_v2 = vld [vmem:[#allocation2 + $0x78] sm:$0xf] }
 0x13e   : > { %v2791_v38 = vunpack.c.l.b16 %v1255_v20  ;;  %v1153_v37 = vor.u32 %v1152_v46, %v1148_v54  ;;  %v1144_v31 = vrot.slane %v1143_v28, 4  ;;  %v3608_v47 = vsel %vm8809_vm10, %v3575_v7, %v7551_v60  ;;  %v6282_v46 = vld [vmem:[#allocation2 + $0xa8] sm:$0xff] }
 0x13f   : > { %v1464_v48 = vrot.slane %v7581_v9, 5  ;;  %v1467_v27 = vrot.slane %v7589_v55, 5  ;;  %v7631_v42 = vsel %vm3617_vm11, %v3600_v43, %v3259_v29  ;;  %v5842_v59 = vrot.slane %v1924_v5, 9  ;;  %v7639_v9 = vld [vmem:[#allocation2 + $0xac] sm:$0xf]  ;;  %v6278_v5 = vld [vmem:[#allocation2 + $0x78] sm:$0xff] }
 0x140   : > { %3334 = vrot.lane.b32.xlu0 %v3313_v39, %s6473_s8  ;;  %v1154_v58 = vrot.slane %v1153_v37, 4  ;;  %v2044_v56 = vrot.slane %v7621_v57, 5  ;;  %v1149_v53 = vsel %vm6667_vm14, %v1144_v31, %v1148_v54  ;;  %v2047_v60 = vrot.slane %v7623_v8, 5  ;;  %v335_v54 = vld [vmem:[#allocation2 + $0xb4] sm:$0x1] }
 0x141   : > { %v1465_v13 = vsel %vm6644_vm12, %v5830_v21, %v1464_v48  ;;  %v1466_v41 = vrot.slane %v1464_v48, 4  ;;  %v2809_v55 = vpack.c.b16 %v2791_v38, %v2790_v50  ;;  %v2782_v10 = vunpack.c.l.b16 %v1149_v53  ;;  %v428_v31 = vld [vmem:[%s6585_s17 + $0x70] sm:$0xf] }
 0x142   : > { %v1159_v12 = vsel %vm6667_vm14, %v1154_v58, %v1158_v18  ;;  %v2870_v6 = vunpack.c.l.b16 %v1465_v13  ;;  %v7649_v45 = vsel %vm6644_vm12, %v5842_v59, %v2044_v56  ;;  %v2046_v39 = vrot.slane %v2044_v56, 4  ;;  %v429_v59 = vld [vmem:[%s6585_s17 + $0x74] sm:$0xf] }
 0x143   : > { %v2783_v30 = vunpack.c.l.b16 %v1159_v12  ;;  %v1468_v44 = vsel %vm6644_vm12, %v1466_v41, %v1467_v27  ;;  %v1844_v61 = vshrl.u32 %v1509_v36, 16  ;;  %v1847_v15 = vshll.u32 %v1509_v36, 16  ;;  %v1928_v12 = vld [vmem:[#allocation2 + $0xa8] sm:$0xe] }
 0x144   : > { %2910 = vrot.lane.b32.xlu1 %v2885_v1, %s6468_s20  ;;  %v2871_v24 = vunpack.c.l.b16 %v1468_v44  ;;  %v1853_v17 = vshll.u32 %v7639_v9, 16  ;;  %v2048_v16 = vsel %vm6644_vm12, %v2046_v39, %v2047_v60  ;;  %v1857_v26 = vshrl.u32 %v7639_v9, 16  ;;  %v3347_v11 = vpop.permute.xlu1 %3346  ;;  %v7676_v39 = vpop.permute.xlu2 %3252 }
 0x145   : > { %v2805_v62 = vpack.c.b16 %v2783_v30, %v2782_v10  ;;  %v1863_v51 = vshll.u32 %v7643_v3, 16  ;;  %v3339_v40 = vpop.permute.xlu0 %3338  ;;  %v3641_v49 = vsel %vm3617_vm11, %v3608_v47, %v3267_v22  ;;  %v3118_v63 = vunpack.c.l.b16 %v7649_v45 }
 0x146   : > { %v1846_v43 = vrot.slane %v1844_v61, 4  ;;  %v1849_v33 = vrot.slane %v1847_v15, 5  ;;  %v2889_v29 = vpack.c.b16 %v2871_v24, %v2870_v6  ;;  %v3119_v32 = vunpack.c.l.b16 %v2048_v16 }
 0x147   : > { %2830 = vrot.lane.b32.xlu2 %v2805_v62, %s6469_s21  ;;  %v1855_v1 = vrot.slane %v1853_v17, 5  ;;  %v1859_v7 = vrot.slane %v1857_v26, 4  ;;  %v1865_v50 = vrot.slane %v1863_v51, 5  ;;  %v3674_v22 = vsel %vm3650_vm13, %v3641_v49, %v3347_v11 }
 0x148   : > { %2838 = vrot.lane.b32.xlu0 %v2809_v55, %s6469_s21  ;;  %v1850_v20 = vor.u32 %v1849_v33, %v1846_v43  ;;  %v1748_v28 = vshrl.u32 %v1501_v2, 16  ;;  %v1751_v37 = vshll.u32 %v1501_v2, 16  ;;  %v1757_v18 = vshll.u32 %v7621_v57, 16 }
 0x149   : > { %v1860_v38 = vor.u32 %v1859_v7, %v1855_v1  ;;  %v1761_v21 = vshrl.u32 %v7621_v57, 16  ;;  %v1767_v27 = vshll.u32 %v7623_v8, 16  ;;  %v336_v58 = vsel %vm6573_vm3, 0, %v335_v54 }
 0x14a   : > { %v1851_v47 = vrot.slane %v1850_v20, 4  ;;  %v1750_v48 = vrot.slane %v1748_v28, 4  ;;  %v1753_v53 = vrot.slane %v1751_v37, 5  ;;  %v1759_v13 = vrot.slane %v1757_v18, 5  ;;  %337 = vst [vmem:[#allocation2 + $0xb4] sm:$0x1] %v336_v58 }
 0x14b   : > { %v1861_v56 = vrot.slane %v1860_v38, 4  ;;  %v1763_v41 = vrot.slane %v1761_v21, 4  ;;  %v1769_v57 = vrot.slane %v1767_v27, 5  ;;  %v673_v36 = vshrl.u32 %v428_v31, 16  ;;  %v391_v20 = vld [vmem:[#allocation2 + $0xbc] sm:$0x1] }
 0x14c   : > { %3014 = vrot.lane.b32.xlu1 %v6282_v46, %s6466_s18  ;;  %v1856_v60 = vsel %vm6667_vm14, %v1851_v47, %v1855_v1  ;;  %v676_v55 = vshll.u32 %v428_v31, 16  ;;  %v1754_v6 = vor.u32 %v1753_v53, %v1750_v48  ;;  %v681_v61 = vshrl.u32 %v429_v59, 16  ;;  %v3427_v43 = vpop.permute.xlu1 %3426  ;;  %v7696_v38 = vld [vmem:[#allocation2 + $0x88] sm:$0xf]  ;;  %v7703_v31 = vld [vmem:[#allocation2 + $0x8c] sm:$0x1] }
 0x14d   : > { %v1866_v8 = vsel %vm6667_vm14, %v1861_v56, %v1865_v50  ;;  %v3046_v10 = vunpack.c.l.b16 %v1856_v60  ;;  %v1764_v30 = vor.u32 %v1763_v41, %v1759_v13  ;;  %v3419_v44 = vpop.permute.xlu0 %3418  ;;  %v675_v24 = vrot.slane %v673_v36, 7  ;;  %v2110_v50 = vld [vmem:[#allocation2 + $0x84] sm:$0xf]  ;;  %v881_v47 = vld [vmem:[#allocation2 + $0x48] sm:$0xf] }
 0x14e   : > { %v3047_v45 = vunpack.c.l.b16 %v1866_v8  ;;  %v684_v15 = vshll.u32 %v429_v59, 16  ;;  %v1755_v17 = vrot.slane %v1754_v6, 4  ;;  %v5846_v16 = vrot.slane %v1928_v12, 9 }
 0x14f   : > { %2918 = vrot.lane.b32.xlu2 %v2889_v29, %s6468_s20  ;;  %v1765_v62 = vrot.slane %v1764_v30, 4  ;;  %v2072_v26 = vrot.slane %v7639_v9, 5  ;;  %v3141_v51 = vpack.c.b16 %v3119_v32, %v3118_v63  ;;  %v678_v11 = vor.u32 %v676_v55, %v675_v24  ;;  %v7723_v30 = vld [vmem:[#allocation2 + $0x50] sm:$0x1] }
 0x150   : > { %3006 = vrot.lane.b32.xlu0 %v6278_v5, %s6466_s18  ;;  %v679_v2 = vrot.slane %v675_v24, 4  ;;  %v7681_v49 = vrot.slane %v681_v61, 7  ;;  %v3666_v33 = vsel %vm3650_vm13, %v7631_v42, %v3339_v40  ;;  %v1760_v1 = vsel %vm6667_vm14, %v1755_v17, %v1759_v13 }
 0x151   : > { %v1770_v29 = vsel %vm6667_vm14, %v1765_v62, %v1769_v57  ;;  %v2074_v7 = vrot.slane %v2072_v26, 4  ;;  %v3038_v54 = vunpack.c.l.b16 %v1760_v1  ;;  %v855_v63 = vld [vmem:[#allocation2 + $0xb4] sm:$0xf]  ;;  %v2073_v32 = vsel %vm6644_vm12, %v5846_v16, %v2072_v26  ;;  %v7716_v57 = vld [vmem:[#allocation2 + $0x4c] sm:$0xf]  ;;  %v7721_v12 = vpop.permute.xlu2 %2828 }
 0x152   : > { %v3039_v46 = vunpack.c.l.b16 %v1770_v29  ;;  %v686_v9 = vor.u32 %v684_v15, %v7681_v49  ;;  %v3065_v28 = vpack.c.b16 %v3047_v45, %v3046_v10  ;;  %v856_v42 = vsel %vm6612_vm7, %v678_v11, %v855_v63  ;;  %v6294_v15 = vld [vmem:[#allocation2 + $0x84] sm:$0xff] }
 0x153   : > { %v2075_v40 = vrot.slane %v7643_v3, 5  ;;  %v3707_v5 = vsel %vm3683_vm1, %v3674_v22, %v3427_v43  ;;  %857 = vst [vmem:[#allocation2 + $0xb4] sm:$0xf] %v856_v42  ;;  %v3699_v21 = vsel %vm3683_vm1, %v3666_v33, %v3419_v44  ;;  %v3126_v22 = vunpack.c.l.b16 %v2073_v32 }
 0x154   : > { %3166 = vrot.lane.b32.xlu1 %v3141_v51, %s6470_s22  ;;  %v3061_v37 = vpack.c.b16 %v3039_v46, %v3038_v54  ;;  %v687_v18 = vsel %vm6602_vm6, %v679_v2, %v686_v9  ;;  %6076 = vmatmul.msk.bf16.vlgmr.msra.gmra.mxu3 %vm3740_vm4, %v3707_v5  ;;  %v392_v48 = vsel %vm6618_vm8, 0, %v391_v20  ;;  %v2357_v27 = vshrl.u32 %v2110_v50, 16  ;;  %v3157_v51 = vpop.permute.xlu1 %3156 }
 0x155   : > { %858 = vst.msk [vmem:[#allocation2 + $0xb8] sm:$0xf] %vm278_vm2, %v687_v18  ;;  %v2076_v3 = vsel %vm6644_vm12, %v2074_v7, %v2075_v40  ;;  %6072 = vmatmul.msk.bf16.vlgmr.msra.gmra.mxu2 %vm3740_vm4, %v3699_v21  ;;  %v2360_v59 = vshll.u32 %v2110_v50, 16  ;;  %v2366_v56 = vshll.u32 %v7696_v38, 16  ;;  %v2370_v53 = vshrl.u32 %v7696_v38, 16  ;;  %v3077_v13 = vpop.permute.xlu0 %3076 }
 0x156   : > { %v3127_v58 = vunpack.c.l.b16 %v2076_v3  ;;  %393 = vst [vmem:[#allocation2 + $0xbc] sm:$0x1] %v392_v48  ;;  %v2359_v41 = vrot.slane %v2357_v27, 4  ;;  %v2376_v60 = vshll.u32 %v7703_v31, 16  ;;  %v1065_v36 = vshrl.u32 %v881_v47, 16 }
 0x157   : > { %3086 = vrot.lane.b32.xlu2 %v3061_v37, %s6472_s29  ;;  %v3528_v55 = vsel %vm3518_vm5, %v7619_v34, %v7652_v35  ;;  %v2362_v8 = vrot.slane %v2360_v59, 5  ;;  %v2368_v10 = vrot.slane %v2366_v56, 5  ;;  %v2372_v6 = vrot.slane %v2370_v53, 4 }
 0x158   : > { %3094 = vrot.lane.b32.xlu0 %v3065_v28, %s6472_s29  ;;  %v688_v44 = vrot.slane %v7681_v49, 4  ;;  %v3561_v45 = vsel %vm8810_vm9, %v3528_v55, %v3077_v13  ;;  %v1067_v24 = vrot.slane %v1065_v36, 4  ;;  %v1068_v61 = vshll.u32 %v881_v47, 16 }
 0x159   : > { %v3145_v17 = vpack.c.b16 %v3127_v58, %v3126_v22  ;;  %v2363_v62 = vor.u32 %v2362_v8, %v2359_v41  ;;  %v2373_v16 = vor.u32 %v2372_v6, %v2368_v10  ;;  %v2378_v26 = vrot.slane %v2376_v60, 5  ;;  %v2533_v58 = vld [vmem:[#allocation2 + $0x84] sm:$0xe]  ;;  %v7744_v55 = vpop.permute.xlu2 %2916 }
 0x15a   : > { %v2118_v34 = vld [vmem:[#allocation2 + $0xb4] sm:$0xf]  ;;  %v1070_v35 = vrot.slane %v1068_v61, 5  ;;  %v1074_v11 = vshll.u32 %v7716_v57, 16  ;;  %v1078_v2 = vshrl.u32 %v7716_v57, 16  ;;  %v1084_v43 = vshll.u32 %v7723_v30, 16 }
 0x15b   : > { %v2453_v1 = vshrl.u32 %v2118_v34, 16  ;;  %v2456_v29 = vshll.u32 %v2118_v34, 16  ;;  %v2364_v7 = vrot.slane %v2363_v62, 4  ;;  %v3594_v54 = vsel %vm8809_vm10, %v3561_v45, %v3157_v51  ;;  %v2537_v5 = vld [vmem:[#allocation2 + $0xb4] sm:$0xe] }
 0x15c   : > { %v6298_v33 = vld [vmem:[#allocation2 + $0xb4] sm:$0xff]  ;;  %v2374_v32 = vrot.slane %v2373_v16, 4  ;;  %v1071_v20 = vor.u32 %v1070_v35, %v1067_v24  ;;  %v1076_v27 = vrot.slane %v1074_v11, 5  ;;  %v1080_v56 = vrot.slane %v1078_v2, 4  ;;  %v1310_v24 = vld [vmem:[#allocation2 + $0x48] sm:$0xe] }
 0x15d   : > { %v2119_v49 = vld [vmem:[#allocation2 + $0xb8] sm:$0xf]  ;;  %v859_v46 = vld [vmem:[#allocation2 + $0xbc] sm:$0x1]  ;;  %3270 = vrot.lane.b32.xlu1 %v6298_v33, %s6467_s19  ;;  %v2455_v28 = vrot.slane %v2453_v1, 4  ;;  %v2458_v42 = vrot.slane %v2456_v29, 5  ;;  %v2369_v40 = vsel %vm6667_vm14, %v2364_v7, %v2368_v10  ;;  %v3627_v13 = vsel %vm3617_vm11, %v3594_v54, %v7676_v39 }
 0x15e   : > { %v2462_v9 = vshll.u32 %v2119_v49, 16  ;;  %v2466_v63 = vshrl.u32 %v2119_v49, 16  ;;  %v860_v50 = vsel %vm6573_vm3, %v688_v44, %v859_v46  ;;  %v2379_v21 = vsel %vm6667_vm14, %v2374_v32, %v2378_v26 }
 0x15f   : > { %3174 = vrot.lane.b32.xlu2 %v3145_v17, %s6470_s22  ;;  %861 = vst [vmem:[#allocation2 + $0xbc] sm:$0x1] %v860_v50  ;;  %v3294_v47 = vunpack.c.l.b16 %v2369_v40  ;;  %v2459_v3 = vor.u32 %v2458_v42, %v2455_v28  ;;  %v3295_v22 = vunpack.c.l.b16 %v2379_v21  ;;  %v1072_v48 = vrot.slane %v1071_v20, 4 }
 0x160   : > { %3262 = vrot.lane.b32.xlu0 %v6294_v15, %s6467_s19  ;;  %v2464_v37 = vrot.slane %v2462_v9, 5  ;;  %v2468_v18 = vrot.slane %v2466_v63, 4  ;;  %v5862_v53 = vrot.slane %v2537_v5, 9  ;;  %v1086_v36 = vrot.slane %v1084_v43, 5  ;;  %v1921_v63 = vld [vmem:[#allocation2 + $0x54] sm:$0xe] }
 0x161   : > { %v2460_v41 = vrot.slane %v2459_v3, 4  ;;  %v1077_v60 = vsel %vm6667_vm14, %v1072_v48, %v1076_v27  ;;  %v2681_v8 = vrot.slane %v2119_v49, 5  ;;  %v3317_v6 = vpack.c.b16 %v3295_v22, %v3294_v47  ;;  %v1496_v22 = vld [vmem:[#allocation2 + $0x58] sm:$0xf] }
 0x162   : > { %v2469_v59 = vor.u32 %v2468_v18, %v2464_v37  ;;  %v1081_v44 = vor.u32 %v1080_v56, %v1076_v27  ;;  %v5858_v45 = vrot.slane %v2533_v58, 9  ;;  %v2776_v15 = vunpack.c.l.b16 %v1077_v60  ;;  %v3413_v62 = vpop.permute.xlu1 %3412  ;;  %v1495_v18 = vld [vmem:[#allocation2 + $0x54] sm:$0xf] }
 0x163   : > { %v2465_v61 = vsel %vm6667_vm14, %v2460_v41, %v2464_v37  ;;  %v7750_v39 = vsel %vm6644_vm12, %v5862_v53, %v2681_v8  ;;  %v2653_v17 = vrot.slane %v7696_v38, 5  ;;  %v2683_v51 = vrot.slane %v2681_v8, 4  ;;  %v1521_v37 = vld [vmem:[#allocation2 + $0x5c] sm:$0x1]  ;;  %v6261_v53 = vld [vmem:[#allocation2 + $0x60] sm:$0xff] }
 0x164   : > { %v2470_v10 = vrot.slane %v2469_v59, 4  ;;  %v3302_v16 = vunpack.c.l.b16 %v2465_v61  ;;  %v1082_v26 = vrot.slane %v1081_v44, 4  ;;  %v2656_v34 = vrot.slane %v7703_v31, 5 }
 0x165   : > { %v2654_v11 = vsel %vm6644_vm12, %v5858_v45, %v2653_v17  ;;  %v2655_v2 = vrot.slane %v2653_v17, 4  ;;  %v5823_v43 = vrot.slane %v1310_v24, 9  ;;  %v1415_v33 = vrot.slane %v7716_v57, 5  ;;  %v2104_v17 = vld [vmem:[#allocation2 + $0x60] sm:$0xf] }
 0x166   : > { %v2137_v35 = vld [vmem:[#allocation2 + $0xbc] sm:$0x1]  ;;  %v1087_v38 = vsel %vm6667_vm14, %v1082_v26, %v1086_v36  ;;  %v3374_v29 = vunpack.c.l.b16 %v2654_v11  ;;  %v3382_v42 = vunpack.c.l.b16 %v7750_v39  ;;  %v1418_v40 = vrot.slane %v7723_v30, 5  ;;  %v7776_v30 = vpop.permute.xlu2 %3084  ;;  %v2530_v39 = vld [vmem:[#allocation2 + $0x60] sm:$0xe] }
 0x167   : > { %v2472_v49 = vshll.u32 %v2137_v35, 16  ;;  %v2684_v1 = vrot.slane %v2137_v35, 5  ;;  %v2777_v7 = vunpack.c.l.b16 %v1087_v38  ;;  %v2657_v31 = vsel %vm6644_vm12, %v2655_v2, %v2656_v34  ;;  %v2130_v35 = vld [vmem:[#allocation2 + $0x68] sm:$0x1] }
 0x168   : > { %3342 = vrot.lane.b32.xlu0 %v3317_v6, %s6473_s8  ;;  %v3333_v54 = vpop.permute.xlu0 %3332  ;;  %v1416_v46 = vsel %vm6644_vm12, %v5823_v43, %v1415_v33  ;;  %v1417_v9 = vrot.slane %v1415_v33, 4  ;;  %v3375_v20 = vunpack.c.l.b16 %v2657_v31  ;;  %v5839_v48 = vrot.slane %v1921_v63, 9  ;;  %v6265_v33 = vld [vmem:[#allocation2 + $0x90] sm:$0xff]  ;;  %v3786_v31 = vpop.f32.mrf.mxu0 }
 0x169   : > { %v2474_v32 = vrot.slane %v2472_v49, 5  ;;  %v2685_v57 = vsel %vm6644_vm12, %v2683_v51, %v2684_v1  ;;  %v3660_v50 = vsel %vm3650_vm13, %v3627_v13, %v3333_v54  ;;  %v2802_v28 = vpack.c.b16 %v2777_v7, %v2776_v15  ;;  %v2105_v49 = vld [vmem:[#allocation2 + $0x64] sm:$0xf] }
 0x16a   : > { %v2856_v5 = vunpack.c.l.b16 %v1416_v46  ;;  %v3397_v47 = vpack.c.b16 %v3375_v20, %v3374_v29  ;;  %v3693_v3 = vsel %vm3683_vm1, %v3660_v50, %v3413_v62  ;;  %v3383_v58 = vunpack.c.l.b16 %v2685_v57  ;;  %v2909_v44 = vpop.permute.xlu1 %2908 }
 0x16b   : > { %v2475_v21 = vsel %vm6667_vm14, %v2470_v10, %v2474_v32  ;;  %2824 = vrot.lane.b32.xlu2 %v2802_v28, %s6469_s21  ;;  %v1419_v59 = vsel %vm6644_vm12, %v1417_v9, %v1418_v40  ;;  %6069 = vmatmul.msk.bf16.gmra.mxu0 %vm3740_vm4, %v3693_v3  ;;  %v2023_v56 = vrot.slane %v1496_v22, 5  ;;  %v2026_v41 = vrot.slane %v1521_v37, 5  ;;  %v7799_v3 = vld [vmem:[%s8800_s2] ss:$0 sm:$0xff] }
 0x16c   : > { %v3303_v27 = vunpack.c.l.b16 %v2475_v21  ;;  %v2857_v13 = vunpack.c.l.b16 %v1419_v59  ;;  %v1676_v60 = vshrl.u32 %v1495_v18, 16  ;;  %v1679_v36 = vshll.u32 %v1495_v18, 16 }
 0x16d   : > { %v2025_v10 = vrot.slane %v2023_v56, 4  ;;  %v1685_v6 = vshll.u32 %v1496_v22, 16  ;;  %v2024_v24 = vsel %vm6644_vm12, %v5839_v48, %v2023_v56  ;;  %v1695_v51 = vshll.u32 %v1521_v37, 16 }
 0x16e   : > { %v3321_v8 = vpack.c.b16 %v3303_v27, %v3302_v16  ;;  %v2882_v45 = vpack.c.b16 %v2857_v13, %v2856_v5  ;;  %v1678_v61 = vrot.slane %v1676_v60, 4  ;;  %v1681_v15 = vrot.slane %v1679_v36, 5  ;;  %v7790_v37 = vpop.permute.xlu2 %3172  ;;  %v6275_v13 = vld [vmem:[#allocation2 + $0x54] sm:$0xff] }
 0x16f   : > { %v2027_v62 = vsel %vm6644_vm12, %v2025_v10, %v2026_v41  ;;  %v1687_v26 = vrot.slane %v1685_v6, 5  ;;  %v1689_v16 = vshrl.u32 %v1496_v22, 16  ;;  %v3463_v11 = vsel %vm8808_vm15, %v6261_v53, %v7721_v12  ;;  %v1314_v10 = vld [vmem:[#allocation2 + $0x78] sm:$0xe] }
 0x170   : > { %3422 = vrot.lane.b32.xlu0 %v3397_v47, %s6471_s23  ;;  %3350 = vrot.lane.b32.xlu1 %v3321_v8, %s6473_s8  ;;  %v2837_v34 = vpop.permute.xlu0 %2836  ;;  %v3401_v2 = vpack.c.b16 %v3383_v58, %v3382_v42  ;;  %v1682_v43 = vor.u32 %v1681_v15, %v1678_v61  ;;  %v3112_v38 = vunpack.c.l.b16 %v2024_v24  ;;  %v5855_v29 = vrot.slane %v2530_v39, 9  ;;  %v7805_v8 = vld [vmem:[#allocation2 + $0x7c] sm:$0xf]  ;;  %v7807_v15 = vld [vmem:[#allocation2 + $0x80] sm:$0x1] }
 0x171   : > { %v1691_v1 = vrot.slane %v1689_v16, 4  ;;  %v2632_v7 = vrot.slane %v2105_v49, 5  ;;  %v3113_v54 = vunpack.c.l.b16 %v2027_v62  ;;  %v2635_v9 = vrot.slane %v2130_v35, 5  ;;  %v897_v39 = vld [vmem:[#allocation2 + $0xa8] sm:$0xf] }
 0x172   : > { %v1683_v46 = vrot.slane %v1682_v43, 4  ;;  %v2285_v63 = vshrl.u32 %v2104_v17, 16  ;;  %v1697_v57 = vrot.slane %v1695_v51, 5  ;;  %v2288_v50 = vshll.u32 %v2104_v17, 16  ;;  %v3013_v60 = vpop.permute.xlu1 %3012 }
 0x173   : > { %2904 = vrot.lane.b32.xlu2 %v2882_v45, %s6468_s20  ;;  %v1692_v32 = vor.u32 %v1691_v1, %v1687_v26  ;;  %v2634_v20 = vrot.slane %v2632_v7, 4  ;;  %v3475_v28 = vsel %vm8808_vm15, %v6265_v33, %v2837_v34  ;;  %v2294_v40 = vshll.u32 %v2105_v49, 16  ;;  %v7821_v33 = vld [vmem:[#allocation2 + $0xb0] sm:$0x1] }
 0x174   : > { %v1688_v12 = vsel %vm6667_vm14, %v1683_v46, %v1687_v26  ;;  %v2287_v42 = vrot.slane %v2285_v63, 4  ;;  %v2633_v18 = vsel %vm6644_vm12, %v5855_v29, %v2632_v7  ;;  %v2290_v47 = vrot.slane %v2288_v50, 5 }
 0x175   : > { %v1693_v5 = vrot.slane %v1692_v32, 4  ;;  %v2636_v21 = vsel %vm6644_vm12, %v2634_v20, %v2635_v9  ;;  %v3032_v22 = vunpack.c.l.b16 %v1688_v12  ;;  %v2296_v48 = vrot.slane %v2294_v40, 5  ;;  %v6291_v40 = vld [vmem:[#allocation2 + $0x60] sm:$0xff] }
 0x176   : > { %v2298_v27 = vshrl.u32 %v2105_v49, 16  ;;  %v2304_v58 = vshll.u32 %v2130_v35, 16  ;;  %v3138_v59 = vpack.c.b16 %v3113_v54, %v3112_v38  ;;  %v3503_v53 = vsel %vm3485_vm0, %v3463_v11, %v2909_v44  ;;  %v7815_v11 = vld [vmem:[#allocation2 + $0xac] sm:$0xf]  ;;  %v7823_v38 = vpop.f32.mrf.mxu0 }
 0x177   : > { %v1698_v56 = vsel %vm6667_vm14, %v1693_v5, %v1697_v57  ;;  %v2291_v41 = vor.u32 %v2290_v47, %v2287_v42  ;;  %v3368_v45 = vunpack.c.l.b16 %v2633_v18  ;;  %v3369_v24 = vunpack.c.l.b16 %v2636_v21  ;;  %v889_v47 = vld [vmem:[#allocation2 + $0x78] sm:$0xf] }
 0x178   : > { %3430 = vrot.lane.b32.xlu1 %v3401_v2, %s6471_s23  ;;  %v3005_v36 = vpop.permute.xlu0 %3004  ;;  %v3033_v6 = vunpack.c.l.b16 %v1698_v56  ;;  %v2300_v61 = vrot.slane %v2298_v27, 4  ;;  %v2306_v62 = vrot.slane %v2304_v58, 5  ;;  %v3511_v26 = vsel %vm3485_vm0, %v3475_v28, %v7744_v55  ;;  %v2823_v5 = vpop.permute.xlu2 %2822 }
 0x179   : > { %v2292_v17 = vrot.slane %v2291_v41, 4  ;;  %v7812_v44 = vadd.f32 %v7799_v3, %v3786_v31  ;;  %v5827_v34 = vrot.slane %v1314_v10, 9  ;;  %v1443_v35 = vrot.slane %v7805_v8, 5  ;;  %v6258_v31 = vld [vmem:[#allocation2 + $0x3c] sm:$0xff] }
 0x17a   : > { %v3058_v16 = vpack.c.b16 %v3033_v6, %v3032_v22  ;;  %v2301_v51 = vor.u32 %v2300_v61, %v2296_v48  ;;  %v1446_v43 = vrot.slane %v7807_v15, 5  ;;  %v1257_v55 = vshrl.u32 %v897_v39, 16  ;;  %v3165_v6 = vpop.permute.xlu1 %3164 }
 0x17b   : > { %3000 = vrot.lane.b32.xlu2 %v6275_v13, %s6466_s18  ;;  %v2297_v2 = vsel %vm6667_vm14, %v2292_v17, %v2296_v48  ;;  %v1260_v49 = vshll.u32 %v897_v39, 16  ;;  %v3394_v1 = vpack.c.b16 %v3369_v24, %v3368_v45  ;;  %v1445_v54 = vrot.slane %v1443_v35, 4 }
 0x17c   : > { %3080 = vrot.lane.b32.xlu0 %v3058_v16, %s6472_s29  ;;  %v2302_v29 = vrot.slane %v2301_v51, 4  ;;  %v3288_v7 = vunpack.c.l.b16 %v2297_v2  ;;  %v1444_v46 = vsel %vm6644_vm12, %v5827_v34, %v1443_v35  ;;  %v1259_v9 = vrot.slane %v1257_v55, 4 }
 0x17d   : > { %v1262_v63 = vrot.slane %v1260_v49, 5  ;;  %v1266_v32 = vshll.u32 %v7815_v11, 16  ;;  %v1447_v20 = vsel %vm6644_vm12, %v1445_v54, %v1446_v43  ;;  %v1270_v50 = vshrl.u32 %v7815_v11, 16 }
 0x17e   : > { %v2307_v57 = vsel %vm6667_vm14, %v2302_v29, %v2306_v62  ;;  %v1276_v12 = vshll.u32 %v7821_v33, 16  ;;  %v3544_v42 = vsel %vm3518_vm5, %v3511_v26, %v3013_v60  ;;  %v3536_v22 = vsel %vm3518_vm5, %v3503_v53, %v3005_v36  ;;  %v1318_v62 = vld [vmem:[#allocation2 + $0xa8] sm:$0xe]  ;;  %v3791_v49 = vpop.f32.mrf.mxu0 }
 0x17f   : > { %v3289_v28 = vunpack.c.l.b16 %v2307_v57  ;;  %v1263_v18 = vor.u32 %v1262_v63, %v1259_v9  ;;  %v1268_v21 = vrot.slane %v1266_v32, 5  ;;  %v3454_v48 = vsel %vm8808_vm15, %v6258_v31, %v2823_v5  ;;  %v7864_v5 = vld [vmem:[#allocation2 + $0x8c] sm:$0x1] }
 0x180   : > { %3160 = vrot.lane.b32.xlu1 %v3138_v59, %s6470_s22  ;;  %v2864_v27 = vunpack.c.l.b16 %v1444_v46  ;;  %v1272_v58 = vrot.slane %v1270_v50, 4  ;;  %v2865_v13 = vunpack.c.l.b16 %v1447_v20  ;;  %v1278_v10 = vrot.slane %v1276_v12, 5  ;;  %v3093_v59 = vpop.permute.xlu0 %3092  ;;  %v1925_v20 = vld [vmem:[#allocation2 + $0x84] sm:$0xe] }
 0x181   : > { %v3314_v56 = vpack.c.b16 %v3289_v28, %v3288_v7  ;;  %v1264_v41 = vrot.slane %v1263_v18, 4  ;;  %v1161_v24 = vshrl.u32 %v889_v47, 16  ;;  %v1164_v60 = vshll.u32 %v889_v47, 16  ;;  %v2903_v28 = vpop.permute.xlu2 %2902  ;;  %v7872_v47 = vld [vmem:[#allocation2 + $0xb8] sm:$0xf] }
 0x182   : > { %v1273_v45 = vor.u32 %v1272_v58, %v1268_v21  ;;  %v1170_v61 = vshll.u32 %v7805_v8, 16  ;;  %v3569_v36 = vsel %vm8810_vm9, %v3536_v22, %v7776_v30  ;;  %v1174_v39 = vshrl.u32 %v7805_v8, 16  ;;  %v3269_v58 = vpop.permute.xlu1 %3268 }
 0x183   : > { %3256 = vrot.lane.b32.xlu2 %v6291_v40, %s6467_s19  ;;  %v1269_v53 = vsel %vm6667_vm14, %v1264_v41, %v1268_v21  ;;  %v1180_v17 = vshll.u32 %v7807_v15, 16  ;;  %v3577_v16 = vsel %vm8810_vm9, %v3544_v42, %v3093_v59  ;;  %v1163_v51 = vrot.slane %v1161_v24, 4  ;;  %v1504_v40 = vld [vmem:[#allocation2 + $0x88] sm:$0xf]  ;;  %v1511_v21 = vld [vmem:[#allocation2 + $0xb4] sm:$0xf] }
 0x184   : > { %3336 = vrot.lane.b32.xlu0 %v3314_v56, %s6473_s8  ;;  %v1274_v26 = vrot.slane %v1273_v45, 4  ;;  %v1166_v34 = vrot.slane %v1164_v60, 5  ;;  %v2886_v35 = vpack.c.b16 %v2865_v13, %v2864_v27  ;;  %v2792_v2 = vunpack.c.l.b16 %v1269_v53  ;;  %v7881_v59 = vld [vmem:[#allocation2 + $0xbc] sm:$0x1] }
 0x185   : > { %v1172_v43 = vrot.slane %v1170_v61, 5  ;;  %v1176_v55 = vrot.slane %v1174_v39, 4  ;;  %v7852_v8 = vsel %vm8809_vm10, %v3569_v36, %v3165_v6  ;;  %v5831_v29 = vrot.slane %v1318_v62, 9  ;;  %v1503_v6 = vld [vmem:[#allocation2 + $0x84] sm:$0xf] }
 0x186   : > { %v1279_v30 = vsel %vm6667_vm14, %v1274_v26, %v1278_v10  ;;  %v1167_v15 = vor.u32 %v1166_v34, %v1163_v51  ;;  %v1182_v54 = vrot.slane %v1180_v17, 5  ;;  %v1471_v46 = vrot.slane %v7815_v11, 5 }
 0x187   : > { %v2793_v7 = vunpack.c.l.b16 %v1279_v30  ;;  %v1177_v31 = vor.u32 %v1176_v55, %v1172_v43  ;;  %v7858_v63 = vadd.f32 %v7799_v3, %v7823_v38  ;;  %v1474_v32 = vrot.slane %v7821_v33, 5 }
 0x188   : > { %3416 = vrot.lane.b32.xlu1 %v3394_v1, %s6471_s23  ;;  %v1168_v9 = vrot.slane %v1167_v15, 4  ;;  %v3792_v57 = vadd.f32 %v7799_v3, %v3791_v49  ;;  %v1472_v1 = vsel %vm6644_vm12, %v5831_v29, %v1471_v46  ;;  %v1473_v42 = vrot.slane %v1471_v46, 4  ;;  %v7887_v39 = vpop.permute.xlu0 %3260 }
 0x189   : > { %v2810_v50 = vpack.c.b16 %v2793_v7, %v2792_v2  ;;  %v1178_v12 = vrot.slane %v1177_v31, 4  ;;  %v7869_v38 = vsel %vm3485_vm0, %v3454_v48, %v2903_v28  ;;  %v2872_v33 = vunpack.c.l.b16 %v1472_v1 }
 0x18a   : > { %v1173_v11 = vsel %vm6667_vm14, %v1168_v9, %v1172_v43  ;;  %v3866_v18 = vmax.f32 %v7812_v44, %v3792_v57  ;;  %v1475_v56 = vsel %vm6644_vm12, %v1473_v42, %v1474_v32  ;;  %v5843_v13 = vrot.slane %v1925_v20, 9  ;;  %v6279_v43 = vld [vmem:[#allocation2 + $0x84] sm:$0xff]  ;;  %v338_v32 = vld [vmem:[#allocation2 + $0xc0] sm:$0x1]  ;;  %v6283_v57 = vld [vmem:[#allocation2 + $0xb4] sm:$0xff] }
 0x18b   : > { %v1183_v22 = vsel %vm6667_vm14, %v1178_v12, %v1182_v54  ;;  %v2784_v27 = vunpack.c.l.b16 %v1173_v11  ;;  %v2873_v48 = vunpack.c.l.b16 %v1475_v56  ;;  %v2051_v10 = vrot.slane %v1504_v40, 5  ;;  %v430_v56 = vld [vmem:[%s6585_s17 + $0x78] sm:$0xf] }
 0x18c   : > { %2840 = vrot.lane.b32.xlu0 %v2810_v50, %s6469_s21  ;;  %v2785_v41 = vunpack.c.l.b16 %v1183_v22  ;;  %3882 = vst.msk [vmem:[#allocation5] sm:$0xff] %vm3485_vm0, %v3866_v18  ;;  %v2054_v44 = vrot.slane %v7864_v5, 5  ;;  %v1868_v45 = vshrl.u32 %v1511_v21, 16  ;;  %v1871_v24 = vshll.u32 %v1511_v21, 16  ;;  %v3988_v22 = vld [vmem:[#allocation3 + $0xc] sm:$0x1] }
 0x18d   : > { %v1877_v60 = vshll.u32 %v7872_v47, 16  ;;  %v1881_v61 = vshrl.u32 %v7872_v47, 16  ;;  %v3610_v36 = vsel %vm8809_vm10, %v3577_v16, %v7790_v37  ;;  %v7891_v17 = vsel %vm6644_vm12, %v5843_v13, %v2051_v10 }
 0x18e   : > { %v2806_v53 = vpack.c.b16 %v2785_v41, %v2784_v27  ;;  %v2053_v62 = vrot.slane %v2051_v10, 4  ;;  %v2890_v26 = vpack.c.b16 %v2873_v48, %v2872_v33  ;;  %v1870_v51 = vrot.slane %v1868_v45, 4  ;;  %v431_v10 = vld [vmem:[%s6585_s17 + $0x7c] sm:$0xf]  ;;  %s6474_s17 = smov 40  }
 0x18f   : > { %v1873_v34 = vrot.slane %v1871_v24, 5  ;;  %v1879_v2 = vrot.slane %v1877_v60, 5  ;;  %v1883_v37 = vrot.slane %v1881_v61, 4  ;;  %v1887_v16 = vshll.u32 %v7881_v59, 16  ;;  %v1929_v61 = vld [vmem:[#allocation2 + $0xb4] sm:$0xe] }
 0x190   : > { %2912 = vrot.lane.b32.xlu1 %v2886_v35, %s6468_s20  ;;  %2832 = vrot.lane.b32.xlu2 %v2806_v53, %s6469_s21  ;;  %v2055_v55 = vsel %vm6644_vm12, %v2053_v62, %v2054_v44  ;;  %v1772_v49 = vshrl.u32 %v1503_v6, 16  ;;  %v3120_v30 = vunpack.c.l.b16 %v7891_v17  ;;  %v1775_v29 = vshll.u32 %v1503_v6, 16  ;;  %v3793_v35 = vpop.f32.mrf.mxu0  ;;  %v7914_v44 = vpop.permute.xlu2 %2998 }
 0x191   : > { %v1874_v15 = vor.u32 %v1873_v34, %v1870_v51  ;;  %v1781_v7 = vshll.u32 %v1504_v40, 16  ;;  %v1884_v31 = vor.u32 %v1883_v37, %v1879_v2  ;;  %v1889_v54 = vrot.slane %v1887_v16, 5 }
 0x192   : > { %v1774_v46 = vrot.slane %v1772_v49, 4  ;;  %v1785_v9 = vshrl.u32 %v1504_v40, 16  ;;  %v3121_v20 = vunpack.c.l.b16 %v2055_v55  ;;  %v1777_v12 = vrot.slane %v1775_v29, 5  ;;  %v394_v49 = vld [vmem:[#allocation2 + $0xc8] sm:$0x1] }
 0x193   : > { %v1875_v50 = vrot.slane %v1874_v15, 4  ;;  %v1783_v28 = vrot.slane %v1781_v7, 5  ;;  %v1885_v1 = vrot.slane %v1884_v31, 4  ;;  %v1791_v11 = vshll.u32 %v7864_v5, 16 }
 0x194   : > { %3008 = vrot.lane.b32.xlu0 %v6279_v43, %s6466_s18  ;;  %v1787_v42 = vrot.slane %v1785_v9, 4  ;;  %v3794_v33 = vadd.f32 %v7799_v3, %v3793_v35  ;;  %v1778_v21 = vor.u32 %v1777_v12, %v1774_v46  ;;  %vm3947_vm15 = vcmask 57344   ;;  %v2534_v35 = vld [vmem:[#allocation2 + $0x90] sm:$0xe] }
 0x195   : > { %v1880_v18 = vsel %vm6667_vm14, %v1875_v50, %v1879_v2  ;;  %v339_v27 = vsel %vm6573_vm3, 0, %v338_v32  ;;  %v3643_v13 = vsel %vm3617_vm11, %v3610_v36, %v3269_v58  ;;  %v1890_v41 = vsel %vm6667_vm14, %v1885_v1, %v1889_v54  ;;  %3948 = vst.msk [vmem:[#allocation3 + $0x4] sm:$0x1] %vm3947_vm15, %v6465_v4  ;;  %v2113_v32 = vld [vmem:[#allocation2 + $0x94] sm:$0xf] }
 0x196   : > { %v3349_v40 = vpop.permute.xlu1 %3348  ;;  %v3048_v48 = vunpack.c.l.b16 %v1880_v18  ;;  %v1788_v5 = vor.u32 %v1787_v42, %v1783_v28  ;;  %v3049_v6 = vunpack.c.l.b16 %v1890_v41  ;;  %v1779_v45 = vrot.slane %v1778_v21, 4  ;;  %3951 = vst.msk [vmem:[#allocation3 + $0x4c] sm:$0x1] %vm3947_vm15, %v6465_v4 }
 0x197   : > { %v1793_v24 = vrot.slane %v1791_v11, 5  ;;  %v3867_v60 = vmax.f32 %v7858_v63, %v3794_v33  ;;  %vm8825_vm10 = vsmask.f32 7938  ;;  %340 = vst [vmem:[#allocation2 + $0xc0] sm:$0x1] %v339_v27  ;;  %v690_v62 = vshrl.u32 %v430_v56, 16 }
 0x198   : > { %3016 = vrot.lane.b32.xlu1 %v6283_v57, %s6466_s18  ;;  %vm7919_vm9 = vmand %vm3947_vm15, %vm8825_vm10  ;;  %2920 = vrot.lane.b32.xlu2 %v2890_v26, %s6468_s20  ;;  %v1789_v36 = vrot.slane %v1788_v5, 4  ;;  %v693_v63 = vshll.u32 %v430_v56, 16  ;;  %v3142_v51 = vpack.c.b16 %v3121_v20, %v3120_v30  ;;  %v3066_v34 = vpack.c.b16 %v3049_v6, %v3048_v48  ;;  %v7941_v57 = vld [vmem:[#allocation2 + $0x98] sm:$0x1]  ;;  %v3796_v42 = vpop.f32.mrf.mxu0  ;;  %v2112_v33 = vld [vmem:[#allocation2 + $0x90] sm:$0xf]  ;;  %v7962_v6 = vpop.permute.xlu2 %3254 }
 0x199   : > { %v3989_v17 = vsel %vm7919_vm9, 0, %v3988_v22  ;;  %v1784_v2 = vsel %vm6667_vm14, %v1779_v45, %v1783_v28  ;;  %3883 = vst.msk [vmem:[#allocation5 + $0x8] sm:$0xff] %vm3485_vm0, %v3867_v60  ;;  %v698_v43 = vshrl.u32 %v431_v10, 16  ;;  %v692_v37 = vrot.slane %v690_v62, 7 }
 0x19a   : > { %v3341_v53 = vpop.permute.xlu0 %3340  ;;  %v1794_v55 = vsel %vm6667_vm14, %v1789_v36, %v1793_v24  ;;  %v3040_v26 = vunpack.c.l.b16 %v1784_v2  ;;  %3990 = vst [vmem:[#allocation3 + $0xc] sm:$0x1] %v3989_v17  ;;  %v701_v16 = vshll.u32 %v431_v10, 16  ;;  %v5847_v7 = vrot.slane %v1929_v61, 9 }
 0x19b   : > { %v3041_v15 = vunpack.c.l.b16 %v1794_v55  ;;  %v7933_v29 = vrot.slane %v698_v43, 7  ;;  %v2079_v30 = vrot.slane %v7872_v47, 5  ;;  %v3635_v31 = vsel %vm3617_vm11, %v7852_v8, %v7887_v39  ;;  %v899_v55 = vld [vmem:[#allocation2 + $0xb4] sm:$0xf] }
 0x19c   : > { %3096 = vrot.lane.b32.xlu0 %v3066_v34, %s6472_s29  ;;  %v695_v54 = vor.u32 %v693_v63, %v692_v37  ;;  %v696_v46 = vrot.slane %v692_v37, 4  ;;  %v2082_v9 = vrot.slane %v7881_v59, 5  ;;  %v3676_v20 = vsel %vm3650_vm13, %v3643_v13, %v3349_v40  ;;  %v6295_v40 = vld [vmem:[#allocation2 + $0x90] sm:$0xff] }
 0x19d   : > { %v3062_v50 = vpack.c.b16 %v3041_v15, %v3040_v26  ;;  %v703_v12 = vor.u32 %v701_v16, %v7933_v29  ;;  %v2080_v28 = vsel %vm6644_vm12, %v5847_v7, %v2079_v30  ;;  %v2081_v1 = vrot.slane %v2079_v30, 4 }
 0x19e   : > { %v3429_v47 = vpop.permute.xlu1 %3428  ;;  %v3128_v8 = vunpack.c.l.b16 %v2080_v28  ;;  %v5859_v11 = vrot.slane %v2534_v35, 9  ;;  %v862_v18 = vld [vmem:[#allocation2 + $0xc0] sm:$0xf]  ;;  %v2660_v21 = vrot.slane %v2113_v32, 5  ;;  %v2663_v22 = vrot.slane %v7941_v57, 5 }
 0x19f   : > { %v3709_v39 = vsel %vm3683_vm1, %v3676_v20, %v3429_v47  ;;  %v704_v59 = vsel %vm6602_vm6, %v696_v46, %v703_v12  ;;  %v395_v27 = vsel %vm6618_vm8, 0, %v394_v49  ;;  %v3668_v56 = vsel %vm3650_vm13, %v3635_v31, %v3341_v53 }
 0x1a0   : > { %3168 = vrot.lane.b32.xlu1 %v3142_v51, %s6470_s22  ;;  %6077 = vmatmul.msk.bf16.gmra.mxu3 %vm3740_vm4, %v3709_v39  ;;  %v3898_v13 = vld [vmem:[#allocation5] ss:$2 sm:$0xff]  ;;  %v3914_v41 = vld [vmem:[#allocation5 + $0x1] ss:$2 sm:$0xff]  ;;  %v863_v14 = vsel %vm6612_vm7, %v695_v54, %v862_v18  ;;  %865 = vst.msk [vmem:[#allocation2 + $0xc4] sm:$0xf] %vm278_vm2, %v704_v59  ;;  %v2083_v5 = vsel %vm6644_vm12, %v2081_v1, %v2082_v9  ;;  %v7987_v28 = vpop.f32.mrf.mxu0 }
 0x1a1   : > { %3088 = vrot.lane.b32.xlu2 %v3062_v50, %s6472_s29  ;;  %v3929_v10 = vmax.f32 %v3898_v13, %v3914_v41  ;;  %864 = vst [vmem:[#allocation2 + $0xc0] sm:$0xf] %v863_v14  ;;  %v3129_v45 = vunpack.c.l.b16 %v2083_v5  ;;  %v2661_v60 = vsel %vm6644_vm12, %v5859_v11, %v2660_v21  ;;  %v2662_v19 = vrot.slane %v2660_v21, 4  ;;  %v4109_v59 = vld [vmem:[#allocation3 + $0xc] sm:$0x1] }
 0x1a2   : > { %v3421_v48 = vpop.permute.xlu0 %3420  ;;  %396 = vst [vmem:[#allocation2 + $0xc8] sm:$0x1] %v395_v27  ;;  %v2381_v61 = vshrl.u32 %v2112_v33, 16  ;;  %v2384_v53 = vshll.u32 %v2112_v33, 16  ;;  %v3530_v36 = vsel %vm3518_vm5, %v7869_v38, %v7914_v44  ;;  %v2390_v63 = vshll.u32 %v2113_v32, 16 }
 0x1a3   : > { %v3701_v24 = vsel %vm3683_vm1, %v3668_v56, %v3421_v48  ;;  %v3937_v17 = vmax.f32 %v3929_v10, 0.0  ;;  %v3146_v62 = vpack.c.b16 %v3129_v45, %v3128_v8  ;;  %v2664_v51 = vsel %vm6644_vm12, %v2662_v19, %v2663_v22  ;;  %v900_v33 = vld [vmem:[#allocation2 + $0xb8] sm:$0xf]  ;;  %v7995_v56 = vpop.permute.xlu2 %2830 }
 0x1a4   : > { %6073 = vmatmul.msk.bf16.gmra.mxu2 %vm3740_vm4, %v3701_v24  ;;  %3264 = vrot.lane.b32.xlu0 %v6295_v40, %s6467_s19  ;;  %v2383_v34 = vrot.slane %v2381_v61, 4  ;;  %v2386_v2 = vrot.slane %v2384_v53, 5  ;;  %v2394_v43 = vshrl.u32 %v2113_v32, 16  ;;  %v3376_v37 = vunpack.c.l.b16 %v2661_v60  ;;  %v916_v24 = vld [vmem:[#allocation2 + $0xbc] sm:$0x1] }
 0x1a5   : > { %v7974_v26 = vpack.c.bf16 %v3937_v17, %v3937_v17  ;;  %v3377_v16 = vunpack.c.l.b16 %v2664_v51  ;;  %v2392_v15 = vrot.slane %v2390_v63, 5  ;;  %v705_v38 = vrot.slane %v7933_v29, 4 }
 0x1a6   : > { %v3159_v49 = vpop.permute.xlu1 %3158  ;;  %v2387_v44 = vor.u32 %v2386_v2, %v2383_v34  ;;  %v2396_v7 = vrot.slane %v2394_v43, 4  ;;  %v2400_v30 = vshll.u32 %v7941_v57, 16  ;;  %v7980_v31 = vadd.f32 %v7799_v3, %v3796_v42 }
 0x1a7   : > { %v4024_v35 = vshrl.u32 %v7974_v26, 16  ;;  %v7982_v54 = vld [vmem:[#allocation2 + $0xc4] sm:$0xf]  ;;  %v1281_v46 = vshrl.u32 %v899_v55, 16  ;;  %v1284_v9 = vshll.u32 %v899_v55, 16  ;;  %v3398_v8 = vpack.c.b16 %v3377_v16, %v3376_v37 }
 0x1a8   : > { %v6299_v32 = vld [vmem:[#allocation2 + $0xc0] sm:$0xff]  ;;  %v2486_v50 = vshll.u32 %v7982_v54, 16  ;;  %v2490_v29 = vshrl.u32 %v7982_v54, 16  ;;  %v2388_v47 = vrot.slane %v2387_v44, 4  ;;  %v2397_v57 = vor.u32 %v2396_v7, %v2392_v15 }
 0x1a9   : > { %3176 = vrot.lane.b32.xlu2 %v3146_v62, %s6470_s22  ;;  %v2120_v20 = vld [vmem:[#allocation2 + $0xc0] sm:$0xf]  ;;  %v7989_v1 = vrot.slane %v4024_v35, 7  ;;  %v866_v39 = vld [vmem:[#allocation2 + $0xc8] sm:$0x1]  ;;  %3272 = vrot.lane.b32.xlu1 %v6299_v32, %s6467_s19  ;;  %v2402_v22 = vrot.slane %v2400_v30, 5 }
 0x1aa   : > { %v3079_v12 = vpop.permute.xlu0 %3078  ;;  %v2477_v42 = vshrl.u32 %v2120_v20, 16  ;;  %v2480_v11 = vshll.u32 %v2120_v20, 16  ;;  %v867_v18 = vsel %vm6573_vm3, %v705_v38, %v866_v39  ;;  %v2488_v40 = vrot.slane %v2486_v50, 5  ;;  %v2538_v32 = vld [vmem:[#allocation2 + $0xc0] sm:$0xe] }
 0x1ab   : > { %v2492_v21 = vrot.slane %v2490_v29, 4  ;;  %v4030_v27 = vrot.slane %v7989_v1, 4  ;;  %868 = vst [vmem:[#allocation2 + $0xc8] sm:$0x1] %v867_v18  ;;  %vm8828_vm2 = vcmask 130048   ;;  %v2393_v10 = vsel %vm6667_vm14, %v2388_v47, %v2392_v15 }
 0x1ac   : > { %v2479_v13 = vrot.slane %v2477_v42, 4  ;;  %v2482_v41 = vrot.slane %v2480_v11, 5  ;;  %v3563_v14 = vsel %vm8828_vm2, %v3530_v36, %v3079_v12  ;;  %vm8829_vm6 = vsmask.f32 256  ;;  %v1319_v36 = vld [vmem:[#allocation2 + $0xb4] sm:$0xe] }
 0x1ad   : > { %vm8000_vm7 = vmand %vm3947_vm15, %vm8829_vm6  ;;  %v2493_v5 = vor.u32 %v2492_v21, %v2488_v40  ;;  %v2398_v45 = vrot.slane %v2397_v57, 4  ;;  %v1283_v60 = vrot.slane %v1281_v46, 4  ;;  %v3296_v53 = vunpack.c.l.b16 %v2393_v10  ;;  %v3801_v57 = vpop.f32.mrf.mxu0 }
 0x1ae   : > { %v4110_v19 = vsel %vm8000_vm7, %v4030_v27, %v4109_v59  ;;  %v2483_v61 = vor.u32 %v2482_v41, %v2479_v13  ;;  %v1286_v17 = vrot.slane %v1284_v9, 5  ;;  %vm8832_vm10 = vcmask 162816   ;;  %v3415_v16 = vpop.permute.xlu1 %3414 }
 0x1af   : > { %4111 = vst [vmem:[#allocation3 + $0xc] sm:$0x1] %v4110_v19  ;;  %v3596_v62 = vsel %vm8832_vm10, %v3563_v14, %v3159_v49  ;;  %v2403_v63 = vsel %vm6667_vm14, %v2398_v45, %v2402_v22  ;;  %v1290_v51 = vshll.u32 %v900_v33, 16  ;;  %v1294_v34 = vshrl.u32 %v900_v33, 16  ;;  %v8021_v22 = vpop.permute.xlu2 %2918 }
 0x1b0   : > { %v2484_v2 = vrot.slane %v2483_v61, 4  ;;  %v3297_v43 = vunpack.c.l.b16 %v2403_v63  ;;  %v1287_v55 = vor.u32 %v1286_v17, %v1283_v60  ;;  %v1300_v37 = vshll.u32 %v916_v24, 16 }
 0x1b1   : > { %v1292_v15 = vrot.slane %v1290_v51, 5  ;;  %v1296_v38 = vrot.slane %v1294_v34, 4  ;;  %v5832_v44 = vrot.slane %v1319_v36, 9  ;;  %v1478_v7 = vrot.slane %v900_v33, 5  ;;  %3424 = vrot.lane.b32.xlu1 %v3398_v8, %s6471_s23  ;;  %v1930_v51 = vld [vmem:[#allocation2 + $0xc0] sm:$0xe] }
 0x1b2   : > { %v3335_v30 = vpop.permute.xlu0 %3334  ;;  %v2489_v35 = vsel %vm6667_vm14, %v2484_v2, %v2488_v40  ;;  %v2494_v46 = vrot.slane %v2493_v5, 4  ;;  %v3318_v49 = vpack.c.b16 %v3297_v43, %v3296_v53  ;;  %v1288_v9 = vrot.slane %v1287_v55, 4  ;;  %v2138_v20 = vld [vmem:[#allocation2 + $0xc8] sm:$0x1]  ;;  %v1514_v53 = vld [vmem:[#allocation2 + $0xc4] sm:$0xf] }
 0x1b3   : > { %v1297_v50 = vor.u32 %v1296_v38, %v1292_v15  ;;  %v1302_v29 = vrot.slane %v1300_v37, 5  ;;  %v1479_v12 = vsel %vm6644_vm12, %v5832_v44, %v1478_v7  ;;  %v1480_v47 = vrot.slane %v1478_v7, 4  ;;  %v1530_v63 = vld [vmem:[#allocation2 + $0xc8] sm:$0x1] }
 0x1b4   : > { %v2496_v39 = vshll.u32 %v2138_v20, 16  ;;  %v3304_v42 = vunpack.c.l.b16 %v2489_v35  ;;  %3344 = vrot.lane.b32.xlu2 %v3318_v49, %s6473_s8  ;;  %v1293_v11 = vsel %vm6667_vm14, %v1288_v9, %v1292_v15  ;;  %v1481_v33 = vrot.slane %v916_v24, 5  ;;  %v1513_v24 = vld [vmem:[#allocation2 + $0xc0] sm:$0xf] }
 0x1b5   : > { %v1298_v59 = vrot.slane %v1297_v50, 4  ;;  %v2874_v18 = vunpack.c.l.b16 %v1479_v12  ;;  %v3629_v8 = vsel %vm3617_vm11, %v3596_v62, %v7962_v6  ;;  %v5863_v40 = vrot.slane %v2538_v32, 9  ;;  %v3803_v50 = vpop.f32.mrf.mxu0 }
 0x1b6   : > { %v2498_v21 = vrot.slane %v2496_v39, 5  ;;  %v1482_v27 = vsel %vm6644_vm12, %v1480_v47, %v1481_v33  ;;  %v3662_v13 = vsel %vm3650_vm13, %v3629_v8, %v3335_v30  ;;  %v2688_v41 = vrot.slane %v7982_v54, 5  ;;  %v8042_v15 = vpop.permute.xlu1 %2910 }
 0x1b7   : > { %v1303_v14 = vsel %vm6667_vm14, %v1298_v59, %v1302_v29  ;;  %v2875_v5 = vunpack.c.l.b16 %v1482_v27  ;;  %v2691_v10 = vrot.slane %v2138_v20, 5  ;;  %v3802_v45 = vadd.f32 %v7799_v3, %v3801_v57  ;;  %v3991_v29 = vld [vmem:[#allocation3 + $0x14] sm:$0x1] }
 0x1b8   : > { %v2499_v6 = vsel %vm6667_vm14, %v2494_v46, %v2498_v21  ;;  %v8032_v60 = vunpack.c.l.b16 %v1293_v11  ;;  %v2689_v19 = vsel %vm6644_vm12, %v5863_v40, %v2688_v41  ;;  %v2690_v61 = vrot.slane %v2688_v41, 4  ;;  %v397_v11 = vld [vmem:[#allocation2 + $0xd4] sm:$0x1]  ;;  %v2123_v40 = vld [vmem:[#allocation2 + $0xd0] sm:$0xf]  ;;  %v8054_v21 = vpop.permute.xlu2 %3086 }
 0x1b9   : > { %v3305_v17 = vunpack.c.l.b16 %v2499_v6  ;;  %v2891_v54 = vpack.c.b16 %v2875_v5, %v2874_v18  ;;  %v3384_v36 = vunpack.c.l.b16 %v2689_v19  ;;  %v3868_v62 = vmax.f32 %v7980_v31, %v3802_v45 }
 0x1ba   : > { %v8037_v34 = vpop.permute.xlu0 %2838  ;;  %v2795_v2 = vunpack.c.l.b16 %v1303_v14  ;;  %v2692_v43 = vsel %vm6644_vm12, %v2690_v61, %v2691_v10  ;;  %v3695_v55 = vsel %vm3683_vm1, %v3662_v13, %v3415_v16  ;;  %v1892_v37 = vshrl.u32 %v1513_v24, 16  ;;  %v2539_v61 = vld [vmem:[#allocation2 + $0xcc] sm:$0xe] }
 0x1bb   : > { %v3322_v38 = vpack.c.b16 %v3305_v17, %v3304_v42  ;;  %2922 = vrot.lane.b32.xlu1 %v2891_v54, %s6468_s20  ;;  %v3385_v44 = vunpack.c.l.b16 %v2692_v43  ;;  %3884 = vst.msk [vmem:[#allocation5 + $0x10] sm:$0xff] %vm3485_vm0, %v3868_v62  ;;  %6070 = vmatmul.msk.bf16.gmra.mxu0 %vm3740_vm4, %v3695_v55  ;;  %v1895_v31 = vshll.u32 %v1513_v24, 16  ;;  %v1901_v7 = vshll.u32 %v1514_v53, 16  ;;  %v341_v42 = vld [vmem:[#allocation2 + $0xcc] sm:$0x1]  ;;  %v6284_v17 = vld [vmem:[#allocation2 + $0xc0] sm:$0xff] }
 0x1bc   : > { %v1894_v30 = vrot.slane %v1892_v37, 4  ;;  %v1905_v35 = vshrl.u32 %v1514_v53, 16  ;;  %v1911_v46 = vshll.u32 %v1530_v63, 16  ;;  %v5848_v49 = vrot.slane %v1930_v51, 9  ;;  %v3957_v37 = vld [vmem:[#allocation3 + $0x8] sm:$0x1] }
 0x1bd   : > { %3352 = vrot.lane.b32.xlu0 %v3322_v38, %s6473_s8  ;;  %v3402_v16 = vpack.c.b16 %v3385_v44, %v3384_v36  ;;  %v1897_v9 = vrot.slane %v1895_v31, 5  ;;  %v1903_v32 = vrot.slane %v1901_v7, 5  ;;  %v2086_v20 = vrot.slane %v1514_v53, 5  ;;  %v3985_v38 = vld [vmem:[#allocation3 + $0x4] sm:$0x1] }
 0x1be   : > { %v3799_v12 = vadd.f32 %v7799_v3, %v7987_v28  ;;  %v2811_v47 = vpack.c.b16 %v2795_v2, %v8032_v60  ;;  %v1907_v57 = vrot.slane %v1905_v35, 4  ;;  %v2089_v39 = vrot.slane %v1530_v63, 5  ;;  %v8074_v63 = vpop.permute.xlu1 %3014 }
 0x1bf   : > { %3432 = vrot.lane.b32.xlu2 %v3402_v16, %s6471_s23  ;;  %v1898_v33 = vor.u32 %v1897_v9, %v1894_v30  ;;  %v1913_v59 = vrot.slane %v1911_v46, 5  ;;  %v2087_v18 = vsel %vm6644_vm12, %v5848_v49, %v2086_v20  ;;  %v2088_v8 = vrot.slane %v2086_v20, 4 }
 0x1c0   : > { %v1908_v27 = vor.u32 %v1907_v57, %v1903_v32  ;;  %v3130_v13 = vunpack.c.l.b16 %v2087_v18  ;;  %v3804_v28 = vadd.f32 %v7799_v3, %v3803_v50  ;;  %v3992_v41 = vsel %vm7919_vm9, 0, %v3991_v29 }
 0x1c1   : > { %v1899_v14 = vrot.slane %v1898_v33, 4  ;;  %v2090_v5 = vsel %vm6644_vm12, %v2088_v8, %v2089_v39  ;;  %3993 = vst [vmem:[#allocation3 + $0x14] sm:$0x1] %v3992_v41  ;;  %v342_v10 = vsel %vm6573_vm3, 0, %v341_v42  ;;  %v398_v45 = vsel %vm6618_vm8, 0, %v397_v11 }
 0x1c2   : > { %v8065_v24 = vpop.permute.xlu0 %3006  ;;  %v1909_v6 = vrot.slane %v1908_v27, 4  ;;  %v3131_v60 = vunpack.c.l.b16 %v2090_v5  ;;  %v3869_v19 = vmax.f32 %v3799_v12, %v3804_v28  ;;  %343 = vst [vmem:[#allocation2 + $0xcc] sm:$0x1] %v342_v10  ;;  %v2510_v3 = vshll.u32 %v2123_v40, 16 }
 0x1c3   : > { %v1904_v53 = vsel %vm6667_vm14, %v1899_v14, %v1903_v32  ;;  %399 = vst [vmem:[#allocation2 + $0xd4] sm:$0x1] %v398_v45  ;;  %v2514_v54 = vshrl.u32 %v2123_v40, 16  ;;  %v2695_v62 = vrot.slane %v2123_v40, 5  ;;  %v5864_v55 = vrot.slane %v2539_v61, 9 }
 0x1c4   : > { %v1914_v0 = vsel %vm6667_vm14, %v1909_v6, %v1913_v59  ;;  %v3147_v36 = vpack.c.b16 %v3131_v60, %v3130_v13  ;;  %3885 = vst.msk [vmem:[#allocation5 + $0x18] sm:$0xff] %vm3485_vm0, %v3869_v19  ;;  %v8072_v23 = vrot.slane %v2510_v3, 5  ;;  %v3050_v51 = vunpack.c.l.b16 %v1904_v53  ;;  %v3960_v13 = vld [vmem:[#allocation3 + $0x10] sm:$0x1] }
 0x1c5   : > { %2842 = vrot.lane.b32.xlu0 %v2811_v47, %s6469_s21  ;;  %v3051_v2 = vunpack.c.l.b16 %v1914_v0  ;;  %v2516_v43 = vrot.slane %v2514_v54, 4  ;;  %vm3945_vm3 = vcmask 60416   ;;  %v4027_v31 = vshll.u32 %v7974_v26, 16  ;;  %v8091_v26 = vpop.permute.xlu2 %3174 }
 0x1c6   : > { %3178 = vrot.lane.b32.xlu1 %v3147_v36, %s6470_s22  ;;  %v2697_v7 = vrot.slane %v2695_v62, 4  ;;  %3946 = vst.msk [vmem:[#allocation3] sm:$0xf] %vm3945_vm3, %v6465_v4  ;;  %v3958_v30 = vsel %vm8000_vm7, 0, %v3957_v37  ;;  %v3986_v35 = vsel %vm7919_vm9, 0, %v3985_v38  ;;  %v2696_v9 = vsel %vm6644_vm12, %v5864_v55, %v2695_v62  ;;  %v8105_v10 = vpop.permute.xlu1 %3166  ;;  %s6475_s22 = smov 48  }
 0x1c7   : > { %3018 = vrot.lane.b32.xlu2 %v6284_v17, %s6466_s18  ;;  %v2517_v44 = vor.u32 %v2516_v43, %v8072_v23  ;;  %v3067_v46 = vpack.c.b16 %v3051_v2, %v3050_v51  ;;  %3959 = vst [vmem:[#allocation3 + $0x8] sm:$0x1] %v3958_v30  ;;  %v3386_v18 = vunpack.c.l.b16 %v2696_v9  ;;  %v4029_v8 = vor.u32 %v4027_v31, %v7989_v1  ;;  %v6262_v51 = vld [vmem:[#allocation2 + $0x6c] sm:$0xff]  ;;  %v6266_v2 = vld [vmem:[#allocation2 + $0x9c] sm:$0xff] }
 0x1c8   : > { %3987 = vst [vmem:[#allocation3 + $0x4] sm:$0x1] %v3986_v35  ;;  %vm8833_vm8 = vsmask.f32 7938  ;;  %v3961_v1 = vsel %vm8000_vm7, 0, %v3960_v13  ;;  %vm8836_vm2 = vcmask 31744  }
 0x1c9   : > { %v2122_v49 = vld [vmem:[#allocation2 + $0xcc] sm:$0xf]  ;;  %v2518_v16 = vrot.slane %v2517_v44, 4  ;;  %3950 = vst.msk [vmem:[#allocation3 + $0x48] sm:$0xf] %vm3945_vm3, %v6465_v4  ;;  %vm8101_vm15 = vmand %vm3945_vm3, %vm8833_vm8  ;;  %vm8838_vm10 = vcmask 130048  }
 0x1ca   : > { %v6300_v32 = vld [vmem:[#allocation2 + $0xcc] sm:$0xff]  ;;  %v8089_v20 = vpop.permute.xlu0 %3094  ;;  %v2139_v50 = vld [vmem:[#allocation2 + $0xd4] sm:$0x1]  ;;  %v2501_v29 = vshrl.u32 %v2122_v49, 16  ;;  %v2504_v12 = vshll.u32 %v2122_v49, 16  ;;  %vm8837_vm6 = vmmov %vm8836_vm2  ;;  %vm8839_vm3 = vcmask 162816  }
 0x1cb   : > { %v3900_v47 = vld [vmem:[#allocation5 + $0x10] ss:$2 sm:$0xff]  ;;  %v3916_v57 = vld [vmem:[#allocation5 + $0x11] ss:$2 sm:$0xff]  ;;  %v2520_v39 = vshll.u32 %v2139_v50, 16  ;;  %v2698_v42 = vrot.slane %v2139_v50, 5  ;;  %vm8840_vm8 = vmmov %vm8838_vm10 }
 0x1cc   : > { %v3930_v11 = vmax.f32 %v3900_v47, %v3916_v57  ;;  %v2503_v33 = vrot.slane %v2501_v29, 4  ;;  %v2506_v59 = vrot.slane %v2504_v12, 5  ;;  %3962 = vst [vmem:[#allocation3 + $0x10] sm:$0x1] %v3961_v1  ;;  %v4115_v35 = vld [vmem:[#allocation3 + $0x14] sm:$0x1] }
 0x1cd   : > { %3098 = vrot.lane.b32.xlu0 %v3067_v46, %s6472_s29  ;;  %v2522_v40 = vrot.slane %v2520_v39, 5  ;;  %v2699_v27 = vsel %vm6644_vm12, %v2697_v7, %v2698_v42  ;;  %v3954_v6 = vld [vmem:[#allocation3] sm:$0x1]  ;;  %v4282_v0 = vld [vmem:[#allocation3] sm:$0xe]  ;;  %v8124_v31 = vpop.permute.xlu2 %2824 }
 0x1ce   : > { %v3938_v28 = vmax.f32 %v3930_v11, 0.0  ;;  %v2507_v41 = vor.u32 %v2506_v59, %v2503_v33  ;;  %v3387_v14 = vunpack.c.l.b16 %v2699_v27  ;;  %v4106_v61 = vld [vmem:[#allocation3 + $0x8] sm:$0xf]  ;;  %v3955_v36 = vsel %vm8000_vm7, 0, %v3954_v6  ;;  %v4163_v49 = vld [vmem:[#allocation3 + $0xc] sm:$0x1] }
 0x1cf   : > { %v2523_v45 = vsel %vm6667_vm14, %v2518_v16, %v2522_v40  ;;  %3274 = vrot.lane.b32.xlu2 %v6300_v32, %s6467_s19  ;;  %v4107_v17 = vsel %vm8101_vm15, %v4029_v8, %v4106_v61  ;;  %v8114_v54 = vld [vmem:[#allocation3 + $0x4] sm:$0x1]  ;;  %3956 = vst [vmem:[#allocation3] sm:$0x1] %v3955_v36  ;;  %v6081_v7 = vrot.slane %v4282_v0, 9  ;;  %v3466_v16 = vsel %vm8836_vm2, %v6262_v51, %v7995_v56  ;;  %v8136_v57 = vpop.permute.xlu1 %3270  ;;  %vm8841_vm2 = vmmov %vm8839_vm3 }
 0x1d0   : > { %v4016_v60 = vpack.c.bf16 %v3938_v28, %v3938_v28  ;;  %v2508_v19 = vrot.slane %v2507_v41, 4  ;;  %v3403_v3 = vpack.c.b16 %v3387_v14, %v3386_v18  ;;  %v3307_v53 = vunpack.c.l.b16 %v2523_v45  ;;  %4108 = vst [vmem:[#allocation3 + $0x8] sm:$0xf] %v4107_v17  ;;  %v8144_v59 = vld [vmem:[#allocation3 + $0xc] sm:$0x1] }
 0x1d1   : > { %v4308_v30 = vrot.slane %v8114_v54, 5  ;;  %v4312_v47 = vrot.slane %v4163_v49, 5  ;;  %v4194_v6 = vshll.u32 %v4163_v49, 16 }
 0x1d2   : > { %v8118_v62 = vpop.permute.xlu0 %3262  ;;  %v4032_v43 = vshrl.u32 %v4016_v60, 16  ;;  %v2513_v55 = vsel %vm6667_vm14, %v2508_v19, %v8072_v23  ;;  %3434 = vrot.lane.b32.xlu1 %v3403_v3, %s6471_s23  ;;  %v4035_v44 = vshll.u32 %v4016_v60, 16  ;;  %v3478_v23 = vsel %vm8837_vm6, %v6266_v2, %v8037_v34 }
 0x1d3   : > { %v3306_v37 = vunpack.c.l.b16 %v2513_v55  ;;  %v4112_v50 = vld [vmem:[#allocation3 + $0x10] sm:$0xf]  ;;  %v4309_v12 = vsel %vm6644_vm12, %v6081_v7, %v4308_v30  ;;  %v3505_v34 = vsel %vm3485_vm0, %v3466_v16, %v8042_v15  ;;  %v3513_v39 = vsel %vm3485_vm0, %v3478_v23, %v8021_v22 }
 0x1d4   : > { %v4034_v38 = vrot.slane %v4032_v43, 7  ;;  %v3538_v18 = vsel %vm3518_vm5, %v3505_v34, %v8065_v24  ;;  %v4747_v28 = vunpack.c.l.b16 %v4309_v12  ;;  %v4180_v15 = vshll.u32 %v8114_v54, 16 }
 0x1d5   : > { %v3323_v46 = vpack.c.b16 %v3307_v53, %v3306_v37  ;;  %v3571_v24 = vsel %vm8838_vm10, %v3538_v18, %v8054_v21  ;;  %v8155_v0 = vpop.permute.xlu2 %2904  ;;  %v4492_v54 = vrot.slane %v8144_v59, 5  ;;  %v3546_v37 = vsel %vm3518_vm5, %v3513_v39, %v8074_v63  ;;  %vm8842_vm10 = vmmov %vm8840_vm8 }
 0x1d6   : > { %v4037_v9 = vor.u32 %v4035_v44, %v4034_v38  ;;  %v4038_v32 = vrot.slane %v4034_v38, 4  ;;  %v4154_v40 = vld [vmem:[#allocation3] sm:$0xf]  ;;  %v3604_v53 = vsel %vm8839_vm3, %v3571_v24, %v8105_v10  ;;  %v4182_v43 = vrot.slane %v4180_v15, 5  ;;  %vm8843_vm3 = vmmov %vm8841_vm2 }
 0x1d7   : > { %3354 = vrot.lane.b32.xlu0 %v3323_v46, %s6473_s8  ;;  %v4283_v42 = vld [vmem:[#allocation3 + $0x8] sm:$0xe]  ;;  %v4171_v41 = vshrl.u32 %v4154_v40, 16  ;;  %v4174_v14 = vshll.u32 %v4154_v40, 16  ;;  %v4196_v21 = vrot.slane %v4194_v6, 5  ;;  %v3637_v44 = vsel %vm3617_vm11, %v3604_v53, %v8118_v62  ;;  %v6259_v40 = vld [vmem:[#allocation2 + $0x48] sm:$0xff] }
 0x1d8   : > { %v4116_v29 = vsel %vm8000_vm7, %v4038_v32, %v4115_v35  ;;  %v4113_v56 = vsel %vm8101_vm15, %v4037_v9, %v4112_v50  ;;  %v4155_v11 = vld [vmem:[#allocation3 + $0x8] sm:$0xf]  ;;  %v6082_v8 = vrot.slane %v4283_v42, 9  ;;  %v3579_v23 = vsel %vm8840_vm8, %v3546_v37, %v8089_v20  ;;  %vm8844_vm8 = vmmov %vm8837_vm6  ;;  %s6476_s8 = smov 56  }
 0x1d9   : > { %4117 = vst [vmem:[#allocation3 + $0x14] sm:$0x1] %v4116_v29  ;;  %v4185_v27 = vshrl.u32 %v4155_v11, 16  ;;  %v4188_v13 = vshll.u32 %v4155_v11, 16  ;;  %v4466_v60 = vld [vmem:[#allocation3 + $0x8] sm:$0xe]  ;;  %v3612_v11 = vsel %vm8841_vm2, %v3579_v23, %v8091_v26  ;;  %vm8845_vm2 = vmmov %vm8842_vm10 }
 0x1da   : > { %v3343_v33 = vpop.permute.xlu0 %3342  ;;  %4114 = vst [vmem:[#allocation3 + $0x10] sm:$0xf] %v4113_v56  ;;  %v4313_v22 = vsel %vm6644_vm12, %v6082_v8, %v4312_v47  ;;  %v4173_v3 = vrot.slane %v4171_v41, 4  ;;  %v4176_v61 = vrot.slane %v4174_v14, 5  ;;  %v4338_v36 = vld [vmem:[#allocation3 + $0x8] sm:$0xf]  ;;  %v3645_v26 = vsel %vm3617_vm11, %v3612_v11, %v8136_v57 }
 0x1db   : > { %v4187_v1 = vrot.slane %v4185_v27, 4  ;;  %v4190_v45 = vrot.slane %v4188_v13, 5  ;;  %v4748_v19 = vunpack.c.l.b16 %v4313_v22  ;;  %v6089_v55 = vrot.slane %v4466_v60, 9  ;;  %v6123_v35 = vld [vmem:[#allocation3 + $0x8] sm:$0xf] }
 0x1dc   : > { %v4177_v2 = vor.u32 %v4176_v61, %v4173_v3  ;;  %v3670_v30 = vsel %vm3650_vm13, %v3637_v44, %v3343_v33  ;;  %v4355_v49 = vshrl.u32 %v4338_v36, 16  ;;  %v4358_v16 = vshll.u32 %v4338_v36, 16 }
 0x1dd   : > { %v4191_v17 = vor.u32 %v4190_v45, %v4187_v1  ;;  %v4755_v51 = vpack.c.b16 %v4748_v19, %v4747_v28  ;;  %v4493_v34 = vsel %vm6644_vm12, %v6089_v55, %v4492_v54  ;;  %v4364_v41 = vshll.u32 %v8144_v59, 16  ;;  %v3001_v45 = vpop.permute.xlu2 %3000 }
 0x1de   : > { %v4178_v10 = vrot.slane %v4177_v2, 4  ;;  %v4357_v33 = vrot.slane %v4355_v49, 4  ;;  %v4360_v18 = vrot.slane %v4358_v16, 5  ;;  %v4815_v28 = vunpack.c.l.b16 %v4493_v34 }
 0x1df   : > { %v4192_v38 = vrot.slane %v4191_v17, 4  ;;  %4759 = vrot.lane.b32.xlu0 %v4755_v51, %s6472_s29  ;;  %v3457_v3 = vsel %vm8837_vm6, %v6259_v40, %v8124_v31  ;;  %v4366_v17 = vrot.slane %v4364_v41, 5  ;;  %vm8846_vm6 = vmmov %vm8843_vm3 }
 0x1e0   : > { %v4347_v7 = vld [vmem:[#allocation3 + $0x14] sm:$0x1]  ;;  %v4183_v12 = vsel %vm6667_vm14, %v4178_v10, %v4182_v43  ;;  %v4361_v15 = vor.u32 %v4360_v18, %v4357_v33  ;;  %v3499_v57 = vsel %vm3485_vm0, %v3457_v3, %v8155_v0 }
 0x1e1   : > { %v4197_v63 = vsel %vm6667_vm14, %v4192_v38, %v4196_v21  ;;  %v6307_v32 = vld [vmem:[#allocation3 + $0xc] sm:$0xf0]  ;;  %v4496_v29 = vrot.slane %v4347_v7, 5  ;;  %v4727_v39 = vunpack.c.l.b16 %v4183_v12  ;;  %v4378_v24 = vshll.u32 %v4347_v7, 16 }
 0x1e2   : > { %v3423_v46 = vpop.permute.xlu0 %3422  ;;  %v3351_v9 = vpop.permute.xlu1 %3350  ;;  %v4467_v50 = vld [vmem:[#allocation3 + $0x10] sm:$0xe]  ;;  %v4728_v47 = vunpack.c.l.b16 %v4197_v63  ;;  %v6124_v56 = vor.u32 %v6307_v32, %v6123_v35  ;;  %v4362_v60 = vrot.slane %v4361_v15, 4  ;;  %v3532_v55 = vsel %vm3518_vm5, %v3499_v57, %v3001_v45 }
 0x1e3   : > { %v3703_v62 = vsel %vm3683_vm1, %v3670_v30, %v3423_v46  ;;  %v4339_v20 = vld [vmem:[#allocation3 + $0x10] sm:$0xf]  ;;  %v6090_v42 = vrot.slane %v4467_v50, 9  ;;  %v3678_v61 = vsel %vm3650_vm13, %v3645_v26, %v3351_v9  ;;  %v4380_v31 = vrot.slane %v4378_v24, 5 }
 0x1e4   : > { %6074 = vmatmul.msk.bf16.gmra.mxu2 %vm3740_vm4, %v3703_v62  ;;  %4787 = vrot.lane.b32.xlu1 %v6124_v56, %s6467_s19  ;;  %v4369_v8 = vshrl.u32 %v4339_v20, 16  ;;  %v4735_v27 = vpack.c.b16 %v4728_v47, %v4727_v39  ;;  %v4372_v1 = vshll.u32 %v4339_v20, 16  ;;  %v4367_v36 = vsel %vm6667_vm14, %v4362_v60, %v4366_v17  ;;  %v6263_v47 = vld [vmem:[#allocation2 + $0x78] sm:$0xff]  ;;  %v6267_v18 = vld [vmem:[#allocation2 + $0xa8] sm:$0xff] }
 0x1e5   : > { %v4497_v13 = vsel %vm6644_vm12, %v6090_v42, %v4496_v29  ;;  %v8196_v37 = vunpack.c.l.b16 %v4367_v36  ;;  %v3257_v44 = vpop.permute.xlu2 %3256 }
 0x1e6   : > { %v4816_v14 = vunpack.c.l.b16 %v4497_v13  ;;  %v4371_v22 = vrot.slane %v4369_v8, 4  ;;  %4739 = vrot.lane.b32.xlu2 %v4735_v27, %s6468_s20  ;;  %v4374_v19 = vrot.slane %v4372_v1, 5 }
 0x1e8   : > { %v4823_v6 = vpack.c.b16 %v4816_v14, %v4815_v28  ;;  %v4375_v54 = vor.u32 %v4374_v19, %v4371_v22  ;;  %v3806_v15 = vpop.f32.mrf.mxu0 }
 0x1ea   : > { %v3431_v59 = vpop.permute.xlu1 %3430  ;;  %4827 = vrot.lane.b32.xlu0 %v4823_v6, %s6474_s17  ;;  %v4376_v51 = vrot.slane %v4375_v54, 4  ;;  %v3994_v54 = vld [vmem:[#allocation3 + $0x1c] sm:$0x1] }
 0x1eb   : > { %v3711_v53 = vsel %vm3683_vm1, %v3678_v61, %v3431_v59  ;;  %v3995_v57 = vsel %vm7919_vm9, 0, %v3994_v54 }
 0x1ec   : > { %6078 = vmatmul.msk.bf16.gmra.mxu3 %vm3740_vm4, %v3711_v53  ;;  %v4381_v43 = vsel %vm6667_vm14, %v4376_v51, %v4380_v31  ;;  %v6268_v53 = vld [vmem:[#allocation2 + $0xb4] sm:$0xff]  ;;  %3996 = vst [vmem:[#allocation3 + $0x1c] sm:$0x1] %v3995_v57 }
 0x1ed   : > { %v8198_v38 = vunpack.c.l.b16 %v4381_v43  ;;  %v2833_v23 = vpop.permute.xlu2 %2832 }
 0x1ee   : > { %v3081_v2 = vpop.permute.xlu0 %3080  ;;  %v3469_v34 = vsel %vm8844_vm8, %v6263_v47, %v2833_v23 }
 0x1ef   : > { %v3565_v21 = vsel %vm8842_vm10, %v3532_v55, %v3081_v2  ;;  %v4803_v0 = vpack.c.b16 %v8198_v38, %v8196_v37  ;;  %vm8847_vm10 = vmmov %vm8844_vm8  ;;  %v8232_v2 = vld [vmem:[%s8800_s2] ss:$0 sm:$0xff] }
 0x1f0   : > { %vm8849_vm8 = vmmov %vm8846_vm6  ;;  %v3808_v24 = vpop.f32.mrf.mxu0  ;;  %v3807_v43 = vadd.f32 %v8232_v2, %v3806_v15  ;;  %v4156_v15 = vld [vmem:[#allocation3 + $0x10] sm:$0xf] }
 0x1f1   : > { %v3809_v23 = vadd.f32 %v8232_v2, %v3808_v24 }
 0x1f2   : > { %v3161_v7 = vpop.permute.xlu1 %3160 }
 0x1f3   : > { %v3598_v10 = vsel %vm8843_vm3, %v3565_v21, %v3161_v7  ;;  %vm8848_vm3 = vmmov %vm8845_vm2 }
 0x1f4   : > { %v3631_v35 = vsel %vm3617_vm11, %v3598_v10, %v3257_v44  ;;  %v3963_v10 = vld [vmem:[#allocation3 + $0x18] sm:$0x1] }
 0x1f5   : > { %v2921_v32 = vpop.permute.xlu2 %2920 }
 0x1f6   : > { %v3337_v30 = vpop.permute.xlu0 %3336 }
 0x1f7   : > { %v3664_v46 = vsel %vm3650_vm13, %v3631_v35, %v3337_v30 }
 0x1fa   : > { %v3417_v49 = vpop.permute.xlu1 %3416 }
 0x1fb   : > { %v3697_v16 = vsel %vm3683_vm1, %v3664_v46, %v3417_v49  ;;  %v3964_v46 = vsel %vm8000_vm7, 0, %v3963_v10 }
 0x1fc   : > { %6071 = vmatmul.msk.bf16.gmra.mxu0 %vm3740_vm4, %v3697_v16  ;;  %3965 = vst [vmem:[#allocation3 + $0x18] sm:$0x1] %v3964_v46 }
 0x1fd   : > { %v3089_v29 = vpop.permute.xlu2 %3088 }
 0x1fe   : > { %v2841_v63 = vpop.permute.xlu0 %2840 }
 0x1ff   : > { %v3481_v13 = vsel %vm8847_vm10, %v6267_v18, %v2841_v63 }
 0x200   : > { %v3515_v1 = vsel %vm3485_vm0, %v3481_v13, %v2921_v32  ;;  %v8244_v32 = vpop.f32.mrf.mxu2 }
 0x202   : > { %v2913_v9 = vpop.permute.xlu1 %2912 }
 0x203   : > { %v3507_v39 = vsel %vm3485_vm0, %v3469_v34, %v2913_v9 }
 0x205   : > { %v3177_v20 = vpop.permute.xlu2 %3176 }
 0x206   : > { %v3009_v50 = vpop.permute.xlu0 %3008 }
 0x207   : > { %v3540_v42 = vsel %vm3518_vm5, %v3507_v39, %v3009_v50 }
 0x208   : > { %v3573_v8 = vsel %vm8845_vm2, %v3540_v42, %v3089_v29  ;;  %vm8850_vm2 = vmmov %vm8847_vm10  ;;  %v8253_v42 = vpop.f32.mrf.mxu2 }
 0x209   : > { %vm8852_vm10 = vmmov %vm8849_vm8 }
 0x20a   : > { %v3017_v62 = vpop.permute.xlu1 %3016 }
 0x20b   : > { %v3548_v26 = vsel %vm3518_vm5, %v3515_v1, %v3017_v62  ;;  %v4118_v1 = vld [vmem:[#allocation3 + $0x18] sm:$0xf] }
 0x20e   : > { %v3097_v56 = vpop.permute.xlu0 %3096  ;;  %v3345_v28 = vpop.permute.xlu2 %3344 }
 0x20f   : > { %v3581_v45 = vsel %vm8848_vm3, %v3548_v26, %v3097_v56 }
 0x210   : > { %v3614_v6 = vsel %vm8849_vm8, %v3581_v45, %v3177_v20  ;;  %v8250_v20 = vpop.f32.mrf.mxu3 }
 0x212   : > { %v3169_v12 = vpop.permute.xlu1 %3168 }
 0x213   : > { %v3606_v40 = vsel %vm8846_vm6, %v3573_v8, %v3169_v12  ;;  %vm8851_vm6 = vmmov %vm8848_vm3 }
 0x216   : > { %v3265_v33 = vpop.permute.xlu0 %3264 }
 0x217   : > { %v3639_v27 = vsel %vm3617_vm11, %v3606_v40, %v3265_v33 }
 0x218   : > { %v3672_v14 = vsel %vm3650_vm13, %v3639_v27, %v3345_v28  ;;  %v8256_v28 = vpop.f32.mrf.mxu3 }
 0x219   : > { %v3433_v3 = vpop.permute.xlu2 %3432 }
 0x21b   : > { %v3273_v11 = vpop.permute.xlu1 %3272 }
 0x21c   : > { %v3647_v60 = vsel %vm3617_vm11, %v3614_v6, %v3273_v11  ;;  %v4199_v6 = vshrl.u32 %v4156_v15, 16 }
 0x221   : > { %v3019_v7 = vpop.permute.xlu2 %3018 }
 0x223   : > { %v3425_v41 = vpop.permute.xlu1 %3424 }
 0x224   : > { %v3705_v22 = vsel %vm3683_vm1, %v3672_v14, %v3425_v41 }
 0x225   : > { %6075 = vmatmul.msk.bf16.gmra.mxu2 %vm3740_vm4, %v3705_v22  ;;  %v4121_v22 = vld [vmem:[#allocation3 + $0x1c] sm:$0x1] }
 0x227   : > { %v3826_v13 = vpop.f32.mrf.mxu2 }
 0x229   : > { %v3275_v29 = vpop.permute.xlu2 %3274 }
 0x22d   : > { %v2923_v17 = vpop.permute.xlu1 %2922 }
 0x22f   : > { %v3353_v19 = vpop.permute.xlu0 %3352  ;;  %v3828_v54 = vpop.f32.mrf.mxu2 }
 0x230   : > { %v3680_v61 = vsel %vm3650_vm13, %v3647_v60, %v3353_v19  ;;  %v4202_v60 = vshll.u32 %v4156_v15, 16 }
 0x231   : > { %v3713_v59 = vsel %vm3683_vm1, %v3680_v61, %v3433_v3  ;;  %v4201_v3 = vrot.slane %v4199_v6, 4 }
 0x232   : > { %6079 = vmatmul.msk.bf16.gmra.mxu3 %vm3740_vm4, %v3713_v59  ;;  %v4204_v61 = vrot.slane %v4202_v60, 5  ;;  %v3846_v59 = vpop.f32.mrf.mxu3 }
 0x234   : > { %v4205_v57 = vor.u32 %v4204_v61, %v4201_v3  ;;  %v3829_v61 = vadd.f32 %v8232_v2, %v3828_v54 }
 0x236   : > { %v4206_v46 = vrot.slane %v4205_v57, 4  ;;  %v4000_v57 = vld [vmem:[#allocation3 + $0x2c] sm:$0x1] }
 0x237   : > { %v2843_v36 = vpop.permute.xlu0 %2842 }
 0x238   : > { %v3484_v51 = vsel %vm8850_vm2, %v6268_v53, %v2843_v36  ;;  %v3811_v31 = vpop.f32.mrf.mxu0  ;;  %v3179_v35 = vpop.permute.xlu1 %3178  ;;  %v4164_v53 = vld [vmem:[#allocation3 + $0x14] sm:$0x1] }
 0x239   : > { %v3812_v55 = vadd.f32 %v8232_v2, %v3811_v31  ;;  %v3517_v21 = vsel %vm3485_vm0, %v3484_v51, %v2923_v17  ;;  %v4284_v17 = vld [vmem:[#allocation3 + $0x10] sm:$0xe]  ;;  %v4316_v51 = vrot.slane %v4164_v53, 5 }
 0x23a   : > { %v3550_v30 = vsel %vm3518_vm5, %v3517_v21, %v3019_v7  ;;  %v6083_v36 = vrot.slane %v4284_v17, 9  ;;  %v6139_v31 = vld [vmem:[#allocation3 + $0x10] sm:$0xf]  ;;  %vm8853_vm5 = vmmov %vm8848_vm3  ;;  %vm5015_vm3 = vcmask 588800  }
 0x23b   : > { %v3870_v44 = vmax.f32 %v3807_v43, %v3812_v55  ;;  %vm8854_vm8 = vmmov %vm8853_vm5 }
 0x23c   : > { %vm8855_vm2 = vmmov %vm8853_vm5 }
 0x23d   : > { %3886 = vst.msk [vmem:[#allocation5 + $0x20] sm:$0xff] %vm3485_vm0, %v3870_v44  ;;  %v4208_v44 = vshll.u32 %v4164_v53, 16 }
 0x23f   : > { %v3099_v49 = vpop.permute.xlu0 %3098 }
 0x240   : > { %v3813_v16 = vpop.f32.mrf.mxu0  ;;  %v3583_v63 = vsel %vm8851_vm6, %v3550_v30, %v3099_v49  ;;  %vm8856_vm6 = vmmov %vm8855_vm2 }
 0x241   : > { %v3814_v9 = vadd.f32 %v8232_v2, %v3813_v16  ;;  %v3616_v50 = vsel %vm8852_vm10, %v3583_v63, %v3179_v35  ;;  %v4317_v16 = vsel %vm6644_vm12, %v6083_v36, %v4316_v51  ;;  %v3997_v36 = vld [vmem:[#allocation3 + $0x24] sm:$0x1]  ;;  %vm5115_vm10 = vcmask 124930  }
 0x242   : > { %v3649_v12 = vsel %vm3617_vm11, %v3616_v50, %v3275_v29  ;;  %v3827_v50 = vadd.f32 %v8232_v2, %v3826_v13 }
 0x243   : > { %v3871_v62 = vmax.f32 %v3809_v23, %v3814_v9 }
 0x244   : > { %v3435_v47 = vpop.permute.xlu1 %3434 }
 0x245   : > { %3887 = vst.msk [vmem:[#allocation5 + $0x28] sm:$0xff] %vm3485_vm0, %v3871_v62 }
 0x249   : > { %v3355_v56 = vpop.permute.xlu0 %3354 }
 0x24a   : > { %v3682_v34 = vsel %vm3650_vm13, %v3649_v12, %v3355_v56  ;;  %v4210_v12 = vrot.slane %v4208_v44, 5  ;;  %v4006_v56 = vld [vmem:[#allocation3 + $0x3c] sm:$0x1]  ;;  %v3822_v44 = vadd.f32 %v8232_v2, %v8244_v32  ;;  %v3824_v32 = vadd.f32 %v8232_v2, %v8253_v42 }
 0x24b   : > { %v3715_v39 = vsel %vm3683_vm1, %v3682_v34, %v3435_v47  ;;  %v3975_v47 = vld [vmem:[#allocation3 + $0x38] sm:$0x1]  ;;  %v3848_v34 = vpop.f32.mrf.mxu3  ;;  %vm4948_vm13 = vcmask 392192  }
 0x24c   : > { %6080 = vmatmul.msk.bf16.gmra.mxu3 %vm3740_vm4, %v3715_v39  ;;  %v3902_v11 = vld [vmem:[#allocation5 + $0x20] ss:$2 sm:$0xff]  ;;  %v3918_v33 = vld [vmem:[#allocation5 + $0x21] ss:$2 sm:$0xff]  ;;  %v3849_v54 = vadd.f32 %v8232_v2, %v3848_v34  ;;  %vm5024_vm4 = vcmask 1043456  }
 0x24d   : > { %v3931_v18 = vmax.f32 %v3902_v11, %v3918_v33  ;;  %v3976_v33 = vsel %vm8000_vm7, 0, %v3975_v47 }
 0x24e   : > { %3977 = vst [vmem:[#allocation3 + $0x38] sm:$0x1] %v3976_v33 }
 0x24f   : > { %v3939_v8 = vmax.f32 %v3931_v18, 0.0  ;;  %v4007_v18 = vsel %vm7919_vm9, 0, %v4006_v56 }
 0x250   : > { %4008 = vst [vmem:[#allocation3 + $0x3c] sm:$0x1] %v4007_v18 }
 0x251   : > { %v4017_v40 = vpack.c.bf16 %v3939_v8, %v3939_v8  ;;  %v4211_v8 = vsel %vm6667_vm14, %v4206_v46, %v4210_v12 }
 0x253   : > { %v4040_v27 = vshrl.u32 %v4017_v40, 16  ;;  %v4043_v14 = vshll.u32 %v4017_v40, 16 }
 0x255   : > { %v4042_v41 = vrot.slane %v4040_v27, 7  ;;  %v4749_v27 = vunpack.c.l.b16 %v4317_v16 }
 0x257   : > { %v4045_v26 = vor.u32 %v4043_v14, %v4042_v41  ;;  %v4046_v45 = vrot.slane %v4042_v41, 4 }
 0x259   : > { %v4122_v19 = vsel %vm8000_vm7, %v4046_v45, %v4121_v22  ;;  %v4119_v24 = vsel %vm8101_vm15, %v4045_v26, %v4118_v1  ;;  %v4729_v26 = vunpack.c.l.b16 %v4211_v8 }
 0x25a   : > { %4123 = vst [vmem:[#allocation3 + $0x1c] sm:$0x1] %v4122_v19  ;;  %v3847_v19 = vadd.f32 %v8232_v2, %v3846_v59  ;;  %v3998_v59 = vsel %vm7919_vm9, 0, %v3997_v36 }
 0x25b   : > { %4120 = vst [vmem:[#allocation3 + $0x18] sm:$0xf] %v4119_v24 }
 0x25c   : > { %3999 = vst [vmem:[#allocation3 + $0x24] sm:$0x1] %v3998_v59 }
 0x261   : > { %v4165_v43 = vld [vmem:[#allocation3 + $0x1c] sm:$0x1] }
 0x262   : > { %v6311_v55 = vld [vmem:[#allocation3 + $0x14] sm:$0xf0]  ;;  %v4222_v49 = vshll.u32 %v4165_v43, 16  ;;  %v4320_v62 = vrot.slane %v4165_v43, 5 }
 0x263   : > { %v4157_v21 = vld [vmem:[#allocation3 + $0x18] sm:$0xf]  ;;  %v6140_v7 = vor.u32 %v6311_v55, %v6139_v31  ;;  %v4001_v31 = vsel %vm7919_vm9, 0, %v4000_v57 }
 0x264   : > { %v4213_v10 = vshrl.u32 %v4157_v21, 16  ;;  %v4216_v30 = vshll.u32 %v4157_v21, 16  ;;  %v4285_v35 = vld [vmem:[#allocation3 + $0x18] sm:$0xe]  ;;  %v4224_v14 = vrot.slane %v4222_v49, 5 }
 0x265   : > { %4855 = vrot.lane.b32.xlu1 %v6140_v7, %s6475_s22  ;;  %v6084_v9 = vrot.slane %v4285_v35, 9  ;;  %4002 = vst [vmem:[#allocation3 + $0x2c] sm:$0x1] %v4001_v31 }
 0x266   : > { %v4215_v23 = vrot.slane %v4213_v10, 4  ;;  %v4218_v63 = vrot.slane %v4216_v30, 5 }
 0x267   : > { %v3831_v29 = vpop.f32.mrf.mxu2  ;;  %v4321_v40 = vsel %vm6644_vm12, %v6084_v9, %v4320_v62 }
 0x268   : > { %v3832_v39 = vadd.f32 %v8232_v2, %v3831_v29  ;;  %v4219_v11 = vor.u32 %v4218_v63, %v4215_v23  ;;  %v4750_v15 = vunpack.c.l.b16 %v4321_v40  ;;  %v3969_v23 = vld [vmem:[#allocation3 + $0x28] sm:$0x1] }
 0x269   : > { %v3970_v63 = vsel %vm8000_vm7, 0, %v3969_v23 }
 0x26a   : > { %v3874_v13 = vmax.f32 %v3827_v50, %v3832_v39  ;;  %v4220_v41 = vrot.slane %v4219_v11, 4  ;;  %v8278_v1 = vpack.c.b16 %v4750_v15, %v4749_v27  ;;  %3971 = vst [vmem:[#allocation3 + $0x28] sm:$0x1] %v3970_v63  ;;  %v3966_v15 = vld [vmem:[#allocation3 + $0x20] sm:$0x1] }
 0x26c   : > { %3890 = vst.msk [vmem:[#allocation5 + $0x40] sm:$0xff] %vm3485_vm0, %v3874_v13  ;;  %v4225_v22 = vsel %vm6667_vm14, %v4220_v41, %v4224_v14  ;;  %v4133_v18 = vld [vmem:[#allocation3 + $0x2c] sm:$0x1] }
 0x26d   : > { %v4730_v45 = vunpack.c.l.b16 %v4225_v22  ;;  %v3967_v22 = vsel %vm8000_vm7, 0, %v3966_v15 }
 0x26e   : > { %3968 = vst [vmem:[#allocation3 + $0x20] sm:$0x1] %v3967_v22 }
 0x26f   : > { %v4736_v6 = vpack.c.b16 %v4730_v45, %v4729_v26  ;;  %v3851_v60 = vpop.f32.mrf.mxu3  ;;  %v3833_v3 = vpop.f32.mrf.mxu2 }
 0x270   : > { %v3852_v24 = vadd.f32 %v8232_v2, %v3851_v60  ;;  %v3834_v53 = vadd.f32 %v8232_v2, %v3833_v3  ;;  %v4145_v60 = vld [vmem:[#allocation3 + $0x3c] sm:$0x1] }
 0x271   : > { %4741 = vrot.lane.b32.xlu1 %v4736_v6, %s6468_s20  ;;  %v4130_v13 = vld [vmem:[#allocation3 + $0x28] sm:$0xf]  ;;  %v4142_v6 = vld [vmem:[#allocation3 + $0x38] sm:$0xf] }
 0x272   : > { %v3878_v17 = vmax.f32 %v3847_v19, %v3852_v24  ;;  %v3875_v51 = vmax.f32 %v3829_v61, %v3834_v53 }
 0x274   : > { %3894 = vst.msk [vmem:[#allocation5 + $0x60] sm:$0xff] %vm3485_vm0, %v3878_v17  ;;  %v4340_v17 = vld [vmem:[#allocation3 + $0x18] sm:$0xf] }
 0x275   : > { %3891 = vst.msk [vmem:[#allocation5 + $0x48] sm:$0xff] %vm3485_vm0, %v3875_v51  ;;  %v4383_v31 = vshrl.u32 %v4340_v17, 16  ;;  %v4386_v59 = vshll.u32 %v4340_v17, 16 }
 0x277   : > { %v3853_v43 = vpop.f32.mrf.mxu3 }
 0x278   : > { %v3854_v55 = vadd.f32 %v8232_v2, %v3853_v43 }
 0x279   : > { %v3816_v21 = vpop.f32.mrf.mxu0 }
 0x27a   : > { %v3879_v7 = vmax.f32 %v3849_v54, %v3854_v55  ;;  %v3817_v10 = vadd.f32 %v8232_v2, %v3816_v21  ;;  %v4385_v55 = vrot.slane %v4383_v31, 4  ;;  %v4388_v21 = vrot.slane %v4386_v59, 5 }
 0x27c   : > { %3895 = vst.msk [vmem:[#allocation5 + $0x68] sm:$0xff] %vm3485_vm0, %v3879_v7  ;;  %v3906_v30 = vld [vmem:[#allocation5 + $0x40] ss:$2 sm:$0xff]  ;;  %v3922_v35 = vld [vmem:[#allocation5 + $0x41] ss:$2 sm:$0xff]  ;;  %v3872_v46 = vmax.f32 %v3817_v10, %v3822_v44 }
 0x27d   : > { %v3933_v49 = vmax.f32 %v3906_v30, %v3922_v35  ;;  %v4127_v10 = vld [vmem:[#allocation3 + $0x24] sm:$0x1]  ;;  %v4124_v30 = vld [vmem:[#allocation3 + $0x20] sm:$0xf]  ;;  %v4348_v35 = vld [vmem:[#allocation3 + $0x1c] sm:$0x1] }
 0x27e   : > { %3888 = vst.msk [vmem:[#allocation5 + $0x30] sm:$0xff] %vm3485_vm0, %v3872_v46 }
 0x27f   : > { %v3941_v16 = vmax.f32 %v3933_v49, 0.0 }
 0x281   : > { %v4019_v9 = vpack.c.bf16 %v3941_v16, %v3941_v16  ;;  %v3818_v62 = vpop.f32.mrf.mxu0  ;;  %v4389_v16 = vor.u32 %v4388_v21, %v4385_v55 }
 0x282   : > { %v3819_v50 = vadd.f32 %v8232_v2, %v3818_v62 }
 0x283   : > { %v3910_v29 = vld [vmem:[#allocation5 + $0x60] ss:$2 sm:$0xff]  ;;  %v3926_v12 = vld [vmem:[#allocation5 + $0x61] ss:$2 sm:$0xff]  ;;  %v4056_v47 = vshrl.u32 %v4019_v9, 16  ;;  %v4059_v11 = vshll.u32 %v4019_v9, 16 }
 0x284   : > { %v3935_v56 = vmax.f32 %v3910_v29, %v3926_v12  ;;  %v3873_v34 = vmax.f32 %v3819_v50, %v3824_v32  ;;  %v4392_v9 = vshll.u32 %v4348_v35, 16  ;;  %v4468_v32 = vld [vmem:[#allocation3 + $0x18] sm:$0xe]  ;;  %v4390_v12 = vrot.slane %v4389_v16, 4 }
 0x285   : > { %v4058_v39 = vrot.slane %v4056_v47, 7 }
 0x286   : > { %v3943_v33 = vmax.f32 %v3935_v56, 0.0  ;;  %3889 = vst.msk [vmem:[#allocation5 + $0x38] sm:$0xff] %vm3485_vm0, %v3873_v34  ;;  %v6091_v56 = vrot.slane %v4468_v32, 9  ;;  %v4500_v34 = vrot.slane %v4348_v35, 5 }
 0x287   : > { %v4061_v8 = vor.u32 %v4059_v11, %v4058_v39  ;;  %v4062_v40 = vrot.slane %v4058_v39, 4 }
 0x288   : > { %v4021_v27 = vpack.c.bf16 %v3943_v33, %v3943_v33 }
 0x289   : > { %v4134_v42 = vsel %vm8000_vm7, %v4062_v40, %v4133_v18  ;;  %v4131_v41 = vsel %vm8101_vm15, %v4061_v8, %v4130_v13  ;;  %v4394_v18 = vrot.slane %v4392_v9, 5 }
 0x28a   : > { %v4072_v14 = vshrl.u32 %v4021_v27, 16  ;;  %4135 = vst [vmem:[#allocation3 + $0x2c] sm:$0x1] %v4134_v42  ;;  %v4075_v45 = vshll.u32 %v4021_v27, 16  ;;  %v4003_v27 = vld [vmem:[#allocation3 + $0x34] sm:$0x1] }
 0x28b   : > { %4132 = vst [vmem:[#allocation3 + $0x28] sm:$0xf] %v4131_v41  ;;  %v4395_v13 = vsel %vm6667_vm14, %v4390_v12, %v4394_v18 }
 0x28c   : > { %v4074_v26 = vrot.slane %v4072_v14, 7  ;;  %v8330_v14 = vsel %vm6644_vm12, %v6091_v56, %v4500_v34  ;;  %v8343_v17 = vunpack.c.l.b16 %v4395_v13 }
 0x28d   : > { %v3904_v19 = vld [vmem:[#allocation5 + $0x30] ss:$2 sm:$0xff]  ;;  %v3920_v24 = vld [vmem:[#allocation5 + $0x31] ss:$2 sm:$0xff] }
 0x28e   : > { %v4077_v3 = vor.u32 %v4075_v45, %v4074_v26  ;;  %v4078_v61 = vrot.slane %v4074_v26, 4  ;;  %v3932_v53 = vmax.f32 %v3904_v19, %v3920_v24  ;;  %v4004_v26 = vsel %vm7919_vm9, 0, %v4003_v27 }
 0x28f   : > { %4005 = vst [vmem:[#allocation3 + $0x34] sm:$0x1] %v4004_v26 }
 0x290   : > { %v4143_v57 = vsel %vm8101_vm15, %v4077_v3, %v4142_v6  ;;  %v4146_v36 = vsel %vm8000_vm7, %v4078_v61, %v4145_v60  ;;  %v3940_v51 = vmax.f32 %v3932_v53, 0.0  ;;  %v3842_v60 = vadd.f32 %v8232_v2, %v8250_v20 }
 0x291   : > { %4144 = vst [vmem:[#allocation3 + $0x38] sm:$0xf] %v4143_v57  ;;  %v8318_v50 = vld [vmem:[#allocation3 + $0x2c] sm:$0x1] }
 0x292   : > { %4147 = vst [vmem:[#allocation3 + $0x3c] sm:$0x1] %v4146_v36  ;;  %v4018_v43 = vpack.c.bf16 %v3940_v51, %v3940_v51  ;;  %v4526_v62 = vld [vmem:[#allocation3 + $0x28] sm:$0xf]  ;;  %v4328_v11 = vrot.slane %v8318_v50, 5  ;;  %v4250_v40 = vshll.u32 %v8318_v50, 16  ;;  %v4817_v36 = vunpack.c.l.b16 %v8330_v14 }
 0x293   : > { %v4287_v29 = vld [vmem:[#allocation3 + $0x28] sm:$0xe]  ;;  %v4582_v47 = vshrl.u32 %v4526_v62, 16  ;;  %v4585_v33 = vshll.u32 %v4526_v62, 16  ;;  %v8324_v42 = vld [vmem:[#allocation3 + $0x2c] sm:$0x1] }
 0x294   : > { %v4048_v54 = vshrl.u32 %v4018_v43, 16  ;;  %v4051_v7 = vshll.u32 %v4018_v43, 16  ;;  %v6086_v39 = vrot.slane %v4287_v29, 9  ;;  %v4654_v8 = vld [vmem:[#allocation3 + $0x28] sm:$0xe]  ;;  %v4689_v51 = vrot.slane %v8324_v42, 5 }
 0x295   : > { %v8326_v41 = vrot.slane %v4582_v47, 4  ;;  %v8338_v6 = vrot.slane %v4585_v33, 5  ;;  %v6100_v3 = vrot.slane %v4654_v8, 9  ;;  %v4159_v55 = vld [vmem:[#allocation3 + $0x28] sm:$0xf] }
 0x296   : > { %v4050_v44 = vrot.slane %v4048_v54, 7  ;;  %v4329_v22 = vsel %vm6644_vm12, %v6086_v39, %v4328_v11  ;;  %v4241_v62 = vshrl.u32 %v4159_v55, 16  ;;  %v4244_v34 = vshll.u32 %v4159_v55, 16 }
 0x297   : > { %v4752_v31 = vunpack.c.l.b16 %v4329_v22  ;;  %v4690_v9 = vsel %vm6644_vm12, %v6100_v3, %v4689_v51  ;;  %v4591_v51 = vshll.u32 %v8324_v42, 16  ;;  %v3844_v42 = vadd.f32 %v8232_v2, %v8256_v28 }
 0x298   : > { %v4053_v46 = vor.u32 %v4051_v7, %v4050_v44  ;;  %v4054_v49 = vrot.slane %v4050_v44, 4  ;;  %v4246_v55 = vrot.slane %v4244_v34, 5 }
 0x29a   : > { %v4128_v23 = vsel %vm8000_vm7, %v4054_v49, %v4127_v10  ;;  %v4125_v63 = vsel %vm8101_vm15, %v4053_v46, %v4124_v30  ;;  %v4588_v10 = vor.u32 %v8338_v6, %v8326_v41  ;;  %v4886_v6 = vunpack.c.l.b16 %v4690_v9  ;;  %v3972_v9 = vld [vmem:[#allocation3 + $0x30] sm:$0x1] }
 0x29b   : > { %4129 = vst [vmem:[#allocation3 + $0x24] sm:$0x1] %v4128_v23  ;;  %v3973_v50 = vsel %vm8000_vm7, 0, %v3972_v9 }
 0x29c   : > { %4126 = vst [vmem:[#allocation3 + $0x20] sm:$0xf] %v4125_v63 }
 0x29d   : > { %3974 = vst [vmem:[#allocation3 + $0x30] sm:$0x1] %v3973_v50 }
 0x2a2   : > { %v8332_v15 = vld [vmem:[#allocation3 + $0x24] sm:$0x1] }
 0x2a3   : > { %v4349_v45 = vld [vmem:[#allocation3 + $0x24] sm:$0x1]  ;;  %v4286_v19 = vld [vmem:[#allocation3 + $0x20] sm:$0xe]  ;;  %v4324_v24 = vrot.slane %v8332_v15, 5 }
 0x2a4   : > { %v6085_v61 = vrot.slane %v4286_v19, 9  ;;  %v4341_v53 = vld [vmem:[#allocation3 + $0x20] sm:$0xf]  ;;  %v4406_v21 = vshll.u32 %v4349_v45, 16  ;;  %v4533_v44 = vld [vmem:[#allocation3 + $0x24] sm:$0x1] }
 0x2a5   : > { %v4525_v57 = vld [vmem:[#allocation3 + $0x20] sm:$0xf]  ;;  %v4397_v59 = vshrl.u32 %v4341_v53, 16  ;;  %v4400_v43 = vshll.u32 %v4341_v53, 16  ;;  %v4504_v12 = vrot.slane %v4349_v45, 5  ;;  %v4685_v8 = vrot.slane %v4533_v44, 5 }
 0x2a6   : > { %v4568_v54 = vshrl.u32 %v4525_v57, 16  ;;  %v4325_v20 = vsel %vm6644_vm12, %v6085_v61, %v4324_v24  ;;  %v4571_v7 = vshll.u32 %v4525_v57, 16  ;;  %v4469_v16 = vld [vmem:[#allocation3 + $0x20] sm:$0xe]  ;;  %v4408_v11 = vrot.slane %v4406_v21, 5 }
 0x2a7   : > { %v4751_v30 = vunpack.c.l.b16 %v4325_v20  ;;  %v4399_v35 = vrot.slane %v4397_v59, 4  ;;  %v4402_v46 = vrot.slane %v4400_v43, 5  ;;  %v6092_v63 = vrot.slane %v4469_v16, 9  ;;  %v4653_v47 = vld [vmem:[#allocation3 + $0x20] sm:$0xe] }
 0x2a8   : > { %v4570_v49 = vrot.slane %v4568_v54, 4  ;;  %v4573_v23 = vrot.slane %v4571_v7, 5  ;;  %v4158_v56 = vld [vmem:[#allocation3 + $0x20] sm:$0xf]  ;;  %v3836_v39 = vpop.f32.mrf.mxu2  ;;  %v6099_v18 = vrot.slane %v4653_v47, 9  ;;  %v4577_v22 = vshll.u32 %v4533_v44, 16 }
 0x2a9   : > { %v4757_v32 = vpack.c.b16 %v4752_v31, %v4751_v30  ;;  %v4403_v29 = vor.u32 %v4402_v46, %v4399_v35  ;;  %v3837_v27 = vadd.f32 %v8232_v2, %v3836_v39  ;;  %v4505_v41 = vsel %vm6644_vm12, %v6092_v63, %v4504_v12 }
 0x2aa   : > { %v4574_v33 = vor.u32 %v4573_v23, %v4570_v49  ;;  %v4227_v14 = vshrl.u32 %v4158_v56, 16  ;;  %v4818_v26 = vunpack.c.l.b16 %v4505_v41  ;;  %v4686_v45 = vsel %vm6644_vm12, %v6099_v18, %v4685_v8  ;;  %v4009_v41 = vld [vmem:[#allocation3 + $0x44] sm:$0x1] }
 0x2ab   : > { %4763 = vrot.lane.b32.xlu1 %v4757_v32, %s6472_s29  ;;  %v4404_v13 = vrot.slane %v4403_v29, 4  ;;  %v3876_v19 = vmax.f32 %v3837_v27, %v3842_v60  ;;  %v4885_v3 = vunpack.c.l.b16 %v4686_v45  ;;  %v4243_v61 = vrot.slane %v4241_v62, 4 }
 0x2ac   : > { %v4575_v57 = vrot.slane %v4574_v33, 4  ;;  %v8362_v31 = vpack.c.b16 %v4818_v26, %v4817_v36  ;;  %v4229_v43 = vrot.slane %v4227_v14, 4  ;;  %v4230_v54 = vshll.u32 %v4158_v56, 16 }
 0x2ad   : > { %v4409_v24 = vsel %vm6667_vm14, %v4404_v13, %v4408_v11  ;;  %3892 = vst.msk [vmem:[#allocation5 + $0x50] sm:$0xff] %vm3485_vm0, %v3876_v19  ;;  %v8365_v59 = vpack.c.b16 %v4886_v6, %v4885_v3  ;;  %v4236_v60 = vshll.u32 %v8332_v15, 16  ;;  %v4579_v20 = vrot.slane %v4577_v22, 5  ;;  %v4342_v6 = vld [vmem:[#allocation3 + $0x28] sm:$0xf] }
 0x2ae   : > { %v4798_v53 = vunpack.c.l.b16 %v4409_v24  ;;  %v4589_v21 = vrot.slane %v4588_v10, 4  ;;  %v4232_v7 = vrot.slane %v4230_v54, 5  ;;  %v4247_v30 = vor.u32 %v4246_v55, %v4243_v61  ;;  %v4139_v19 = vld [vmem:[#allocation3 + $0x34] sm:$0x1]  ;;  %v4136_v24 = vld [vmem:[#allocation3 + $0x30] sm:$0xf] }
 0x2af   : > { %v4580_v35 = vsel %vm6667_vm14, %v4575_v57, %v4579_v20  ;;  %v4593_v46 = vrot.slane %v4591_v51, 5  ;;  %v4252_v49 = vrot.slane %v4250_v40, 5  ;;  %v4010_v45 = vsel %vm7919_vm9, 0, %v4009_v41  ;;  %v4350_v54 = vld [vmem:[#allocation3 + $0x2c] sm:$0x1] }
 0x2b0   : > { %v4804_v44 = vpack.c.b16 %v4798_v53, %v8343_v17  ;;  %v3838_v36 = vpop.f32.mrf.mxu2  ;;  %v4233_v15 = vor.u32 %v4232_v7, %v4229_v43  ;;  %v4248_v10 = vrot.slane %v4247_v30, 4  ;;  %v4238_v17 = vrot.slane %v4236_v60, 5  ;;  %4011 = vst [vmem:[#allocation3 + $0x44] sm:$0x1] %v4010_v45  ;;  %v4470_v55 = vld [vmem:[#allocation3 + $0x28] sm:$0xe] }
 0x2b1   : > { %v3839_v16 = vadd.f32 %v8232_v2, %v3838_v36  ;;  %v4594_v23 = vsel %vm6667_vm14, %v4589_v21, %v4593_v46  ;;  %v4865_v28 = vunpack.c.l.b16 %v4580_v35  ;;  %v4411_v53 = vshrl.u32 %v4342_v6, 16  ;;  %v8399_v60 = vld [vmem:[#allocation3 + $0x10] sm:$0xf]  ;;  %v4524_v30 = vld [vmem:[#allocation3 + $0x18] sm:$0xf] }
 0x2b2   : > { %v4234_v62 = vrot.slane %v4233_v15, 4  ;;  %v4253_v32 = vsel %vm6667_vm14, %v4248_v10, %v4252_v49  ;;  %v4866_v40 = vunpack.c.l.b16 %v4594_v23  ;;  %v4414_v57 = vshll.u32 %v4342_v6, 16  ;;  %v3978_v10 = vld [vmem:[#allocation3 + $0x40] sm:$0x1]  ;;  %v6131_v23 = vld [vmem:[#allocation3 + $0x28] sm:$0xf] }
 0x2b3   : > { %4809 = vrot.lane.b32.xlu1 %v4804_v44, %s6471_s23  ;;  %v3877_v63 = vmax.f32 %v3839_v16, %v3844_v42  ;;  %v8388_v47 = vunpack.c.l.b16 %v4253_v32  ;;  %v6093_v20 = vrot.slane %v4470_v55, 9  ;;  %v4508_v21 = vrot.slane %v4350_v54, 5  ;;  %v8413_v45 = vld [vmem:[#allocation3 + $0x3c] sm:$0x1] }
 0x2b4   : > { %v4239_v29 = vsel %vm6667_vm14, %v4234_v62, %v4238_v17  ;;  %v4872_v56 = vpack.c.b16 %v4866_v40, %v4865_v28  ;;  %v4413_v44 = vrot.slane %v4411_v53, 4  ;;  %v4416_v7 = vrot.slane %v4414_v57, 5 }
 0x2b5   : > { %3893 = vst.msk [vmem:[#allocation5 + $0x58] sm:$0xff] %vm3485_vm0, %v3877_v63  ;;  %v8386_v12 = vunpack.c.l.b16 %v4239_v29  ;;  %v3856_v39 = vpop.f32.mrf.mxu3  ;;  %v4540_v46 = vshrl.u32 %v8399_v60, 16  ;;  %v4543_v49 = vshll.u32 %v8399_v60, 16  ;;  %v4554_v16 = vshrl.u32 %v4524_v30, 16 }
 0x2b6   : > { %v3857_v36 = vadd.f32 %v8232_v2, %v3856_v39  ;;  %v4557_v15 = vshll.u32 %v4524_v30, 16  ;;  %v4509_v63 = vsel %vm6644_vm12, %v6093_v20, %v4508_v21  ;;  %v4417_v28 = vor.u32 %v4416_v7, %v4413_v44  ;;  %v4652_v30 = vld [vmem:[#allocation3 + $0x18] sm:$0xe] }
 0x2b7   : > { %v4737_v34 = vpack.c.b16 %v8388_v47, %v8386_v12  ;;  %v3979_v9 = vsel %vm8000_vm7, 0, %v3978_v10  ;;  %v4556_v55 = vrot.slane %v4554_v16, 4  ;;  %v4542_v10 = vrot.slane %v4540_v46, 4 }
 0x2b8   : > { %3980 = vst [vmem:[#allocation3 + $0x40] sm:$0x1] %v3979_v9  ;;  %v4418_v41 = vrot.slane %v4417_v28, 4  ;;  %v4559_v60 = vrot.slane %v4557_v15, 5  ;;  %v4531_v28 = vld [vmem:[#allocation3 + $0x14] sm:$0x1] }
 0x2b9   : > { %v6098_v9 = vrot.slane %v4652_v30, 9  ;;  %v4619_v48 = vshll.u32 %v8413_v45, 16 }
 0x2bb   : > { %4877 = vrot.lane.b32.xlu1 %v4872_v56, %s6476_s8  ;;  %v4656_v56 = vld [vmem:[#allocation3 + $0x38] sm:$0xe] }
 0x2bc   : > { %v3908_v11 = vld [vmem:[#allocation5 + $0x50] ss:$2 sm:$0xff]  ;;  %v3924_v33 = vld [vmem:[#allocation5 + $0x51] ss:$2 sm:$0xff] }
 0x2bd   : > { %v3934_v18 = vmax.f32 %v3908_v11, %v3924_v33  ;;  %v3858_v26 = vpop.f32.mrf.mxu3  ;;  %v4819_v33 = vunpack.c.l.b16 %v4509_v63 }
 0x2bf   : > { %v3942_v8 = vmax.f32 %v3934_v18, 0.0 }
 0x2c1   : > { %v4020_v27 = vpack.c.bf16 %v3942_v8, %v3942_v8  ;;  %v4420_v8 = vshll.u32 %v4350_v54, 16  ;;  %v4697_v54 = vrot.slane %v8413_v45, 5 }
 0x2c3   : > { %v4064_v13 = vshrl.u32 %v4020_v27, 16  ;;  %v4067_v22 = vshll.u32 %v4020_v27, 16  ;;  %v4422_v44 = vrot.slane %v4420_v8, 5 }
 0x2c5   : > { %v4066_v14 = vrot.slane %v4064_v13, 7  ;;  %v3859_v13 = vadd.f32 %v8232_v2, %v3858_v26 }
 0x2c7   : > { %v4069_v3 = vor.u32 %v4067_v22, %v4066_v14  ;;  %v4070_v61 = vrot.slane %v4066_v14, 4 }
 0x2c9   : > { %v4140_v51 = vsel %vm8000_vm7, %v4070_v61, %v4139_v19  ;;  %v4137_v43 = vsel %vm8101_vm15, %v4069_v3, %v4136_v24 }
 0x2ca   : > { %4141 = vst [vmem:[#allocation3 + $0x34] sm:$0x1] %v4140_v51 }
 0x2cb   : > { %4138 = vst [vmem:[#allocation3 + $0x30] sm:$0xf] %v4137_v43  ;;  %v6102_v43 = vrot.slane %v4656_v56, 9 }
 0x2cd   : > { %v4698_v63 = vsel %vm6644_vm12, %v6102_v43, %v4697_v54 }
 0x2cf   : > { %v3861_v42 = vpop.f32.mrf.mxu3 }
 0x2d0   : > { %v3862_v35 = vadd.f32 %v8232_v2, %v3861_v42 }
 0x2d1   : > { %v4351_v62 = vld [vmem:[#allocation3 + $0x34] sm:$0x1] }
 0x2d2   : > { %v3880_v17 = vmax.f32 %v3857_v36, %v3862_v35  ;;  %v8409_v32 = vld [vmem:[#allocation3 + $0x34] sm:$0x1]  ;;  %v6309_v50 = vld [vmem:[#allocation3 + $0x2c] sm:$0xf0]  ;;  %v4512_v29 = vrot.slane %v4351_v62, 5  ;;  %v4434_v24 = vshll.u32 %v4351_v62, 16 }
 0x2d3   : > { %v4471_v40 = vld [vmem:[#allocation3 + $0x30] sm:$0xe]  ;;  %v6132_v39 = vor.u32 %v6309_v50, %v6131_v23  ;;  %v4693_v61 = vrot.slane %v8409_v32, 5  ;;  %v4532_v36 = vld [vmem:[#allocation3 + $0x1c] sm:$0x1] }
 0x2d4   : > { %3896 = vst.msk [vmem:[#allocation5 + $0x70] sm:$0xff] %vm3485_vm0, %v3880_v17  ;;  %v6094_v11 = vrot.slane %v4471_v40, 9  ;;  %v4343_v18 = vld [vmem:[#allocation3 + $0x30] sm:$0xf]  ;;  %v4436_v15 = vrot.slane %v4434_v24, 5  ;;  %v4545_v17 = vrot.slane %v4543_v49, 5 }
 0x2d5   : > { %v4655_v27 = vld [vmem:[#allocation3 + $0x30] sm:$0xe]  ;;  %v4425_v14 = vshrl.u32 %v4343_v18, 16  ;;  %v4428_v22 = vshll.u32 %v4343_v18, 16  ;;  %4791 = vrot.lane.b32.xlu2 %v6132_v39, %s6467_s19  ;;  %v3981_v23 = vld [vmem:[#allocation3 + $0x48] sm:$0x1] }
 0x2d6   : > { %v4513_v19 = vsel %vm6644_vm12, %v6094_v11, %v4512_v29  ;;  %v6101_v3 = vrot.slane %v4655_v27, 9  ;;  %v4651_v35 = vld [vmem:[#allocation3 + $0x10] sm:$0xe]  ;;  %v3982_v62 = vsel %vm8000_vm7, 0, %v3981_v23  ;;  %v4681_v40 = vrot.slane %v4532_v36, 5 }
 0x2d7   : > { %v3863_v6 = vpop.f32.mrf.mxu3  ;;  %v4820_v57 = vunpack.c.l.b16 %v4513_v19  ;;  %v4427_v51 = vrot.slane %v4425_v14, 4  ;;  %v4430_v26 = vrot.slane %v4428_v22, 5  ;;  %v4560_v29 = vor.u32 %v4559_v60, %v4556_v55  ;;  %3983 = vst [vmem:[#allocation3 + $0x48] sm:$0x1] %v3982_v62  ;;  %v4527_v43 = vld [vmem:[#allocation3 + $0x30] sm:$0xf] }
 0x2d8   : > { %v3864_v53 = vadd.f32 %v8232_v2, %v3863_v6  ;;  %v4694_v42 = vsel %vm6644_vm12, %v6101_v3, %v4693_v61  ;;  %v4423_v2 = vsel %vm6667_vm14, %v4418_v41, %v4422_v44  ;;  %v6097_v39 = vrot.slane %v4651_v35, 9  ;;  %v4012_v41 = vld [vmem:[#allocation3 + $0x4c] sm:$0x1] }
 0x2d9   : > { %v4825_v21 = vpack.c.b16 %v4820_v57, %v4819_v33  ;;  %v4431_v7 = vor.u32 %v4430_v26, %v4427_v51  ;;  %v4887_v50 = vunpack.c.l.b16 %v4694_v42  ;;  %v4799_v49 = vunpack.c.l.b16 %v4423_v2 }
 0x2da   : > { %v3881_v20 = vmax.f32 %v3859_v13, %v3864_v53  ;;  %v4888_v11 = vunpack.c.l.b16 %v4698_v63  ;;  %v4677_v33 = vrot.slane %v4531_v28, 5  ;;  %v4546_v18 = vor.u32 %v4545_v17, %v4542_v10  ;;  %v6308_v63 = vld [vmem:[#allocation3 + $0x1c] sm:$0xf0] }
 0x2db   : > { %4831 = vrot.lane.b32.xlu1 %v4825_v21, %s6474_s17  ;;  %v4432_v16 = vrot.slane %v4431_v7, 4  ;;  %v4563_v8 = vshll.u32 %v4532_v36, 16  ;;  %v4549_v13 = vshll.u32 %v4531_v28, 16  ;;  %v4682_v22 = vsel %vm6644_vm12, %v6098_v9, %v4681_v40  ;;  %v4528_v21 = vld [vmem:[#allocation3 + $0x38] sm:$0xf] }
 0x2dc   : > { %3897 = vst.msk [vmem:[#allocation5 + $0x78] sm:$0xff] %vm3485_vm0, %v3881_v20  ;;  %v4893_v14 = vpack.c.b16 %v4888_v11, %v4887_v50  ;;  %v4561_v6 = vrot.slane %v4560_v29, 4  ;;  %v4013_v19 = vsel %vm7919_vm9, 0, %v4012_v41  ;;  %v4678_v24 = vsel %vm6644_vm12, %v6097_v39, %v4677_v33  ;;  %v6127_v50 = vld [vmem:[#allocation3 + $0x18] sm:$0xf] }
 0x2dd   : > { %v4437_v46 = vsel %vm6667_vm14, %v4432_v16, %v4436_v15  ;;  %4807 = vrot.lane.b32.xlu2 %v4803_v0, %s6471_s23  ;;  %4014 = vst [vmem:[#allocation3 + $0x4c] sm:$0x1] %v4013_v19  ;;  %v4547_v3 = vrot.slane %v4546_v18, 4  ;;  %v4565_v61 = vrot.slane %v4563_v8, 5  ;;  %v4884_v53 = vunpack.c.l.b16 %v4682_v22  ;;  %v4148_v15 = vld [vmem:[#allocation3 + $0x40] sm:$0xf] }
 0x2de   : > { %v4800_v56 = vunpack.c.l.b16 %v4437_v46  ;;  %v4551_v51 = vrot.slane %v4549_v13, 5  ;;  %v4883_v26 = vunpack.c.l.b16 %v4678_v24  ;;  %v4596_v7 = vshrl.u32 %v4527_v43, 16  ;;  %v4160_v39 = vld [vmem:[#allocation3 + $0x30] sm:$0xf]  ;;  %v4161_v18 = vld [vmem:[#allocation3 + $0x38] sm:$0xf] }
 0x2df   : > { %v4566_v58 = vsel %vm6667_vm14, %v4561_v6, %v4565_v61  ;;  %v4599_v30 = vshll.u32 %v4527_v43, 16  ;;  %v4610_v10 = vshrl.u32 %v4528_v21, 16  ;;  %v4613_v2 = vshll.u32 %v4528_v21, 16  ;;  %v6143_v8 = vld [vmem:[#allocation3 + $0x20] sm:$0xf] }
 0x2e0   : > { %v4805_v27 = vpack.c.b16 %v4800_v56, %v4799_v49  ;;  %v4552_v55 = vsel %vm6667_vm14, %v4547_v3, %v4551_v51  ;;  %v4891_v60 = vpack.c.b16 %v4884_v53, %v4883_v26  ;;  %v4864_v20 = vunpack.c.l.b16 %v4566_v58  ;;  %v6312_v22 = vld [vmem:[#allocation3 + $0x24] sm:$0xf0]  ;;  %v8468_v58 = vld [vmem:[#allocation3 + $0x3c] sm:$0x1]  ;;  %v4168_v43 = vld [vmem:[#allocation3 + $0x34] sm:$0x1] }
 0x2e1   : > { %v4863_v42 = vunpack.c.l.b16 %v4552_v55  ;;  %v4598_v28 = vrot.slane %v4596_v7, 4  ;;  %v4601_v9 = vrot.slane %v4599_v30, 5  ;;  %v4612_v40 = vrot.slane %v4610_v10, 4 }
 0x2e2   : > { %4811 = vrot.lane.b32.xlu0 %v4805_v27, %s6471_s23  ;;  %v4615_v29 = vrot.slane %v4613_v2, 5  ;;  %v6128_v49 = vor.u32 %v6308_v63, %v6127_v50  ;;  %v4605_v11 = vshll.u32 %v8409_v32, 16  ;;  %v4255_v5 = vshrl.u32 %v4160_v39, 16 }
 0x2e3   : > { %v3912_v37 = vld [vmem:[#allocation5 + $0x70] ss:$2 sm:$0xff]  ;;  %v3928_v38 = vld [vmem:[#allocation5 + $0x71] ss:$2 sm:$0xff]  ;;  %4899 = vrot.lane.b32.xlu1 %v4893_v14, %s6477_s15  ;;  %v4871_v16 = vpack.c.b16 %v4864_v20, %v4863_v42  ;;  %v4602_v56 = vor.u32 %v4601_v9, %v4598_v28  ;;  %v4258_v13 = vshll.u32 %v4160_v39, 16  ;;  %v4269_v41 = vshrl.u32 %v4161_v18, 16 }
 0x2e4   : > { %v3936_v0 = vmax.f32 %v3912_v37, %v3928_v38  ;;  %v4616_v33 = vor.u32 %v4615_v29, %v4612_v40  ;;  %v4272_v14 = vshll.u32 %v4161_v18, 16  ;;  %v4607_v6 = vrot.slane %v4605_v11, 5  ;;  %v6135_v37 = vld [vmem:[#allocation3 + $0x38] sm:$0xf]  ;;  %v4530_v9 = vld [vmem:[#allocation3 + $0x48] sm:$0xf] }
 0x2e5   : > { %4761 = vrot.lane.b32.xlu2 %v8278_v1, %s6472_s29  ;;  %v4151_v1 = vld [vmem:[#allocation3 + $0x44] sm:$0x1]  ;;  %v4603_v27 = vrot.slane %v4602_v56, 4  ;;  %v4621_v32 = vrot.slane %v4619_v48, 5  ;;  %v4257_v3 = vrot.slane %v4255_v5, 4  ;;  %v4260_v61 = vrot.slane %v4258_v13, 5 }
 0x2e6   : > { %v3944_v57 = vmax.f32 %v3936_v0, 0.0  ;;  %v4617_v19 = vrot.slane %v4616_v33, 4  ;;  %v6144_v0 = vor.u32 %v6312_v22, %v6143_v8  ;;  %v4271_v53 = vrot.slane %v4269_v41, 4 }
 0x2e7   : > { %v4608_v45 = vsel %vm6667_vm14, %v4603_v27, %v4607_v6  ;;  %v4261_v55 = vor.u32 %v4260_v61, %v4257_v3  ;;  %v4278_v42 = vshll.u32 %v8468_v58, 16  ;;  %v4332_v33 = vrot.slane %v4168_v43, 5 }
 0x2e8   : > { %v4022_v54 = vpack.c.bf16 %v3944_v57, %v3944_v57  ;;  %v4274_v57 = vrot.slane %v4272_v14, 5  ;;  %v4622_v51 = vsel %vm6667_vm14, %v4617_v19, %v4621_v32  ;;  %v4867_v26 = vunpack.c.l.b16 %v4608_v45 }
 0x2e9   : > { %v4868_v7 = vunpack.c.l.b16 %v4622_v51  ;;  %v4638_v48 = vshrl.u32 %v4530_v9, 16  ;;  %v4641_v8 = vshll.u32 %v4530_v9, 16  ;;  %v4336_v22 = vrot.slane %v8468_v58, 5 }
 0x2ea   : > { %v4080_v44 = vshrl.u32 %v4022_v54, 16  ;;  %4895 = vrot.lane.b32.xlu0 %v4891_v60, %s6477_s15  ;;  %v4083_v35 = vshll.u32 %v4022_v54, 16  ;;  %v4344_v54 = vld [vmem:[#allocation3 + $0x38] sm:$0xf]  ;;  %v4275_v30 = vor.u32 %v4274_v57, %v4271_v53  ;;  %vm4939_vm9 = vcmask 326656  }
 0x2eb   : > { %v4442_v10 = vshll.u32 %v4344_v54, 16  ;;  %v4873_v2 = vpack.c.b16 %v4868_v7, %v4867_v26  ;;  %v4640_v32 = vrot.slane %v4638_v48, 4 }
 0x2ec   : > { %v4082_v36 = vrot.slane %v4080_v44, 7  ;;  %v6314_v44 = vld [vmem:[#allocation3 + $0x44] sm:$0xf0] }
 0x2ed   : > { %4875 = vrot.lane.b32.xlu2 %v4871_v16, %s6476_s8  ;;  %v6313_v16 = vld [vmem:[#allocation3 + $0x34] sm:$0xf0]  ;;  %v4444_v39 = vrot.slane %v4442_v10, 5 }
 0x2ee   : > { %v4085_v17 = vor.u32 %v4083_v35, %v4082_v36  ;;  %v4086_v23 = vrot.slane %v4082_v36, 4  ;;  %v4264_v36 = vshll.u32 %v4168_v43, 16  ;;  %v4439_v35 = vshrl.u32 %v4344_v54, 16  ;;  %v4538_v54 = vld [vmem:[#allocation3 + $0x4c] sm:$0x1] }
 0x2ef   : > { %v4647_v7 = vshll.u32 %v4538_v54, 16 }
 0x2f0   : > { %v4152_v62 = vsel %vm8000_vm7, %v4086_v23, %v4151_v1  ;;  %v4149_v46 = vsel %vm8101_vm15, %v4085_v17, %v4148_v15  ;;  %v6147_v1 = vld [vmem:[#allocation3 + $0x30] sm:$0xf]  ;;  %v4262_v23 = vrot.slane %v4261_v55, 4  ;;  %v4266_v29 = vrot.slane %v4264_v36, 5 }
 0x2f1   : > { %4153 = vst [vmem:[#allocation3 + $0x44] sm:$0x1] %v4152_v62  ;;  %v4288_v15 = vld [vmem:[#allocation3 + $0x30] sm:$0xe]  ;;  %v4276_v62 = vrot.slane %v4275_v30, 4  ;;  %v6148_v40 = vor.u32 %v6313_v16, %v6147_v1  ;;  %v4441_v56 = vrot.slane %v4439_v35, 4 }
 0x2f2   : > { %4150 = vst [vmem:[#allocation3 + $0x40] sm:$0xf] %v4149_v46  ;;  %4789 = vrot.lane.b32.xlu0 %v6128_v49, %s6467_s19  ;;  %v4289_v46 = vld [vmem:[#allocation3 + $0x38] sm:$0xe]  ;;  %v4352_v49 = vld [vmem:[#allocation3 + $0x3c] sm:$0x1]  ;;  %v4267_v27 = vsel %vm6667_vm14, %v4262_v23, %v4266_v29 }
 0x2f3   : > { %v6087_v11 = vrot.slane %v4288_v15, 9  ;;  %v6088_v14 = vrot.slane %v4289_v46, 9  ;;  %v4445_v19 = vor.u32 %v4444_v39, %v4441_v56  ;;  %v4516_v10 = vrot.slane %v4352_v49, 5 }
 0x2f4   : > { %vm4957_vm7 = vcmask 457728   ;;  %vm4966_vm15 = vcmask 523264  }
 0x2f5   : > { %4829 = vrot.lane.b32.xlu2 %v8362_v31, %s6474_s17  ;;  %v4333_v45 = vsel %vm6644_vm12, %v6087_v11, %v4332_v33  ;;  %v4337_v51 = vsel %vm6644_vm12, %v6088_v14, %v4336_v22  ;;  %v4446_v58 = vrot.slane %v4445_v19, 4  ;;  %v4983_v19 = vld [vmem:[%s8801_s3 + $0x20] sm:$0xf] }
 0x2f8   : > { %v4353_v18 = vld [vmem:[#allocation3 + $0x44] sm:$0x1] }
 0x2f9   : > { %v6310_v38 = vld [vmem:[#allocation3 + $0x3c] sm:$0xf0]  ;;  %v4520_v47 = vrot.slane %v4353_v18, 5 }
 0x2fa   : > { %v6136_v24 = vor.u32 %v6310_v38, %v6135_v37  ;;  %4857 = vrot.lane.b32.xlu0 %v6144_v0, %s6475_s22  ;;  %v4345_v31 = vld [vmem:[#allocation3 + $0x40] sm:$0xf]  ;;  %v4448_v37 = vshll.u32 %v4352_v49, 16  ;;  %v4462_v38 = vshll.u32 %v4353_v18, 16  ;;  %v4733_v0 = vunpack.c.l.b16 %v4267_v27 }
 0x2fb   : > { %v4453_v60 = vshrl.u32 %v4345_v31, 16  ;;  %v4456_v20 = vshll.u32 %v4345_v31, 16  ;;  %v6151_v21 = vld [vmem:[#allocation3 + $0x40] sm:$0xf]  ;;  %v4705_v49 = vrot.slane %v4538_v54, 5 }
 0x2fc   : > { %4793 = vrot.lane.b32.xlu1 %v6136_v24, %s6467_s19  ;;  %v6152_v17 = vor.u32 %v6314_v44, %v6151_v21  ;;  %v4529_v50 = vld [vmem:[#allocation3 + $0x40] sm:$0xf]  ;;  %v4643_v24 = vrot.slane %v4641_v8, 5  ;;  %v4450_v26 = vrot.slane %v4448_v37, 5  ;;  %v4464_v43 = vrot.slane %v4462_v38, 5  ;;  %s269_s19 = sand.u32 1, %s6455_s25  }
 0x2fd   : > { %4897 = vrot.lane.b32.xlu2 %v8365_v59, %s6477_s15  ;;  %v4455_v63 = vrot.slane %v4453_v60, 4  ;;  %v4458_v28 = vrot.slane %v4456_v20, 5  ;;  %v4280_v59 = vrot.slane %v4278_v42, 5  ;;  %v4624_v13 = vshrl.u32 %v4529_v50, 16  ;;  %v4473_v31 = vld [vmem:[#allocation3 + $0x40] sm:$0xe] }
 0x2fe   : > { %v4627_v41 = vshll.u32 %v4529_v50, 16  ;;  %v4753_v60 = vunpack.c.l.b16 %v4333_v45  ;;  %v4472_v20 = vld [vmem:[#allocation3 + $0x38] sm:$0xe]  ;;  %v4537_v21 = vld [vmem:[#allocation3 + $0x44] sm:$0x1]  ;;  %v4644_v44 = vor.u32 %v4643_v24, %v4640_v32  ;;  %v6096_v12 = vrot.slane %v4473_v31, 9  ;;  %v4740_v24 = vpop.permute.xlu2 %4739 }
 0x2ff   : > { %v4459_v5 = vor.u32 %v4458_v28, %v4455_v63  ;;  %v4281_v6 = vsel %vm6667_vm14, %v4276_v62, %v4280_v59  ;;  %v4626_v61 = vrot.slane %v4624_v13, 4  ;;  %v4754_v42 = vunpack.c.l.b16 %v4337_v51  ;;  %v4658_v28 = vld [vmem:[#allocation3 + $0x48] sm:$0xe]  ;;  %v4657_v62 = vld [vmem:[#allocation3 + $0x40] sm:$0xe]  ;;  %v6317_v45 = vld [vmem:[%s8801_s3 + $0x10] sm:$0xff]  ;;  %v4760_v51 = vpop.permute.xlu0 %4759 }
 0x300   : > { %v4629_v53 = vrot.slane %v4627_v41, 5  ;;  %v4734_v57 = vunpack.c.l.b16 %v4281_v6  ;;  %v4451_v36 = vsel %vm6667_vm14, %v4446_v58, %v4450_v26  ;;  %v6095_v35 = vrot.slane %v4472_v20, 9  ;;  %v6318_v32 = vld [vmem:[%s8801_s3 + $0x18] sm:$0xff]  ;;  %v6303_v54 = vld [vmem:[#allocation3 + $0x4] sm:$0xf0]  ;;  %s5733_s18 = scalar_lea.sflag [#allocation9], %s269_s19 }
 0x301   : > { %v4460_v3 = vrot.slane %v4459_v5, 4  ;;  %v4758_v1 = vpack.c.b16 %v4754_v42, %v4753_v60  ;;  %v4521_v15 = vsel %vm6644_vm12, %v6096_v12, %v4520_v47  ;;  %v4645_v23 = vrot.slane %v4644_v44, 4 }
 0x302   : > { %4879 = vrot.lane.b32.xlu0 %v4873_v2, %s6476_s8  ;;  %v4738_v55 = vpack.c.b16 %v4734_v57, %v4733_v0  ;;  %v4633_v2 = vshll.u32 %v4537_v21, 16  ;;  %v4649_v63 = vrot.slane %v4647_v7, 5  ;;  %v4801_v9 = vunpack.c.l.b16 %v4451_v36  ;;  %v4788_v57 = vpop.permute.xlu1 %4787 }
 0x303   : > { %v4465_v30 = vsel %vm6667_vm14, %v4460_v3, %v4464_v43  ;;  %v4517_v59 = vsel %vm6644_vm12, %v6095_v35, %v4516_v10  ;;  %v6104_v29 = vrot.slane %v4658_v28, 9  ;;  %v6103_v11 = vrot.slane %v4657_v62, 9  ;;  %v6316_v3 = vld [vmem:[%s8801_s3 + $0x8] sm:$0xff]  ;;  %v6107_v43 = vld [vmem:[#allocation3] sm:$0xf] }
 0x304   : > { %4861 = vrot.lane.b32.xlu1 %v6152_v17, %s6475_s22  ;;  %v4802_v16 = vunpack.c.l.b16 %v4465_v30  ;;  %v4635_v46 = vrot.slane %v4633_v2, 5  ;;  %v4650_v39 = vsel %vm6667_vm14, %v4645_v23, %v4649_v63  ;;  %v4701_v33 = vrot.slane %v4537_v21, 5 }
 0x305   : > { %4859 = vrot.lane.b32.xlu2 %v6148_v40, %s6475_s22  ;;  %v4822_v40 = vunpack.c.l.b16 %v4521_v15  ;;  %v4821_v18 = vunpack.c.l.b16 %v4517_v59  ;;  %v4870_v27 = vunpack.c.l.b16 %v4650_v39  ;;  %v4706_v13 = vsel %vm6644_vm12, %v6104_v29, %v4705_v49 }
 0x306   : > { %v4806_v50 = vpack.c.b16 %v4802_v16, %v4801_v9  ;;  %v4702_v5 = vsel %vm6644_vm12, %v6103_v11, %v4701_v33  ;;  %v4890_v22 = vunpack.c.l.b16 %v4706_v13  ;;  %v5005_v37 = vunpack.c.l.b16 %v4983_v19  ;;  %v6111_v16 = vld [vmem:[#allocation3 + $0x10] sm:$0xf] }
 0x307   : > { %v4826_v48 = vpack.c.b16 %v4822_v40, %v4821_v18  ;;  %v4889_v14 = vunpack.c.l.b16 %v4702_v5  ;;  %v4828_v26 = vpop.permute.xlu0 %4827  ;;  %v6108_v60 = vor.u32 %v6303_v54, %v6107_v43 }
 0x308   : > { %v5010_v38 = vpack.c.b16 %v5005_v37, %v5005_v37  ;;  %v6119_v37 = vld [vmem:[#allocation3 + $0x30] sm:$0xf] }
 0x309   : > { %v4894_v6 = vpack.c.b16 %v4890_v22, %v4889_v14  ;;  %v4905_v21 = vsel %vm3485_vm0, %v6108_v60, %v4740_v24 }
 0x30a   : > { %4743 = vrot.lane.b32.xlu0 %v4737_v34, %s6468_s20  ;;  %v4630_v34 = vor.u32 %v4629_v53, %v4626_v61  ;;  %v5026_v0 = vsel %vm5024_vm4, %v5010_v38, 0  ;;  %v6315_v53 = vld [vmem:[%s8801_s3] sm:$0xff]  ;;  %v4856_v58 = vpop.permute.xlu1 %4855  ;;  %v4916_v44 = vsel %vm8853_vm5, %v4905_v21, %v4760_v51  ;;  %vm8857_vm4 = vsmask.f32 256 }
 0x30b   : > { %5031 = vmatpush.bf16.msra.mxu1 %v5026_v0  ;;  %v4924_v7 = vsel %vm3617_vm11, %v4916_v44, %v4788_v57 }
 0x30c   : > { %v4631_v17 = vrot.slane %v4630_v34, 4 }
 0x30d   : > { %4745 = vrot.lane.b32.xlu2 %v4738_v55, %s6468_s20  ;;  %s5814_s20 = sshll.u32 %s269_s19, 2 }
 0x30e   : > { %v4636_v56 = vsel %vm6667_vm14, %v4631_v17, %v4635_v46  ;;  %s271_s16 = scalar_lea.vmem [#allocation8], %s5814_s20  ;;  %s6421_s20 = scalar_lea.hbm %s8805_s7, 8 }
 0x30f   : > { %v4869_v8 = vunpack.c.l.b16 %v4636_v56  ;;  %5032 = vmatpush.bf16.msra.mxu1 %v6318_v32  ;;  %v6306_v32 = vld [vmem:[#allocation3 + $0x34] sm:$0xf0] }
 0x311   : > { %v4874_v41 = vpack.c.b16 %v4870_v27, %v4869_v8  ;;  %v6305_v8 = vld [vmem:[#allocation3 + $0x24] sm:$0xf0] }
 0x312   : > { %4765 = vrot.lane.b32.xlu0 %v4758_v1, %s6472_s29  ;;  %v4742_v20 = vpop.permute.xlu1 %4741  ;;  %v6304_v1 = vld [vmem:[#allocation3 + $0x14] sm:$0xf0] }
 0x313   : > { %5033 = vmatpush.bf16.msra.mxu1 %v6317_v45  ;;  %v6112_v17 = vor.u32 %v6304_v1, %v6111_v16  ;;  %v6120_v45 = vor.u32 %v6306_v32, %v6119_v37 }
 0x315   : > { %4813 = vrot.lane.b32.xlu2 %v4806_v50, %s6471_s23  ;;  %v4908_v63 = vsel %vm3485_vm0, %v6112_v17, %v4742_v20  ;;  %v5124_v17 = vld [vmem:[#allocation4 + $0x10] sm:$0x4] }
 0x317   : > { %5034 = vmatpush.bf16.msra.mxu1 %v6316_v3 }
 0x31a   : > { %4833 = vrot.lane.b32.xlu0 %v4826_v48, %s6474_s17  ;;  %v6115_v48 = vld [vmem:[#allocation3 + $0x20] sm:$0xf]  ;;  %s6480_s17 = smov 112  }
 0x31b   : > { %5035 = vmatpush.bf16.msra.mxu1 %v6315_v53  ;;  %v6116_v27 = vor.u32 %v6305_v8, %v6115_v48 }
 0x31d   : > { %4881 = vrot.lane.b32.xlu2 %v4874_v41, %s6476_s8  ;;  %v4764_v34 = vpop.permute.xlu1 %4763 }
 0x322   : > { %4901 = vrot.lane.b32.xlu0 %v4894_v6, %s6477_s15 }
 0x325   : > { %v4810_v23 = vpop.permute.xlu1 %4809 }
 0x32d   : > { %v4878_v50 = vpop.permute.xlu1 %4877 }
 0x32f   : > { %v4792_v61 = vpop.permute.xlu2 %4791 }
 0x337   : > { %v4808_v31 = vpop.permute.xlu2 %4807 }
 0x338   : > { %v4932_v12 = vsel %vm3683_vm1, %v4924_v7, %v4808_v31 }
 0x339   : > { %v4941_v42 = vsel %vm4939_vm9, %v4932_v12, %v4828_v26 }
 0x33a   : > { %v4950_v36 = vsel %vm4948_vm13, %v4941_v42, %v4856_v58 }
 0x33f   : > { %v4762_v55 = vpop.permute.xlu2 %4761 }
 0x340   : > { %v4918_v9 = vsel %vm8854_vm8, %v4908_v63, %v4762_v55  ;;  %vm5173_vm8 = vcmask 124928  }
 0x347   : > { %v4876_v47 = vpop.permute.xlu2 %4875 }
 0x348   : > { %v4959_v35 = vsel %vm4957_vm7, %v4950_v36, %v4876_v47  ;;  %v5121_v47 = vld [vmem:[#allocation4 + $0x8] sm:$0x4] }
 0x34d   : > { %v4832_v11 = vpop.permute.xlu1 %4831 }
 0x34f   : > { %v4830_v15 = vpop.permute.xlu2 %4829 }
 0x354   : > { %v4812_v30 = vpop.permute.xlu0 %4811 }
 0x355   : > { %v4900_v41 = vpop.permute.xlu1 %4899 }
 0x357   : > { %v4898_v46 = vpop.permute.xlu2 %4897 }
 0x35c   : > { %v4896_v10 = vpop.permute.xlu0 %4895 }
 0x35d   : > { %v4968_v2 = vsel %vm4966_vm15, %v4959_v35, %v4896_v10  ;;  %v8580_v10 = vld [vmem:[%s8802_s4] ss:$0 sm:$0xff] }
 0x35e   : > { %6169 = vmatmul.msk.bf16.vlgmr.msra.gmra.mxu1 %vm5015_vm3, %v4968_v2 }
 0x35f   : > { %v4860_v18 = vpop.permute.xlu2 %4859 }
 0x364   : > { %v4790_v28 = vpop.permute.xlu0 %4789 }
 0x365   : > { %v4926_v62 = vsel %vm3617_vm11, %v4918_v9, %v4790_v28 }
 0x366   : > { %v4934_v59 = vsel %vm3683_vm1, %v4926_v62, %v4810_v23 }
 0x367   : > { %v4943_v29 = vsel %vm4939_vm9, %v4934_v59, %v4830_v15  ;;  %v4746_v22 = vpop.permute.xlu2 %4745  ;;  %v5103_v15 = vld [vmem:[#allocation4 + $0x10] sm:$0x1] }
 0x368   : > { %v4914_v31 = vsel %vm3485_vm0, %v6120_v45, %v4746_v22  ;;  %v5127_v22 = vld [vmem:[#allocation4 + $0x18] sm:$0x4]  ;;  %v5193_v45 = vld [vmem:[#allocation4 + $0xc] sm:$0x1] }
 0x36c   : > { %v4858_v40 = vpop.permute.xlu0 %4857 }
 0x36d   : > { %v4952_v49 = vsel %vm4948_vm13, %v4943_v29, %v4858_v40 }
 0x36e   : > { %v4961_v56 = vsel %vm4957_vm7, %v4952_v49, %v4878_v50  ;;  %v4794_v57 = vpop.permute.xlu1 %4793 }
 0x36f   : > { %v4970_v39 = vsel %vm4966_vm15, %v4961_v56, %v4898_v46  ;;  %v4814_v51 = vpop.permute.xlu2 %4813 }
 0x370   : > { %6170 = vmatmul.msk.bf16.gmra.mxu1 %vm5015_vm3, %v4970_v39 }
 0x374   : > { %v4880_v33 = vpop.permute.xlu0 %4879 }
 0x376   : > { %v4862_v55 = vpop.permute.xlu1 %4861 }
 0x377   : > { %v4882_v20 = vpop.permute.xlu2 %4881 }
 0x37c   : > { %v4744_v5 = vpop.permute.xlu0 %4743 }
 0x37d   : > { %v4911_v13 = vsel %vm3485_vm0, %v6116_v27, %v4744_v5  ;;  %vm5090_vm0 = vcmask 122880  }
 0x37e   : > { %v4920_v14 = vsel %vm8855_vm2, %v4911_v13, %v4764_v34  ;;  %vm8563_vm5 = vmand %vm5090_vm0, %vm8857_vm4  ;;  %5091 = vst.msk [vmem:[#allocation4 + $0x4] sm:$0x1] %vm5090_vm0, %v6465_v4 }
 0x37f   : > { %v4928_v6 = vsel %vm3617_vm11, %v4920_v14, %v4792_v61  ;;  %5094 = vst.msk [vmem:[#allocation4 + $0x2c] sm:$0x1] %vm5090_vm0, %v6465_v4  ;;  %v5104_v23 = vsel %vm8563_vm5, 0, %v5103_v15  ;;  %v5106_v14 = vld [vmem:[#allocation4 + $0x18] sm:$0x1] }
 0x380   : > { %v4936_v19 = vsel %vm3683_vm1, %v4928_v6, %v4812_v30  ;;  %v5100_v30 = vld [vmem:[#allocation4 + $0x8] sm:$0x1]  ;;  %5105 = vst [vmem:[#allocation4 + $0x10] sm:$0x1] %v5104_v23  ;;  %v5107_v6 = vsel %vm8563_vm5, 0, %v5106_v14 }
 0x381   : > { %v4945_v38 = vsel %vm4939_vm9, %v4936_v19, %v4832_v11  ;;  %v5101_v34 = vsel %vm8563_vm5, 0, %v5100_v30  ;;  %5108 = vst [vmem:[#allocation4 + $0x18] sm:$0x1] %v5107_v6  ;;  %v5220_v30 = vshll.u32 %v5193_v45, 16 }
 0x382   : > { %v4954_v0 = vsel %vm4948_vm13, %v4945_v38, %v4860_v18  ;;  %5102 = vst [vmem:[#allocation4 + $0x8] sm:$0x1] %v5101_v34 }
 0x383   : > { %v4963_v24 = vsel %vm4957_vm7, %v4954_v0, %v4880_v33 }
 0x384   : > { %v4766_v3 = vpop.permute.xlu0 %4765  ;;  %v4972_v53 = vsel %vm4966_vm15, %v4963_v24, %v4900_v41 }
 0x385   : > { %6171 = vmatmul.msk.bf16.gmra.mxu1 %vm5015_vm3, %v4972_v53  ;;  %v4922_v61 = vsel %vm8856_vm6, %v4914_v31, %v4766_v3  ;;  %v5192_v38 = vld [vmem:[#allocation4 + $0x4] sm:$0x1] }
 0x386   : > { %v4930_v58 = vsel %vm3617_vm11, %v4922_v61, %v4794_v57  ;;  %vm5116_vm11 = vsmask.f32 7946  ;;  %v5266_v32 = vrot.slane %v5192_v38, 5 }
 0x387   : > { %v4938_v43 = vsel %vm3683_vm1, %v4930_v58, %v4814_v51 }
 0x38c   : > { %v4834_v26 = vpop.permute.xlu0 %4833 }
 0x38d   : > { %v4947_v54 = vsel %vm4939_vm9, %v4938_v43, %v4834_v26  ;;  %vm8570_vm9 = vmand %vm5115_vm10, %vm5116_vm11 }
 0x38e   : > { %v4956_v60 = vsel %vm4948_vm13, %v4947_v54, %v4862_v55  ;;  %v5122_v36 = vsel %vm8570_vm9, 0, %v5121_v47  ;;  %v5125_v63 = vsel %vm8570_vm9, 0, %v5124_v17  ;;  %v5128_v19 = vsel %vm8570_vm9, 0, %v5127_v22 }
 0x38f   : > { %v4965_v44 = vsel %vm4957_vm7, %v4956_v60, %v4882_v20  ;;  %5123 = vst [vmem:[#allocation4 + $0x8] sm:$0x4] %v5122_v36  ;;  %vm8862_vm7 = vmmov %vm8855_vm2  ;;  %vm5174_vm2 = vsmask.f32 2306  ;;  %v5270_v55 = vrot.slane %v5193_v45, 5  ;;  %v5206_v60 = vshll.u32 %v5192_v38, 16 }
 0x390   : > { %5126 = vst [vmem:[#allocation4 + $0x10] sm:$0x4] %v5125_v63  ;;  %vm8598_vm6 = vmand %vm5173_vm8, %vm5174_vm2 }
 0x391   : > { %vm8865_vm0 = vmmov %vm8862_vm7  ;;  %5129 = vst [vmem:[#allocation4 + $0x18] sm:$0x4] %v5128_v19  ;;  %v5208_v34 = vrot.slane %v5206_v60, 5 }
 0x392   : > { %vm8866_vm10 = vmmov %vm8865_vm0 }
 0x393   : > { %vm8867_vm11 = vmmov %vm8865_vm0 }
 0x394   : > { %v4902_v21 = vpop.permute.xlu0 %4901  ;;  %vm8868_vm4 = vmmov %vm8865_vm0 }
 0x395   : > { %v4974_v7 = vsel %vm4966_vm15, %v4965_v44, %v4902_v21 }
 0x396   : > { %6172 = vmatmul.msk.bf16.gmra.mxu1 %vm5015_vm3, %v4974_v7  ;;  %vm5088_vm3 = vcmask 125952   ;;  %v5176_v13 = vld [vmem:[#allocation4 + $0x8] sm:$0x7] }
 0x397   : > { %5089 = vst.msk [vmem:[#allocation4] sm:$0xf] %vm5088_vm3, %v6465_v4 }
 0x398   : > { %5093 = vst.msk [vmem:[#allocation4 + $0x28] sm:$0xf] %vm5088_vm3, %v6465_v4  ;;  %vm8871_vm3 = vmmov %vm8865_vm0 }
 0x39e   : > { %v5118_v49 = vld [vmem:[#allocation4] sm:$0x4]  ;;  %v5097_v56 = vld [vmem:[#allocation4] sm:$0x1] }
 0x39f   : > { %v5119_v18 = vsel %vm8570_vm9, 0, %v5118_v49  ;;  %v5098_v48 = vsel %vm8563_vm5, 0, %v5097_v56 }
 0x3a0   : > { %5120 = vst [vmem:[#allocation4] sm:$0x4] %v5119_v18 }
 0x3a1   : > { %5099 = vst [vmem:[#allocation4] sm:$0x1] %v5098_v48 }
 0x3a7   : > { %v5252_v0 = vld [vmem:[#allocation4] sm:$0xe] }
 0x3a8   : > { %v5188_v24 = vld [vmem:[#allocation4] sm:$0xf]  ;;  %v6173_v3 = vrot.slane %v5252_v0, 9  ;;  %v5284_v0 = vld [vmem:[#allocation4 + $0xc] sm:$0x1] }
 0x3a9   : > { %v5197_v53 = vshrl.u32 %v5188_v24, 16  ;;  %v5200_v57 = vshll.u32 %v5188_v24, 16 }
 0x3aa   : > { %v5267_v54 = vsel %vm6644_vm12, %v6173_v3, %v5266_v32  ;;  %v5285_v3 = vld [vmem:[#allocation4 + $0x14] sm:$0x1] }
 0x3ab   : > { %v5199_v26 = vrot.slane %v5197_v53, 4  ;;  %v5202_v43 = vrot.slane %v5200_v57, 5 }
 0x3ad   : > { %v5203_v7 = vor.u32 %v5202_v43, %v5199_v26  ;;  %v5298_v26 = vshll.u32 %v5284_v0, 16  ;;  %v5312_v43 = vshll.u32 %v5285_v3, 16 }
 0x3db   : > { %v5037_v35 = vpop.f32.mrf.mxu1 }
 0x3dc   : > { %v5038_v1 = vadd.f32 %v8580_v10, %v5037_v35 }
 0x3e3   : > { %v5039_v2 = vpop.f32.mrf.mxu1 }
 0x3e4   : > { %v5040_v16 = vadd.f32 %v8580_v10, %v5039_v2 }
 0x3e6   : > { %v5057_v28 = vmax.f32 %v5038_v1, %v5040_v16  ;;  %v5485_v1 = vunpack.c.l.b16 %v5267_v54  ;;  %v5204_v16 = vrot.slane %v5203_v7, 4  ;;  %v6333_v54 = vld [vmem:[%s8803_s5 + $0x40] sm:$0xff] }
 0x3e7   : > { %5702 = vmatpush.bf16.msrb.mxu3 %v6333_v54 }
 0x3e8   : > { %5061 = vst.msk [vmem:[#allocation6] sm:$0xff] %vm8862_vm7, %v5057_v28  ;;  %vm5587_vm7 = vcmask 916480  }
 0x3ed   : > { %v5042_v9 = vpop.f32.mrf.mxu1 }
 0x3ee   : > { %v5043_v11 = vadd.f32 %v8580_v10, %v5042_v9  ;;  %v5209_v9 = vsel %vm6667_vm14, %v5204_v16, %v5208_v34 }
 0x3ef   : > { %v5065_v62 = vld [vmem:[#allocation6] ss:$2 sm:$0xf]  ;;  %v5073_v59 = vld [vmem:[#allocation6 + $0x1] ss:$2 sm:$0xf] }
 0x3f0   : > { %v5080_v46 = vmax.f32 %v5065_v62, %v5073_v59  ;;  %v5222_v59 = vrot.slane %v5220_v30, 5 }
 0x3f2   : > { %v5084_v50 = vmax.f32 %v5080_v46, 0.0 }
 0x3f4   : > { %v5136_v40 = vpack.c.bf16 %v5084_v50, %v5084_v50 }
 0x3f5   : > { %v5044_v29 = vpop.f32.mrf.mxu1 }
 0x3f6   : > { %v5141_v39 = vshrl.u32 %v5136_v40, 16  ;;  %v5045_v33 = vadd.f32 %v8580_v10, %v5044_v29  ;;  %v5144_v8 = vshll.u32 %v5136_v40, 16 }
 0x3f8   : > { %v5143_v4 = vrot.slane %v5141_v39, 7  ;;  %v5058_v27 = vmax.f32 %v5043_v11, %v5045_v33  ;;  %v5109_v39 = vld [vmem:[#allocation4 + $0x20] sm:$0x1]  ;;  %v5130_v11 = vld [vmem:[#allocation4 + $0x20] sm:$0x4] }
 0x3f9   : > { %v5179_v33 = vld [vmem:[#allocation4 + $0x10] sm:$0x7] }
 0x3fa   : > { %v5146_v41 = vor.u32 %v5144_v8, %v5143_v4  ;;  %5062 = vst.msk [vmem:[#allocation6 + $0x8] sm:$0xff] %vm8865_vm0, %v5058_v27  ;;  %v5110_v4 = vsel %vm8563_vm5, 0, %v5109_v39  ;;  %v5131_v8 = vsel %vm8570_vm9, 0, %v5130_v11 }
 0x3fb   : > { %5111 = vst [vmem:[#allocation4 + $0x20] sm:$0x1] %v5110_v4  ;;  %v5182_v4 = vld [vmem:[#allocation4 + $0x18] sm:$0x7] }
 0x3fc   : > { %v5177_v37 = vsel %vm8598_vm6, %v5146_v41, %v5176_v13  ;;  %v5475_v13 = vunpack.c.l.b16 %v5209_v9  ;;  %5132 = vst [vmem:[#allocation4 + $0x20] sm:$0x4] %v5131_v8 }
 0x3fd   : > { %5178 = vst [vmem:[#allocation4 + $0x8] sm:$0x7] %v5177_v37 }
 0x401   : > { %v5067_v31 = vld [vmem:[#allocation6 + $0x8] ss:$2 sm:$0xf]  ;;  %v5075_v61 = vld [vmem:[#allocation6 + $0x9] ss:$2 sm:$0xf] }
 0x402   : > { %v5081_v51 = vmax.f32 %v5067_v31, %v5075_v61  ;;  %v5047_v58 = vpop.f32.mrf.mxu1  ;;  %v5358_v31 = vrot.slane %v5284_v0, 5 }
 0x403   : > { %v5048_v29 = vadd.f32 %v8580_v10, %v5047_v58 }
 0x404   : > { %v5085_v20 = vmax.f32 %v5081_v51, 0.0  ;;  %v5253_v21 = vld [vmem:[#allocation4 + $0x8] sm:$0xe]  ;;  %v5362_v51 = vrot.slane %v5285_v3, 5 }
 0x405   : > { %v5189_v44 = vld [vmem:[#allocation4 + $0x8] sm:$0xf]  ;;  %v6174_v47 = vrot.slane %v5253_v21, 9 }
 0x406   : > { %v5211_v36 = vshrl.u32 %v5189_v44, 16  ;;  %v5214_v35 = vshll.u32 %v5189_v44, 16  ;;  %v5137_v2 = vpack.c.bf16 %v5085_v20, %v5085_v20  ;;  %v5280_v46 = vld [vmem:[#allocation4 + $0x8] sm:$0xf] }
 0x407   : > { %v5271_v15 = vsel %vm6644_vm12, %v6174_v47, %v5270_v55  ;;  %v5289_v22 = vshrl.u32 %v5280_v46, 16  ;;  %v5292_v6 = vshll.u32 %v5280_v46, 16  ;;  %v5344_v32 = vld [vmem:[#allocation4 + $0x8] sm:$0xe] }
 0x408   : > { %v5213_v17 = vrot.slane %v5211_v36, 4  ;;  %v5216_v23 = vrot.slane %v5214_v35, 5  ;;  %v5148_v63 = vshrl.u32 %v5137_v2, 16  ;;  %v5486_v28 = vunpack.c.l.b16 %v5271_v15  ;;  %v6195_v61 = vld [vmem:[#allocation4 + $0x8] sm:$0xf] }
 0x409   : > { %v5151_v40 = vshll.u32 %v5137_v2, 16  ;;  %v5291_v24 = vrot.slane %v5289_v22, 4  ;;  %v5294_v45 = vrot.slane %v5292_v6, 5  ;;  %v6177_v57 = vrot.slane %v5344_v32, 9 }
 0x40a   : > { %v5217_v62 = vor.u32 %v5216_v23, %v5213_v17  ;;  %v5150_v50 = vrot.slane %v5148_v63, 7  ;;  %v5049_v49 = vpop.f32.mrf.mxu1  ;;  %v5489_v56 = vpack.c.b16 %v5486_v28, %v5485_v1  ;;  %v5300_v1 = vrot.slane %v5298_v26, 5 }
 0x40b   : > { %v5050_v18 = vadd.f32 %v8580_v10, %v5049_v49  ;;  %v5295_v58 = vor.u32 %v5294_v45, %v5291_v24  ;;  %v5359_v30 = vsel %vm6644_vm12, %v6177_v57, %v5358_v31  ;;  %v5378_v31 = vld [vmem:[#allocation4 + $0x1c] sm:$0x1] }
 0x40c   : > { %v5218_v48 = vrot.slane %v5217_v62, 4  ;;  %v5153_v27 = vor.u32 %v5151_v40, %v5150_v50  ;;  %5491 = vrot.lane.b32.xlu2 %v5489_v56, %s6471_s23  ;;  %v5519_v62 = vunpack.c.l.b16 %v5359_v30 }
 0x40d   : > { %v5059_v41 = vmax.f32 %v5048_v29, %v5050_v18  ;;  %v5296_v2 = vrot.slane %v5295_v58, 4  ;;  %v5314_v29 = vrot.slane %v5312_v43, 5  ;;  %v5133_v58 = vld [vmem:[#allocation4 + $0x28] sm:$0x4] }
 0x40e   : > { %v5223_v14 = vsel %vm6667_vm14, %v5218_v48, %v5222_v59  ;;  %v5180_v19 = vsel %vm8598_vm6, %v5153_v27, %v5179_v33 }
 0x40f   : > { %v5476_v37 = vunpack.c.l.b16 %v5223_v14  ;;  %5181 = vst [vmem:[#allocation4 + $0x10] sm:$0x7] %v5180_v19  ;;  %v5301_v18 = vsel %vm6667_vm14, %v5296_v2, %v5300_v1  ;;  %v5194_v19 = vld [vmem:[#allocation4 + $0x14] sm:$0x1]  ;;  %v5112_v1 = vld [vmem:[#allocation4 + $0x28] sm:$0x1] }
 0x410   : > { %5063 = vst.msk [vmem:[#allocation6 + $0x10] sm:$0xff] %vm8866_vm10, %v5059_v41  ;;  %v5377_v41 = vld [vmem:[#allocation4 + $0x14] sm:$0x1]  ;;  %v5509_v14 = vunpack.c.l.b16 %v5301_v18 }
 0x411   : > { %v5479_v38 = vpack.c.b16 %v5476_v37, %v5475_v13  ;;  %v5391_v54 = vshll.u32 %v5377_v41, 16 }
 0x413   : > { %5481 = vrot.lane.b32.xlu1 %v5479_v38, %s6472_s29  ;;  %v5052_v53 = vpop.f32.mrf.mxu1  ;;  %v8657_v42 = vrot.slane %v5391_v54, 5 }
 0x414   : > { %v5053_v28 = vadd.f32 %v8580_v10, %v5052_v53  ;;  %v5451_v53 = vrot.slane %v5377_v41, 5 }
 0x416   : > { %v6321_v55 = vld [vmem:[#allocation4 + $0xc] sm:$0xf0] }
 0x417   : > { %v5345_v60 = vld [vmem:[#allocation4 + $0x10] sm:$0xe]  ;;  %v5069_v21 = vld [vmem:[#allocation6 + $0x10] ss:$2 sm:$0xf]  ;;  %v6196_v7 = vor.u32 %v6321_v55, %v6195_v61  ;;  %v5134_v55 = vsel %vm8570_vm9, 0, %v5133_v58 }
 0x418   : > { %v5281_v20 = vld [vmem:[#allocation4 + $0x10] sm:$0xf]  ;;  %v5077_v44 = vld [vmem:[#allocation6 + $0x11] ss:$2 sm:$0xf]  ;;  %v6178_v34 = vrot.slane %v5345_v60, 9 }
 0x419   : > { %v5082_v47 = vmax.f32 %v5069_v21, %v5077_v44  ;;  %v5303_v36 = vshrl.u32 %v5281_v20, 16  ;;  %v5306_v35 = vshll.u32 %v5281_v20, 16  ;;  %5505 = vrot.lane.b32.xlu0 %v6196_v7, %s6475_s22  ;;  %v5373_v63 = vld [vmem:[#allocation4 + $0x10] sm:$0xf]  ;;  %v5405_v60 = vshll.u32 %v5378_v31, 16 }
 0x41a   : > { %v5363_v15 = vsel %vm6644_vm12, %v6178_v34, %v5362_v51  ;;  %v5382_v56 = vshrl.u32 %v5373_v63, 16  ;;  %v5385_v39 = vshll.u32 %v5373_v63, 16  ;;  %v5190_v8 = vld [vmem:[#allocation4 + $0x10] sm:$0xf]  ;;  %v5274_v51 = vrot.slane %v5194_v19, 5 }
 0x41b   : > { %v5086_v16 = vmax.f32 %v5082_v47, 0.0  ;;  %v5305_v17 = vrot.slane %v5303_v36, 4  ;;  %v5308_v23 = vrot.slane %v5306_v35, 5  ;;  %v5054_v9 = vpop.f32.mrf.mxu1  ;;  %v5520_v59 = vunpack.c.l.b16 %v5363_v15  ;;  %v5437_v6 = vld [vmem:[#allocation4 + $0x10] sm:$0xe] }
 0x41c   : > { %v5055_v50 = vadd.f32 %v8580_v10, %v5054_v9  ;;  %v5384_v37 = vrot.slane %v5382_v56, 4  ;;  %v5387_v38 = vrot.slane %v5385_v39, 5  ;;  %v5254_v32 = vld [vmem:[#allocation4 + $0x10] sm:$0xe]  ;;  %v5225_v24 = vshrl.u32 %v5190_v8, 16 }
 0x41d   : > { %v5138_v46 = vpack.c.bf16 %v5086_v16, %v5086_v16  ;;  %v5309_v40 = vor.u32 %v5308_v23, %v5305_v17  ;;  %v5523_v49 = vpack.c.b16 %v5520_v59, %v5519_v62  ;;  %v5228_v45 = vshll.u32 %v5190_v8, 16  ;;  %5135 = vst [vmem:[#allocation4 + $0x28] sm:$0x4] %v5134_v55  ;;  %v5195_v34 = vld [vmem:[#allocation4 + $0x1c] sm:$0x1] }
 0x41e   : > { %v5060_v33 = vmax.f32 %v5053_v28, %v5055_v50  ;;  %v6181_v61 = vrot.slane %v5437_v6, 9  ;;  %v6175_v26 = vrot.slane %v5254_v32, 9  ;;  %v5388_v43 = vor.u32 %v5387_v38, %v5384_v37  ;;  %v6203_v15 = vld [vmem:[#allocation4 + $0x10] sm:$0xf]  ;;  %v8677_v37 = vld [vmem:[#allocation4 + $0x1c] sm:$0x1] }
 0x41f   : > { %v5155_v11 = vshrl.u32 %v5138_v46, 16  ;;  %v5310_v48 = vrot.slane %v5309_v40, 4  ;;  %5525 = vrot.lane.b32.xlu2 %v5523_v49, %s6478_s13  ;;  %v5158_v13 = vshll.u32 %v5138_v46, 16  ;;  %v5227_v20 = vrot.slane %v5225_v24, 4 }
 0x420   : > { %5064 = vst.msk [vmem:[#allocation6 + $0x18] sm:$0xff] %vm8867_vm11, %v5060_v33  ;;  %v5230_v21 = vrot.slane %v5228_v45, 5  ;;  %v5234_v44 = vshll.u32 %v5194_v19, 16  ;;  %v5452_v36 = vsel %vm6644_vm12, %v6181_v61, %v5451_v53  ;;  %v8653_v35 = vsel %vm6644_vm12, %v6175_v26, %v5274_v51  ;;  %v8675_v19 = vld [vmem:[#allocation4 + $0x2c] sm:$0x1] }
 0x421   : > { %v5157_v27 = vrot.slane %v5155_v11, 7  ;;  %v5315_v10 = vsel %vm6667_vm14, %v5310_v48, %v5314_v29  ;;  %v8655_v2 = vrot.slane %v5388_v43, 4  ;;  %v5455_v17 = vrot.slane %v5378_v31, 5 }
 0x422   : > { %v5510_v22 = vunpack.c.l.b16 %v5315_v10  ;;  %v5231_v23 = vor.u32 %v5230_v21, %v5227_v20  ;;  %v5113_v63 = vsel %vm8563_vm5, 0, %v5112_v1  ;;  %v5278_v28 = vrot.slane %v5195_v34, 5  ;;  %v5185_v10 = vld [vmem:[#allocation4 + $0x20] sm:$0x7]  ;;  %vm8869_vm5 = vmmov %vm8865_vm0 }
 0x423   : > { %v5160_v0 = vor.u32 %v5158_v13, %v5157_v27  ;;  %v8661_v9 = vrot.slane %v5405_v60, 5  ;;  %v8663_v62 = vrot.slane %v5234_v44, 5  ;;  %v5248_v59 = vshll.u32 %v5195_v34, 16  ;;  %5114 = vst [vmem:[#allocation4 + $0x28] sm:$0x1] %v5113_v63 }
 0x424   : > { %v5513_v3 = vpack.c.b16 %v5510_v22, %v5509_v14  ;;  %v5553_v29 = vunpack.c.l.b16 %v5452_v36  ;;  %v5487_v56 = vunpack.c.l.b16 %v8653_v35  ;;  %v5394_v12 = vsel %vm6667_vm14, %v8655_v2, %v8657_v42  ;;  %v5440_v61 = vld [vmem:[#allocation4 + $0x28] sm:$0xe] }
 0x425   : > { %v5183_v57 = vsel %vm8598_vm6, %v5160_v0, %v5182_v4  ;;  %v5232_v13 = vrot.slane %v5231_v23, 4  ;;  %v5250_v26 = vrot.slane %v5248_v59, 5  ;;  %v5463_v43 = vrot.slane %v8675_v19, 5  ;;  %v5287_v59 = vld [vmem:[#allocation4 + $0x24] sm:$0x1] }
 0x426   : > { %5184 = vst [vmem:[#allocation4 + $0x18] sm:$0x7] %v5183_v57  ;;  %5515 = vrot.lane.b32.xlu1 %v5513_v3, %s6477_s15  ;;  %v5366_v20 = vrot.slane %v8677_v37, 5  ;;  %vm5582_vm9 = vcmask 785408  }
 0x427   : > { %v5071_v7 = vld [vmem:[#allocation6 + $0x18] ss:$2 sm:$0xf]  ;;  %v5079_v30 = vld [vmem:[#allocation6 + $0x19] ss:$2 sm:$0xf] }
 0x428   : > { %v5083_v47 = vmax.f32 %v5071_v7, %v5079_v30  ;;  %v5237_v7 = vsel %vm6667_vm14, %v5232_v13, %v8663_v62  ;;  %v6184_v30 = vrot.slane %v5440_v61, 9  ;;  %v5379_v62 = vld [vmem:[#allocation4 + $0x24] sm:$0x1]  ;;  %v5340_v13 = vshll.u32 %v5287_v59, 16 }
 0x429   : > { %v5477_v63 = vunpack.c.l.b16 %v5237_v7 }
 0x42a   : > { %v5087_v16 = vmax.f32 %v5083_v47, 0.0 }
 0x42c   : > { %v5139_v46 = vpack.c.bf16 %v5087_v16, %v5087_v16  ;;  %v5376_v16 = vld [vmem:[#allocation4 + $0x28] sm:$0xf] }
 0x42d   : > { %v6323_v50 = vld [vmem:[#allocation4 + $0x14] sm:$0xf0] }
 0x42e   : > { %v5438_v40 = vld [vmem:[#allocation4 + $0x18] sm:$0xe]  ;;  %v6204_v39 = vor.u32 %v6323_v50, %v6203_v15  ;;  %v5162_v4 = vshrl.u32 %v5139_v46, 16  ;;  %v5165_v0 = vshll.u32 %v5139_v46, 16  ;;  %v5464_v46 = vsel %vm6644_vm12, %v6184_v30, %v5463_v43 }
 0x42f   : > { %v5255_v49 = vld [vmem:[#allocation4 + $0x18] sm:$0xe]  ;;  %v6182_v11 = vrot.slane %v5438_v40, 9  ;;  %v5424_v40 = vshrl.u32 %v5376_v16, 16  ;;  %v5342_v43 = vrot.slane %v5340_v13, 5 }
 0x430   : > { %v6176_v33 = vrot.slane %v5255_v49, 9  ;;  %v5374_v18 = vld [vmem:[#allocation4 + $0x18] sm:$0xf]  ;;  %5539 = vrot.lane.b32.xlu0 %v6204_v39, %s6479_s14  ;;  %v5164_v38 = vrot.slane %v5162_v4, 7  ;;  %v5326_v39 = vshll.u32 %v8677_v37, 16  ;;  %v5556_v4 = vunpack.c.l.b16 %v5464_v46 }
 0x431   : > { %v5191_v48 = vld [vmem:[#allocation4 + $0x18] sm:$0xf]  ;;  %v5396_v8 = vshrl.u32 %v5374_v18, 16  ;;  %v5399_v27 = vshll.u32 %v5374_v18, 16  ;;  %v5456_v41 = vsel %vm6644_vm12, %v6182_v11, %v5455_v17  ;;  %v5543_v17 = vunpack.c.l.b16 %v5394_v12 }
 0x432   : > { %v5279_v14 = vsel %vm6644_vm12, %v6176_v33, %v5278_v28  ;;  %v5239_v22 = vshrl.u32 %v5191_v48, 16  ;;  %v5242_v6 = vshll.u32 %v5191_v48, 16  ;;  %v5554_v32 = vunpack.c.l.b16 %v5456_v41  ;;  %v5282_v45 = vld [vmem:[#allocation4 + $0x18] sm:$0xf] }
 0x433   : > { %v5398_v24 = vrot.slane %v5396_v8, 4  ;;  %v5488_v3 = vunpack.c.l.b16 %v5279_v14  ;;  %v5401_v53 = vrot.slane %v5399_v27, 5  ;;  %v5167_v51 = vor.u32 %v5165_v0, %v5164_v38  ;;  %v5346_v54 = vld [vmem:[#allocation4 + $0x18] sm:$0xe] }
 0x434   : > { %v5241_v57 = vrot.slane %v5239_v22, 4  ;;  %v5244_v31 = vrot.slane %v5242_v6, 5  ;;  %v5557_v58 = vpack.c.b16 %v5554_v32, %v5553_v29  ;;  %v5317_v21 = vshrl.u32 %v5282_v45, 16 }
 0x435   : > { %v5402_v55 = vor.u32 %v5401_v53, %v5398_v24  ;;  %v5186_v44 = vsel %vm8598_vm6, %v5167_v51, %v5185_v10  ;;  %v5320_v47 = vshll.u32 %v5282_v45, 16  ;;  %v5490_v34 = vpack.c.b16 %v5488_v3, %v5487_v56 }
 0x436   : > { %v5245_v60 = vor.u32 %v5244_v31, %v5241_v57  ;;  %6245 = vmatmul.msk.bf16.vlgmr.msrb.gmra.mxu3 %vm8868_vm4, %v5557_v58  ;;  %5187 = vst [vmem:[#allocation4 + $0x20] sm:$0x7] %v5186_v44  ;;  %v6179_v2 = vrot.slane %v5346_v54, 9  ;;  %v5319_v42 = vrot.slane %v5317_v21, 4  ;;  %v5427_v29 = vshll.u32 %v5376_v16, 16 }
 0x437   : > { %v5403_v36 = vrot.slane %v5402_v55, 4  ;;  %v5322_v1 = vrot.slane %v5320_v47, 5  ;;  %v5419_v11 = vshll.u32 %v5379_v62, 16  ;;  %v5459_v33 = vrot.slane %v5379_v62, 5 }
 0x438   : > { %v5246_v35 = vrot.slane %v5245_v60, 4  ;;  %5493 = vrot.lane.b32.xlu0 %v5490_v34, %s6471_s23  ;;  %v5367_v50 = vsel %vm6644_vm12, %v6179_v2, %v5366_v20  ;;  %v5370_v18 = vrot.slane %v5287_v59, 5  ;;  %v5433_v12 = vshll.u32 %v8675_v19, 16 }
 0x439   : > { %v5408_v5 = vsel %vm6667_vm14, %v5403_v36, %v8661_v9  ;;  %v5323_v9 = vor.u32 %v5322_v1, %v5319_v42  ;;  %v5521_v27 = vunpack.c.l.b16 %v5367_v50  ;;  %v5426_v22 = vrot.slane %v5424_v40, 4  ;;  %v6332_v1 = vld [vmem:[%s8803_s5 + $0x38] sm:$0xff] }
 0x43a   : > { %v5251_v15 = vsel %vm6667_vm14, %v5246_v35, %v5250_v26  ;;  %v5544_v23 = vunpack.c.l.b16 %v5408_v5  ;;  %v5429_v6 = vrot.slane %v5427_v29, 5  ;;  %v5328_v38 = vrot.slane %v5326_v39, 5  ;;  %v6199_v26 = vld [vmem:[#allocation4 + $0x18] sm:$0xf]  ;;  %v6324_v5 = vld [vmem:[#allocation4 + $0x24] sm:$0xf0]  ;;  %5676 = vmatpush.bf16.msrb.mxu2 %v6332_v1 }
 0x43b   : > { %v5478_v28 = vunpack.c.l.b16 %v5251_v15  ;;  %v5324_v37 = vrot.slane %v5323_v9, 4  ;;  %v5421_v34 = vrot.slane %v5419_v11, 5  ;;  %v5435_v36 = vrot.slane %v5433_v12, 5  ;;  %v6330_v29 = vld [vmem:[%s8803_s5 + $0x28] sm:$0xff]  ;;  %v6325_v39 = vld [vmem:[%s8803_s5] sm:$0xff] }
 0x43c   : > { %v5547_v49 = vpack.c.b16 %v5544_v23, %v5543_v17  ;;  %v5430_v60 = vor.u32 %v5429_v6, %v5426_v22  ;;  %v6331_v23 = vld [vmem:[%s8803_s5 + $0x30] sm:$0xff]  ;;  %v6326_v9 = vld [vmem:[%s8803_s5 + $0x8] sm:$0xff] }
 0x43d   : > { %v5480_v56 = vpack.c.b16 %v5478_v28, %v5477_v63  ;;  %v5439_v48 = vld [vmem:[#allocation4 + $0x20] sm:$0xe]  ;;  %v5329_v52 = vsel %vm6667_vm14, %v5324_v37, %v5328_v38  ;;  %v6319_v12 = vld [vmem:[#allocation4 + $0x4] sm:$0xf0] }
 0x43e   : > { %5549 = vrot.lane.b32.xlu1 %v5547_v49, %s6480_s17  ;;  %v5347_v8 = vld [vmem:[#allocation4 + $0x20] sm:$0xe]  ;;  %v6183_v10 = vrot.slane %v5439_v48, 9  ;;  %v5431_v42 = vrot.slane %v5430_v60, 4  ;;  %v5511_v15 = vunpack.c.l.b16 %v5329_v52  ;;  %5677 = vmatpush.bf16.msrb.mxu2 %v6331_v23  ;;  %v6328_v49 = vld [vmem:[%s8803_s5 + $0x18] sm:$0xff] }
 0x43f   : > { %5483 = vrot.lane.b32.xlu2 %v5480_v56, %s6472_s29  ;;  %v6180_v41 = vrot.slane %v5347_v8, 9  ;;  %v5283_v14 = vld [vmem:[#allocation4 + $0x20] sm:$0xf]  ;;  %v6327_v56 = vld [vmem:[%s8803_s5 + $0x10] sm:$0xff] }
 0x440   : > { %v5331_v0 = vshrl.u32 %v5283_v14, 16  ;;  %v5334_v32 = vshll.u32 %v5283_v14, 16  ;;  %v5375_v24 = vld [vmem:[#allocation4 + $0x20] sm:$0xf]  ;;  %v5460_v3 = vsel %vm6644_vm12, %v6183_v10, %v5459_v33  ;;  %v5436_v59 = vsel %vm6667_vm14, %v5431_v42, %v5435_v36 }
 0x441   : > { %v6322_v45 = vld [vmem:[#allocation4 + $0x1c] sm:$0xf0]  ;;  %v5371_v19 = vsel %vm6644_vm12, %v6180_v41, %v5370_v18  ;;  %v5410_v53 = vshrl.u32 %v5375_v24, 16  ;;  %v5413_v57 = vshll.u32 %v5375_v24, 16  ;;  %v5555_v31 = vunpack.c.l.b16 %v5460_v3  ;;  %vm8870_vm12 = vmmov %vm8865_vm0  ;;  %v6320_v24 = vld [vmem:[#allocation4 + $0x14] sm:$0xf0] }
 0x442   : > { %v5522_v61 = vunpack.c.l.b16 %v5371_v19  ;;  %v5333_v51 = vrot.slane %v5331_v0, 4  ;;  %v5336_v58 = vrot.slane %v5334_v32, 5  ;;  %v6200_v20 = vor.u32 %v6322_v45, %v6199_v26  ;;  %v6207_v16 = vld [vmem:[#allocation4 + $0x20] sm:$0xf]  ;;  %5678 = vmatpush.bf16.msrb.mxu2 %v6330_v29  ;;  %v6191_v45 = vld [vmem:[#allocation4 + $0x10] sm:$0xf] }
 0x443   : > { %v5412_v54 = vrot.slane %v5410_v53, 4  ;;  %v5415_v55 = vrot.slane %v5413_v57, 5  ;;  %v5558_v21 = vpack.c.b16 %v5556_v4, %v5555_v31  ;;  %v6208_v28 = vor.u32 %v6324_v5, %v6207_v16  ;;  %v6187_v18 = vld [vmem:[#allocation4] sm:$0xf] }
 0x444   : > { %v5524_v44 = vpack.c.b16 %v5522_v61, %v5521_v27  ;;  %v5337_v7 = vor.u32 %v5336_v58, %v5333_v51  ;;  %v5546_v50 = vunpack.c.l.b16 %v5436_v59  ;;  %v6188_v4 = vor.u32 %v6319_v12, %v6187_v18 }
 0x445   : > { %v5416_v30 = vor.u32 %v5415_v55, %v5412_v54  ;;  %v6192_v19 = vor.u32 %v6320_v24, %v6191_v45 }
 0x446   : > { %5507 = vrot.lane.b32.xlu1 %v6200_v20, %s6475_s22  ;;  %6246 = vmatmul.msk.bf16.gmra.mxu3 %vm8869_vm5, %v5558_v21  ;;  %v5338_v47 = vrot.slane %v5337_v7, 4  ;;  %v6399_v7 = vld [vmem:[%s8804_s6] ss:$0 sm:$0xff] }
 0x447   : > { %5527 = vrot.lane.b32.xlu0 %v5524_v44, %s6478_s13  ;;  %v5417_v2 = vrot.slane %v5416_v30, 4  ;;  %5679 = vmatpush.bf16.msrb.mxu2 %v6329_v25 }
 0x448   : > { %v5343_v35 = vsel %vm6667_vm14, %v5338_v47, %v5342_v43 }
 0x449   : > { %v5512_v17 = vunpack.c.l.b16 %v5343_v35  ;;  %v5422_v62 = vsel %vm6667_vm14, %v5417_v2, %v5421_v34  ;;  %vm5577_vm14 = vcmask 654336  }
 0x44a   : > { %v5545_v46 = vunpack.c.l.b16 %v5422_v62 }
 0x44b   : > { %v5514_v63 = vpack.c.b16 %v5512_v17, %v5511_v15  ;;  %5680 = vmatpush.bf16.msrb.mxu2 %v6328_v49 }
 0x44c   : > { %v5548_v40 = vpack.c.b16 %v5546_v50, %v5545_v46 }
 0x44d   : > { %5517 = vrot.lane.b32.xlu2 %v5514_v63, %s6477_s15 }
 0x44e   : > { %5541 = vrot.lane.b32.xlu1 %v6208_v28, %s6479_s14  ;;  %s5744_s14 = scalar_lea.hbm %s8805_s7, %s6334_s9 }
 0x44f   : > { %5681 = vmatpush.bf16.msrb.mxu2 %v6327_v56  ;;  %s5747_s29 = sshll.u32 %s5744_s14, 4  ;;  %s5748_s29 = int_to_ptr.hbm [resolvable:$true] %s5747_s29 }
 0x450   : > { %s6415_s22 = sshra.s32 %s5748_s29, 4  ;;  %s6416_s22 = int_to_ptr.hbm [resolvable:$true] %s6415_s22 }
 0x451   : > { %s6417_s21 = scalar_lea.hbm %s6416_s22, 4  ;;  %p6422_p0 = scmp.lt.s32.totalorder %s6416_s22, %s8805_s7 }
 0x452   : > { %p6418_p11 = scmp.ne.s32.totalorder %s6416_s22, %s6417_s21  ;;  %p6423_p1 = scmp.lt.s32.totalorder %s6421_s20, %s6417_s21 }
 0x453   : > { %5682 = vmatpush.bf16.msrb.mxu2 %v6326_v9 }
 0x454   : > { %p6419_p12 = pnand %p6418_p11, %p6560_p5  ;;  %p6424_p2 = por %p6423_p1, %p6422_p0 }
 0x455   : > { %5551 = vrot.lane.b32.xlu2 %v5548_v40, %s6480_s17  ;;  %s5745_s17 = sshll.u32 %s271_s16, 4  ;;  %s5746_s17 = int_to_ptr.vmem [resolvable:$true] %s5745_s17 }
 0x456   : > { %p6420_p13 = pneg %p6419_p12 }
 0x457   : > { %5683 = vmatpush.bf16.msrb.mxu2 %v6325_v39 }
 0x458   : > { %p6425_p3 = pnand %p6424_p2, %p6420_p13 }
 0x466   : > { %v5492_v11 = vpop.permute.xlu2 %5491 }
 0x479   : > { %v5526_v8 = vpop.permute.xlu2 %5525 }
 0x485   : > { %v5482_v33 = vpop.permute.xlu1 %5481 }
 0x486   : > { %v5561_v27 = vsel %vm8870_vm12, %v6188_v4, %v5482_v33 }
 0x487   : > { %v5566_v10 = vsel %vm3683_vm1, %v5561_v27, %v5492_v11 }
 0x48b   : > { %v5506_v48 = vpop.permute.xlu0 %5505 }
 0x48c   : > { %v5570_v41 = vsel %vm4948_vm13, %v5566_v10, %v5506_v48 }
 0x498   : > { %v5516_v13 = vpop.permute.xlu1 %5515 }
 0x499   : > { %v5574_v22 = vsel %vm4966_vm15, %v5570_v41, %v5516_v13  ;;  %v5484_v6 = vpop.permute.xlu2 %5483 }
 0x49a   : > { %v5579_v37 = vsel %vm5577_vm14, %v5574_v22, %v5526_v8  ;;  %v5564_v57 = vsel %vm8871_vm3, %v6192_v19, %v5484_v6 }
 0x4a2   : > { %v5540_v14 = vpop.permute.xlu0 %5539 }
 0x4a3   : > { %v5584_v38 = vsel %vm5582_vm9, %v5579_v37, %v5540_v14 }
 0x4a7   : > { %v5518_v53 = vpop.permute.xlu2 %5517 }
 0x4aa   : > { %v5494_v3 = vpop.permute.xlu0 %5493 }
 0x4ab   : > { %v5568_v61 = vsel %vm3683_vm1, %v5564_v57, %v5494_v3 }
 0x4af   : > { %v5552_v55 = vpop.permute.xlu2 %5551 }
 0x4b0   : > { %v5550_v0 = vpop.permute.xlu1 %5549 }
 0x4b1   : > { %v5589_v32 = vsel %vm5587_vm7, %v5584_v38, %v5550_v0 }
 0x4b2   : > { %5684 = vmatmul.bf16.vlgmr.msrb.gmra.mxu2 %v5589_v32 }
 0x4b8   : > { %v5508_v31 = vpop.permute.xlu1 %5507 }
 0x4b9   : > { %v5572_v51 = vsel %vm4948_vm13, %v5568_v61, %v5508_v31  ;;  %v5528_v58 = vpop.permute.xlu0 %5527  ;;  %v5704_v21 = vpop.f32.mrf.mxu3  ;;  %vm5729_vm13 = vcmask 254976  }
 0x4ba   : > { %v5576_v26 = vsel %vm4966_vm15, %v5572_v51, %v5518_v53 }
 0x4bb   : > { %v5581_v43 = vsel %vm5577_vm14, %v5576_v26, %v5528_v58 }
 0x4c0   : > { %v5542_v54 = vpop.permute.xlu1 %5541 }
 0x4c1   : > { %v5586_v60 = vsel %vm5582_vm9, %v5581_v43, %v5542_v54  ;;  %v5706_v30 = vpop.f32.mrf.mxu3 }
 0x4c2   : > { %v5592_v20 = vsel %vm5587_vm7, %v5586_v60, %v5552_v55 }
 0x4c3   : > { %5689 = vmatmul.bf16.gmra.mxu2 %v5592_v20 }
 0x4c9   : > { %v5709_v42 = vpop.f32.mrf.mxu3 }
 0x4d1   : > { %v5711_v62 = vpop.f32.mrf.mxu3 }
 0x535   : > { %v5685_v44 = vpop.f32.mrf.mxu2 }
 0x536   : > { %v5686_v52 = vadd.f32 %v6399_v7, %v5685_v44 }
 0x538   : > { %v5705_v36 = vadd.f32 %v5704_v21, %v5686_v52 }
 0x53d   : > { %v5687_v47 = vpop.f32.mrf.mxu2 }
 0x53e   : > { %v5688_v34 = vadd.f32 %v6399_v7, %v5687_v47 }
 0x540   : > { %v5707_v35 = vadd.f32 %v5706_v30, %v5688_v34 }
 0x542   : > { %v5714_v2 = vmax.f32 %v5705_v36, %v5707_v35 }
 0x544   : > { %5716 = vst.msk [vmem:[#allocation7] sm:$0xff] %vm3683_vm1, %v5714_v2 }
 0x546   : > { %v5690_v1 = vpop.f32.mrf.mxu2 }
 0x547   : > { %v5691_v17 = vadd.f32 %v6399_v7, %v5690_v1 }
 0x549   : > { %v5710_v59 = vadd.f32 %v5709_v42, %v5691_v17 }
 0x54b   : > { %v5718_v16 = vld [vmem:[#allocation7] ss:$2 sm:$0x3]  ;;  %v5722_v5 = vld [vmem:[#allocation7 + $0x1] ss:$2 sm:$0x3] }
 0x54c   : > { %v5725_v15 = vmax.f32 %v5718_v16, %v5722_v5 }
 0x54e   : > { %v5692_v23 = vpop.f32.mrf.mxu2  ;;  %v5727_v63 = vmax.f32 %v5725_v15, 0.0 }
 0x54f   : > { %v5693_v28 = vadd.f32 %v6399_v7, %v5692_v23 }
 0x550   : > { %5730 = vst.msk [vmem:[%s271_s16] sm:$0x3] %vm5729_vm13, %v5727_v63 }
 0x551   : > { %v5712_v46 = vadd.f32 %v5711_v62, %v5693_v28 }
 0x553   : > { %v5715_v50 = vmax.f32 %v5710_v59, %v5712_v46 }
 0x555   : > { %5717 = vst.msk [vmem:[#allocation7 + $0x8] sm:$0xff] %vm3683_vm1, %v5715_v50 }
 0x55c   : > { %v5720_v40 = vld [vmem:[#allocation7 + $0x8] ss:$2 sm:$0x3]  ;;  %v5724_v29 = vld [vmem:[#allocation7 + $0x9] ss:$2 sm:$0x3] }
 0x55d   : > { %v5726_v25 = vmax.f32 %v5720_v40, %v5724_v29 }
 0x55f   : > { %v5728_v49 = vmax.f32 %v5726_v25, 0.0 }
 0x561   : > { %5731 = vst.msk [vmem:[%s271_s16 + $0x2] sm:$0x3] %vm5729_vm13, %v5728_v49 }
 0x562   : > { %6428 = shalt.err (!%p6425_p3)
}
 0x563   : > { %s6481_s19 = smov 2  }
 0x564   : > { %6341 = dma.vmem_to_hbm [thread:$0]  (%p6560_p5), %s5746_s17, 64, %s5748_s29, %s5733_s18, %s6471_s23, %s6471_s23, %s6481_s19  }
 0x565 PF: > { %p6347_p4 = scmp.ge.s32.totalorder %s6463_s27, 2  ;;  %s5762_s16 = sand.u32 1, %s6451_s24  }
 0x566   : > { %s5763_s13 = scalar_lea.sflag [#allocation9], %s5762_s16 }
 0x567   : > { %p6344_p7 = pnand %p6347_p4, %p6564_p6 }
 0x569   : > { %p6345_p8 = pneg %p6344_p7 }
 0x56b   : > { %6446 = dma.done.wait (%p6345_p8), %s5763_s13, 64  }
 0x56c   : > { %6448 = vsyncadd (%p6345_p8), %s5763_s13, 4294967232  ;;  %p17_p9 = scmp.ge.s32.totalorder %s6547_s30, 4   ;;  %s8872_s24 = smov %s6455_s25 }
 0x56d   : > { %s8873_s25 = smov %s6459_s26  ;;  %s8874_s26 = smov %s6558_s10 }
 0x56e   : > { %s8875_s27 = smov %s6547_s30  ;;  %19 = sbr.rel (!%p17_p9) target bundleno = 3 (0x3), region = 117 }
 0x573   :  { %5769 = vsyncpa [#allocation9], 1 }
 0x574   :  { %5771 = vsyncpa [#allocation9 + $0x1], 1 }

</bundles_post_ra>
